<compile_context>
chip_gen: v6e
topology: v6e:2x2x1
jax: 0.10.0
libtpu: 0.0.40
codegen_flags: <defaults>
</compile_context>

<pallas_src>
import jax
import jax.numpy as jnp
from jax.experimental import pallas as pl
from jax.experimental.pallas import tpu as pltpu


def _make_down_block_kernel(H, W, Cp, eps=1e-5):
    """Cp = packed channel count (2 * Cout). One grid step = one pair of samples."""
    OH, OW = H // 2, W // 2
    HW, OHW = H * W, OH * OW
    Hh, Wh = OH + 1, OW + 1          # parity-plane extents: (H+2)/2, (W+2)/2
    f32, bf16 = jnp.float32, jnp.bfloat16
    inv_hw = 1.0 / HW

    def inorm_relu(h):
        # InstanceNorm2d defaults: affine=False, eps=1e-5, biased var over HxW.
        # One-pass statistics: var = E[x^2] - E[x]^2.
        s1 = jnp.sum(h, axis=0, keepdims=True)
        s2 = jnp.sum(h * h, axis=0, keepdims=True)
        mean = s1 * inv_hw
        var = s2 * inv_hw - mean * mean
        return jnp.maximum((h - mean) * jax.lax.rsqrt(var + eps), 0.0)

    def kernel(xcol_ref, wcat_ref, w2_ref, wd_ref, bs_ref, bd_ref,
               ot_ref, out_ref, planes_ref, skip_ref):

        # ---- zero only the parity-plane zero-padding borders that are read ----
        # (per-step so the kernel stays correct if the grid is split across
        #  megacore TensorCores; cost is 8 tiny stores.)
        zrow = jnp.zeros((1, Wh, Cp), bf16)
        zcol = jnp.zeros((Hh, 1, Cp), bf16)
        planes_ref[0, 0:1, :, :] = zrow          # plane (r%2=0, c%2=0): padded row 0
        planes_ref[1, 0:1, :, :] = zrow          # plane (0,1): padded row 0
        planes_ref[2, OH:OH + 1, :, :] = zrow    # plane (1,0): padded row H+1
        planes_ref[3, OH:OH + 1, :, :] = zrow    # plane (1,1): padded row H+1
        planes_ref[0, :, 0:1, :] = zcol          # plane (0,0): padded col 0
        planes_ref[2, :, 0:1, :] = zcol          # plane (1,0): padded col 0
        planes_ref[1, :, OW:OW + 1, :] = zcol    # plane (0,1): padded col W+1
        planes_ref[3, :, OW:OW + 1, :] = zcol    # plane (1,1): padded col W+1

        def store_blocks(act_bf16):
            # Activation rows are in (p, q, i, j) parity-block order; pixel
            # (h, w) = (2i+p, 2j+q) lives at padded (h+1, w+1), i.e. plane
            # (1-p, 1-q), window rows [p, p+OH), cols [q, q+OW).
            for p in range(2):
                for q in range(2):
                    blk = act_bf16[(2 * p + q) * OHW:(2 * p + q + 1) * OHW, :]
                    plane = 2 * (1 - p) + (1 - q)
                    planes_ref[plane, p:p + OH, q:q + OW, :] = blk.reshape(OH, OW, Cp)

        def tap(a, b):
            # Contiguous (OH, OW, Cp) window holding padded pixels
            # (2i + a, 2j + b) for i in [0, OH), j in [0, OW).
            plane = 2 * (a % 2) + (b % 2)
            v = planes_ref[plane, a // 2:a // 2 + OH, b // 2:b // 2 + OW, :]
            return v.reshape(OHW, Cp)

        # ---- conv1 (3x3/pad1) + 1x1 skip fused into one 2*Cp-wide matmul ------
        # (b1 is dropped: a per-channel bias is cancelled by the affine=False
        #  InstanceNorm that follows.)
        xcol = xcol_ref[0]                                       # (HW, K1p) bf16
        hcat = jnp.dot(xcol, wcat_ref[...], preferred_element_type=f32)
        skip_ref[...] = hcat[:, Cp:] + bs_ref[...]               # park skip in VMEM
        h1 = inorm_relu(hcat[:, :Cp]).astype(bf16)
        store_blocks(h1)

        # ---- conv2 (3x3/pad1, b2 dropped): 9 accumulating tap matmuls per
        #      parity block, LHS read straight from the parity planes. ----------
        h2_blocks = []
        for p in range(2):
            for q in range(2):
                acc = None
                for kh in range(3):
                    for kw in range(3):
                        t = kh * 3 + kw
                        d = jnp.dot(tap(p + kh, q + kw),
                                    w2_ref[t * Cp:(t + 1) * Cp, :],
                                    preferred_element_type=f32)
                        acc = d if acc is None else acc + d
                h2_blocks.append(acc)
        h2 = jnp.concatenate(h2_blocks, axis=0)                  # (HW, Cp), Π order
        out_temp = inorm_relu(h2) + skip_ref[...]
        ot_ref[0] = out_temp

        # ---- downsample (4x4 / stride 2 / pad 1): reuse the parity planes;
        #      all 16 taps are contiguous windows -> 16 accumulating matmuls. ---
        store_blocks(out_temp.astype(bf16))
        acc = None
        for kh in range(4):
            for kw in range(4):
                t = kh * 4 + kw
                d = jnp.dot(tap(kh, kw),
                            wd_ref[t * Cp:(t + 1) * Cp, :],
                            preferred_element_type=f32)
                acc = d if acc is None else acc + d
        out_ref[0] = acc + bd_ref[...]

    return kernel


def down_block(x_nchw, params):
    """DownBlock forward. Returns (out, out_temp) in NCHW, like the PyTorch module."""
    N, Cin, H, W = x_nchw.shape
    Cout = params['w1'].shape[-1]
    OH, OW = H // 2, W // 2
    HW, OHW = H * W, OH * OW
    f32, bf16 = jnp.float32, jnp.bfloat16

    # ---- pack two batch samples per grid step onto the 128-lane channel axis ----
    N2 = N + (N % 2)
    P = N2 // 2
    Cin2, Cp = 2 * Cin, 2 * Cout

    x = jnp.transpose(x_nchw, (0, 2, 3, 1)).astype(f32)                 # NHWC
    if N2 != N:
        x = jnp.concatenate([x, jnp.zeros((1, H, W, Cin), f32)], axis=0)
    xp = x.reshape(P, 2, H, W, Cin).transpose(0, 2, 3, 1, 4).reshape(P, H, W, Cin2)

    # ---- conv1/skip im2col built in the wrapper (input is tiny); pixel rows
    #      permuted into (h%2, w%2, h//2, w//2) parity-block order. --------------
    K1 = 9 * Cin2
    K1p = max(64, ((K1 + 7) // 8) * 8)           # lane-pack-friendly K
    xpp = jnp.pad(xp, ((0, 0), (1, 1), (1, 1), (0, 0)))
    xcol = jnp.concatenate(
        [xpp[:, kh:kh + H, kw:kw + W, :] for kh in range(3) for kw in range(3)],
        axis=-1)                                                        # (P,H,W,K1)
    xcol = (xcol.reshape(P, OH, 2, OW, 2, K1)
                .transpose(0, 2, 4, 1, 3, 5)
                .reshape(P, HW, K1))
    xcol = jnp.pad(xcol, ((0, 0), (0, 0), (0, K1p - K1))).astype(bf16)

    # ---- block-diagonal (sample-pair) weights, im2col-flattened, bf16 -----------
    def pair_block(w):          # (..., ci, co) -> (..., 2ci, 2co) block-diagonal
        ci, co = w.shape[-2:]
        z = jnp.zeros(w.shape[:-2] + (2 * ci, 2 * co), f32)
        z = z.at[..., :ci, :co].set(w)
        z = z.at[..., ci:, co:].set(w)
        return z

    w1c = pair_block(params['w1']).reshape(K1, Cp)
    wsc = jnp.zeros((K1, Cp), f32).at[4 * Cin2:5 * Cin2, :].set(
        pair_block(params['ws']))                           # centre (1,1) tap rows
    wcat = jnp.concatenate([w1c, wsc], axis=1)              # (K1, 2*Cp): conv1 | skip
    wcat = jnp.pad(wcat, ((0, K1p - K1), (0, 0))).astype(bf16)
    w2c = pair_block(params['w2']).reshape(9 * Cp, Cp).astype(bf16)
    wdc = pair_block(params['wd']).reshape(16 * Cp, Cp).astype(bf16)

    dup = lambda b: jnp.concatenate([b, b]).reshape(1, Cp).astype(f32)
    bsp, bdp = dup(params['bs']), dup(params['bd'])         # b1/b2 dropped (IN cancels)

    kernel = _make_down_block_kernel(H, W, Cp)

    grid_spec = pltpu.PrefetchScalarGridSpec(
        num_scalar_prefetch=0,
        grid=(P,),
        in_specs=[
            pl.BlockSpec((1, HW, K1p), lambda p: (p, 0, 0)),
            pl.BlockSpec((K1p, 2 * Cp), lambda p: (0, 0)),
            pl.BlockSpec((9 * Cp, Cp), lambda p: (0, 0)),
            pl.BlockSpec((16 * Cp, Cp), lambda p: (0, 0)),
            pl.BlockSpec((1, Cp), lambda p: (0, 0)),
            pl.BlockSpec((1, Cp), lambda p: (0, 0)),
        ],
        out_specs=[
            pl.BlockSpec((1, HW, Cp), lambda p: (p, 0, 0)),
            pl.BlockSpec((1, OHW, Cp), lambda p: (p, 0, 0)),
        ],
        scratch_shapes=[
            pltpu.VMEM((4, OH + 1, OW + 1, Cp), bf16),      # parity-split padded act
            pltpu.VMEM((HW, Cp), f32),                      # parked 1x1-skip branch
        ],
    )

    ot, out = pl.pallas_call(
        kernel,
        out_shape=(jax.ShapeDtypeStruct((P, HW, Cp), f32),
                   jax.ShapeDtypeStruct((P, OHW, Cp), f32)),
        grid_spec=grid_spec,
        compiler_params=pltpu.CompilerParams(
            dimension_semantics=("parallel",),
            vmem_limit_bytes=32 * 1024 * 1024),
    )(xcol, wcat, w2c, wdc, bsp, bdp)

    # ---- un-pack: rows are (p, q, i, j); packed channels are (sample, Cout) ------
    out_temp = (ot.reshape(P, 2, 2, OH, OW, 2, Cout)
                  .transpose(0, 5, 6, 3, 1, 4, 2)           # (P, s, co, i, p, j, q)
                  .reshape(N2, Cout, H, W)[:N])
    out_ds = (out.reshape(P, OH, OW, 2, Cout)
                 .transpose(0, 3, 4, 1, 2)
                 .reshape(N2, Cout, OH, OW)[:N])
    return out_ds, out_temp


# ----------------------- pure-JAX reference (for checking) -----------------------
def _conv_ref(x_nchw, w_hwio, b, stride, pad):
    y = jax.lax.conv_general_dilated(
        x_nchw, w_hwio, (stride, stride), [(pad, pad), (pad, pad)],
        dimension_numbers=('NCHW', 'HWIO', 'NCHW'))
    return y + b.reshape(1, -1, 1, 1)


def _inorm_relu_ref(h):
    mean = h.mean(axis=(2, 3), keepdims=True)
    var = ((h - mean) ** 2).mean(axis=(2, 3), keepdims=True)
    return jnp.maximum((h - mean) / jnp.sqrt(var + 1e-5), 0.0)


def down_block_ref(x_nchw, params):
    Cin, Cout = params['ws'].shape
    h = _conv_ref(x_nchw, params['w1'], params['b1'], 1, 1)
    h = _inorm_relu_ref(h)
    h = _conv_ref(h, params['w2'], params['b2'], 1, 1)
    h = _inorm_relu_ref(h)
    skip = _conv_ref(x_nchw, params['ws'].reshape(1, 1, Cin, Cout),
                     params['bs'], 1, 0)
    out_temp = h + skip
    out = _conv_ref(out_temp, params['wd'], params['bd'], 2, 1)
    return out, out_temp


# ------------------------------------ main ----------------------------------------
def _init_conv(key, kh, kw, cin, cout):
    fan_in = cin * kh * kw
    bound = 1.0 / (fan_in ** 0.5)
    kw_, kb_ = jax.random.split(key)
    w = jax.random.uniform(kw_, (kh, kw, cin, cout), jnp.float32, -bound, bound)
    b = jax.random.uniform(kb_, (cout,), jnp.float32, -bound, bound)
    return w, b


if __name__ == "__main__":
    N, Cin, Cout, H, W = 2, 3, 64, 16, 16

    key = jax.random.PRNGKey(0)
    kx, k1, k2, ks, kd = jax.random.split(key, 5)

    w1, b1 = _init_conv(k1, 3, 3, Cin, Cout)
    w2, b2 = _init_conv(k2, 3, 3, Cout, Cout)
    ws4, bs = _init_conv(ks, 1, 1, Cin, Cout)
    wd, bd = _init_conv(kd, 4, 4, Cout, Cout)
    params = dict(w1=w1, b1=b1, w2=w2, b2=b2,
                  ws=ws4.reshape(Cin, Cout), bs=bs, wd=wd, bd=bd)

    x = jax.random.normal(kx, (N, Cin, H, W), jnp.float32)

    out, out_temp = down_block(x, params)
    out = jax.block_until_ready(out)
    out_temp = jax.block_until_ready(out_temp)

    # correctness check against the pure-f32 reference (kernel matmuls run in
    # bf16 with f32 accumulation -> loose max-abs, tight mean-abs).
    out_r, out_temp_r = down_block_ref(x, params)
    assert out.shape == (N, Cout, H // 2, W // 2)
    assert out_temp.shape == (N, Cout, H, W)
    assert float(jnp.max(jnp.abs(out - out_r))) < 5e-2
    assert float(jnp.max(jnp.abs(out_temp - out_temp_r))) < 5e-2
    assert float(jnp.mean(jnp.abs(out - out_r))) < 7e-3
    assert float(jnp.mean(jnp.abs(out_temp - out_temp_r))) < 7e-3

    print("KERNEL_OK")
</pallas_src>

<mosaic_0001>
module attributes {stable_mosaic.version = 11 : i64} {
  func.func @kernel(%arg0: i32, %arg1: memref<1x256x64xbf16, #tpu.memory_space<vmem>>, %arg2: memref<64x256xbf16, #tpu.memory_space<vmem>>, %arg3: memref<1152x128xbf16, #tpu.memory_space<vmem>>, %arg4: memref<2048x128xbf16, #tpu.memory_space<vmem>>, %arg5: memref<1x128xf32, #tpu.memory_space<vmem>>, %arg6: memref<1x128xf32, #tpu.memory_space<vmem>>, %arg7: memref<1x256x128xf32, #tpu.memory_space<vmem>>, %arg8: memref<1x64x128xf32, #tpu.memory_space<vmem>>, %arg9: memref<4x9x9x128xbf16, #tpu.memory_space<vmem>>, %arg10: memref<256x128xf32, #tpu.memory_space<vmem>>) attributes {dimension_semantics = [#tpu.dimension_semantics<parallel>], iteration_bounds = array<i64: 1>, scalar_prefetch = 0 : i64, scratch_operands = 2 : i64, tpu.core_type = #tpu.core_type<tc>, window_params = [{transform_indices = @transform_0, window_bounds = array<i64: 1, 256, 64>}, {pipeline_mode = #tpu.pipeline_mode<synchronous>, transform_indices = @transform_1, window_bounds = array<i64: 64, 256>}, {pipeline_mode = #tpu.pipeline_mode<synchronous>, transform_indices = @transform_2, window_bounds = array<i64: 1152, 128>}, {pipeline_mode = #tpu.pipeline_mode<synchronous>, transform_indices = @transform_3, window_bounds = array<i64: 2048, 128>}, {pipeline_mode = #tpu.pipeline_mode<synchronous>, transform_indices = @transform_4, window_bounds = array<i64: 1, 128>}, {pipeline_mode = #tpu.pipeline_mode<synchronous>, transform_indices = @transform_5, window_bounds = array<i64: 1, 128>}, {transform_indices = @transform_6, window_bounds = array<i64: 1, 256, 128>}, {transform_indices = @transform_7, window_bounds = array<i64: 1, 64, 128>}]} {
    %cst = arith.constant 0.000000e+00 : bf16
    %0 = vector.broadcast %cst : bf16 to vector<1x9x128xbf16>
    %cst_0 = arith.constant 0.000000e+00 : bf16
    %1 = vector.broadcast %cst_0 : bf16 to vector<9x1x128xbf16>
    %c0 = arith.constant 0 : index
    %c0_1 = arith.constant 0 : index
    %c0_2 = arith.constant 0 : index
    %c0_3 = arith.constant 0 : index
    %2 = vector.load %arg9[%c0, %c0_1, %c0_2, %c0_3] : memref<4x9x9x128xbf16, #tpu.memory_space<vmem>>, vector<1x1x9x128xbf16>
    %3 = vector.shape_cast %2 : vector<1x1x9x128xbf16> to vector<1x9x128xbf16>
    %4 = vector.shape_cast %0 : vector<1x9x128xbf16> to vector<1x1x9x128xbf16>
    tpu.vector_store %arg9[%c0, %c0_1, %c0_2, %c0_3], %4 {strides = array<i32>} : memref<4x9x9x128xbf16, #tpu.memory_space<vmem>>, vector<1x1x9x128xbf16>,
    %c1 = arith.constant 1 : index
    %c0_4 = arith.constant 0 : index
    %c0_5 = arith.constant 0 : index
    %c0_6 = arith.constant 0 : index
    %5 = vector.load %arg9[%c1, %c0_4, %c0_5, %c0_6] : memref<4x9x9x128xbf16, #tpu.memory_space<vmem>>, vector<1x1x9x128xbf16>
    %6 = vector.shape_cast %5 : vector<1x1x9x128xbf16> to vector<1x9x128xbf16>
    %7 = vector.shape_cast %0 : vector<1x9x128xbf16> to vector<1x1x9x128xbf16>
    tpu.vector_store %arg9[%c1, %c0_4, %c0_5, %c0_6], %7 {strides = array<i32>} : memref<4x9x9x128xbf16, #tpu.memory_space<vmem>>, vector<1x1x9x128xbf16>,
    %c2 = arith.constant 2 : index
    %c8 = arith.constant 8 : index
    %c0_7 = arith.constant 0 : index
    %c0_8 = arith.constant 0 : index
    %8 = vector.load %arg9[%c2, %c8, %c0_7, %c0_8] : memref<4x9x9x128xbf16, #tpu.memory_space<vmem>>, vector<1x1x9x128xbf16>
    %9 = vector.shape_cast %8 : vector<1x1x9x128xbf16> to vector<1x9x128xbf16>
    %10 = vector.shape_cast %0 : vector<1x9x128xbf16> to vector<1x1x9x128xbf16>
    tpu.vector_store %arg9[%c2, %c8, %c0_7, %c0_8], %10 {strides = array<i32>} : memref<4x9x9x128xbf16, #tpu.memory_space<vmem>>, vector<1x1x9x128xbf16>,
    %c3 = arith.constant 3 : index
    %c8_9 = arith.constant 8 : index
    %c0_10 = arith.constant 0 : index
    %c0_11 = arith.constant 0 : index
    %11 = vector.load %arg9[%c3, %c8_9, %c0_10, %c0_11] : memref<4x9x9x128xbf16, #tpu.memory_space<vmem>>, vector<1x1x9x128xbf16>
    %12 = vector.shape_cast %11 : vector<1x1x9x128xbf16> to vector<1x9x128xbf16>
    %13 = vector.shape_cast %0 : vector<1x9x128xbf16> to vector<1x1x9x128xbf16>
    tpu.vector_store %arg9[%c3, %c8_9, %c0_10, %c0_11], %13 {strides = array<i32>} : memref<4x9x9x128xbf16, #tpu.memory_space<vmem>>, vector<1x1x9x128xbf16>,
    %c0_12 = arith.constant 0 : index
    %c0_13 = arith.constant 0 : index
    %c0_14 = arith.constant 0 : index
    %c0_15 = arith.constant 0 : index
    %14 = vector.load %arg9[%c0_12, %c0_13, %c0_14, %c0_15] : memref<4x9x9x128xbf16, #tpu.memory_space<vmem>>, vector<1x9x1x128xbf16>
    %15 = vector.shape_cast %14 : vector<1x9x1x128xbf16> to vector<9x1x128xbf16>
    %16 = vector.shape_cast %1 : vector<9x1x128xbf16> to vector<1x9x1x128xbf16>
    tpu.vector_store %arg9[%c0_12, %c0_13, %c0_14, %c0_15], %16 {strides = array<i32>} : memref<4x9x9x128xbf16, #tpu.memory_space<vmem>>, vector<1x9x1x128xbf16>,
    %c2_16 = arith.constant 2 : index
    %c0_17 = arith.constant 0 : index
    %c0_18 = arith.constant 0 : index
    %c0_19 = arith.constant 0 : index
    %17 = vector.load %arg9[%c2_16, %c0_17, %c0_18, %c0_19] : memref<4x9x9x128xbf16, #tpu.memory_space<vmem>>, vector<1x9x1x128xbf16>
    %18 = vector.shape_cast %17 : vector<1x9x1x128xbf16> to vector<9x1x128xbf16>
    %19 = vector.shape_cast %1 : vector<9x1x128xbf16> to vector<1x9x1x128xbf16>
    tpu.vector_store %arg9[%c2_16, %c0_17, %c0_18, %c0_19], %19 {strides = array<i32>} : memref<4x9x9x128xbf16, #tpu.memory_space<vmem>>, vector<1x9x1x128xbf16>,
    %c1_20 = arith.constant 1 : index
    %c0_21 = arith.constant 0 : index
    %c8_22 = arith.constant 8 : index
    %c0_23 = arith.constant 0 : index
    %20 = vector.load %arg9[%c1_20, %c0_21, %c8_22, %c0_23] : memref<4x9x9x128xbf16, #tpu.memory_space<vmem>>, vector<1x9x1x128xbf16>
    %21 = vector.shape_cast %20 : vector<1x9x1x128xbf16> to vector<9x1x128xbf16>
    %22 = vector.shape_cast %1 : vector<9x1x128xbf16> to vector<1x9x1x128xbf16>
    tpu.vector_store %arg9[%c1_20, %c0_21, %c8_22, %c0_23], %22 {strides = array<i32>} : memref<4x9x9x128xbf16, #tpu.memory_space<vmem>>, vector<1x9x1x128xbf16>,
    %c3_24 = arith.constant 3 : index
    %c0_25 = arith.constant 0 : index
    %c8_26 = arith.constant 8 : index
    %c0_27 = arith.constant 0 : index
    %23 = vector.load %arg9[%c3_24, %c0_25, %c8_26, %c0_27] : memref<4x9x9x128xbf16, #tpu.memory_space<vmem>>, vector<1x9x1x128xbf16>
    %24 = vector.shape_cast %23 : vector<1x9x1x128xbf16> to vector<9x1x128xbf16>
    %25 = vector.shape_cast %1 : vector<9x1x128xbf16> to vector<1x9x1x128xbf16>
    tpu.vector_store %arg9[%c3_24, %c0_25, %c8_26, %c0_27], %25 {strides = array<i32>} : memref<4x9x9x128xbf16, #tpu.memory_space<vmem>>, vector<1x9x1x128xbf16>,
    %c0_28 = arith.constant 0 : index
    %c0_29 = arith.constant 0 : index
    %c0_30 = arith.constant 0 : index
    %26 = vector.load %arg1[%c0_28, %c0_29, %c0_30] : memref<1x256x64xbf16, #tpu.memory_space<vmem>>, vector<1x256x64xbf16>
    %27 = vector.shape_cast %26 : vector<1x256x64xbf16> to vector<256x64xbf16>
    %c0_31 = arith.constant 0 : index
    %c0_32 = arith.constant 0 : index
    %28 = vector.load %arg2[%c0_31, %c0_32] : memref<64x256xbf16, #tpu.memory_space<vmem>>, vector<64x256xbf16>
    %cst_33 = arith.constant dense<0.000000e+00> : vector<256x256xf32>
    %29 = tpu.matmul %27, %28, %cst_33 {dimension_numbers = #tpu.dot_dimension_numbers<[1], [0], [0], [1], [0, 0, 1, 1], [], []>} : vector<256x64xbf16>, vector<64x256xbf16>, vector<256x256xf32> -> vector<256x256xf32>
    %30 = vector.extract_strided_slice %29 {offsets = [0, 128], sizes = [256, 128], strides = [1, 1]} : vector<256x256xf32> to vector<256x128xf32>
    %c0_34 = arith.constant 0 : index
    %c0_35 = arith.constant 0 : index
    %31 = vector.load %arg5[%c0_34, %c0_35] : memref<1x128xf32, #tpu.memory_space<vmem>>, vector<1x128xf32>
    %32 = vector.broadcast %31 : vector<1x128xf32> to vector<256x128xf32>
    %33 = arith.addf %30, %32 : vector<256x128xf32>
    %c0_36 = arith.constant 0 : index
    %c0_37 = arith.constant 0 : index
    %34 = vector.load %arg10[%c0_36, %c0_37] : memref<256x128xf32, #tpu.memory_space<vmem>>, vector<256x128xf32>
    tpu.vector_store %arg10[%c0_36, %c0_37], %33 {strides = array<i32>} : memref<256x128xf32, #tpu.memory_space<vmem>>, vector<256x128xf32>,
    %35 = vector.extract_strided_slice %29 {offsets = [0, 0], sizes = [256, 128], strides = [1, 1]} : vector<256x256xf32> to vector<256x128xf32>
    %cst_38 = arith.constant dense<0.000000e+00> : vector<128xf32>
    %36 = vector.multi_reduction <add>, %35, %cst_38 [0] : vector<256x128xf32> to vector<128xf32>
    %37 = vector.shape_cast %36 : vector<128xf32> to vector<1x128xf32>
    %38 = arith.mulf %35, %35 : vector<256x128xf32>
    %cst_39 = arith.constant dense<0.000000e+00> : vector<128xf32>
    %39 = vector.multi_reduction <add>, %38, %cst_39 [0] : vector<256x128xf32> to vector<128xf32>
    %40 = vector.shape_cast %39 : vector<128xf32> to vector<1x128xf32>
    %cst_40 = arith.constant 3.906250e-03 : f32
    %41 = vector.broadcast %cst_40 : f32 to vector<1x128xf32>
    %42 = arith.mulf %37, %41 : vector<1x128xf32>
    %cst_41 = arith.constant 3.906250e-03 : f32
    %43 = vector.broadcast %cst_41 : f32 to vector<1x128xf32>
    %44 = arith.mulf %40, %43 : vector<1x128xf32>
    %45 = arith.mulf %42, %42 : vector<1x128xf32>
    %46 = arith.subf %44, %45 : vector<1x128xf32>
    %47 = vector.broadcast %42 : vector<1x128xf32> to vector<256x128xf32>
    %48 = arith.subf %35, %47 : vector<256x128xf32>
    %cst_42 = arith.constant 9.99999974E-6 : f32
    %49 = vector.broadcast %cst_42 : f32 to vector<1x128xf32>
    %50 = arith.addf %46, %49 : vector<1x128xf32>
    %51 = math.rsqrt %50 : vector<1x128xf32>
    %52 = vector.broadcast %51 : vector<1x128xf32> to vector<256x128xf32>
    %53 = arith.mulf %48, %52 : vector<256x128xf32>
    %cst_43 = arith.constant 0.000000e+00 : f32
    %54 = vector.broadcast %cst_43 : f32 to vector<256x128xf32>
    %55 = arith.maximumf %53, %54 : vector<256x128xf32>
    %56 = arith.truncf %55 : vector<256x128xf32> to vector<256x128xbf16>
    %57 = vector.extract_strided_slice %56 {offsets = [0, 0], sizes = [64, 128], strides = [1, 1]} : vector<256x128xbf16> to vector<64x128xbf16>
    %58 = vector.shape_cast %57 : vector<64x128xbf16> to vector<8x8x128xbf16>
    %c3_44 = arith.constant 3 : index
    %c0_45 = arith.constant 0 : index
    %c0_46 = arith.constant 0 : index
    %c0_47 = arith.constant 0 : index
    %59 = vector.load %arg9[%c3_44, %c0_45, %c0_46, %c0_47] : memref<4x9x9x128xbf16, #tpu.memory_space<vmem>>, vector<1x8x8x128xbf16>
    %60 = vector.shape_cast %59 : vector<1x8x8x128xbf16> to vector<8x8x128xbf16>
    %61 = vector.shape_cast %58 : vector<8x8x128xbf16> to vector<1x8x8x128xbf16>
    tpu.vector_store %arg9[%c3_44, %c0_45, %c0_46, %c0_47], %61 {strides = array<i32>} : memref<4x9x9x128xbf16, #tpu.memory_space<vmem>>, vector<1x8x8x128xbf16>,
    %62 = vector.extract_strided_slice %56 {offsets = [64, 0], sizes = [64, 128], strides = [1, 1]} : vector<256x128xbf16> to vector<64x128xbf16>
    %63 = vector.shape_cast %62 : vector<64x128xbf16> to vector<8x8x128xbf16>
    %c2_48 = arith.constant 2 : index
    %c0_49 = arith.constant 0 : index
    %c1_50 = arith.constant 1 : index
    %c0_51 = arith.constant 0 : index
    %64 = vector.load %arg9[%c2_48, %c0_49, %c1_50, %c0_51] : memref<4x9x9x128xbf16, #tpu.memory_space<vmem>>, vector<1x8x8x128xbf16>
    %65 = vector.shape_cast %64 : vector<1x8x8x128xbf16> to vector<8x8x128xbf16>
    %66 = vector.shape_cast %63 : vector<8x8x128xbf16> to vector<1x8x8x128xbf16>
    tpu.vector_store %arg9[%c2_48, %c0_49, %c1_50, %c0_51], %66 {strides = array<i32>} : memref<4x9x9x128xbf16, #tpu.memory_space<vmem>>, vector<1x8x8x128xbf16>,
    %67 = vector.extract_strided_slice %56 {offsets = [128, 0], sizes = [64, 128], strides = [1, 1]} : vector<256x128xbf16> to vector<64x128xbf16>
    %68 = vector.shape_cast %67 : vector<64x128xbf16> to vector<8x8x128xbf16>
    %c1_52 = arith.constant 1 : index
    %c1_53 = arith.constant 1 : index
    %c0_54 = arith.constant 0 : index
    %c0_55 = arith.constant 0 : index
    %69 = vector.load %arg9[%c1_52, %c1_53, %c0_54, %c0_55] : memref<4x9x9x128xbf16, #tpu.memory_space<vmem>>, vector<1x8x8x128xbf16>
    %70 = vector.shape_cast %69 : vector<1x8x8x128xbf16> to vector<8x8x128xbf16>
    %71 = vector.shape_cast %68 : vector<8x8x128xbf16> to vector<1x8x8x128xbf16>
    tpu.vector_store %arg9[%c1_52, %c1_53, %c0_54, %c0_55], %71 {strides = array<i32>} : memref<4x9x9x128xbf16, #tpu.memory_space<vmem>>, vector<1x8x8x128xbf16>,
    %72 = vector.extract_strided_slice %56 {offsets = [192, 0], sizes = [64, 128], strides = [1, 1]} : vector<256x128xbf16> to vector<64x128xbf16>
    %73 = vector.shape_cast %72 : vector<64x128xbf16> to vector<8x8x128xbf16>
    %c0_56 = arith.constant 0 : index
    %c1_57 = arith.constant 1 : index
    %c1_58 = arith.constant 1 : index
    %c0_59 = arith.constant 0 : index
    %74 = vector.load %arg9[%c0_56, %c1_57, %c1_58, %c0_59] : memref<4x9x9x128xbf16, #tpu.memory_space<vmem>>, vector<1x8x8x128xbf16>
    %75 = vector.shape_cast %74 : vector<1x8x8x128xbf16> to vector<8x8x128xbf16>
    %76 = vector.shape_cast %73 : vector<8x8x128xbf16> to vector<1x8x8x128xbf16>
    tpu.vector_store %arg9[%c0_56, %c1_57, %c1_58, %c0_59], %76 {strides = array<i32>} : memref<4x9x9x128xbf16, #tpu.memory_space<vmem>>, vector<1x8x8x128xbf16>,
    %c0_60 = arith.constant 0 : index
    %c0_61 = arith.constant 0 : index
    %c0_62 = arith.constant 0 : index
    %c0_63 = arith.constant 0 : index
    %77 = vector.load %arg9[%c0_60, %c0_61, %c0_62, %c0_63] : memref<4x9x9x128xbf16, #tpu.memory_space<vmem>>, vector<1x8x8x128xbf16>
    %78 = vector.shape_cast %77 : vector<1x8x8x128xbf16> to vector<8x8x128xbf16>
    %79 = vector.shape_cast %78 : vector<8x8x128xbf16> to vector<64x128xbf16>
    %c0_64 = arith.constant 0 : index
    %c0_65 = arith.constant 0 : index
    %80 = vector.load %arg3[%c0_64, %c0_65] : memref<1152x128xbf16, #tpu.memory_space<vmem>>, vector<128x128xbf16>
    %cst_66 = arith.constant dense<0.000000e+00> : vector<64x128xf32>
    %81 = tpu.matmul %79, %80, %cst_66 {dimension_numbers = #tpu.dot_dimension_numbers<[1], [0], [0], [1], [0, 0, 1, 1], [], []>} : vector<64x128xbf16>, vector<128x128xbf16>, vector<64x128xf32> -> vector<64x128xf32>
    %c1_67 = arith.constant 1 : index
    %c0_68 = arith.constant 0 : index
    %c0_69 = arith.constant 0 : index
    %c0_70 = arith.constant 0 : index
    %82 = vector.load %arg9[%c1_67, %c0_68, %c0_69, %c0_70] : memref<4x9x9x128xbf16, #tpu.memory_space<vmem>>, vector<1x8x8x128xbf16>
    %83 = vector.shape_cast %82 : vector<1x8x8x128xbf16> to vector<8x8x128xbf16>
    %84 = vector.shape_cast %83 : vector<8x8x128xbf16> to vector<64x128xbf16>
    %c128 = arith.constant 128 : index
    %c0_71 = arith.constant 0 : index
    %85 = vector.load %arg3[%c128, %c0_71] : memref<1152x128xbf16, #tpu.memory_space<vmem>>, vector<128x128xbf16>
    %cst_72 = arith.constant dense<0.000000e+00> : vector<64x128xf32>
    %86 = tpu.matmul %84, %85, %cst_72 {dimension_numbers = #tpu.dot_dimension_numbers<[1], [0], [0], [1], [0, 0, 1, 1], [], []>} : vector<64x128xbf16>, vector<128x128xbf16>, vector<64x128xf32> -> vector<64x128xf32>
    %87 = arith.addf %81, %86 : vector<64x128xf32>
    %c0_73 = arith.constant 0 : index
    %c0_74 = arith.constant 0 : index
    %c1_75 = arith.constant 1 : index
    %c0_76 = arith.constant 0 : index
    %88 = vector.load %arg9[%c0_73, %c0_74, %c1_75, %c0_76] : memref<4x9x9x128xbf16, #tpu.memory_space<vmem>>, vector<1x8x8x128xbf16>
    %89 = vector.shape_cast %88 : vector<1x8x8x128xbf16> to vector<8x8x128xbf16>
    %90 = vector.shape_cast %89 : vector<8x8x128xbf16> to vector<64x128xbf16>
    %c256 = arith.constant 256 : index
    %c0_77 = arith.constant 0 : index
    %91 = vector.load %arg3[%c256, %c0_77] : memref<1152x128xbf16, #tpu.memory_space<vmem>>, vector<128x128xbf16>
    %cst_78 = arith.constant dense<0.000000e+00> : vector<64x128xf32>
    %92 = tpu.matmul %90, %91, %cst_78 {dimension_numbers = #tpu.dot_dimension_numbers<[1], [0], [0], [1], [0, 0, 1, 1], [], []>} : vector<64x128xbf16>, vector<128x128xbf16>, vector<64x128xf32> -> vector<64x128xf32>
    %93 = arith.addf %87, %92 : vector<64x128xf32>
    %c2_79 = arith.constant 2 : index
    %c0_80 = arith.constant 0 : index
    %c0_81 = arith.constant 0 : index
    %c0_82 = arith.constant 0 : index
    %94 = vector.load %arg9[%c2_79, %c0_80, %c0_81, %c0_82] : memref<4x9x9x128xbf16, #tpu.memory_space<vmem>>, vector<1x8x8x128xbf16>
    %95 = vector.shape_cast %94 : vector<1x8x8x128xbf16> to vector<8x8x128xbf16>
    %96 = vector.shape_cast %95 : vector<8x8x128xbf16> to vector<64x128xbf16>
    %c384 = arith.constant 384 : index
    %c0_83 = arith.constant 0 : index
    %97 = vector.load %arg3[%c384, %c0_83] : memref<1152x128xbf16, #tpu.memory_space<vmem>>, vector<128x128xbf16>
    %cst_84 = arith.constant dense<0.000000e+00> : vector<64x128xf32>
    %98 = tpu.matmul %96, %97, %cst_84 {dimension_numbers = #tpu.dot_dimension_numbers<[1], [0], [0], [1], [0, 0, 1, 1], [], []>} : vector<64x128xbf16>, vector<128x128xbf16>, vector<64x128xf32> -> vector<64x128xf32>
    %99 = arith.addf %93, %98 : vector<64x128xf32>
    %c3_85 = arith.constant 3 : index
    %c0_86 = arith.constant 0 : index
    %c0_87 = arith.constant 0 : index
    %c0_88 = arith.constant 0 : index
    %100 = vector.load %arg9[%c3_85, %c0_86, %c0_87, %c0_88] : memref<4x9x9x128xbf16, #tpu.memory_space<vmem>>, vector<1x8x8x128xbf16>
    %101 = vector.shape_cast %100 : vector<1x8x8x128xbf16> to vector<8x8x128xbf16>
    %102 = vector.shape_cast %101 : vector<8x8x128xbf16> to vector<64x128xbf16>
    %c512 = arith.constant 512 : index
    %c0_89 = arith.constant 0 : index
    %103 = vector.load %arg3[%c512, %c0_89] : memref<1152x128xbf16, #tpu.memory_space<vmem>>, vector<128x128xbf16>
    %cst_90 = arith.constant dense<0.000000e+00> : vector<64x128xf32>
    %104 = tpu.matmul %102, %103, %cst_90 {dimension_numbers = #tpu.dot_dimension_numbers<[1], [0], [0], [1], [0, 0, 1, 1], [], []>} : vector<64x128xbf16>, vector<128x128xbf16>, vector<64x128xf32> -> vector<64x128xf32>
    %105 = arith.addf %99, %104 : vector<64x128xf32>
    %c2_91 = arith.constant 2 : index
    %c0_92 = arith.constant 0 : index
    %c1_93 = arith.constant 1 : index
    %c0_94 = arith.constant 0 : index
    %106 = vector.load %arg9[%c2_91, %c0_92, %c1_93, %c0_94] : memref<4x9x9x128xbf16, #tpu.memory_space<vmem>>, vector<1x8x8x128xbf16>
    %107 = vector.shape_cast %106 : vector<1x8x8x128xbf16> to vector<8x8x128xbf16>
    %108 = vector.shape_cast %107 : vector<8x8x128xbf16> to vector<64x128xbf16>
    %c640 = arith.constant 640 : index
    %c0_95 = arith.constant 0 : index
    %109 = vector.load %arg3[%c640, %c0_95] : memref<1152x128xbf16, #tpu.memory_space<vmem>>, vector<128x128xbf16>
    %cst_96 = arith.constant dense<0.000000e+00> : vector<64x128xf32>
    %110 = tpu.matmul %108, %109, %cst_96 {dimension_numbers = #tpu.dot_dimension_numbers<[1], [0], [0], [1], [0, 0, 1, 1], [], []>} : vector<64x128xbf16>, vector<128x128xbf16>, vector<64x128xf32> -> vector<64x128xf32>
    %111 = arith.addf %105, %110 : vector<64x128xf32>
    %c0_97 = arith.constant 0 : index
    %c1_98 = arith.constant 1 : index
    %c0_99 = arith.constant 0 : index
    %c0_100 = arith.constant 0 : index
    %112 = vector.load %arg9[%c0_97, %c1_98, %c0_99, %c0_100] : memref<4x9x9x128xbf16, #tpu.memory_space<vmem>>, vector<1x8x8x128xbf16>
    %113 = vector.shape_cast %112 : vector<1x8x8x128xbf16> to vector<8x8x128xbf16>
    %114 = vector.shape_cast %113 : vector<8x8x128xbf16> to vector<64x128xbf16>
    %c768 = arith.constant 768 : index
    %c0_101 = arith.constant 0 : index
    %115 = vector.load %arg3[%c768, %c0_101] : memref<1152x128xbf16, #tpu.memory_space<vmem>>, vector<128x128xbf16>
    %cst_102 = arith.constant dense<0.000000e+00> : vector<64x128xf32>
    %116 = tpu.matmul %114, %115, %cst_102 {dimension_numbers = #tpu.dot_dimension_numbers<[1], [0], [0], [1], [0, 0, 1, 1], [], []>} : vector<64x128xbf16>, vector<128x128xbf16>, vector<64x128xf32> -> vector<64x128xf32>
    %117 = arith.addf %111, %116 : vector<64x128xf32>
    %c1_103 = arith.constant 1 : index
    %c1_104 = arith.constant 1 : index
    %c0_105 = arith.constant 0 : index
    %c0_106 = arith.constant 0 : index
    %118 = vector.load %arg9[%c1_103, %c1_104, %c0_105, %c0_106] : memref<4x9x9x128xbf16, #tpu.memory_space<vmem>>, vector<1x8x8x128xbf16>
    %119 = vector.shape_cast %118 : vector<1x8x8x128xbf16> to vector<8x8x128xbf16>
    %120 = vector.shape_cast %119 : vector<8x8x128xbf16> to vector<64x128xbf16>
    %c896 = arith.constant 896 : index
    %c0_107 = arith.constant 0 : index
    %121 = vector.load %arg3[%c896, %c0_107] : memref<1152x128xbf16, #tpu.memory_space<vmem>>, vector<128x128xbf16>
    %cst_108 = arith.constant dense<0.000000e+00> : vector<64x128xf32>
    %122 = tpu.matmul %120, %121, %cst_108 {dimension_numbers = #tpu.dot_dimension_numbers<[1], [0], [0], [1], [0, 0, 1, 1], [], []>} : vector<64x128xbf16>, vector<128x128xbf16>, vector<64x128xf32> -> vector<64x128xf32>
    %123 = arith.addf %117, %122 : vector<64x128xf32>
    %c0_109 = arith.constant 0 : index
    %c1_110 = arith.constant 1 : index
    %c1_111 = arith.constant 1 : index
    %c0_112 = arith.constant 0 : index
    %124 = vector.load %arg9[%c0_109, %c1_110, %c1_111, %c0_112] : memref<4x9x9x128xbf16, #tpu.memory_space<vmem>>, vector<1x8x8x128xbf16>
    %125 = vector.shape_cast %124 : vector<1x8x8x128xbf16> to vector<8x8x128xbf16>
    %126 = vector.shape_cast %125 : vector<8x8x128xbf16> to vector<64x128xbf16>
    %c1024 = arith.constant 1024 : index
    %c0_113 = arith.constant 0 : index
    %127 = vector.load %arg3[%c1024, %c0_113] : memref<1152x128xbf16, #tpu.memory_space<vmem>>, vector<128x128xbf16>
    %cst_114 = arith.constant dense<0.000000e+00> : vector<64x128xf32>
    %128 = tpu.matmul %126, %127, %cst_114 {dimension_numbers = #tpu.dot_dimension_numbers<[1], [0], [0], [1], [0, 0, 1, 1], [], []>} : vector<64x128xbf16>, vector<128x128xbf16>, vector<64x128xf32> -> vector<64x128xf32>
    %129 = arith.addf %123, %128 : vector<64x128xf32>
    %c1_115 = arith.constant 1 : index
    %c0_116 = arith.constant 0 : index
    %c0_117 = arith.constant 0 : index
    %c0_118 = arith.constant 0 : index
    %130 = vector.load %arg9[%c1_115, %c0_116, %c0_117, %c0_118] : memref<4x9x9x128xbf16, #tpu.memory_space<vmem>>, vector<1x8x8x128xbf16>
    %131 = vector.shape_cast %130 : vector<1x8x8x128xbf16> to vector<8x8x128xbf16>
    %132 = vector.shape_cast %131 : vector<8x8x128xbf16> to vector<64x128xbf16>
    %c0_119 = arith.constant 0 : index
    %c0_120 = arith.constant 0 : index
    %133 = vector.load %arg3[%c0_119, %c0_120] : memref<1152x128xbf16, #tpu.memory_space<vmem>>, vector<128x128xbf16>
    %cst_121 = arith.constant dense<0.000000e+00> : vector<64x128xf32>
    %134 = tpu.matmul %132, %133, %cst_121 {dimension_numbers = #tpu.dot_dimension_numbers<[1], [0], [0], [1], [0, 0, 1, 1], [], []>} : vector<64x128xbf16>, vector<128x128xbf16>, vector<64x128xf32> -> vector<64x128xf32>
    %c0_122 = arith.constant 0 : index
    %c0_123 = arith.constant 0 : index
    %c1_124 = arith.constant 1 : index
    %c0_125 = arith.constant 0 : index
    %135 = vector.load %arg9[%c0_122, %c0_123, %c1_124, %c0_125] : memref<4x9x9x128xbf16, #tpu.memory_space<vmem>>, vector<1x8x8x128xbf16>
    %136 = vector.shape_cast %135 : vector<1x8x8x128xbf16> to vector<8x8x128xbf16>
    %137 = vector.shape_cast %136 : vector<8x8x128xbf16> to vector<64x128xbf16>
    %c128_126 = arith.constant 128 : index
    %c0_127 = arith.constant 0 : index
    %138 = vector.load %arg3[%c128_126, %c0_127] : memref<1152x128xbf16, #tpu.memory_space<vmem>>, vector<128x128xbf16>
    %cst_128 = arith.constant dense<0.000000e+00> : vector<64x128xf32>
    %139 = tpu.matmul %137, %138, %cst_128 {dimension_numbers = #tpu.dot_dimension_numbers<[1], [0], [0], [1], [0, 0, 1, 1], [], []>} : vector<64x128xbf16>, vector<128x128xbf16>, vector<64x128xf32> -> vector<64x128xf32>
    %140 = arith.addf %134, %139 : vector<64x128xf32>
    %c1_129 = arith.constant 1 : index
    %c0_130 = arith.constant 0 : index
    %c1_131 = arith.constant 1 : index
    %c0_132 = arith.constant 0 : index
    %141 = vector.load %arg9[%c1_129, %c0_130, %c1_131, %c0_132] : memref<4x9x9x128xbf16, #tpu.memory_space<vmem>>, vector<1x8x8x128xbf16>
    %142 = vector.shape_cast %141 : vector<1x8x8x128xbf16> to vector<8x8x128xbf16>
    %143 = vector.shape_cast %142 : vector<8x8x128xbf16> to vector<64x128xbf16>
    %c256_133 = arith.constant 256 : index
    %c0_134 = arith.constant 0 : index
    %144 = vector.load %arg3[%c256_133, %c0_134] : memref<1152x128xbf16, #tpu.memory_space<vmem>>, vector<128x128xbf16>
    %cst_135 = arith.constant dense<0.000000e+00> : vector<64x128xf32>
    %145 = tpu.matmul %143, %144, %cst_135 {dimension_numbers = #tpu.dot_dimension_numbers<[1], [0], [0], [1], [0, 0, 1, 1], [], []>} : vector<64x128xbf16>, vector<128x128xbf16>, vector<64x128xf32> -> vector<64x128xf32>
    %146 = arith.addf %140, %145 : vector<64x128xf32>
    %c3_136 = arith.constant 3 : index
    %c0_137 = arith.constant 0 : index
    %c0_138 = arith.constant 0 : index
    %c0_139 = arith.constant 0 : index
    %147 = vector.load %arg9[%c3_136, %c0_137, %c0_138, %c0_139] : memref<4x9x9x128xbf16, #tpu.memory_space<vmem>>, vector<1x8x8x128xbf16>
    %148 = vector.shape_cast %147 : vector<1x8x8x128xbf16> to vector<8x8x128xbf16>
    %149 = vector.shape_cast %148 : vector<8x8x128xbf16> to vector<64x128xbf16>
    %c384_140 = arith.constant 384 : index
    %c0_141 = arith.constant 0 : index
    %150 = vector.load %arg3[%c384_140, %c0_141] : memref<1152x128xbf16, #tpu.memory_space<vmem>>, vector<128x128xbf16>
    %cst_142 = arith.constant dense<0.000000e+00> : vector<64x128xf32>
    %151 = tpu.matmul %149, %150, %cst_142 {dimension_numbers = #tpu.dot_dimension_numbers<[1], [0], [0], [1], [0, 0, 1, 1], [], []>} : vector<64x128xbf16>, vector<128x128xbf16>, vector<64x128xf32> -> vector<64x128xf32>
    %152 = arith.addf %146, %151 : vector<64x128xf32>
    %c2_143 = arith.constant 2 : index
    %c0_144 = arith.constant 0 : index
    %c1_145 = arith.constant 1 : index
    %c0_146 = arith.constant 0 : index
    %153 = vector.load %arg9[%c2_143, %c0_144, %c1_145, %c0_146] : memref<4x9x9x128xbf16, #tpu.memory_space<vmem>>, vector<1x8x8x128xbf16>
    %154 = vector.shape_cast %153 : vector<1x8x8x128xbf16> to vector<8x8x128xbf16>
    %155 = vector.shape_cast %154 : vector<8x8x128xbf16> to vector<64x128xbf16>
    %c512_147 = arith.constant 512 : index
    %c0_148 = arith.constant 0 : index
    %156 = vector.load %arg3[%c512_147, %c0_148] : memref<1152x128xbf16, #tpu.memory_space<vmem>>, vector<128x128xbf16>
    %cst_149 = arith.constant dense<0.000000e+00> : vector<64x128xf32>
    %157 = tpu.matmul %155, %156, %cst_149 {dimension_numbers = #tpu.dot_dimension_numbers<[1], [0], [0], [1], [0, 0, 1, 1], [], []>} : vector<64x128xbf16>, vector<128x128xbf16>, vector<64x128xf32> -> vector<64x128xf32>
    %158 = arith.addf %152, %157 : vector<64x128xf32>
    %c3_150 = arith.constant 3 : index
    %c0_151 = arith.constant 0 : index
    %c1_152 = arith.constant 1 : index
    %c0_153 = arith.constant 0 : index
    %159 = vector.load %arg9[%c3_150, %c0_151, %c1_152, %c0_153] : memref<4x9x9x128xbf16, #tpu.memory_space<vmem>>, vector<1x8x8x128xbf16>
    %160 = vector.shape_cast %159 : vector<1x8x8x128xbf16> to vector<8x8x128xbf16>
    %161 = vector.shape_cast %160 : vector<8x8x128xbf16> to vector<64x128xbf16>
    %c640_154 = arith.constant 640 : index
    %c0_155 = arith.constant 0 : index
    %162 = vector.load %arg3[%c640_154, %c0_155] : memref<1152x128xbf16, #tpu.memory_space<vmem>>, vector<128x128xbf16>
    %cst_156 = arith.constant dense<0.000000e+00> : vector<64x128xf32>
    %163 = tpu.matmul %161, %162, %cst_156 {dimension_numbers = #tpu.dot_dimension_numbers<[1], [0], [0], [1], [0, 0, 1, 1], [], []>} : vector<64x128xbf16>, vector<128x128xbf16>, vector<64x128xf32> -> vector<64x128xf32>
    %164 = arith.addf %158, %163 : vector<64x128xf32>
    %c1_157 = arith.constant 1 : index
    %c1_158 = arith.constant 1 : index
    %c0_159 = arith.constant 0 : index
    %c0_160 = arith.constant 0 : index
    %165 = vector.load %arg9[%c1_157, %c1_158, %c0_159, %c0_160] : memref<4x9x9x128xbf16, #tpu.memory_space<vmem>>, vector<1x8x8x128xbf16>
    %166 = vector.shape_cast %165 : vector<1x8x8x128xbf16> to vector<8x8x128xbf16>
    %167 = vector.shape_cast %166 : vector<8x8x128xbf16> to vector<64x128xbf16>
    %c768_161 = arith.constant 768 : index
    %c0_162 = arith.constant 0 : index
    %168 = vector.load %arg3[%c768_161, %c0_162] : memref<1152x128xbf16, #tpu.memory_space<vmem>>, vector<128x128xbf16>
    %cst_163 = arith.constant dense<0.000000e+00> : vector<64x128xf32>
    %169 = tpu.matmul %167, %168, %cst_163 {dimension_numbers = #tpu.dot_dimension_numbers<[1], [0], [0], [1], [0, 0, 1, 1], [], []>} : vector<64x128xbf16>, vector<128x128xbf16>, vector<64x128xf32> -> vector<64x128xf32>
    %170 = arith.addf %164, %169 : vector<64x128xf32>
    %c0_164 = arith.constant 0 : index
    %c1_165 = arith.constant 1 : index
    %c1_166 = arith.constant 1 : index
    %c0_167 = arith.constant 0 : index
    %171 = vector.load %arg9[%c0_164, %c1_165, %c1_166, %c0_167] : memref<4x9x9x128xbf16, #tpu.memory_space<vmem>>, vector<1x8x8x128xbf16>
    %172 = vector.shape_cast %171 : vector<1x8x8x128xbf16> to vector<8x8x128xbf16>
    %173 = vector.shape_cast %172 : vector<8x8x128xbf16> to vector<64x128xbf16>
    %c896_168 = arith.constant 896 : index
    %c0_169 = arith.constant 0 : index
    %174 = vector.load %arg3[%c896_168, %c0_169] : memref<1152x128xbf16, #tpu.memory_space<vmem>>, vector<128x128xbf16>
    %cst_170 = arith.constant dense<0.000000e+00> : vector<64x128xf32>
    %175 = tpu.matmul %173, %174, %cst_170 {dimension_numbers = #tpu.dot_dimension_numbers<[1], [0], [0], [1], [0, 0, 1, 1], [], []>} : vector<64x128xbf16>, vector<128x128xbf16>, vector<64x128xf32> -> vector<64x128xf32>
    %176 = arith.addf %170, %175 : vector<64x128xf32>
    %c1_171 = arith.constant 1 : index
    %c1_172 = arith.constant 1 : index
    %c1_173 = arith.constant 1 : index
    %c0_174 = arith.constant 0 : index
    %177 = vector.load %arg9[%c1_171, %c1_172, %c1_173, %c0_174] : memref<4x9x9x128xbf16, #tpu.memory_space<vmem>>, vector<1x8x8x128xbf16>
    %178 = vector.shape_cast %177 : vector<1x8x8x128xbf16> to vector<8x8x128xbf16>
    %179 = vector.shape_cast %178 : vector<8x8x128xbf16> to vector<64x128xbf16>
    %c1024_175 = arith.constant 1024 : index
    %c0_176 = arith.constant 0 : index
    %180 = vector.load %arg3[%c1024_175, %c0_176] : memref<1152x128xbf16, #tpu.memory_space<vmem>>, vector<128x128xbf16>
    %cst_177 = arith.constant dense<0.000000e+00> : vector<64x128xf32>
    %181 = tpu.matmul %179, %180, %cst_177 {dimension_numbers = #tpu.dot_dimension_numbers<[1], [0], [0], [1], [0, 0, 1, 1], [], []>} : vector<64x128xbf16>, vector<128x128xbf16>, vector<64x128xf32> -> vector<64x128xf32>
    %182 = arith.addf %176, %181 : vector<64x128xf32>
    %c2_178 = arith.constant 2 : index
    %c0_179 = arith.constant 0 : index
    %c0_180 = arith.constant 0 : index
    %c0_181 = arith.constant 0 : index
    %183 = vector.load %arg9[%c2_178, %c0_179, %c0_180, %c0_181] : memref<4x9x9x128xbf16, #tpu.memory_space<vmem>>, vector<1x8x8x128xbf16>
    %184 = vector.shape_cast %183 : vector<1x8x8x128xbf16> to vector<8x8x128xbf16>
    %185 = vector.shape_cast %184 : vector<8x8x128xbf16> to vector<64x128xbf16>
    %c0_182 = arith.constant 0 : index
    %c0_183 = arith.constant 0 : index
    %186 = vector.load %arg3[%c0_182, %c0_183] : memref<1152x128xbf16, #tpu.memory_space<vmem>>, vector<128x128xbf16>
    %cst_184 = arith.constant dense<0.000000e+00> : vector<64x128xf32>
    %187 = tpu.matmul %185, %186, %cst_184 {dimension_numbers = #tpu.dot_dimension_numbers<[1], [0], [0], [1], [0, 0, 1, 1], [], []>} : vector<64x128xbf16>, vector<128x128xbf16>, vector<64x128xf32> -> vector<64x128xf32>
    %c3_185 = arith.constant 3 : index
    %c0_186 = arith.constant 0 : index
    %c0_187 = arith.constant 0 : index
    %c0_188 = arith.constant 0 : index
    %188 = vector.load %arg9[%c3_185, %c0_186, %c0_187, %c0_188] : memref<4x9x9x128xbf16, #tpu.memory_space<vmem>>, vector<1x8x8x128xbf16>
    %189 = vector.shape_cast %188 : vector<1x8x8x128xbf16> to vector<8x8x128xbf16>
    %190 = vector.shape_cast %189 : vector<8x8x128xbf16> to vector<64x128xbf16>
    %c128_189 = arith.constant 128 : index
    %c0_190 = arith.constant 0 : index
    %191 = vector.load %arg3[%c128_189, %c0_190] : memref<1152x128xbf16, #tpu.memory_space<vmem>>, vector<128x128xbf16>
    %cst_191 = arith.constant dense<0.000000e+00> : vector<64x128xf32>
    %192 = tpu.matmul %190, %191, %cst_191 {dimension_numbers = #tpu.dot_dimension_numbers<[1], [0], [0], [1], [0, 0, 1, 1], [], []>} : vector<64x128xbf16>, vector<128x128xbf16>, vector<64x128xf32> -> vector<64x128xf32>
    %193 = arith.addf %187, %192 : vector<64x128xf32>
    %c2_192 = arith.constant 2 : index
    %c0_193 = arith.constant 0 : index
    %c1_194 = arith.constant 1 : index
    %c0_195 = arith.constant 0 : index
    %194 = vector.load %arg9[%c2_192, %c0_193, %c1_194, %c0_195] : memref<4x9x9x128xbf16, #tpu.memory_space<vmem>>, vector<1x8x8x128xbf16>
    %195 = vector.shape_cast %194 : vector<1x8x8x128xbf16> to vector<8x8x128xbf16>
    %196 = vector.shape_cast %195 : vector<8x8x128xbf16> to vector<64x128xbf16>
    %c256_196 = arith.constant 256 : index
    %c0_197 = arith.constant 0 : index
    %197 = vector.load %arg3[%c256_196, %c0_197] : memref<1152x128xbf16, #tpu.memory_space<vmem>>, vector<128x128xbf16>
    %cst_198 = arith.constant dense<0.000000e+00> : vector<64x128xf32>
    %198 = tpu.matmul %196, %197, %cst_198 {dimension_numbers = #tpu.dot_dimension_numbers<[1], [0], [0], [1], [0, 0, 1, 1], [], []>} : vector<64x128xbf16>, vector<128x128xbf16>, vector<64x128xf32> -> vector<64x128xf32>
    %199 = arith.addf %193, %198 : vector<64x128xf32>
    %c0_199 = arith.constant 0 : index
    %c1_200 = arith.constant 1 : index
    %c0_201 = arith.constant 0 : index
    %c0_202 = arith.constant 0 : index
    %200 = vector.load %arg9[%c0_199, %c1_200, %c0_201, %c0_202] : memref<4x9x9x128xbf16, #tpu.memory_space<vmem>>, vector<1x8x8x128xbf16>
    %201 = vector.shape_cast %200 : vector<1x8x8x128xbf16> to vector<8x8x128xbf16>
    %202 = vector.shape_cast %201 : vector<8x8x128xbf16> to vector<64x128xbf16>
    %c384_203 = arith.constant 384 : index
    %c0_204 = arith.constant 0 : index
    %203 = vector.load %arg3[%c384_203, %c0_204] : memref<1152x128xbf16, #tpu.memory_space<vmem>>, vector<128x128xbf16>
    %cst_205 = arith.constant dense<0.000000e+00> : vector<64x128xf32>
    %204 = tpu.matmul %202, %203, %cst_205 {dimension_numbers = #tpu.dot_dimension_numbers<[1], [0], [0], [1], [0, 0, 1, 1], [], []>} : vector<64x128xbf16>, vector<128x128xbf16>, vector<64x128xf32> -> vector<64x128xf32>
    %205 = arith.addf %199, %204 : vector<64x128xf32>
    %c1_206 = arith.constant 1 : index
    %c1_207 = arith.constant 1 : index
    %c0_208 = arith.constant 0 : index
    %c0_209 = arith.constant 0 : index
    %206 = vector.load %arg9[%c1_206, %c1_207, %c0_208, %c0_209] : memref<4x9x9x128xbf16, #tpu.memory_space<vmem>>, vector<1x8x8x128xbf16>
    %207 = vector.shape_cast %206 : vector<1x8x8x128xbf16> to vector<8x8x128xbf16>
    %208 = vector.shape_cast %207 : vector<8x8x128xbf16> to vector<64x128xbf16>
    %c512_210 = arith.constant 512 : index
    %c0_211 = arith.constant 0 : index
    %209 = vector.load %arg3[%c512_210, %c0_211] : memref<1152x128xbf16, #tpu.memory_space<vmem>>, vector<128x128xbf16>
    %cst_212 = arith.constant dense<0.000000e+00> : vector<64x128xf32>
    %210 = tpu.matmul %208, %209, %cst_212 {dimension_numbers = #tpu.dot_dimension_numbers<[1], [0], [0], [1], [0, 0, 1, 1], [], []>} : vector<64x128xbf16>, vector<128x128xbf16>, vector<64x128xf32> -> vector<64x128xf32>
    %211 = arith.addf %205, %210 : vector<64x128xf32>
    %c0_213 = arith.constant 0 : index
    %c1_214 = arith.constant 1 : index
    %c1_215 = arith.constant 1 : index
    %c0_216 = arith.constant 0 : index
    %212 = vector.load %arg9[%c0_213, %c1_214, %c1_215, %c0_216] : memref<4x9x9x128xbf16, #tpu.memory_space<vmem>>, vector<1x8x8x128xbf16>
    %213 = vector.shape_cast %212 : vector<1x8x8x128xbf16> to vector<8x8x128xbf16>
    %214 = vector.shape_cast %213 : vector<8x8x128xbf16> to vector<64x128xbf16>
    %c640_217 = arith.constant 640 : index
    %c0_218 = arith.constant 0 : index
    %215 = vector.load %arg3[%c640_217, %c0_218] : memref<1152x128xbf16, #tpu.memory_space<vmem>>, vector<128x128xbf16>
    %cst_219 = arith.constant dense<0.000000e+00> : vector<64x128xf32>
    %216 = tpu.matmul %214, %215, %cst_219 {dimension_numbers = #tpu.dot_dimension_numbers<[1], [0], [0], [1], [0, 0, 1, 1], [], []>} : vector<64x128xbf16>, vector<128x128xbf16>, vector<64x128xf32> -> vector<64x128xf32>
    %217 = arith.addf %211, %216 : vector<64x128xf32>
    %c2_220 = arith.constant 2 : index
    %c1_221 = arith.constant 1 : index
    %c0_222 = arith.constant 0 : index
    %c0_223 = arith.constant 0 : index
    %218 = vector.load %arg9[%c2_220, %c1_221, %c0_222, %c0_223] : memref<4x9x9x128xbf16, #tpu.memory_space<vmem>>, vector<1x8x8x128xbf16>
    %219 = vector.shape_cast %218 : vector<1x8x8x128xbf16> to vector<8x8x128xbf16>
    %220 = vector.shape_cast %219 : vector<8x8x128xbf16> to vector<64x128xbf16>
    %c768_224 = arith.constant 768 : index
    %c0_225 = arith.constant 0 : index
    %221 = vector.load %arg3[%c768_224, %c0_225] : memref<1152x128xbf16, #tpu.memory_space<vmem>>, vector<128x128xbf16>
    %cst_226 = arith.constant dense<0.000000e+00> : vector<64x128xf32>
    %222 = tpu.matmul %220, %221, %cst_226 {dimension_numbers = #tpu.dot_dimension_numbers<[1], [0], [0], [1], [0, 0, 1, 1], [], []>} : vector<64x128xbf16>, vector<128x128xbf16>, vector<64x128xf32> -> vector<64x128xf32>
    %223 = arith.addf %217, %222 : vector<64x128xf32>
    %c3_227 = arith.constant 3 : index
    %c1_228 = arith.constant 1 : index
    %c0_229 = arith.constant 0 : index
    %c0_230 = arith.constant 0 : index
    %224 = vector.load %arg9[%c3_227, %c1_228, %c0_229, %c0_230] : memref<4x9x9x128xbf16, #tpu.memory_space<vmem>>, vector<1x8x8x128xbf16>
    %225 = vector.shape_cast %224 : vector<1x8x8x128xbf16> to vector<8x8x128xbf16>
    %226 = vector.shape_cast %225 : vector<8x8x128xbf16> to vector<64x128xbf16>
    %c896_231 = arith.constant 896 : index
    %c0_232 = arith.constant 0 : index
    %227 = vector.load %arg3[%c896_231, %c0_232] : memref<1152x128xbf16, #tpu.memory_space<vmem>>, vector<128x128xbf16>
    %cst_233 = arith.constant dense<0.000000e+00> : vector<64x128xf32>
    %228 = tpu.matmul %226, %227, %cst_233 {dimension_numbers = #tpu.dot_dimension_numbers<[1], [0], [0], [1], [0, 0, 1, 1], [], []>} : vector<64x128xbf16>, vector<128x128xbf16>, vector<64x128xf32> -> vector<64x128xf32>
    %229 = arith.addf %223, %228 : vector<64x128xf32>
    %c2_234 = arith.constant 2 : index
    %c1_235 = arith.constant 1 : index
    %c1_236 = arith.constant 1 : index
    %c0_237 = arith.constant 0 : index
    %230 = vector.load %arg9[%c2_234, %c1_235, %c1_236, %c0_237] : memref<4x9x9x128xbf16, #tpu.memory_space<vmem>>, vector<1x8x8x128xbf16>
    %231 = vector.shape_cast %230 : vector<1x8x8x128xbf16> to vector<8x8x128xbf16>
    %232 = vector.shape_cast %231 : vector<8x8x128xbf16> to vector<64x128xbf16>
    %c1024_238 = arith.constant 1024 : index
    %c0_239 = arith.constant 0 : index
    %233 = vector.load %arg3[%c1024_238, %c0_239] : memref<1152x128xbf16, #tpu.memory_space<vmem>>, vector<128x128xbf16>
    %cst_240 = arith.constant dense<0.000000e+00> : vector<64x128xf32>
    %234 = tpu.matmul %232, %233, %cst_240 {dimension_numbers = #tpu.dot_dimension_numbers<[1], [0], [0], [1], [0, 0, 1, 1], [], []>} : vector<64x128xbf16>, vector<128x128xbf16>, vector<64x128xf32> -> vector<64x128xf32>
    %235 = arith.addf %229, %234 : vector<64x128xf32>
    %c3_241 = arith.constant 3 : index
    %c0_242 = arith.constant 0 : index
    %c0_243 = arith.constant 0 : index
    %c0_244 = arith.constant 0 : index
    %236 = vector.load %arg9[%c3_241, %c0_242, %c0_243, %c0_244] : memref<4x9x9x128xbf16, #tpu.memory_space<vmem>>, vector<1x8x8x128xbf16>
    %237 = vector.shape_cast %236 : vector<1x8x8x128xbf16> to vector<8x8x128xbf16>
    %238 = vector.shape_cast %237 : vector<8x8x128xbf16> to vector<64x128xbf16>
    %c0_245 = arith.constant 0 : index
    %c0_246 = arith.constant 0 : index
    %239 = vector.load %arg3[%c0_245, %c0_246] : memref<1152x128xbf16, #tpu.memory_space<vmem>>, vector<128x128xbf16>
    %cst_247 = arith.constant dense<0.000000e+00> : vector<64x128xf32>
    %240 = tpu.matmul %238, %239, %cst_247 {dimension_numbers = #tpu.dot_dimension_numbers<[1], [0], [0], [1], [0, 0, 1, 1], [], []>} : vector<64x128xbf16>, vector<128x128xbf16>, vector<64x128xf32> -> vector<64x128xf32>
    %c2_248 = arith.constant 2 : index
    %c0_249 = arith.constant 0 : index
    %c1_250 = arith.constant 1 : index
    %c0_251 = arith.constant 0 : index
    %241 = vector.load %arg9[%c2_248, %c0_249, %c1_250, %c0_251] : memref<4x9x9x128xbf16, #tpu.memory_space<vmem>>, vector<1x8x8x128xbf16>
    %242 = vector.shape_cast %241 : vector<1x8x8x128xbf16> to vector<8x8x128xbf16>
    %243 = vector.shape_cast %242 : vector<8x8x128xbf16> to vector<64x128xbf16>
    %c128_252 = arith.constant 128 : index
    %c0_253 = arith.constant 0 : index
    %244 = vector.load %arg3[%c128_252, %c0_253] : memref<1152x128xbf16, #tpu.memory_space<vmem>>, vector<128x128xbf16>
    %cst_254 = arith.constant dense<0.000000e+00> : vector<64x128xf32>
    %245 = tpu.matmul %243, %244, %cst_254 {dimension_numbers = #tpu.dot_dimension_numbers<[1], [0], [0], [1], [0, 0, 1, 1], [], []>} : vector<64x128xbf16>, vector<128x128xbf16>, vector<64x128xf32> -> vector<64x128xf32>
    %246 = arith.addf %240, %245 : vector<64x128xf32>
    %c3_255 = arith.constant 3 : index
    %c0_256 = arith.constant 0 : index
    %c1_257 = arith.constant 1 : index
    %c0_258 = arith.constant 0 : index
    %247 = vector.load %arg9[%c3_255, %c0_256, %c1_257, %c0_258] : memref<4x9x9x128xbf16, #tpu.memory_space<vmem>>, vector<1x8x8x128xbf16>
    %248 = vector.shape_cast %247 : vector<1x8x8x128xbf16> to vector<8x8x128xbf16>
    %249 = vector.shape_cast %248 : vector<8x8x128xbf16> to vector<64x128xbf16>
    %c256_259 = arith.constant 256 : index
    %c0_260 = arith.constant 0 : index
    %250 = vector.load %arg3[%c256_259, %c0_260] : memref<1152x128xbf16, #tpu.memory_space<vmem>>, vector<128x128xbf16>
    %cst_261 = arith.constant dense<0.000000e+00> : vector<64x128xf32>
    %251 = tpu.matmul %249, %250, %cst_261 {dimension_numbers = #tpu.dot_dimension_numbers<[1], [0], [0], [1], [0, 0, 1, 1], [], []>} : vector<64x128xbf16>, vector<128x128xbf16>, vector<64x128xf32> -> vector<64x128xf32>
    %252 = arith.addf %246, %251 : vector<64x128xf32>
    %c1_262 = arith.constant 1 : index
    %c1_263 = arith.constant 1 : index
    %c0_264 = arith.constant 0 : index
    %c0_265 = arith.constant 0 : index
    %253 = vector.load %arg9[%c1_262, %c1_263, %c0_264, %c0_265] : memref<4x9x9x128xbf16, #tpu.memory_space<vmem>>, vector<1x8x8x128xbf16>
    %254 = vector.shape_cast %253 : vector<1x8x8x128xbf16> to vector<8x8x128xbf16>
    %255 = vector.shape_cast %254 : vector<8x8x128xbf16> to vector<64x128xbf16>
    %c384_266 = arith.constant 384 : index
    %c0_267 = arith.constant 0 : index
    %256 = vector.load %arg3[%c384_266, %c0_267] : memref<1152x128xbf16, #tpu.memory_space<vmem>>, vector<128x128xbf16>
    %cst_268 = arith.constant dense<0.000000e+00> : vector<64x128xf32>
    %257 = tpu.matmul %255, %256, %cst_268 {dimension_numbers = #tpu.dot_dimension_numbers<[1], [0], [0], [1], [0, 0, 1, 1], [], []>} : vector<64x128xbf16>, vector<128x128xbf16>, vector<64x128xf32> -> vector<64x128xf32>
    %258 = arith.addf %252, %257 : vector<64x128xf32>
    %c0_269 = arith.constant 0 : index
    %c1_270 = arith.constant 1 : index
    %c1_271 = arith.constant 1 : index
    %c0_272 = arith.constant 0 : index
    %259 = vector.load %arg9[%c0_269, %c1_270, %c1_271, %c0_272] : memref<4x9x9x128xbf16, #tpu.memory_space<vmem>>, vector<1x8x8x128xbf16>
    %260 = vector.shape_cast %259 : vector<1x8x8x128xbf16> to vector<8x8x128xbf16>
    %261 = vector.shape_cast %260 : vector<8x8x128xbf16> to vector<64x128xbf16>
    %c512_273 = arith.constant 512 : index
    %c0_274 = arith.constant 0 : index
    %262 = vector.load %arg3[%c512_273, %c0_274] : memref<1152x128xbf16, #tpu.memory_space<vmem>>, vector<128x128xbf16>
    %cst_275 = arith.constant dense<0.000000e+00> : vector<64x128xf32>
    %263 = tpu.matmul %261, %262, %cst_275 {dimension_numbers = #tpu.dot_dimension_numbers<[1], [0], [0], [1], [0, 0, 1, 1], [], []>} : vector<64x128xbf16>, vector<128x128xbf16>, vector<64x128xf32> -> vector<64x128xf32>
    %264 = arith.addf %258, %263 : vector<64x128xf32>
    %c1_276 = arith.constant 1 : index
    %c1_277 = arith.constant 1 : index
    %c1_278 = arith.constant 1 : index
    %c0_279 = arith.constant 0 : index
    %265 = vector.load %arg9[%c1_276, %c1_277, %c1_278, %c0_279] : memref<4x9x9x128xbf16, #tpu.memory_space<vmem>>, vector<1x8x8x128xbf16>
    %266 = vector.shape_cast %265 : vector<1x8x8x128xbf16> to vector<8x8x128xbf16>
    %267 = vector.shape_cast %266 : vector<8x8x128xbf16> to vector<64x128xbf16>
    %c640_280 = arith.constant 640 : index
    %c0_281 = arith.constant 0 : index
    %268 = vector.load %arg3[%c640_280, %c0_281] : memref<1152x128xbf16, #tpu.memory_space<vmem>>, vector<128x128xbf16>
    %cst_282 = arith.constant dense<0.000000e+00> : vector<64x128xf32>
    %269 = tpu.matmul %267, %268, %cst_282 {dimension_numbers = #tpu.dot_dimension_numbers<[1], [0], [0], [1], [0, 0, 1, 1], [], []>} : vector<64x128xbf16>, vector<128x128xbf16>, vector<64x128xf32> -> vector<64x128xf32>
    %270 = arith.addf %264, %269 : vector<64x128xf32>
    %c3_283 = arith.constant 3 : index
    %c1_284 = arith.constant 1 : index
    %c0_285 = arith.constant 0 : index
    %c0_286 = arith.constant 0 : index
    %271 = vector.load %arg9[%c3_283, %c1_284, %c0_285, %c0_286] : memref<4x9x9x128xbf16, #tpu.memory_space<vmem>>, vector<1x8x8x128xbf16>
    %272 = vector.shape_cast %271 : vector<1x8x8x128xbf16> to vector<8x8x128xbf16>
    %273 = vector.shape_cast %272 : vector<8x8x128xbf16> to vector<64x128xbf16>
    %c768_287 = arith.constant 768 : index
    %c0_288 = arith.constant 0 : index
    %274 = vector.load %arg3[%c768_287, %c0_288] : memref<1152x128xbf16, #tpu.memory_space<vmem>>, vector<128x128xbf16>
    %cst_289 = arith.constant dense<0.000000e+00> : vector<64x128xf32>
    %275 = tpu.matmul %273, %274, %cst_289 {dimension_numbers = #tpu.dot_dimension_numbers<[1], [0], [0], [1], [0, 0, 1, 1], [], []>} : vector<64x128xbf16>, vector<128x128xbf16>, vector<64x128xf32> -> vector<64x128xf32>
    %276 = arith.addf %270, %275 : vector<64x128xf32>
    %c2_290 = arith.constant 2 : index
    %c1_291 = arith.constant 1 : index
    %c1_292 = arith.constant 1 : index
    %c0_293 = arith.constant 0 : index
    %277 = vector.load %arg9[%c2_290, %c1_291, %c1_292, %c0_293] : memref<4x9x9x128xbf16, #tpu.memory_space<vmem>>, vector<1x8x8x128xbf16>
    %278 = vector.shape_cast %277 : vector<1x8x8x128xbf16> to vector<8x8x128xbf16>
    %279 = vector.shape_cast %278 : vector<8x8x128xbf16> to vector<64x128xbf16>
    %c896_294 = arith.constant 896 : index
    %c0_295 = arith.constant 0 : index
    %280 = vector.load %arg3[%c896_294, %c0_295] : memref<1152x128xbf16, #tpu.memory_space<vmem>>, vector<128x128xbf16>
    %cst_296 = arith.constant dense<0.000000e+00> : vector<64x128xf32>
    %281 = tpu.matmul %279, %280, %cst_296 {dimension_numbers = #tpu.dot_dimension_numbers<[1], [0], [0], [1], [0, 0, 1, 1], [], []>} : vector<64x128xbf16>, vector<128x128xbf16>, vector<64x128xf32> -> vector<64x128xf32>
    %282 = arith.addf %276, %281 : vector<64x128xf32>
    %c3_297 = arith.constant 3 : index
    %c1_298 = arith.constant 1 : index
    %c1_299 = arith.constant 1 : index
    %c0_300 = arith.constant 0 : index
    %283 = vector.load %arg9[%c3_297, %c1_298, %c1_299, %c0_300] : memref<4x9x9x128xbf16, #tpu.memory_space<vmem>>, vector<1x8x8x128xbf16>
    %284 = vector.shape_cast %283 : vector<1x8x8x128xbf16> to vector<8x8x128xbf16>
    %285 = vector.shape_cast %284 : vector<8x8x128xbf16> to vector<64x128xbf16>
    %c1024_301 = arith.constant 1024 : index
    %c0_302 = arith.constant 0 : index
    %286 = vector.load %arg3[%c1024_301, %c0_302] : memref<1152x128xbf16, #tpu.memory_space<vmem>>, vector<128x128xbf16>
    %cst_303 = arith.constant dense<0.000000e+00> : vector<64x128xf32>
    %287 = tpu.matmul %285, %286, %cst_303 {dimension_numbers = #tpu.dot_dimension_numbers<[1], [0], [0], [1], [0, 0, 1, 1], [], []>} : vector<64x128xbf16>, vector<128x128xbf16>, vector<64x128xf32> -> vector<64x128xf32>
    %288 = arith.addf %282, %287 : vector<64x128xf32>
    %289 = tpu.concatenate %129, %182, %235, %288 in 0 : vector<64x128xf32>, vector<64x128xf32>, vector<64x128xf32>, vector<64x128xf32> -> vector<256x128xf32>
    %cst_304 = arith.constant dense<0.000000e+00> : vector<128xf32>
    %290 = vector.multi_reduction <add>, %289, %cst_304 [0] : vector<256x128xf32> to vector<128xf32>
    %291 = vector.shape_cast %290 : vector<128xf32> to vector<1x128xf32>
    %292 = arith.mulf %289, %289 : vector<256x128xf32>
    %cst_305 = arith.constant dense<0.000000e+00> : vector<128xf32>
    %293 = vector.multi_reduction <add>, %292, %cst_305 [0] : vector<256x128xf32> to vector<128xf32>
    %294 = vector.shape_cast %293 : vector<128xf32> to vector<1x128xf32>
    %cst_306 = arith.constant 3.906250e-03 : f32
    %295 = vector.broadcast %cst_306 : f32 to vector<1x128xf32>
    %296 = arith.mulf %291, %295 : vector<1x128xf32>
    %cst_307 = arith.constant 3.906250e-03 : f32
    %297 = vector.broadcast %cst_307 : f32 to vector<1x128xf32>
    %298 = arith.mulf %294, %297 : vector<1x128xf32>
    %299 = arith.mulf %296, %296 : vector<1x128xf32>
    %300 = arith.subf %298, %299 : vector<1x128xf32>
    %301 = vector.broadcast %296 : vector<1x128xf32> to vector<256x128xf32>
    %302 = arith.subf %289, %301 : vector<256x128xf32>
    %cst_308 = arith.constant 9.99999974E-6 : f32
    %303 = vector.broadcast %cst_308 : f32 to vector<1x128xf32>
    %304 = arith.addf %300, %303 : vector<1x128xf32>
    %305 = math.rsqrt %304 : vector<1x128xf32>
    %306 = vector.broadcast %305 : vector<1x128xf32> to vector<256x128xf32>
    %307 = arith.mulf %302, %306 : vector<256x128xf32>
    %cst_309 = arith.constant 0.000000e+00 : f32
    %308 = vector.broadcast %cst_309 : f32 to vector<256x128xf32>
    %309 = arith.maximumf %307, %308 : vector<256x128xf32>
    %c0_310 = arith.constant 0 : index
    %c0_311 = arith.constant 0 : index
    %310 = vector.load %arg10[%c0_310, %c0_311] : memref<256x128xf32, #tpu.memory_space<vmem>>, vector<256x128xf32>
    %311 = arith.addf %309, %310 : vector<256x128xf32>
    %c0_312 = arith.constant 0 : index
    %c0_313 = arith.constant 0 : index
    %c0_314 = arith.constant 0 : index
    %312 = vector.load %arg7[%c0_312, %c0_313, %c0_314] : memref<1x256x128xf32, #tpu.memory_space<vmem>>, vector<1x256x128xf32>
    %313 = vector.shape_cast %312 : vector<1x256x128xf32> to vector<256x128xf32>
    %314 = vector.shape_cast %311 : vector<256x128xf32> to vector<1x256x128xf32>
    tpu.vector_store %arg7[%c0_312, %c0_313, %c0_314], %314 {strides = array<i32>} : memref<1x256x128xf32, #tpu.memory_space<vmem>>, vector<1x256x128xf32>,
    %315 = arith.truncf %311 : vector<256x128xf32> to vector<256x128xbf16>
    %316 = vector.extract_strided_slice %315 {offsets = [0, 0], sizes = [64, 128], strides = [1, 1]} : vector<256x128xbf16> to vector<64x128xbf16>
    %317 = vector.shape_cast %316 : vector<64x128xbf16> to vector<8x8x128xbf16>
    %c3_315 = arith.constant 3 : index
    %c0_316 = arith.constant 0 : index
    %c0_317 = arith.constant 0 : index
    %c0_318 = arith.constant 0 : index
    %318 = vector.load %arg9[%c3_315, %c0_316, %c0_317, %c0_318] : memref<4x9x9x128xbf16, #tpu.memory_space<vmem>>, vector<1x8x8x128xbf16>
    %319 = vector.shape_cast %318 : vector<1x8x8x128xbf16> to vector<8x8x128xbf16>
    %320 = vector.shape_cast %317 : vector<8x8x128xbf16> to vector<1x8x8x128xbf16>
    tpu.vector_store %arg9[%c3_315, %c0_316, %c0_317, %c0_318], %320 {strides = array<i32>} : memref<4x9x9x128xbf16, #tpu.memory_space<vmem>>, vector<1x8x8x128xbf16>,
    %321 = vector.extract_strided_slice %315 {offsets = [64, 0], sizes = [64, 128], strides = [1, 1]} : vector<256x128xbf16> to vector<64x128xbf16>
    %322 = vector.shape_cast %321 : vector<64x128xbf16> to vector<8x8x128xbf16>
    %c2_319 = arith.constant 2 : index
    %c0_320 = arith.constant 0 : index
    %c1_321 = arith.constant 1 : index
    %c0_322 = arith.constant 0 : index
    %323 = vector.load %arg9[%c2_319, %c0_320, %c1_321, %c0_322] : memref<4x9x9x128xbf16, #tpu.memory_space<vmem>>, vector<1x8x8x128xbf16>
    %324 = vector.shape_cast %323 : vector<1x8x8x128xbf16> to vector<8x8x128xbf16>
    %325 = vector.shape_cast %322 : vector<8x8x128xbf16> to vector<1x8x8x128xbf16>
    tpu.vector_store %arg9[%c2_319, %c0_320, %c1_321, %c0_322], %325 {strides = array<i32>} : memref<4x9x9x128xbf16, #tpu.memory_space<vmem>>, vector<1x8x8x128xbf16>,
    %326 = vector.extract_strided_slice %315 {offsets = [128, 0], sizes = [64, 128], strides = [1, 1]} : vector<256x128xbf16> to vector<64x128xbf16>
    %327 = vector.shape_cast %326 : vector<64x128xbf16> to vector<8x8x128xbf16>
    %c1_323 = arith.constant 1 : index
    %c1_324 = arith.constant 1 : index
    %c0_325 = arith.constant 0 : index
    %c0_326 = arith.constant 0 : index
    %328 = vector.load %arg9[%c1_323, %c1_324, %c0_325, %c0_326] : memref<4x9x9x128xbf16, #tpu.memory_space<vmem>>, vector<1x8x8x128xbf16>
    %329 = vector.shape_cast %328 : vector<1x8x8x128xbf16> to vector<8x8x128xbf16>
    %330 = vector.shape_cast %327 : vector<8x8x128xbf16> to vector<1x8x8x128xbf16>
    tpu.vector_store %arg9[%c1_323, %c1_324, %c0_325, %c0_326], %330 {strides = array<i32>} : memref<4x9x9x128xbf16, #tpu.memory_space<vmem>>, vector<1x8x8x128xbf16>,
    %331 = vector.extract_strided_slice %315 {offsets = [192, 0], sizes = [64, 128], strides = [1, 1]} : vector<256x128xbf16> to vector<64x128xbf16>
    %332 = vector.shape_cast %331 : vector<64x128xbf16> to vector<8x8x128xbf16>
    %c0_327 = arith.constant 0 : index
    %c1_328 = arith.constant 1 : index
    %c1_329 = arith.constant 1 : index
    %c0_330 = arith.constant 0 : index
    %333 = vector.load %arg9[%c0_327, %c1_328, %c1_329, %c0_330] : memref<4x9x9x128xbf16, #tpu.memory_space<vmem>>, vector<1x8x8x128xbf16>
    %334 = vector.shape_cast %333 : vector<1x8x8x128xbf16> to vector<8x8x128xbf16>
    %335 = vector.shape_cast %332 : vector<8x8x128xbf16> to vector<1x8x8x128xbf16>
    tpu.vector_store %arg9[%c0_327, %c1_328, %c1_329, %c0_330], %335 {strides = array<i32>} : memref<4x9x9x128xbf16, #tpu.memory_space<vmem>>, vector<1x8x8x128xbf16>,
    %c0_331 = arith.constant 0 : index
    %c0_332 = arith.constant 0 : index
    %c0_333 = arith.constant 0 : index
    %c0_334 = arith.constant 0 : index
    %336 = vector.load %arg9[%c0_331, %c0_332, %c0_333, %c0_334] : memref<4x9x9x128xbf16, #tpu.memory_space<vmem>>, vector<1x8x8x128xbf16>
    %337 = vector.shape_cast %336 : vector<1x8x8x128xbf16> to vector<8x8x128xbf16>
    %338 = vector.shape_cast %337 : vector<8x8x128xbf16> to vector<64x128xbf16>
    %c0_335 = arith.constant 0 : index
    %c0_336 = arith.constant 0 : index
    %339 = vector.load %arg4[%c0_335, %c0_336] : memref<2048x128xbf16, #tpu.memory_space<vmem>>, vector<128x128xbf16>
    %cst_337 = arith.constant dense<0.000000e+00> : vector<64x128xf32>
    %340 = tpu.matmul %338, %339, %cst_337 {dimension_numbers = #tpu.dot_dimension_numbers<[1], [0], [0], [1], [0, 0, 1, 1], [], []>} : vector<64x128xbf16>, vector<128x128xbf16>, vector<64x128xf32> -> vector<64x128xf32>
    %c1_338 = arith.constant 1 : index
    %c0_339 = arith.constant 0 : index
    %c0_340 = arith.constant 0 : index
    %c0_341 = arith.constant 0 : index
    %341 = vector.load %arg9[%c1_338, %c0_339, %c0_340, %c0_341] : memref<4x9x9x128xbf16, #tpu.memory_space<vmem>>, vector<1x8x8x128xbf16>
    %342 = vector.shape_cast %341 : vector<1x8x8x128xbf16> to vector<8x8x128xbf16>
    %343 = vector.shape_cast %342 : vector<8x8x128xbf16> to vector<64x128xbf16>
    %c128_342 = arith.constant 128 : index
    %c0_343 = arith.constant 0 : index
    %344 = vector.load %arg4[%c128_342, %c0_343] : memref<2048x128xbf16, #tpu.memory_space<vmem>>, vector<128x128xbf16>
    %cst_344 = arith.constant dense<0.000000e+00> : vector<64x128xf32>
    %345 = tpu.matmul %343, %344, %cst_344 {dimension_numbers = #tpu.dot_dimension_numbers<[1], [0], [0], [1], [0, 0, 1, 1], [], []>} : vector<64x128xbf16>, vector<128x128xbf16>, vector<64x128xf32> -> vector<64x128xf32>
    %346 = arith.addf %340, %345 : vector<64x128xf32>
    %c0_345 = arith.constant 0 : index
    %c0_346 = arith.constant 0 : index
    %c1_347 = arith.constant 1 : index
    %c0_348 = arith.constant 0 : index
    %347 = vector.load %arg9[%c0_345, %c0_346, %c1_347, %c0_348] : memref<4x9x9x128xbf16, #tpu.memory_space<vmem>>, vector<1x8x8x128xbf16>
    %348 = vector.shape_cast %347 : vector<1x8x8x128xbf16> to vector<8x8x128xbf16>
    %349 = vector.shape_cast %348 : vector<8x8x128xbf16> to vector<64x128xbf16>
    %c256_349 = arith.constant 256 : index
    %c0_350 = arith.constant 0 : index
    %350 = vector.load %arg4[%c256_349, %c0_350] : memref<2048x128xbf16, #tpu.memory_space<vmem>>, vector<128x128xbf16>
    %cst_351 = arith.constant dense<0.000000e+00> : vector<64x128xf32>
    %351 = tpu.matmul %349, %350, %cst_351 {dimension_numbers = #tpu.dot_dimension_numbers<[1], [0], [0], [1], [0, 0, 1, 1], [], []>} : vector<64x128xbf16>, vector<128x128xbf16>, vector<64x128xf32> -> vector<64x128xf32>
    %352 = arith.addf %346, %351 : vector<64x128xf32>
    %c1_352 = arith.constant 1 : index
    %c0_353 = arith.constant 0 : index
    %c1_354 = arith.constant 1 : index
    %c0_355 = arith.constant 0 : index
    %353 = vector.load %arg9[%c1_352, %c0_353, %c1_354, %c0_355] : memref<4x9x9x128xbf16, #tpu.memory_space<vmem>>, vector<1x8x8x128xbf16>
    %354 = vector.shape_cast %353 : vector<1x8x8x128xbf16> to vector<8x8x128xbf16>
    %355 = vector.shape_cast %354 : vector<8x8x128xbf16> to vector<64x128xbf16>
    %c384_356 = arith.constant 384 : index
    %c0_357 = arith.constant 0 : index
    %356 = vector.load %arg4[%c384_356, %c0_357] : memref<2048x128xbf16, #tpu.memory_space<vmem>>, vector<128x128xbf16>
    %cst_358 = arith.constant dense<0.000000e+00> : vector<64x128xf32>
    %357 = tpu.matmul %355, %356, %cst_358 {dimension_numbers = #tpu.dot_dimension_numbers<[1], [0], [0], [1], [0, 0, 1, 1], [], []>} : vector<64x128xbf16>, vector<128x128xbf16>, vector<64x128xf32> -> vector<64x128xf32>
    %358 = arith.addf %352, %357 : vector<64x128xf32>
    %c2_359 = arith.constant 2 : index
    %c0_360 = arith.constant 0 : index
    %c0_361 = arith.constant 0 : index
    %c0_362 = arith.constant 0 : index
    %359 = vector.load %arg9[%c2_359, %c0_360, %c0_361, %c0_362] : memref<4x9x9x128xbf16, #tpu.memory_space<vmem>>, vector<1x8x8x128xbf16>
    %360 = vector.shape_cast %359 : vector<1x8x8x128xbf16> to vector<8x8x128xbf16>
    %361 = vector.shape_cast %360 : vector<8x8x128xbf16> to vector<64x128xbf16>
    %c512_363 = arith.constant 512 : index
    %c0_364 = arith.constant 0 : index
    %362 = vector.load %arg4[%c512_363, %c0_364] : memref<2048x128xbf16, #tpu.memory_space<vmem>>, vector<128x128xbf16>
    %cst_365 = arith.constant dense<0.000000e+00> : vector<64x128xf32>
    %363 = tpu.matmul %361, %362, %cst_365 {dimension_numbers = #tpu.dot_dimension_numbers<[1], [0], [0], [1], [0, 0, 1, 1], [], []>} : vector<64x128xbf16>, vector<128x128xbf16>, vector<64x128xf32> -> vector<64x128xf32>
    %364 = arith.addf %358, %363 : vector<64x128xf32>
    %c3_366 = arith.constant 3 : index
    %c0_367 = arith.constant 0 : index
    %c0_368 = arith.constant 0 : index
    %c0_369 = arith.constant 0 : index
    %365 = vector.load %arg9[%c3_366, %c0_367, %c0_368, %c0_369] : memref<4x9x9x128xbf16, #tpu.memory_space<vmem>>, vector<1x8x8x128xbf16>
    %366 = vector.shape_cast %365 : vector<1x8x8x128xbf16> to vector<8x8x128xbf16>
    %367 = vector.shape_cast %366 : vector<8x8x128xbf16> to vector<64x128xbf16>
    %c640_370 = arith.constant 640 : index
    %c0_371 = arith.constant 0 : index
    %368 = vector.load %arg4[%c640_370, %c0_371] : memref<2048x128xbf16, #tpu.memory_space<vmem>>, vector<128x128xbf16>
    %cst_372 = arith.constant dense<0.000000e+00> : vector<64x128xf32>
    %369 = tpu.matmul %367, %368, %cst_372 {dimension_numbers = #tpu.dot_dimension_numbers<[1], [0], [0], [1], [0, 0, 1, 1], [], []>} : vector<64x128xbf16>, vector<128x128xbf16>, vector<64x128xf32> -> vector<64x128xf32>
    %370 = arith.addf %364, %369 : vector<64x128xf32>
    %c2_373 = arith.constant 2 : index
    %c0_374 = arith.constant 0 : index
    %c1_375 = arith.constant 1 : index
    %c0_376 = arith.constant 0 : index
    %371 = vector.load %arg9[%c2_373, %c0_374, %c1_375, %c0_376] : memref<4x9x9x128xbf16, #tpu.memory_space<vmem>>, vector<1x8x8x128xbf16>
    %372 = vector.shape_cast %371 : vector<1x8x8x128xbf16> to vector<8x8x128xbf16>
    %373 = vector.shape_cast %372 : vector<8x8x128xbf16> to vector<64x128xbf16>
    %c768_377 = arith.constant 768 : index
    %c0_378 = arith.constant 0 : index
    %374 = vector.load %arg4[%c768_377, %c0_378] : memref<2048x128xbf16, #tpu.memory_space<vmem>>, vector<128x128xbf16>
    %cst_379 = arith.constant dense<0.000000e+00> : vector<64x128xf32>
    %375 = tpu.matmul %373, %374, %cst_379 {dimension_numbers = #tpu.dot_dimension_numbers<[1], [0], [0], [1], [0, 0, 1, 1], [], []>} : vector<64x128xbf16>, vector<128x128xbf16>, vector<64x128xf32> -> vector<64x128xf32>
    %376 = arith.addf %370, %375 : vector<64x128xf32>
    %c3_380 = arith.constant 3 : index
    %c0_381 = arith.constant 0 : index
    %c1_382 = arith.constant 1 : index
    %c0_383 = arith.constant 0 : index
    %377 = vector.load %arg9[%c3_380, %c0_381, %c1_382, %c0_383] : memref<4x9x9x128xbf16, #tpu.memory_space<vmem>>, vector<1x8x8x128xbf16>
    %378 = vector.shape_cast %377 : vector<1x8x8x128xbf16> to vector<8x8x128xbf16>
    %379 = vector.shape_cast %378 : vector<8x8x128xbf16> to vector<64x128xbf16>
    %c896_384 = arith.constant 896 : index
    %c0_385 = arith.constant 0 : index
    %380 = vector.load %arg4[%c896_384, %c0_385] : memref<2048x128xbf16, #tpu.memory_space<vmem>>, vector<128x128xbf16>
    %cst_386 = arith.constant dense<0.000000e+00> : vector<64x128xf32>
    %381 = tpu.matmul %379, %380, %cst_386 {dimension_numbers = #tpu.dot_dimension_numbers<[1], [0], [0], [1], [0, 0, 1, 1], [], []>} : vector<64x128xbf16>, vector<128x128xbf16>, vector<64x128xf32> -> vector<64x128xf32>
    %382 = arith.addf %376, %381 : vector<64x128xf32>
    %c0_387 = arith.constant 0 : index
    %c1_388 = arith.constant 1 : index
    %c0_389 = arith.constant 0 : index
    %c0_390 = arith.constant 0 : index
    %383 = vector.load %arg9[%c0_387, %c1_388, %c0_389, %c0_390] : memref<4x9x9x128xbf16, #tpu.memory_space<vmem>>, vector<1x8x8x128xbf16>
    %384 = vector.shape_cast %383 : vector<1x8x8x128xbf16> to vector<8x8x128xbf16>
    %385 = vector.shape_cast %384 : vector<8x8x128xbf16> to vector<64x128xbf16>
    %c1024_391 = arith.constant 1024 : index
    %c0_392 = arith.constant 0 : index
    %386 = vector.load %arg4[%c1024_391, %c0_392] : memref<2048x128xbf16, #tpu.memory_space<vmem>>, vector<128x128xbf16>
    %cst_393 = arith.constant dense<0.000000e+00> : vector<64x128xf32>
    %387 = tpu.matmul %385, %386, %cst_393 {dimension_numbers = #tpu.dot_dimension_numbers<[1], [0], [0], [1], [0, 0, 1, 1], [], []>} : vector<64x128xbf16>, vector<128x128xbf16>, vector<64x128xf32> -> vector<64x128xf32>
    %388 = arith.addf %382, %387 : vector<64x128xf32>
    %c1_394 = arith.constant 1 : index
    %c1_395 = arith.constant 1 : index
    %c0_396 = arith.constant 0 : index
    %c0_397 = arith.constant 0 : index
    %389 = vector.load %arg9[%c1_394, %c1_395, %c0_396, %c0_397] : memref<4x9x9x128xbf16, #tpu.memory_space<vmem>>, vector<1x8x8x128xbf16>
    %390 = vector.shape_cast %389 : vector<1x8x8x128xbf16> to vector<8x8x128xbf16>
    %391 = vector.shape_cast %390 : vector<8x8x128xbf16> to vector<64x128xbf16>
    %c1152 = arith.constant 1152 : index
    %c0_398 = arith.constant 0 : index
    %392 = vector.load %arg4[%c1152, %c0_398] : memref<2048x128xbf16, #tpu.memory_space<vmem>>, vector<128x128xbf16>
    %cst_399 = arith.constant dense<0.000000e+00> : vector<64x128xf32>
    %393 = tpu.matmul %391, %392, %cst_399 {dimension_numbers = #tpu.dot_dimension_numbers<[1], [0], [0], [1], [0, 0, 1, 1], [], []>} : vector<64x128xbf16>, vector<128x128xbf16>, vector<64x128xf32> -> vector<64x128xf32>
    %394 = arith.addf %388, %393 : vector<64x128xf32>
    %c0_400 = arith.constant 0 : index
    %c1_401 = arith.constant 1 : index
    %c1_402 = arith.constant 1 : index
    %c0_403 = arith.constant 0 : index
    %395 = vector.load %arg9[%c0_400, %c1_401, %c1_402, %c0_403] : memref<4x9x9x128xbf16, #tpu.memory_space<vmem>>, vector<1x8x8x128xbf16>
    %396 = vector.shape_cast %395 : vector<1x8x8x128xbf16> to vector<8x8x128xbf16>
    %397 = vector.shape_cast %396 : vector<8x8x128xbf16> to vector<64x128xbf16>
    %c1280 = arith.constant 1280 : index
    %c0_404 = arith.constant 0 : index
    %398 = vector.load %arg4[%c1280, %c0_404] : memref<2048x128xbf16, #tpu.memory_space<vmem>>, vector<128x128xbf16>
    %cst_405 = arith.constant dense<0.000000e+00> : vector<64x128xf32>
    %399 = tpu.matmul %397, %398, %cst_405 {dimension_numbers = #tpu.dot_dimension_numbers<[1], [0], [0], [1], [0, 0, 1, 1], [], []>} : vector<64x128xbf16>, vector<128x128xbf16>, vector<64x128xf32> -> vector<64x128xf32>
    %400 = arith.addf %394, %399 : vector<64x128xf32>
    %c1_406 = arith.constant 1 : index
    %c1_407 = arith.constant 1 : index
    %c1_408 = arith.constant 1 : index
    %c0_409 = arith.constant 0 : index
    %401 = vector.load %arg9[%c1_406, %c1_407, %c1_408, %c0_409] : memref<4x9x9x128xbf16, #tpu.memory_space<vmem>>, vector<1x8x8x128xbf16>
    %402 = vector.shape_cast %401 : vector<1x8x8x128xbf16> to vector<8x8x128xbf16>
    %403 = vector.shape_cast %402 : vector<8x8x128xbf16> to vector<64x128xbf16>
    %c1408 = arith.constant 1408 : index
    %c0_410 = arith.constant 0 : index
    %404 = vector.load %arg4[%c1408, %c0_410] : memref<2048x128xbf16, #tpu.memory_space<vmem>>, vector<128x128xbf16>
    %cst_411 = arith.constant dense<0.000000e+00> : vector<64x128xf32>
    %405 = tpu.matmul %403, %404, %cst_411 {dimension_numbers = #tpu.dot_dimension_numbers<[1], [0], [0], [1], [0, 0, 1, 1], [], []>} : vector<64x128xbf16>, vector<128x128xbf16>, vector<64x128xf32> -> vector<64x128xf32>
    %406 = arith.addf %400, %405 : vector<64x128xf32>
    %c2_412 = arith.constant 2 : index
    %c1_413 = arith.constant 1 : index
    %c0_414 = arith.constant 0 : index
    %c0_415 = arith.constant 0 : index
    %407 = vector.load %arg9[%c2_412, %c1_413, %c0_414, %c0_415] : memref<4x9x9x128xbf16, #tpu.memory_space<vmem>>, vector<1x8x8x128xbf16>
    %408 = vector.shape_cast %407 : vector<1x8x8x128xbf16> to vector<8x8x128xbf16>
    %409 = vector.shape_cast %408 : vector<8x8x128xbf16> to vector<64x128xbf16>
    %c1536 = arith.constant 1536 : index
    %c0_416 = arith.constant 0 : index
    %410 = vector.load %arg4[%c1536, %c0_416] : memref<2048x128xbf16, #tpu.memory_space<vmem>>, vector<128x128xbf16>
    %cst_417 = arith.constant dense<0.000000e+00> : vector<64x128xf32>
    %411 = tpu.matmul %409, %410, %cst_417 {dimension_numbers = #tpu.dot_dimension_numbers<[1], [0], [0], [1], [0, 0, 1, 1], [], []>} : vector<64x128xbf16>, vector<128x128xbf16>, vector<64x128xf32> -> vector<64x128xf32>
    %412 = arith.addf %406, %411 : vector<64x128xf32>
    %c3_418 = arith.constant 3 : index
    %c1_419 = arith.constant 1 : index
    %c0_420 = arith.constant 0 : index
    %c0_421 = arith.constant 0 : index
    %413 = vector.load %arg9[%c3_418, %c1_419, %c0_420, %c0_421] : memref<4x9x9x128xbf16, #tpu.memory_space<vmem>>, vector<1x8x8x128xbf16>
    %414 = vector.shape_cast %413 : vector<1x8x8x128xbf16> to vector<8x8x128xbf16>
    %415 = vector.shape_cast %414 : vector<8x8x128xbf16> to vector<64x128xbf16>
    %c1664 = arith.constant 1664 : index
    %c0_422 = arith.constant 0 : index
    %416 = vector.load %arg4[%c1664, %c0_422] : memref<2048x128xbf16, #tpu.memory_space<vmem>>, vector<128x128xbf16>
    %cst_423 = arith.constant dense<0.000000e+00> : vector<64x128xf32>
    %417 = tpu.matmul %415, %416, %cst_423 {dimension_numbers = #tpu.dot_dimension_numbers<[1], [0], [0], [1], [0, 0, 1, 1], [], []>} : vector<64x128xbf16>, vector<128x128xbf16>, vector<64x128xf32> -> vector<64x128xf32>
    %418 = arith.addf %412, %417 : vector<64x128xf32>
    %c2_424 = arith.constant 2 : index
    %c1_425 = arith.constant 1 : index
    %c1_426 = arith.constant 1 : index
    %c0_427 = arith.constant 0 : index
    %419 = vector.load %arg9[%c2_424, %c1_425, %c1_426, %c0_427] : memref<4x9x9x128xbf16, #tpu.memory_space<vmem>>, vector<1x8x8x128xbf16>
    %420 = vector.shape_cast %419 : vector<1x8x8x128xbf16> to vector<8x8x128xbf16>
    %421 = vector.shape_cast %420 : vector<8x8x128xbf16> to vector<64x128xbf16>
    %c1792 = arith.constant 1792 : index
    %c0_428 = arith.constant 0 : index
    %422 = vector.load %arg4[%c1792, %c0_428] : memref<2048x128xbf16, #tpu.memory_space<vmem>>, vector<128x128xbf16>
    %cst_429 = arith.constant dense<0.000000e+00> : vector<64x128xf32>
    %423 = tpu.matmul %421, %422, %cst_429 {dimension_numbers = #tpu.dot_dimension_numbers<[1], [0], [0], [1], [0, 0, 1, 1], [], []>} : vector<64x128xbf16>, vector<128x128xbf16>, vector<64x128xf32> -> vector<64x128xf32>
    %424 = arith.addf %418, %423 : vector<64x128xf32>
    %c3_430 = arith.constant 3 : index
    %c1_431 = arith.constant 1 : index
    %c1_432 = arith.constant 1 : index
    %c0_433 = arith.constant 0 : index
    %425 = vector.load %arg9[%c3_430, %c1_431, %c1_432, %c0_433] : memref<4x9x9x128xbf16, #tpu.memory_space<vmem>>, vector<1x8x8x128xbf16>
    %426 = vector.shape_cast %425 : vector<1x8x8x128xbf16> to vector<8x8x128xbf16>
    %427 = vector.shape_cast %426 : vector<8x8x128xbf16> to vector<64x128xbf16>
    %c1920 = arith.constant 1920 : index
    %c0_434 = arith.constant 0 : index
    %428 = vector.load %arg4[%c1920, %c0_434] : memref<2048x128xbf16, #tpu.memory_space<vmem>>, vector<128x128xbf16>
    %cst_435 = arith.constant dense<0.000000e+00> : vector<64x128xf32>
    %429 = tpu.matmul %427, %428, %cst_435 {dimension_numbers = #tpu.dot_dimension_numbers<[1], [0], [0], [1], [0, 0, 1, 1], [], []>} : vector<64x128xbf16>, vector<128x128xbf16>, vector<64x128xf32> -> vector<64x128xf32>
    %430 = arith.addf %424, %429 : vector<64x128xf32>
    %c0_436 = arith.constant 0 : index
    %c0_437 = arith.constant 0 : index
    %431 = vector.load %arg6[%c0_436, %c0_437] : memref<1x128xf32, #tpu.memory_space<vmem>>, vector<1x128xf32>
    %432 = vector.broadcast %431 : vector<1x128xf32> to vector<64x128xf32>
    %433 = arith.addf %430, %432 : vector<64x128xf32>
    %c0_438 = arith.constant 0 : index
    %c0_439 = arith.constant 0 : index
    %c0_440 = arith.constant 0 : index
    %434 = vector.load %arg8[%c0_438, %c0_439, %c0_440] : memref<1x64x128xf32, #tpu.memory_space<vmem>>, vector<1x64x128xf32>
    %435 = vector.shape_cast %434 : vector<1x64x128xf32> to vector<64x128xf32>
    %436 = vector.shape_cast %433 : vector<64x128xf32> to vector<1x64x128xf32>
    tpu.vector_store %arg8[%c0_438, %c0_439, %c0_440], %436 {strides = array<i32>} : memref<1x64x128xf32, #tpu.memory_space<vmem>>, vector<1x64x128xf32>,
    return
  }
  func.func @transform_0(%arg0: i32) -> (i32, i32, i32) {
    %c0_i32 = arith.constant 0 : i32
    %c0_i32_0 = arith.constant 0 : i32
    %c0_i32_1 = arith.constant 0 : i32
    return %arg0, %c0_i32, %c0_i32_0 : i32, i32, i32
  }
  func.func @transform_1(%arg0: i32) -> (i32, i32) {
    %c0_i32 = arith.constant 0 : i32
    %c0_i32_0 = arith.constant 0 : i32
    %c0_i32_1 = arith.constant 0 : i32
    return %c0_i32, %c0_i32_0 : i32, i32
  }
  func.func @transform_2(%arg0: i32) -> (i32, i32) {
    %c0_i32 = arith.constant 0 : i32
    %c0_i32_0 = arith.constant 0 : i32
    %c0_i32_1 = arith.constant 0 : i32
    return %c0_i32, %c0_i32_0 : i32, i32
  }
  func.func @transform_3(%arg0: i32) -> (i32, i32) {
    %c0_i32 = arith.constant 0 : i32
    %c0_i32_0 = arith.constant 0 : i32
    %c0_i32_1 = arith.constant 0 : i32
    return %c0_i32, %c0_i32_0 : i32, i32
  }
  func.func @transform_4(%arg0: i32) -> (i32, i32) {
    %c0_i32 = arith.constant 0 : i32
    %c0_i32_0 = arith.constant 0 : i32
    %c0_i32_1 = arith.constant 0 : i32
    return %c0_i32, %c0_i32_0 : i32, i32
  }
  func.func @transform_5(%arg0: i32) -> (i32, i32) {
    %c0_i32 = arith.constant 0 : i32
    %c0_i32_0 = arith.constant 0 : i32
    %c0_i32_1 = arith.constant 0 : i32
    return %c0_i32, %c0_i32_0 : i32, i32
  }
  func.func @transform_6(%arg0: i32) -> (i32, i32, i32) {
    %c0_i32 = arith.constant 0 : i32
    %c0_i32_0 = arith.constant 0 : i32
    %c0_i32_1 = arith.constant 0 : i32
    return %arg0, %c0_i32, %c0_i32_0 : i32, i32, i32
  }
  func.func @transform_7(%arg0: i32) -> (i32, i32, i32) {
    %c0_i32 = arith.constant 0 : i32
    %c0_i32_0 = arith.constant 0 : i32
    %c0_i32_1 = arith.constant 0 : i32
    return %arg0, %c0_i32, %c0_i32_0 : i32, i32, i32
  }
}

</mosaic_0001>

<bundles_post_ra>
// kernel: tpu_custom_call.1
= control target key start
LH: loop header
LB: loop body
LE: loop exit
PB: predicated region body
PF: predicated region fallthrough
CT: control target
= control target key end

     0   :  { %13 = vsyncpa [#allocation5], 0  ;;  %s16274_s0 = inlined_call_operand.vmem [shape: bf16[1,256,64], index: 0, kind: input, shape index: {}]   ;;  %s16275_s1 = inlined_call_operand.vmem [shape: bf16[64,256], index: 1, kind: input, shape index: {}]   ;;  %s16276_s2 = inlined_call_operand.hbm [shape: bf16[1152,128], index: 2, kind: input, shape index: {}]   ;;  %s16277_s3 = inlined_call_operand.hbm [shape: bf16[2048,128], index: 3, kind: input, shape index: {}]   ;;  %s16278_s4 = inlined_call_operand.vmem [shape: f32[1,128], index: 4, kind: input, shape index: {}]   ;;  %s16279_s5 = inlined_call_operand.vmem [shape: f32[1,128], index: 5, kind: input, shape index: {}]   ;;  %s16280_s6 = inlined_call_operand.hbm [shape: f32[1,256,128], index: 6, kind: output, shape index: {0}]   ;;  %s16281_s7 = inlined_call_operand.hbm [shape: f32[1,64,128], index: 7, kind: output, shape index: {1}]  }
   0x1   :  { %14 = vsyncpa [#allocation8], 0 }
   0x2   :  { %15 = vsyncpa [#allocation6], 0 }
   0x3   :  { %16 = vsyncpa [#allocation11], 0  ;;  %s13037_s24 = smov [#allocation4]  }
   0x4   :  { %s26_s25 = sshll.u32 %s13037_s24, 4  ;;  %s27_s25 = int_to_ptr.vmem [resolvable:$true] %s26_s25 }
   0x5   :  { %s12957_s26 = scalar_lea.vmem %s27_s25, 9216  ;;  %p12962_p1 = scmp.lt.s32.totalorder %s27_s25, %s27_s25 }
   0x6   :  { %p12958_p0 = scmp.ne.s32.totalorder %s27_s25, %s12957_s26  ;;  %p12963_p2 = scmp.lt.s32.totalorder %s12957_s26, %s12957_s26 }
   0x8   :  { %p12964_p3 = por %p12963_p2, %p12962_p1 }
   0xa   :  { %p12965_p4 = pnand %p12964_p3, %p12958_p0 }
   0xc   :  { %12968 = shalt.err (!%p12965_p4)
}
   0xd   :  { %s13038_s27 = smov 64   ;;  %s13039_s28 = smov 4  }
   0xe   :  { %32 = dma.hbm_to_vmem [thread:$0]  %s16276_s2, 9216, %s27_s25, [#allocation5], %s13038_s27, %s13038_s27, %s13039_s28  }
   0xf   :  { %s13040_s8 = smov [#allocation7]  }
  0x10   :  { %s38_s9 = sshll.u32 %s13040_s8, 4  ;;  %s39_s9 = int_to_ptr.vmem [resolvable:$true] %s38_s9 }
  0x11   :  { %s12977_s10 = scalar_lea.vmem %s39_s9, 16384  ;;  %p12982_p6 = scmp.lt.s32.totalorder %s39_s9, %s39_s9 }
  0x12   :  { %p12978_p5 = scmp.ne.s32.totalorder %s39_s9, %s12977_s10  ;;  %p12983_p7 = scmp.lt.s32.totalorder %s12977_s10, %s12977_s10 }
  0x14   :  { %p12984_p8 = por %p12983_p7, %p12982_p6 }
  0x16   :  { %p12985_p9 = pnand %p12984_p8, %p12978_p5 }
  0x18   :  { %12988 = shalt.err (!%p12985_p9)
}
  0x19   :  { %44 = dma.hbm_to_vmem [thread:$0]  %s16277_s3, 16384, %s39_s9, [#allocation8], %s13038_s27, %s13038_s27, %s13039_s28  }
  0x1a   :  { %13029 = dma.done.wait [#allocation5], 9216  }
  0x1b   :  { %13030 = vsyncadd [#allocation5], 4294958080 }
  0x1c   :  { %13031 = dma.done.wait [#allocation8], 16384  }
  0x1d   :  { %13032 = vsyncadd [#allocation8], 4294950912  ;;  %v13041_v0 = vmov 0   ;;  %v12519_v1 = vld [vmem:[%s16275_s1 + $0x34] ss:$8 sps:$4 sm:$0xff]   ;;  %v12531_v9 = vld [vmem:[%s16274_s0] sm:$0xff]  }
  0x1e   :  { %429 = vmatprep.mubr.bf16.mxu0 %v13041_v0  ;;  %56 = vst [vmem:[#allocation2] sm:$0xf] %v13041_v0  ;;  %64 = vst [vmem:[#allocation2 + $0x48] sm:$0xf] %v13041_v0  ;;  %v12521_v2 = vld [vmem:[%s16275_s1 + $0x30] ss:$8 sps:$4 sm:$0xff]   ;;  %405 = vmatprep.subr.bf16.mxu0 %v12519_v1 }
  0x1f   :  { %69 = vst [vmem:[#allocation2 + $0xd0] sm:$0xf] %v13041_v0  ;;  %74 = vst [vmem:[#allocation2 + $0x118] sm:$0xf] %v13041_v0  ;;  %v12522_v3 = vld [vmem:[%s16275_s1 + $0x24] ss:$8 sps:$4 sm:$0xff]   ;;  %406 = vmatpush1.bf16.msra.mxu0 %v12521_v2 }
  0x20   :  { %v12524_v4 = vld [vmem:[%s16275_s1 + $0x20] ss:$8 sps:$4 sm:$0xff]   ;;  %407 = vmatprep.subr.bf16.mxu0 %v12522_v3  ;;  %v12525_v5 = vld [vmem:[%s16275_s1 + $0x14] ss:$8 sps:$4 sm:$0xff]   ;;  %v12527_v6 = vld [vmem:[%s16275_s1 + $0x10] ss:$8 sps:$4 sm:$0xff]  }
  0x21   :  { %v12528_v7 = vld [vmem:[%s16275_s1 + $0x4] ss:$8 sps:$4 sm:$0xff]   ;;  %v12530_v8 = vld [vmem:[%s16275_s1] ss:$8 sps:$4 sm:$0xff]   ;;  %vm348_vm0 = vcmask 523264   ;;  %v12533_v11 = vld [vmem:[%s16274_s0 + $0x10] sm:$0xff]  }
  0x22   :  { %v12532_v10 = vld [vmem:[%s16274_s0 + $0x8] sm:$0xff]   ;;  %v12534_v12 = vld [vmem:[%s16274_s0 + $0x18] sm:$0xff]   ;;  %v12535_v13 = vld [vmem:[%s16274_s0 + $0x20] sm:$0xff]   ;;  %vm57_vm1 = vcmask 1040384   ;;  %vm58_vm2 = vsmask.f32 256 }
  0x23   :  { %408 = vmatpush1.bf16.msra.mxu0 %v12524_v4  ;;  %v12536_v14 = vld [vmem:[%s16274_s0 + $0x28] sm:$0xff]   ;;  %v12537_v15 = vld [vmem:[%s16274_s0 + $0x30] sm:$0xff]   ;;  %v12538_v16 = vld [vmem:[%s16274_s0 + $0x38] sm:$0xff]   ;;  %v16310_v23 = vmov 0  ;;  %vm1021_vm4 = vcmask 1043456  }
  0x24   :  { %409 = vmatprep.subr.bf16.mxu0 %v12525_v5  ;;  %v12539_v17 = vld [vmem:[%s16274_s0 + $0x40] sm:$0xff]   ;;  %v12540_v18 = vld [vmem:[%s16274_s0 + $0x48] sm:$0xff]   ;;  %v12541_v19 = vld [vmem:[%s16274_s0 + $0x50] sm:$0xff]   ;;  %vm1022_vm5 = vsmask.f32 7938 }
  0x25   :  { %v12542_v20 = vld [vmem:[%s16274_s0 + $0x58] sm:$0xff]   ;;  %v12543_v21 = vld [vmem:[%s16274_s0 + $0x60] sm:$0xff]   ;;  %v106_v22 = vld [vmem:[#allocation2 + $0x90] sm:$0x1]  ;;  %vm1596_vm7 = vsmask.f32 3328 }
  0x26   :  { %vm13185_vm3 = vmand %vm57_vm1, %vm58_vm2  ;;  %v12544_v25 = vld [vmem:[%s16274_s0 + $0x68] sm:$0xff]   ;;  %v109_v26 = vld [vmem:[#allocation2 + $0x98] sm:$0x1]  ;;  %vm1597_vm8 = vsmask.f32 7440 }
  0x27   :  { %410 = vmatpush1.bf16.msra.mxu0 %v12527_v6  ;;  %v16311_v23 = vsel %vm13185_vm3, 4294967295, %v16310_v23  ;;  %v107_v24 = vsel %vm13185_vm3, 0, %v106_v22  ;;  %v110_v27 = vsel %vm13185_vm3, 0, %v109_v26  ;;  %v112_v28 = vld [vmem:[#allocation2 + $0xa0] sm:$0x1]  ;;  %v12545_v31 = vld [vmem:[%s16274_s0 + $0x70] sm:$0xff]   ;;  %vm13616_vm6 = vmand %vm1021_vm4, %vm1022_vm5 }
  0x28   :  { %411 = vmatprep.subr.bf16.mxu0 %v12528_v7  ;;  %16312 = vst [vmem:[#allocation16_spill] sm:$0xff] %v16311_v23  ;;  %108 = vst [vmem:[#allocation2 + $0x90] sm:$0x1] %v107_v24  ;;  %v113_v29 = vsel %vm13185_vm3, 0, %v112_v28  ;;  %v115_v30 = vld [vmem:[#allocation2 + $0xa8] sm:$0x1] }
  0x29   :  { %111 = vst [vmem:[#allocation2 + $0x98] sm:$0x1] %v110_v27  ;;  %114 = vst [vmem:[#allocation2 + $0xa0] sm:$0x1] %v113_v29  ;;  %v116_v32 = vsel %vm13185_vm3, 0, %v115_v30  ;;  %v12546_v36 = vld [vmem:[%s16274_s0 + $0x78] sm:$0xff]  }
  0x2a   :  { %117 = vst [vmem:[#allocation2 + $0xa8] sm:$0x1] %v116_v32  ;;  %v118_v33 = vld [vmem:[#allocation2 + $0xb0] sm:$0x1]  ;;  %v121_v35 = vld [vmem:[#allocation2 + $0xb8] sm:$0x1]  ;;  %vm13819_vm9 = vmor %vm1596_vm7, %vm1597_vm8 }
  0x2b   :  { %412 = vmatpush1.bf16.msra.mxu0 %v12530_v8  ;;  %v119_v34 = vsel %vm13185_vm3, 0, %v118_v33  ;;  %v122_v37 = vsel %vm13185_vm3, 0, %v121_v35  ;;  %v124_v38 = vld [vmem:[#allocation2 + $0xc0] sm:$0x1]  ;;  %v127_v40 = vld [vmem:[#allocation2 + $0xc8] sm:$0x1] }
  0x2c   :  { %120 = vst [vmem:[#allocation2 + $0xb0] sm:$0x1] %v119_v34  ;;  %123 = vst [vmem:[#allocation2 + $0xb8] sm:$0x1] %v122_v37  ;;  %v125_v39 = vsel %vm13185_vm3, 0, %v124_v38  ;;  %v128_v41 = vsel %vm13185_vm3, 0, %v127_v40 }
  0x2d   :  { %126 = vst [vmem:[#allocation2 + $0xc0] sm:$0x1] %v125_v39  ;;  %129 = vst [vmem:[#allocation2 + $0xc8] sm:$0x1] %v128_v41  ;;  %v81_v42 = vld [vmem:[#allocation2 + $0x8] sm:$0x1] }
  0x2e   :  { %10164 = vmatmul.mubr.msk.bf16.vlgmr.msra.gmra.mxu0 %vm348_vm0, %v12531_v9  ;;  %v82_v43 = vsel %vm13185_vm3, 0, %v81_v42  ;;  %v84_v44 = vld [vmem:[#allocation2 + $0x10] sm:$0x1]  ;;  %v87_v46 = vld [vmem:[#allocation2 + $0x18] sm:$0x1]  ;;  %v12551_v32 = vld [vmem:[#allocation4 + $0x68] sm:$0xff]  }
  0x2f   :  { %439 = vmatprep.mubr.bf16.mxu0 %v13041_v0  ;;  %83 = vst [vmem:[#allocation2 + $0x8] sm:$0x1] %v82_v43  ;;  %v85_v45 = vsel %vm13185_vm3, 0, %v84_v44  ;;  %v88_v47 = vsel %vm13185_vm3, 0, %v87_v46  ;;  %v90_v48 = vld [vmem:[#allocation2 + $0x20] sm:$0x1] }
  0x30   :  { %86 = vst [vmem:[#allocation2 + $0x10] sm:$0x1] %v85_v45  ;;  %89 = vst [vmem:[#allocation2 + $0x18] sm:$0x1] %v88_v47  ;;  %v91_v49 = vsel %vm13185_vm3, 0, %v90_v48  ;;  %v12547_v22 = vld [vmem:[#allocation4 + $0x78] sm:$0xff]  }
  0x31   :  { %92 = vst [vmem:[#allocation2 + $0x20] sm:$0x1] %v91_v49  ;;  %v93_v50 = vld [vmem:[#allocation2 + $0x28] sm:$0x1]  ;;  %v96_v52 = vld [vmem:[#allocation2 + $0x30] sm:$0x1]  ;;  %11262 = vmatprep.subr.bf16.mxu1 %v12547_v22 }
  0x32   :  { %v94_v51 = vsel %vm13185_vm3, 0, %v93_v50  ;;  %v97_v53 = vsel %vm13185_vm3, 0, %v96_v52  ;;  %v99_v54 = vld [vmem:[#allocation2 + $0x38] sm:$0x1]  ;;  %v102_v56 = vld [vmem:[#allocation2 + $0x40] sm:$0x1]  ;;  %11263 = vmatpush3.bf16.msra.mxu1 %v12547_v22 }
  0x33   :  { %95 = vst [vmem:[#allocation2 + $0x28] sm:$0x1] %v94_v51  ;;  %98 = vst [vmem:[#allocation2 + $0x30] sm:$0x1] %v97_v53  ;;  %v100_v55 = vsel %vm13185_vm3, 0, %v99_v54  ;;  %v103_v57 = vsel %vm13185_vm3, 0, %v102_v56 }
  0x34   :  { %101 = vst [vmem:[#allocation2 + $0x38] sm:$0x1] %v100_v55  ;;  %104 = vst [vmem:[#allocation2 + $0x40] sm:$0x1] %v103_v57  ;;  %v12548_v24 = vld [vmem:[#allocation4 + $0x138] sm:$0xff]   ;;  %v12549_v27 = vld [vmem:[#allocation4 + $0x70] sm:$0xff]  }
  0x35   :  { %11358 = vmatprep.subr.bf16.mxu0 %v12548_v24  ;;  %v12550_v28 = vld [vmem:[#allocation4 + $0x130] sm:$0xff]   ;;  %11264 = vmatprep.subr.bf16.mxu1 %v12549_v27  ;;  %v12552_v33 = vld [vmem:[#allocation4 + $0x128] sm:$0xff]   ;;  %v12553_v42 = vld [vmem:[#allocation4 + $0x60] sm:$0xff]  }
  0x36   :  { %10165 = vmatmul.mubr.msk.bf16.gmra.mxu0 %vm348_vm0, %v12532_v10  ;;  %11265 = vmatpush3.bf16.msra.mxu1 %v12549_v27  ;;  %v12554_v43 = vld [vmem:[#allocation4 + $0x120] sm:$0xff]   ;;  %v12555_v52 = vld [vmem:[#allocation4 + $0x58] sm:$0xff]  }
  0x37   :  { %449 = vmatprep.mubr.bf16.mxu0 %v13041_v0  ;;  %11359 = vmatpush3.bf16.msra.mxu0 %v12548_v24  ;;  %v12556_v53 = vld [vmem:[#allocation4 + $0x118] sm:$0xff]  }
  0x38   :  { %11360 = vmatprep.subr.bf16.mxu0 %v12550_v28  ;;  %11266 = vmatprep.subr.bf16.mxu1 %v12551_v32 }
  0x3a   :  { %11267 = vmatpush3.bf16.msra.mxu1 %v12551_v32  ;;  %v12558_v32 = vld [vmem:[#allocation4 + $0x110] sm:$0xff]  }
  0x3b   :  { %11361 = vmatpush3.bf16.msra.mxu0 %v12550_v28  ;;  %11268 = vmatprep.subr.bf16.mxu1 %v12553_v42 }
  0x3c   :  { %11362 = vmatprep.subr.bf16.mxu0 %v12552_v33 }
  0x3e   :  { %10166 = vmatmul.mubr.msk.bf16.gmra.mxu0 %vm348_vm0, %v12533_v11  ;;  %11269 = vmatpush3.bf16.msra.mxu1 %v12553_v42 }
  0x3f   :  { %459 = vmatprep.mubr.bf16.mxu0 %v13041_v0  ;;  %11363 = vmatpush3.bf16.msra.mxu0 %v12552_v33 }
  0x40   :  { %11364 = vmatprep.subr.bf16.mxu0 %v12554_v43  ;;  %11270 = vmatprep.subr.bf16.mxu1 %v12555_v52 }
  0x42   :  { %11271 = vmatpush3.bf16.msra.mxu1 %v12555_v52 }
  0x43   :  { %11365 = vmatpush3.bf16.msra.mxu0 %v12554_v43  ;;  %v12559_v43 = vld [vmem:[#allocation4 + $0x48] sm:$0xff]  }
  0x44   :  { %11366 = vmatprep.subr.bf16.mxu0 %v12556_v53 }
  0x46   :  { %10167 = vmatmul.mubr.msk.bf16.gmra.mxu0 %vm348_vm0, %v12534_v12 }
  0x47   :  { %469 = vmatprep.mubr.bf16.mxu0 %v13041_v0  ;;  %11367 = vmatpush3.bf16.msra.mxu0 %v12556_v53 }
  0x48   :  { %11368 = vmatprep.subr.bf16.mxu0 %v12558_v32 }
  0x4b   :  { %11369 = vmatpush3.bf16.msra.mxu0 %v12558_v32  ;;  %v78_v32 = vld [vmem:[#allocation2] sm:$0x1] }
  0x4e   :  { %10168 = vmatmul.mubr.msk.bf16.gmra.mxu0 %vm348_vm0, %v12535_v13 }
  0x4f   :  { %479 = vmatprep.mubr.bf16.mxu0 %v13041_v0 }
  0x56   :  { %10169 = vmatmul.mubr.msk.bf16.gmra.mxu0 %vm348_vm0, %v12536_v14 }
  0x57   :  { %489 = vmatprep.mubr.bf16.mxu0 %v13041_v0 }
  0x5e   :  { %10170 = vmatmul.mubr.msk.bf16.gmra.mxu0 %vm348_vm0, %v12537_v15 }
  0x5f   :  { %499 = vmatprep.mubr.bf16.mxu0 %v13041_v0 }
  0x66   :  { %10171 = vmatmul.mubr.msk.bf16.gmra.mxu0 %vm348_vm0, %v12538_v16 }
  0x67   :  { %509 = vmatprep.mubr.bf16.mxu0 %v13041_v0 }
  0x6e   :  { %10172 = vmatmul.mubr.msk.bf16.gmra.mxu0 %vm348_vm0, %v12539_v17 }
  0x6f   :  { %519 = vmatprep.mubr.bf16.mxu0 %v13041_v0 }
  0x76   :  { %10173 = vmatmul.mubr.msk.bf16.gmra.mxu0 %vm348_vm0, %v12540_v18 }
  0x77   :  { %529 = vmatprep.mubr.bf16.mxu0 %v13041_v0 }
  0x7e   :  { %10174 = vmatmul.mubr.msk.bf16.gmra.mxu0 %vm348_vm0, %v12541_v19 }
  0x7f   :  { %539 = vmatprep.mubr.bf16.mxu0 %v13041_v0 }
  0x86   :  { %10175 = vmatmul.mubr.msk.bf16.gmra.mxu0 %vm348_vm0, %v12542_v20 }
  0x87   :  { %549 = vmatprep.mubr.bf16.mxu0 %v13041_v0 }
  0x8e   :  { %10176 = vmatmul.mubr.msk.bf16.gmra.mxu0 %vm348_vm0, %v12543_v21 }
  0x8f   :  { %559 = vmatprep.mubr.bf16.mxu0 %v13041_v0 }
  0x96   :  { %10177 = vmatmul.mubr.msk.bf16.gmra.mxu0 %vm348_vm0, %v12544_v25 }
  0x97   :  { %569 = vmatprep.mubr.bf16.mxu0 %v13041_v0 }
  0x9e   :  { %10178 = vmatmul.mubr.msk.bf16.gmra.mxu0 %vm348_vm0, %v12545_v31 }
  0x9f   :  { %579 = vmatprep.mubr.bf16.mxu0 %v13041_v0 }
  0xa6   :  { %10179 = vmatmul.mubr.msk.bf16.gmra.mxu0 %vm348_vm0, %v12546_v36 }
  0xee   :  { %v13236_v58 = vpop.f32.mrf.mxu0 }
  0xef   :  { %v698_v35 = vmul.f32 %v13236_v58, %v13236_v58 }
  0xf0   :  { %v13238_v59 = vpop.f32.mrf.mxu0 }
  0xf1   :  { %16313 = vst [vmem:[#allocation17_spill] sm:$0xff] %v13238_v59 }
  0xf2   :  { %v13240_v60 = vpop.f32.mrf.mxu0 }
  0xf3   :  { %v699_v31 = vmul.f32 %v13240_v60, %v13240_v60  ;;  %v661_v36 = vadd.f32 %v13240_v60, %v13236_v58 }
  0xf4   :  { %v13242_v61 = vpop.f32.mrf.mxu0 }
  0xf5   :  { %16314 = vst [vmem:[#allocation18_spill] sm:$0xff] %v13242_v61  ;;  %v730_v39 = vadd.f32 %v699_v31, %v698_v35  ;;  %v12557_v31 = vld [vmem:[#allocation4 + $0x50] sm:$0xff]  }
  0xf6   :  { %v13244_v62 = vpop.f32.mrf.mxu0  ;;  %11272 = vmatprep.subr.bf16.mxu1 %v12557_v31 }
  0xf7   :  { %v700_v37 = vmul.f32 %v13244_v62, %v13244_v62  ;;  %v662_v40 = vadd.f32 %v661_v36, %v13244_v62  ;;  %11273 = vmatpush3.bf16.msra.mxu1 %v12557_v31 }
  0xf8   :  { %v13246_v63 = vpop.f32.mrf.mxu0  ;;  %11274 = vmatprep.subr.bf16.mxu1 %v12559_v43 }
  0xf9   :  { %16315 = vst [vmem:[#allocation19_spill] sm:$0xff] %v13246_v63  ;;  %v731_v45 = vadd.f32 %v730_v39, %v700_v37 }
  0xfa   :  { %v13248_v0 = vpop.f32.mrf.mxu0 }
  0xfb   :  { %v701_v41 = vmul.f32 %v13248_v0, %v13248_v0  ;;  %v663_v46 = vadd.f32 %v662_v40, %v13248_v0  ;;  %11275 = vmatpush3.bf16.msra.mxu1 %v12559_v43  ;;  %v13369_v43 = vld [vmem:[#allocation4 + $0x1b8] sm:$0xff]  }
  0xfc   :  { %v13250_v1 = vpop.f32.mrf.mxu0 }
  0xfd   :  { %16316 = vst [vmem:[#allocation20_spill] sm:$0xff] %v13250_v1  ;;  %v732_v49 = vadd.f32 %v731_v45, %v701_v41  ;;  %v12560_v45 = vld [vmem:[#allocation4 + $0x108] sm:$0xff]  }
  0xfe   :  { %v13252_v2 = vpop.f32.mrf.mxu0  ;;  %11370 = vmatprep.subr.bf16.mxu0 %v12560_v45 }
  0xff   :  { %v702_v47 = vmul.f32 %v13252_v2, %v13252_v2  ;;  %v664_v50 = vadd.f32 %v663_v46, %v13252_v2  ;;  %11371 = vmatpush3.bf16.msra.mxu0 %v12560_v45 }
 0x100   :  { %v13254_v3 = vpop.f32.mrf.mxu0 }
 0x101   :  { %16317 = vst [vmem:[#allocation21_spill] sm:$0xff] %v13254_v3  ;;  %v733_v55 = vadd.f32 %v732_v49, %v702_v47 }
 0x102   :  { %v13256_v4 = vpop.f32.mrf.mxu0 }
 0x103   :  { %v703_v51 = vmul.f32 %v13256_v4, %v13256_v4  ;;  %v665_v56 = vadd.f32 %v664_v50, %v13256_v4 }
 0x104   :  { %v13258_v5 = vpop.f32.mrf.mxu0 }
 0x105   :  { %16318 = vst [vmem:[#allocation22_spill] sm:$0xff] %v13258_v5  ;;  %v734_v24 = vadd.f32 %v733_v55, %v703_v51 }
 0x106   :  { %v13260_v6 = vpop.f32.mrf.mxu0 }
 0x107   :  { %v704_v57 = vmul.f32 %v13260_v6, %v13260_v6  ;;  %v666_v27 = vadd.f32 %v665_v56, %v13260_v6  ;;  %v12561_v56 = vld [vmem:[#allocation4 + $0x40] sm:$0xff]  }
 0x108   :  { %v13262_v7 = vpop.f32.mrf.mxu0  ;;  %11276 = vmatprep.subr.bf16.mxu1 %v12561_v56 }
 0x109   :  { %16319 = vst [vmem:[#allocation23_spill] sm:$0xff] %v13262_v7  ;;  %v735_v35 = vadd.f32 %v734_v24, %v704_v57  ;;  %v12562_v57 = vld [vmem:[#allocation4 + $0x100] sm:$0xff]   ;;  %11277 = vmatpush3.bf16.msra.mxu1 %v12561_v56 }
 0x10a   :  { %v13264_v8 = vpop.f32.mrf.mxu0  ;;  %11372 = vmatprep.subr.bf16.mxu0 %v12562_v57 }
 0x10b   :  { %v705_v28 = vmul.f32 %v13264_v8, %v13264_v8  ;;  %v667_v36 = vadd.f32 %v666_v27, %v13264_v8  ;;  %11373 = vmatpush3.bf16.msra.mxu0 %v12562_v57 }
 0x10c   :  { %v13266_v9 = vpop.f32.mrf.mxu0  ;;  %11406 = vmatprep.subr.bf16.mxu0 %v13369_v43 }
 0x10d   :  { %16320 = vst [vmem:[#allocation24_spill] sm:$0xff] %v13266_v9  ;;  %v736_v40 = vadd.f32 %v735_v35, %v705_v28 }
 0x10e   :  { %v13268_v10 = vpop.f32.mrf.mxu0 }
 0x10f   :  { %v706_v37 = vmul.f32 %v13268_v10, %v13268_v10  ;;  %v668_v41 = vadd.f32 %v667_v36, %v13268_v10  ;;  %v79_v36 = vsel %vm13185_vm3, 0, %v78_v32 }
 0x110   :  { %v13270_v11 = vpop.f32.mrf.mxu0  ;;  %80 = vst [vmem:[#allocation2] sm:$0x1] %v79_v36 }
 0x111   :  { %16321 = vst [vmem:[#allocation25_spill] sm:$0xff] %v13270_v11  ;;  %v737_v47 = vadd.f32 %v736_v40, %v706_v37 }
 0x112   :  { %v13272_v12 = vpop.f32.mrf.mxu0 }
 0x113   :  { %v707_v42 = vmul.f32 %v13272_v12, %v13272_v12  ;;  %v669_v49 = vadd.f32 %v668_v41, %v13272_v12 }
 0x114   :  { %v13274_v13 = vpop.f32.mrf.mxu0 }
 0x115   :  { %16322 = vst [vmem:[#allocation26_spill] sm:$0xff] %v13274_v13  ;;  %v738_v52 = vadd.f32 %v737_v47, %v707_v42  ;;  %v13367_v42 = vld [vmem:[#allocation4 + $0x38] sm:$0xff]   ;;  %v13663_v13 = vld [vmem:[#allocation4 + $0x1b0] sm:$0xff]  }
 0x116   :  { %v13276_v14 = vpop.f32.mrf.mxu0  ;;  %11286 = vmatprep.subr.bf16.mxu1 %v13367_v42 }
 0x117   :  { %v708_v50 = vmul.f32 %v13276_v14, %v13276_v14  ;;  %v670_v53 = vadd.f32 %v669_v49, %v13276_v14 }
 0x118   :  { %v13278_v15 = vpop.f32.mrf.mxu0 }
 0x119   :  { %16323 = vst [vmem:[#allocation27_spill] sm:$0xff] %v13278_v15  ;;  %v739_v27 = vadd.f32 %v738_v52, %v708_v50  ;;  %v167_v15 = vld [vmem:[#allocation2 + $0xec] sm:$0x1] }
 0x11a   :  { %v13280_v16 = vpop.f32.mrf.mxu0 }
 0x11b   :  { %v709_v55 = vmul.f32 %v13280_v16, %v13280_v16  ;;  %v671_v28 = vadd.f32 %v670_v53, %v13280_v16  ;;  %v60_v53 = vld [vmem:[#allocation2 + $0x4] sm:$0x1] }
 0x11c   :  { %v13282_v17 = vpop.f32.mrf.mxu0 }
 0x11d   :  { %16324 = vst [vmem:[#allocation28_spill] sm:$0xff] %v13282_v17  ;;  %v740_v37 = vadd.f32 %v739_v27, %v709_v55  ;;  %v61_v27 = vsel %vm13185_vm3, 0, %v60_v53  ;;  %v164_v17 = vld [vmem:[#allocation2 + $0xe4] sm:$0x1] }
 0x11e   :  { %v13284_v18 = vpop.f32.mrf.mxu0  ;;  %62 = vst [vmem:[#allocation2 + $0x4] sm:$0x1] %v61_v27 }
 0x11f   :  { %v710_v31 = vmul.f32 %v13284_v18, %v13284_v18  ;;  %v672_v40 = vadd.f32 %v671_v28, %v13284_v18 }
 0x120   :  { %v13286_v19 = vpop.f32.mrf.mxu0 }
 0x121   :  { %16325 = vst [vmem:[#allocation29_spill] sm:$0xff] %v13286_v19  ;;  %v741_v47 = vadd.f32 %v740_v37, %v710_v31  ;;  %v161_v19 = vld [vmem:[#allocation2 + $0xdc] sm:$0x1] }
 0x122   :  { %v13288_v20 = vpop.f32.mrf.mxu0 }
 0x123   :  { %v711_v41 = vmul.f32 %v13288_v20, %v13288_v20  ;;  %v673_v49 = vadd.f32 %v672_v40, %v13288_v20 }
 0x124   :  { %v13290_v21 = vpop.f32.mrf.mxu0 }
 0x125   :  { %16326 = vst [vmem:[#allocation30_spill] sm:$0xff] %v13290_v21  ;;  %v742_v55 = vadd.f32 %v741_v47, %v711_v41 }
 0x126   :  { %v13292_v25 = vpop.f32.mrf.mxu0 }
 0x127   :  { %v712_v50 = vmul.f32 %v13292_v25, %v13292_v25  ;;  %v674_v56 = vadd.f32 %v673_v49, %v13292_v25 }
 0x128   :  { %v13294_v26 = vpop.f32.mrf.mxu0 }
 0x129   :  { %16327 = vst [vmem:[#allocation31_spill] sm:$0xff] %v13294_v26  ;;  %v743_v31 = vadd.f32 %v742_v55, %v712_v50 }
 0x12a   :  { %v13296_v29 = vpop.f32.mrf.mxu0 }
 0x12b   :  { %v713_v57 = vmul.f32 %v13296_v29, %v13296_v29  ;;  %v675_v32 = vadd.f32 %v674_v56, %v13296_v29 }
 0x12c   :  { %v13298_v30 = vpop.f32.mrf.mxu0 }
 0x12d   :  { %16328 = vst [vmem:[#allocation32_spill] sm:$0xff] %v13298_v30  ;;  %v744_v40 = vadd.f32 %v743_v31, %v713_v57 }
 0x12e   :  { %v13302_v34 = vpop.f32.mrf.mxu0 }
 0x12f   :  { %v714_v36 = vmul.f32 %v13302_v34, %v13302_v34  ;;  %v676_v41 = vadd.f32 %v675_v32, %v13302_v34 }
 0x130   :  { %v13310_v38 = vpop.f32.mrf.mxu0 }
 0x131   :  { %16329 = vst [vmem:[#allocation33_spill] sm:$0xff] %v13310_v38  ;;  %v745_v53 = vadd.f32 %v744_v40, %v714_v36 }
 0x132   :  { %v13315_v44 = vpop.f32.mrf.mxu0 }
 0x133   :  { %v715_v47 = vmul.f32 %v13315_v44, %v13315_v44 }
 0x134   :  { %v13320_v48 = vpop.f32.mrf.mxu0 }
 0x135   :  { %16330 = vst [vmem:[#allocation34_spill] sm:$0xff] %v13320_v48  ;;  %v746_v56 = vadd.f32 %v745_v53, %v715_v47 }
 0x136   :  { %v13325_v54 = vpop.f32.mrf.mxu0 }
 0x137   :  { %v716_v50 = vmul.f32 %v13325_v54, %v13325_v54 }
 0x138   :  { %v13330_v22 = vpop.f32.mrf.mxu0 }
 0x139   :  { %16331 = vst [vmem:[#allocation35_spill] sm:$0xff] %v13330_v22  ;;  %v747_v32 = vadd.f32 %v746_v56, %v716_v50 }
 0x13a   :  { %v13335_v33 = vpop.f32.mrf.mxu0 }
 0x13b   :  { %v717_v57 = vmul.f32 %v13335_v33, %v13335_v33 }
 0x13c   :  { %v13340_v39 = vpop.f32.mrf.mxu0 }
 0x13d   :  { %16332 = vst [vmem:[#allocation36_spill] sm:$0xff] %v13340_v39 }
 0x13e   :  { %v13345_v46 = vpop.f32.mrf.mxu0 }
 0x13f   :  { %v718_v36 = vmul.f32 %v13345_v46, %v13345_v46 }
 0x140   :  { %v13350_v51 = vpop.f32.mrf.mxu0 }
 0x141   :  { %16333 = vst [vmem:[#allocation37_spill] sm:$0xff] %v13350_v51 }
 0x142   :  { %v13355_v24 = vpop.f32.mrf.mxu0 }
 0x143   :  { %v719_v47 = vmul.f32 %v13355_v24, %v13355_v24 }
 0x144   :  { %v13360_v35 = vpop.f32.mrf.mxu0 }
 0x145   :  { %16334 = vst [vmem:[#allocation38_spill] sm:$0xff] %v13360_v35 }
 0x146   :  { %v13371_v45 = vpop.f32.mrf.mxu0 }
 0x147   :  { %v720_v50 = vmul.f32 %v13371_v45, %v13371_v45 }
 0x148   :  { %v13378_v52 = vpop.f32.mrf.mxu0 }
 0x149   :  { %16335 = vst [vmem:[#allocation39_spill] sm:$0xff] %v13378_v52  ;;  %v677_v52 = vadd.f32 %v676_v41, %v13315_v44  ;;  %v748_v41 = vadd.f32 %v747_v32, %v717_v57 }
 0x14a   :  { %v13385_v28 = vpop.f32.mrf.mxu0 }
 0x14b   :  { %v678_v27 = vadd.f32 %v677_v52, %v13325_v54  ;;  %v749_v53 = vadd.f32 %v748_v41, %v718_v36  ;;  %v721_v57 = vmul.f32 %v13385_v28, %v13385_v28 }
 0x14c   :  { %v13390_v37 = vpop.f32.mrf.mxu0 }
 0x14d   :  { %16336 = vst [vmem:[#allocation40_spill] sm:$0xff] %v13390_v37  ;;  %v679_v37 = vadd.f32 %v678_v27, %v13335_v33  ;;  %v750_v27 = vadd.f32 %v749_v53, %v719_v47 }
 0x14e   :  { %v13395_v49 = vpop.f32.mrf.mxu0 }
 0x14f   :  { %v680_v35 = vadd.f32 %v679_v37, %v13345_v46  ;;  %v751_v32 = vadd.f32 %v750_v27, %v720_v50  ;;  %v722_v36 = vmul.f32 %v13395_v49, %v13395_v49 }
 0x150   :  { %v13400_v55 = vpop.f32.mrf.mxu0 }
 0x151   :  { %16337 = vst [vmem:[#allocation41_spill] sm:$0xff] %v13400_v55  ;;  %v681_v55 = vadd.f32 %v680_v35, %v13355_v24  ;;  %v752_v41 = vadd.f32 %v751_v32, %v721_v57 }
 0x152   :  { %v13405_v31 = vpop.f32.mrf.mxu0 }
 0x153   :  { %v682_v51 = vadd.f32 %v681_v55, %v13371_v45  ;;  %v723_v47 = vmul.f32 %v13405_v31, %v13405_v31  ;;  %v753_v53 = vadd.f32 %v752_v41, %v722_v36 }
 0x154   :  { %v13410_v40 = vpop.f32.mrf.mxu0 }
 0x155   :  { %16338 = vst [vmem:[#allocation42_spill] sm:$0xff] %v13410_v40  ;;  %v683_v40 = vadd.f32 %v682_v51, %v13385_v28  ;;  %v754_v27 = vadd.f32 %v753_v53, %v723_v47 }
 0x156   :  { %v13415_v52 = vpop.f32.mrf.mxu0 }
 0x157   :  { %v684_v39 = vadd.f32 %v683_v40, %v13395_v49  ;;  %v724_v50 = vmul.f32 %v13415_v52, %v13415_v52 }
 0x158   :  { %v13420_v56 = vpop.f32.mrf.mxu0 }
 0x159   :  { %16339 = vst [vmem:[#allocation43_spill] sm:$0xff] %v13420_v56  ;;  %v685_v56 = vadd.f32 %v684_v39, %v13405_v31  ;;  %v755_v32 = vadd.f32 %v754_v27, %v724_v50 }
 0x15a   :  { %v13425_v37 = vpop.f32.mrf.mxu0 }
 0x15b   :  { %v686_v22 = vadd.f32 %v685_v56, %v13415_v52  ;;  %v725_v57 = vmul.f32 %v13425_v37, %v13425_v37 }
 0x15c   :  { %v13430_v35 = vpop.f32.mrf.mxu0 }
 0x15d   :  { %16340 = vst [vmem:[#allocation44_spill] sm:$0xff] %v13430_v35  ;;  %v687_v35 = vadd.f32 %v686_v22, %v13425_v37  ;;  %v756_v41 = vadd.f32 %v755_v32, %v725_v57 }
 0x15e   :  { %v13435_v55 = vpop.f32.mrf.mxu0 }
 0x15f   :  { %v726_v36 = vmul.f32 %v13435_v55, %v13435_v55  ;;  %v688_v48 = vadd.f32 %v687_v35, %v13435_v55 }
 0x160   :  { %v13440_v51 = vpop.f32.mrf.mxu0 }
 0x161   :  { %16341 = vst [vmem:[#allocation45_spill] sm:$0xff] %v13440_v51  ;;  %v757_v53 = vadd.f32 %v756_v41, %v726_v36 }
 0x162   :  { %v13445_v40 = vpop.f32.mrf.mxu0 }
 0x163   :  { %v727_v47 = vmul.f32 %v13445_v40, %v13445_v40  ;;  %v689_v51 = vadd.f32 %v688_v48, %v13445_v40 }
 0x164   :  { %v13450_v39 = vpop.f32.mrf.mxu0 }
 0x165   :  { %16342 = vst [vmem:[#allocation46_spill] sm:$0xff] %v13450_v39  ;;  %v758_v27 = vadd.f32 %v757_v53, %v727_v47  ;;  %v162_v47 = vsel %vm13185_vm3, 0, %v161_v19 }
 0x166   :  { %v13455_v56 = vpop.f32.mrf.mxu0  ;;  %163 = vst [vmem:[#allocation2 + $0xdc] sm:$0x1] %v162_v47  ;;  %v65_v47 = vld [vmem:[#allocation2 + $0x4c] sm:$0x1] }
 0x167   :  { %v728_v50 = vmul.f32 %v13455_v56, %v13455_v56  ;;  %v690_v38 = vadd.f32 %v689_v51, %v13455_v56  ;;  %v165_v51 = vsel %vm13185_vm3, 0, %v164_v17  ;;  %v170_v17 = vld [vmem:[#allocation2 + $0xf4] sm:$0x1] }
 0x168   :  { %v13460_v22 = vpop.f32.mrf.mxu0  ;;  %166 = vst [vmem:[#allocation2 + $0xe4] sm:$0x1] %v165_v51  ;;  %v171_v51 = vsel %vm13185_vm3, 0, %v170_v17 }
 0x169   :  { %16343 = vst [vmem:[#allocation47_spill] sm:$0xff] %v13460_v22  ;;  %v759_v57 = vadd.f32 %v758_v27, %v728_v50  ;;  %172 = vst [vmem:[#allocation2 + $0xf4] sm:$0x1] %v171_v51 }
 0x16a   :  { %v13463_v39 = vpop.f32.mrf.mxu0 }
 0x16b   :  { %v691_v35 = vadd.f32 %v690_v38, %v13463_v39  ;;  %v729_v32 = vmul.f32 %v13463_v39, %v13463_v39 }
 0x16d   :  { %v692_v30 = vrot.slane %v691_v35, 4  ;;  %v760_v36 = vadd.f32 %v759_v57, %v729_v32 }
 0x16f   :  { %v693_v41 = vadd.f32 %v692_v30, %v691_v35  ;;  %v761_v48 = vrot.slane %v760_v36, 4 }
 0x171   :  { %v694_v26 = vrot.slane %v693_v41, 2  ;;  %v762_v21 = vadd.f32 %v761_v48, %v760_v36 }
 0x173   :  { %v695_v53 = vadd.f32 %v694_v26, %v693_v41  ;;  %v763_v50 = vrot.slane %v762_v21, 2  ;;  %v173_v26 = vld [vmem:[#allocation2 + $0xfc] sm:$0x1]  ;;  %v176_v41 = vld [vmem:[#allocation2 + $0x104] sm:$0x1] }
 0x175   :  { %v696_v38 = vrot.slane %v695_v53, 1  ;;  %v764_v27 = vadd.f32 %v763_v50, %v762_v21  ;;  %v168_v21 = vsel %vm13185_vm3, 0, %v167_v15  ;;  %v177_v50 = vsel %vm13185_vm3, 0, %v176_v41 }
 0x176   :  { %169 = vst [vmem:[#allocation2 + $0xec] sm:$0x1] %v168_v21  ;;  %178 = vst [vmem:[#allocation2 + $0x104] sm:$0x1] %v177_v50 }
 0x177   :  { %v697_v22 = vadd.f32 %v696_v38, %v695_v53  ;;  %v765_v57 = vrot.slane %v764_v27, 1  ;;  %v174_v53 = vsel %vm13185_vm3, 0, %v173_v26 }
 0x178   :  { %175 = vst [vmem:[#allocation2 + $0xfc] sm:$0x1] %v174_v53 }
 0x179   :  { %v766_v30 = vadd.f32 %v765_v57, %v764_v27  ;;  %v13472_v35 = vmul.f32 0.00390625, %v697_v22  ;;  %v179_v22 = vld [vmem:[#allocation2 + $0x10c] sm:$0x1]  ;;  %v182_v27 = vld [vmem:[#allocation2 + $0x114] sm:$0x1]  ;;  %v66_v57 = vsel %vm13185_vm3, 0, %v65_v47 }
 0x17a   :  { %v180_v38 = vsel %vm13185_vm3, 0, %v179_v22  ;;  %v183_v15 = vsel %vm13185_vm3, 0, %v182_v27  ;;  %67 = vst [vmem:[#allocation2 + $0x4c] sm:$0x1] %v66_v57 }
 0x17b   :  { %v768_v32 = vmul.f32 0.00390625, %v766_v30  ;;  %v769_v36 = vmul.f32 %v13472_v35, %v13472_v35  ;;  %181 = vst [vmem:[#allocation2 + $0x10c] sm:$0x1] %v180_v38  ;;  %v802_v30 = vsub.f32 %v13463_v39, %v13472_v35  ;;  %184 = vst [vmem:[#allocation2 + $0x114] sm:$0x1] %v183_v15  ;;  %v775_v17 = vsub.f32 %v13252_v2, %v13472_v35 }
 0x17c   :  { %v776_v26 = vsub.f32 %v13256_v4, %v13472_v35  ;;  %v777_v39 = vsub.f32 %v13260_v6, %v13472_v35  ;;  %v782_v2 = vsub.f32 %v13280_v16, %v13472_v35  ;;  %v783_v4 = vsub.f32 %v13284_v18, %v13472_v35 }
 0x17d   :  { %v770_v48 = vsub.f32 %v768_v32, %v769_v36  ;;  %v771_v32 = vsub.f32 %v13236_v58, %v13472_v35  ;;  %v772_v36 = vsub.f32 %v13240_v60, %v13472_v35  ;;  %v778_v58 = vsub.f32 %v13264_v8, %v13472_v35 }
 0x17e   :  { %v779_v60 = vsub.f32 %v13268_v10, %v13472_v35  ;;  %v784_v6 = vsub.f32 %v13288_v20, %v13472_v35  ;;  %v785_v8 = vsub.f32 %v13292_v25, %v13472_v35  ;;  %v786_v10 = vsub.f32 %v13296_v29, %v13472_v35 }
 0x17f   :  { %v803_v19 = vadd.f32 1e-05, %v770_v48  ;;  %v773_v48 = vsub.f32 %v13244_v62, %v13472_v35  ;;  %v780_v62 = vsub.f32 %v13272_v12, %v13472_v35  ;;  %v787_v12 = vsub.f32 %v13302_v34, %v13472_v35 }
 0x180   :  { %v789_v16 = vsub.f32 %v13325_v54, %v13472_v35  ;;  %v790_v18 = vsub.f32 %v13335_v33, %v13472_v35  ;;  %v791_v20 = vsub.f32 %v13345_v46, %v13472_v35  ;;  %v792_v25 = vsub.f32 %v13355_v24, %v13472_v35 }
 0x181   :  { %12811 = vrsqrt.f32 %v803_v19  ;;  %v774_v19 = vsub.f32 %v13248_v0, %v13472_v35  ;;  %v781_v0 = vsub.f32 %v13276_v14, %v13472_v35  ;;  %v788_v14 = vsub.f32 %v13315_v44, %v13472_v35 }
 0x182   :  { %v793_v29 = vsub.f32 %v13371_v45, %v13472_v35  ;;  %v794_v34 = vsub.f32 %v13385_v28, %v13472_v35  ;;  %v795_v44 = vsub.f32 %v13395_v49, %v13472_v35  ;;  %v796_v54 = vsub.f32 %v13405_v31, %v13472_v35 }
 0x183   :  { %v797_v33 = vsub.f32 %v13415_v52, %v13472_v35  ;;  %v798_v24 = vsub.f32 %v13425_v37, %v13472_v35  ;;  %v799_v45 = vsub.f32 %v13435_v55, %v13472_v35  ;;  %v800_v41 = vsub.f32 %v13445_v40, %v13472_v35 }
 0x184   :  { %v801_v28 = vsub.f32 %v13455_v56, %v13472_v35 }
 0x18e   :  { %v12812_v46 = vpop.eup %12811 }
 0x18f   :  { %v836_v49 = vmul.f32 %v12812_v46, %v802_v30  ;;  %v13554_v47 = vmul.f32 %v12812_v46, %v771_v32  ;;  %v13556_v31 = vmul.f32 %v12812_v46, %v772_v36  ;;  %v13558_v21 = vmul.f32 %v12812_v46, %v773_v48 }
 0x190   :  { %v13560_v52 = vmul.f32 %v12812_v46, %v774_v19  ;;  %v13562_v51 = vmul.f32 %v12812_v46, %v775_v17  ;;  %v13564_v37 = vmul.f32 %v12812_v46, %v776_v26  ;;  %v13566_v55 = vmul.f32 %v12812_v46, %v777_v39 }
 0x191   :  { %v868_v22 = vmax.f32 %v836_v49, 0.0  ;;  %v13568_v40 = vmul.f32 %v12812_v46, %v778_v58  ;;  %v13570_v53 = vmul.f32 %v12812_v46, %v779_v60  ;;  %v13572_v56 = vmul.f32 %v12812_v46, %v780_v62 }
 0x192   :  { %v13574_v35 = vmul.f32 %v12812_v46, %v781_v0  ;;  %v13576_v50 = vmul.f32 %v12812_v46, %v782_v2  ;;  %v13578_v38 = vmul.f32 %v12812_v46, %v783_v4  ;;  %v13580_v27 = vmul.f32 %v12812_v46, %v784_v6 }
 0x193   :  { %v10605_v57 = vpack.c.bf16 %v868_v22, %v868_v22  ;;  %v13582_v15 = vmul.f32 %v12812_v46, %v785_v8  ;;  %v13584_v30 = vmul.f32 %v12812_v46, %v786_v10  ;;  %v13586_v32 = vmul.f32 %v12812_v46, %v787_v12  ;;  %v1252_v8 = vld [vmem:[#allocation2 + $0x40] sm:$0xf] }
 0x194   :  { %v13588_v36 = vmul.f32 %v12812_v46, %v788_v14  ;;  %v13590_v48 = vmul.f32 %v12812_v46, %v789_v16  ;;  %v13592_v19 = vmul.f32 %v12812_v46, %v790_v18  ;;  %v13594_v17 = vmul.f32 %v12812_v46, %v791_v20  ;;  %v1255_v18 = vld [vmem:[#allocation2 + $0x44] sm:$0x1] }
 0x195   :  { %v1186_v26 = vshrl.u32 %v10605_v57, 16  ;;  %v1189_v39 = vshll.u32 %v10605_v57, 16  ;;  %v13596_v58 = vmul.f32 %v12812_v46, %v792_v25  ;;  %v13598_v60 = vmul.f32 %v12812_v46, %v793_v29  ;;  %v1036_v57 = vld [vmem:[#allocation2 + $0xa0] sm:$0xf] }
 0x196   :  { %v13600_v62 = vmul.f32 %v12812_v46, %v794_v34  ;;  %v13602_v0 = vmul.f32 %v12812_v46, %v795_v44  ;;  %v13604_v2 = vmul.f32 %v12812_v46, %v796_v54  ;;  %v13606_v4 = vmul.f32 %v12812_v46, %v797_v33 }
 0x197   :  { %v1188_v6 = vrot.slane %v1186_v26, 7  ;;  %v13608_v10 = vmul.f32 %v12812_v46, %v798_v24  ;;  %v13610_v12 = vmul.f32 %v12812_v46, %v799_v45  ;;  %v13612_v14 = vmul.f32 %v12812_v46, %v800_v41 }
 0x198   :  { %v16344_v16 = vmov 0  ;;  %v13620_v20 = vmul.f32 %v12812_v46, %v801_v28  ;;  %v837_v25 = vmax.f32 %v13554_v47, 0.0  ;;  %v838_v29 = vmax.f32 %v13556_v31, 0.0 }
 0x199   :  { %v16345_v16 = vsel %vm13616_vm6, 4294967295, %v16344_v16  ;;  %v839_v34 = vmax.f32 %v13558_v21, 0.0  ;;  %v1191_v44 = vor.u32 %v1189_v39, %v1188_v6  ;;  %v1192_v54 = vrot.slane %v1188_v6, 4 }
 0x19a   :  { %16346 = vst [vmem:[#allocation48_spill] sm:$0xff] %v16345_v16  ;;  %v840_v33 = vmax.f32 %v13560_v52, 0.0  ;;  %v841_v24 = vmax.f32 %v13562_v51, 0.0  ;;  %v842_v45 = vmax.f32 %v13564_v37, 0.0  ;;  %v843_v41 = vmax.f32 %v13566_v55, 0.0 }
 0x19b   :  { %v844_v49 = vmax.f32 %v13568_v40, 0.0  ;;  %v845_v46 = vmax.f32 %v13570_v53, 0.0  ;;  %v1253_v28 = vsel %vm13616_vm6, %v1191_v44, %v1252_v8  ;;  %v1256_v47 = vsel %vm13185_vm3, %v1192_v54, %v1255_v18 }
 0x19c   :  { %v846_v31 = vmax.f32 %v13572_v56, 0.0  ;;  %v847_v21 = vmax.f32 %v13574_v35, 0.0  ;;  %1254 = vst [vmem:[#allocation2 + $0x40] sm:$0xf] %v1253_v28  ;;  %1257 = vst [vmem:[#allocation2 + $0x44] sm:$0x1] %v1256_v47  ;;  %v10574_v44 = vpack.c.bf16 %v837_v25, %v837_v25  ;;  %v10575_v54 = vpack.c.bf16 %v838_v29, %v838_v29 }
 0x19d   :  { %v848_v52 = vmax.f32 %v13576_v50, 0.0  ;;  %v849_v51 = vmax.f32 %v13578_v38, 0.0  ;;  %v850_v37 = vmax.f32 %v13580_v27, 0.0  ;;  %v851_v55 = vmax.f32 %v13582_v15, 0.0  ;;  %v1042_v35 = vld [vmem:[#allocation2 + $0xa8] sm:$0xf] }
 0x19e   :  { %v852_v22 = vmax.f32 %v13584_v30, 0.0  ;;  %v10576_v28 = vpack.c.bf16 %v839_v34, %v839_v34  ;;  %v10577_v47 = vpack.c.bf16 %v840_v33, %v840_v33  ;;  %v10578_v38 = vpack.c.bf16 %v841_v24, %v841_v24  ;;  %913 = vst [vmem:[#allocation2 + $0xd8] sm:$0xf] %v10574_v44  ;;  %914 = vst [vmem:[#allocation2 + $0xe0] sm:$0xf] %v10575_v54 }
 0x19f   :  { %v10579_v27 = vpack.c.bf16 %v842_v45, %v842_v45  ;;  %v10580_v50 = vpack.c.bf16 %v843_v41, %v843_v41  ;;  %v10581_v15 = vpack.c.bf16 %v844_v49, %v844_v49  ;;  %v10582_v26 = vpack.c.bf16 %v845_v46, %v845_v46 }
 0x1a0   :  { %915 = vst [vmem:[#allocation2 + $0xe8] sm:$0xf] %v10576_v28  ;;  %916 = vst [vmem:[#allocation2 + $0xf0] sm:$0xf] %v10577_v47  ;;  %v10583_v39 = vpack.c.bf16 %v846_v31, %v846_v31  ;;  %v10584_v30 = vpack.c.bf16 %v847_v21, %v847_v21  ;;  %v10585_v6 = vpack.c.bf16 %v848_v52, %v848_v52  ;;  %v1024_v28 = vld [vmem:[#allocation2 + $0x90] sm:$0xf] }
 0x1a1   :  { %917 = vst [vmem:[#allocation2 + $0xf8] sm:$0xf] %v10578_v38  ;;  %918 = vst [vmem:[#allocation2 + $0x100] sm:$0xf] %v10579_v27  ;;  %v10586_v25 = vpack.c.bf16 %v849_v51, %v849_v51  ;;  %v10587_v29 = vpack.c.bf16 %v850_v37, %v850_v37  ;;  %v13657_v34 = vpack.c.bf16 %v851_v55, %v851_v55  ;;  %v942_v24 = vshrl.u32 %v10582_v26, 16 }
 0x1a2   :  { %919 = vst [vmem:[#allocation2 + $0x108] sm:$0xf] %v10580_v50  ;;  %920 = vst [vmem:[#allocation2 + $0x110] sm:$0xf] %v10581_v15  ;;  %v13659_v33 = vpack.c.bf16 %v852_v22, %v852_v22  ;;  %v945_v45 = vshll.u32 %v10582_v26, 16  ;;  %v950_v41 = vshrl.u32 %v10583_v39, 16 }
 0x1a3   :  { %v953_v49 = vshll.u32 %v10583_v39, 16  ;;  %v958_v44 = vshrl.u32 %v10584_v30, 16  ;;  %v961_v54 = vshll.u32 %v10584_v30, 16  ;;  %v966_v46 = vshrl.u32 %v10585_v6, 16  ;;  %v1027_v50 = vld [vmem:[#allocation2 + $0x94] sm:$0x1] }
 0x1a4   :  { %v969_v31 = vshll.u32 %v10585_v6, 16  ;;  %v944_v21 = vrot.slane %v942_v24, 7  ;;  %v952_v52 = vrot.slane %v950_v41, 7  ;;  %v974_v38 = vshrl.u32 %v10586_v25, 16  ;;  %v1030_v22 = vld [vmem:[#allocation2 + $0x98] sm:$0xf] }
 0x1a5   :  { %v977_v27 = vshll.u32 %v10586_v25, 16  ;;  %v960_v15 = vrot.slane %v958_v44, 7  ;;  %v968_v51 = vrot.slane %v966_v46, 7  ;;  %v982_v37 = vshrl.u32 %v10587_v29, 16  ;;  %v1033_v47 = vld [vmem:[#allocation2 + $0x9c] sm:$0x1] }
 0x1a6   :  { %v985_v55 = vshll.u32 %v10587_v29, 16  ;;  %v947_v18 = vor.u32 %v945_v45, %v944_v21  ;;  %v948_v26 = vrot.slane %v944_v21, 4  ;;  %v955_v8 = vor.u32 %v953_v49, %v952_v52  ;;  %v1039_v30 = vld [vmem:[#allocation2 + $0xa4] sm:$0x1]  ;;  %v1045_v6 = vld [vmem:[#allocation2 + $0xac] sm:$0x1] }
 0x1a7   :  { %v956_v39 = vrot.slane %v952_v52, 4  ;;  %v963_v24 = vor.u32 %v961_v54, %v960_v15  ;;  %v964_v41 = vrot.slane %v960_v15, 4  ;;  %v971_v56 = vor.u32 %v969_v31, %v968_v51  ;;  %v12565_v40 = vld [vmem:[#allocation2 + $0xd8] ss:$8 sps:$4 sm:$0xff]   ;;  %v1048_v45 = vld [vmem:[#allocation2 + $0xb0] sm:$0xf] }
 0x1a8   :  { %v972_v25 = vrot.slane %v968_v51, 4  ;;  %v976_v53 = vrot.slane %v974_v38, 7  ;;  %v984_v44 = vrot.slane %v982_v37, 7  ;;  %v990_v46 = vshrl.u32 %v13657_v34, 16  ;;  %v1051_v49 = vld [vmem:[#allocation2 + $0xb4] sm:$0x1]  ;;  %11374 = vmatprep.mubr.bf16.mxu0 %v12565_v40 }
 0x1a9   :  { %v993_v29 = vshll.u32 %v13657_v34, 16  ;;  %v1054_v21 = vld [vmem:[#allocation2 + $0xb8] sm:$0xf]  ;;  %v1057_v52 = vld [vmem:[#allocation2 + $0xbc] sm:$0x1]  ;;  %v998_v11 = vshrl.u32 %v13659_v33, 16  ;;  %v1025_v31 = vsel %vm13616_vm6, %v947_v18, %v1024_v28  ;;  %v1028_v38 = vsel %vm13185_vm3, %v948_v26, %v1027_v50 }
 0x1aa   :  { %v1001_v54 = vshll.u32 %v13659_v33, 16  ;;  %v1060_v15 = vld [vmem:[#allocation2 + $0xc0] sm:$0xf]  ;;  %v1063_v51 = vld [vmem:[#allocation2 + $0xc4] sm:$0x1]  ;;  %v979_v37 = vor.u32 %v977_v27, %v976_v53  ;;  %v980_v9 = vrot.slane %v976_v53, 4  ;;  %v987_v7 = vor.u32 %v985_v55, %v984_v44 }
 0x1ab   :  { %v1069_v34 = vld [vmem:[#allocation2 + $0xcc] sm:$0x1]  ;;  %v988_v5 = vrot.slane %v984_v44, 4  ;;  %1026 = vst [vmem:[#allocation2 + $0x90] sm:$0xf] %v1025_v31  ;;  %v992_v1 = vrot.slane %v990_v46, 7  ;;  %v1031_v33 = vsel %vm13616_vm6, %v955_v8, %v1030_v22  ;;  %v1034_v18 = vsel %vm13185_vm3, %v956_v39, %v1033_v47 }
 0x1ac   :  { %1029 = vst [vmem:[#allocation2 + $0x94] sm:$0x1] %v1028_v38  ;;  %v12568_v3 = vld [vmem:[#allocation2 + $0xe8] ss:$8 sps:$4 sm:$0xff]   ;;  %v1000_v63 = vrot.slane %v998_v11, 7  ;;  %v1037_v53 = vsel %vm13616_vm6, %v963_v24, %v1036_v57  ;;  %v1040_v27 = vsel %vm13185_vm3, %v964_v41, %v1039_v30  ;;  %v1043_v40 = vsel %vm13616_vm6, %v971_v56, %v1042_v35  ;;  %v12580_v31 = vld [vmem:[#allocation4 + $0x1a0] sm:$0xff]  }
 0x1ad   :  { %v12570_v50 = vld [vmem:[#allocation2 + $0xf8] ss:$8 sps:$4 sm:$0xff]   ;;  %v1066_v28 = vld [vmem:[#allocation2 + $0xc8] sm:$0xf]  ;;  %1032 = vst [vmem:[#allocation2 + $0x98] sm:$0xf] %v1031_v33  ;;  %v1046_v11 = vsel %vm13185_vm3, %v972_v25, %v1045_v6  ;;  %11375 = vmatmul.mubr.bf16.vlgmr.msra.gmra.mxu0 %v12568_v3  ;;  %v995_v8 = vor.u32 %v993_v29, %v992_v1  ;;  %v1049_v57 = vsel %vm13616_vm6, %v979_v37, %v1048_v45 }
 0x1ae   :  { %1035 = vst [vmem:[#allocation2 + $0x9c] sm:$0x1] %v1034_v18  ;;  %v996_v55 = vrot.slane %v992_v1, 4  ;;  %v1003_v22 = vor.u32 %v1001_v54, %v1000_v63  ;;  %v1004_v47 = vrot.slane %v1000_v63, 4  ;;  %1038 = vst [vmem:[#allocation2 + $0xa0] sm:$0xf] %v1037_v53  ;;  %11407 = vmatpush3.bf16.msra.mxu0 %v13369_v43  ;;  %11378 = vmatprep.mubr.bf16.mxu0 %v12570_v50 }
 0x1af   :  { %1041 = vst [vmem:[#allocation2 + $0xa4] sm:$0x1] %v1040_v27  ;;  %1044 = vst [vmem:[#allocation2 + $0xa8] sm:$0xf] %v1043_v40  ;;  %v1052_v56 = vsel %vm13185_vm3, %v980_v9, %v1051_v49  ;;  %v1055_v3 = vsel %vm13616_vm6, %v987_v7, %v1054_v21  ;;  %v1058_v1 = vsel %vm13185_vm3, %v988_v5, %v1057_v52  ;;  %11408 = vmatprep.subr.bf16.mxu0 %v13663_v13  ;;  %v12574_v63 = vld [vmem:[#allocation4 + $0x1a8] sm:$0xff]  }
 0x1b0   :  { %1047 = vst [vmem:[#allocation2 + $0xac] sm:$0x1] %v1046_v11  ;;  %1050 = vst [vmem:[#allocation2 + $0xb0] sm:$0xf] %v1049_v57  ;;  %v1061_v43 = vsel %vm13616_vm6, %v995_v8, %v1060_v15  ;;  %v1064_v35 = vsel %vm13185_vm3, %v996_v55, %v1063_v51  ;;  %v1067_v9 = vsel %vm13616_vm6, %v1003_v22, %v1066_v28  ;;  %v16347_v5 = vmax.f32 %v13586_v32, 0.0  ;;  %v12582_v22 = vld [vmem:[#allocation4 + $0x198] sm:$0xff]  }
 0x1b1   :  { %1053 = vst [vmem:[#allocation2 + $0xb4] sm:$0x1] %v1052_v56  ;;  %1056 = vst [vmem:[#allocation2 + $0xb8] sm:$0xf] %v1055_v3  ;;  %v1070_v7 = vsel %vm13185_vm3, %v1004_v47, %v1069_v34  ;;  %v16348_v39 = vmax.f32 %v13588_v36, 0.0  ;;  %v16349_v6 = vmax.f32 %v13590_v48, 0.0 }
 0x1b2   :  { %1059 = vst [vmem:[#allocation2 + $0xbc] sm:$0x1] %v1058_v1  ;;  %1062 = vst [vmem:[#allocation2 + $0xc0] sm:$0xf] %v1061_v43  ;;  %v10590_v26 = vpack.c.bf16 %v16347_v5, %v16347_v5  ;;  %v16350_v41 = vmax.f32 %v13592_v19, 0.0  ;;  %v16351_v44 = vmax.f32 %v13594_v17, 0.0  ;;  %11409 = vmatpush3.bf16.msra.mxu0 %v13663_v13 }
 0x1b3   :  { %1065 = vst [vmem:[#allocation2 + $0xc4] sm:$0x1] %v1064_v35  ;;  %1068 = vst [vmem:[#allocation2 + $0xc8] sm:$0xf] %v1067_v9  ;;  %v10591_v30 = vpack.c.bf16 %v16348_v39, %v16348_v39  ;;  %v10592_v24 = vpack.c.bf16 %v16349_v6, %v16349_v6  ;;  %v16352_v32 = vmax.f32 %v13596_v58, 0.0  ;;  %v16353_v36 = vmax.f32 %v13598_v60, 0.0  ;;  %11410 = vmatprep.subr.bf16.mxu0 %v12574_v63 }
 0x1b4   :  { %1071 = vst [vmem:[#allocation2 + $0xcc] sm:$0x1] %v1070_v7  ;;  %v10593_v25 = vpack.c.bf16 %v16350_v41, %v16350_v41  ;;  %v10594_v46 = vpack.c.bf16 %v16351_v44, %v16351_v44  ;;  %v16354_v48 = vmax.f32 %v13600_v62, 0.0  ;;  %1101 = vst [vmem:[#allocation2 + $0x50] sm:$0xf] %v10590_v26  ;;  %v16355_v19 = vmax.f32 %v13602_v0, 0.0 }
 0x1b5   :  { %v10595_v29 = vpack.c.bf16 %v16352_v32, %v16352_v32  ;;  %v10596_v45 = vpack.c.bf16 %v16353_v36, %v16353_v36  ;;  %1102 = vst [vmem:[#allocation2 + $0x58] sm:$0xf] %v10591_v30  ;;  %1103 = vst [vmem:[#allocation2 + $0x60] sm:$0xf] %v10592_v24  ;;  %v16356_v58 = vmax.f32 %v13604_v2, 0.0  ;;  %v16357_v21 = vmax.f32 %v13606_v4, 0.0 }
 0x1b6   :  { %v10597_v49 = vpack.c.bf16 %v16354_v48, %v16354_v48  ;;  %1104 = vst [vmem:[#allocation2 + $0x68] sm:$0xf] %v10593_v25  ;;  %v10598_v17 = vpack.c.bf16 %v16355_v19, %v16355_v19  ;;  %v16358_v52 = vmax.f32 %v13608_v10, 0.0  ;;  %v12576_v54 = vld [vmem:[#allocation2 + $0x108] ss:$8 sps:$4 sm:$0xff]   ;;  %v16359_v0 = vmax.f32 %v13610_v12, 0.0  ;;  %11411 = vmatpush3.bf16.msra.mxu0 %v12574_v63 }
 0x1b7   :  { %v10599_v60 = vpack.c.bf16 %v16356_v58, %v16356_v58  ;;  %v10600_v62 = vpack.c.bf16 %v16357_v21, %v16357_v21  ;;  %1105 = vst [vmem:[#allocation2 + $0x70] sm:$0xf] %v10594_v46  ;;  %1106 = vst [vmem:[#allocation2 + $0x78] sm:$0xf] %v10595_v29  ;;  %v16360_v38 = vmax.f32 %v13612_v14, 0.0  ;;  %v16361_v15 = vmax.f32 %v13620_v20, 0.0  ;;  %11379 = vmatmul.mubr.bf16.gmra.mxu0 %v12576_v54 }
 0x1b8   :  { %v10601_v13 = vpack.c.bf16 %v16358_v52, %v16358_v52  ;;  %1107 = vst [vmem:[#allocation2 + $0x80] sm:$0xf] %v10596_v45  ;;  %1108 = vst [vmem:[#allocation2 + $0x88] sm:$0xf] %v10597_v49  ;;  %v10602_v2 = vpack.c.bf16 %v16359_v0, %v16359_v0  ;;  %v1130_v51 = vshrl.u32 %v10598_v17, 16  ;;  %v1133_v34 = vshll.u32 %v10598_v17, 16  ;;  %11412 = vmatprep.subr.bf16.mxu0 %v12580_v31 }
 0x1b9   :  { %v10603_v4 = vpack.c.bf16 %v16360_v38, %v16360_v38  ;;  %v13747_v10 = vpack.c.bf16 %v16361_v15, %v16361_v15  ;;  %v1138_v37 = vshrl.u32 %v10599_v60, 16  ;;  %v1141_v33 = vshll.u32 %v10599_v60, 16  ;;  %v1210_v53 = vld [vmem:[#allocation2 + $0x8] sm:$0xf]  ;;  %v1213_v27 = vld [vmem:[#allocation2 + $0xc] sm:$0x1] }
 0x1ba   :  { %v1146_v18 = vshrl.u32 %v10600_v62, 16  ;;  %v1149_v50 = vshll.u32 %v10600_v62, 16  ;;  %v1154_v28 = vshrl.u32 %v10601_v13, 16  ;;  %v1157_v12 = vshll.u32 %v10601_v13, 16  ;;  %v1216_v14 = vld [vmem:[#allocation2 + $0x10] sm:$0xf]  ;;  %11413 = vmatpush3.bf16.msra.mxu0 %v12580_v31 }
 0x1bb   :  { %v1219_v40 = vld [vmem:[#allocation2 + $0x14] sm:$0x1]  ;;  %v1132_v11 = vrot.slane %v1130_v51, 7  ;;  %v1140_v8 = vrot.slane %v1138_v37, 7  ;;  %v1162_v20 = vshrl.u32 %v10602_v2, 16  ;;  %v1165_v55 = vshll.u32 %v10602_v2, 16  ;;  %11414 = vmatprep.subr.bf16.mxu0 %v12582_v22 }
 0x1bc   :  { %v1148_v47 = vrot.slane %v1146_v18, 7  ;;  %v1156_v57 = vrot.slane %v1154_v28, 7  ;;  %v1170_v56 = vshrl.u32 %v10603_v4, 16  ;;  %v1173_v3 = vshll.u32 %v10603_v4, 16  ;;  %v1222_v1 = vld [vmem:[#allocation2 + $0x18] sm:$0xf] }
 0x1bd   :  { %v1225_v43 = vld [vmem:[#allocation2 + $0x1c] sm:$0x1]  ;;  %v1228_v35 = vld [vmem:[#allocation2 + $0x20] sm:$0xf]  ;;  %v1135_v9 = vor.u32 %v1133_v34, %v1132_v11  ;;  %v1136_v7 = vrot.slane %v1132_v11, 4  ;;  %v1143_v63 = vor.u32 %v1141_v33, %v1140_v8  ;;  %v1144_v5 = vrot.slane %v1140_v8, 4 }
 0x1be   :  { %v1231_v26 = vld [vmem:[#allocation2 + $0x24] sm:$0x1]  ;;  %v1234_v39 = vld [vmem:[#allocation2 + $0x28] sm:$0xf]  ;;  %v1237_v30 = vld [vmem:[#allocation2 + $0x2c] sm:$0x1]  ;;  %v1151_v24 = vor.u32 %v1149_v50, %v1148_v47  ;;  %v1159_v25 = vor.u32 %v1157_v12, %v1156_v57  ;;  %11415 = vmatpush3.bf16.msra.mxu0 %v12582_v22 }
 0x1bf   :  { %v1240_v6 = vld [vmem:[#allocation2 + $0x30] sm:$0xf]  ;;  %v1152_v41 = vrot.slane %v1148_v47, 4  ;;  %v1160_v44 = vrot.slane %v1156_v57, 4  ;;  %v1243_v29 = vld [vmem:[#allocation2 + $0x34] sm:$0x1]  ;;  %v1211_v17 = vsel %vm13616_vm6, %v1135_v9, %v1210_v53  ;;  %v1214_v58 = vsel %vm13185_vm3, %v1136_v7, %v1213_v27 }
 0x1c0   :  { %v13749_v46 = vld [vmem:[#allocation2 + $0x48] ss:$8 sps:$4 sm:$0xff]   ;;  %v1164_v36 = vrot.slane %v1162_v20, 7  ;;  %v1172_v45 = vrot.slane %v1170_v56, 7  ;;  %v1178_v48 = vshrl.u32 %v13747_v10, 16  ;;  %v1181_v49 = vshll.u32 %v13747_v10, 16 }
 0x1c1   :  { %v13751_v32 = vld [vmem:[#allocation4 + $0x30] sm:$0xff]   ;;  %v1217_v60 = vsel %vm13616_vm6, %v1143_v63, %v1216_v14  ;;  %v1220_v21 = vsel %vm13185_vm3, %v1144_v5, %v1219_v40  ;;  %11278 = vmatprep.mubr.bf16.mxu1 %v13749_v46  ;;  %v13764_v62 = vld [vmem:[#allocation2 + $0x58] ss:$8 sps:$4 sm:$0xff]   ;;  %v1249_v13 = vld [vmem:[#allocation2 + $0x3c] sm:$0x1]  ;;  %v1223_v15 = vsel %vm13616_vm6, %v1151_v24, %v1222_v1  ;;  %v1226_v10 = vsel %vm13185_vm3, %v1152_v41, %v1225_v43 }
 0x1c2   :  { %v12584_v19 = vld [vmem:[#allocation4 + $0x190] sm:$0xff]   ;;  %v1246_v52 = vld [vmem:[#allocation2 + $0x38] sm:$0xf]  ;;  %v1167_v54 = vor.u32 %v1165_v55, %v1164_v36  ;;  %v1168_v31 = vrot.slane %v1164_v36, 4  ;;  %v1175_v0 = vor.u32 %v1173_v3, %v1172_v45  ;;  %v1176_v2 = vrot.slane %v1172_v45, 4  ;;  %11279 = vmatmul.mubr.bf16.vlgmr.msra.gmra.mxu1 %v13764_v62  ;;  %v12586_v50 = vld [vmem:[#allocation4 + $0x188] sm:$0xff]  }
 0x1c3   :  { %1212 = vst [vmem:[#allocation2 + $0x8] sm:$0xf] %v1211_v17  ;;  %1215 = vst [vmem:[#allocation2 + $0xc] sm:$0x1] %v1214_v58  ;;  %v13766_v38 = vld [vmem:[#allocation2 + $0x68] ss:$8 sps:$4 sm:$0xff]   ;;  %v1229_v51 = vsel %vm13616_vm6, %v1159_v25, %v1228_v35  ;;  %v1232_v34 = vsel %vm13185_vm3, %v1160_v44, %v1231_v26  ;;  %11287 = vmatpush3.bf16.msra.mxu1 %v13367_v42  ;;  %11416 = vmatprep.subr.bf16.mxu0 %v12584_v19 }
 0x1c4   :  { %1218 = vst [vmem:[#allocation2 + $0x10] sm:$0xf] %v1217_v60  ;;  %1221 = vst [vmem:[#allocation2 + $0x14] sm:$0x1] %v1220_v21  ;;  %v1180_v4 = vrot.slane %v1178_v48, 7  ;;  %v1235_v37 = vsel %vm13616_vm6, %v1167_v54, %v1234_v39  ;;  %v1238_v33 = vsel %vm13185_vm3, %v1168_v31, %v1237_v30  ;;  %v1241_v18 = vsel %vm13616_vm6, %v1175_v0, %v1240_v6  ;;  %v13788_v27 = vld [vmem:[#allocation4 + $0x28] sm:$0xff]  }
 0x1c5   :  { %1224 = vst [vmem:[#allocation2 + $0x18] sm:$0xf] %v1223_v15  ;;  %1227 = vst [vmem:[#allocation2 + $0x1c] sm:$0x1] %v1226_v10  ;;  %v1244_v53 = vsel %vm13185_vm3, %v1176_v2, %v1243_v29  ;;  %11282 = vmatprep.mubr.bf16.mxu1 %v13766_v38  ;;  %11288 = vmatprep.subr.bf16.mxu1 %v13751_v32  ;;  %v13795_v40 = vld [vmem:[#allocation4 + $0x20] sm:$0xff]   ;;  %v12592_v22 = vld [vmem:[#allocation4 + $0x238] sm:$0xff]  }
 0x1c6   :  { %1230 = vst [vmem:[#allocation2 + $0x20] sm:$0xf] %v1229_v51  ;;  %v1183_v28 = vor.u32 %v1181_v49, %v1180_v4  ;;  %v1184_v12 = vrot.slane %v1180_v4, 4  ;;  %1233 = vst [vmem:[#allocation2 + $0x24] sm:$0x1] %v1232_v34  ;;  %11417 = vmatpush3.bf16.msra.mxu0 %v12584_v19  ;;  %v12588_v11 = vld [vmem:[#allocation4 + $0x180] sm:$0xff]  }
 0x1c7   :  { %1236 = vst [vmem:[#allocation2 + $0x28] sm:$0xf] %v1235_v37  ;;  %1239 = vst [vmem:[#allocation2 + $0x2c] sm:$0x1] %v1238_v33  ;;  %11289 = vmatpush3.bf16.msra.mxu1 %v13751_v32  ;;  %11418 = vmatprep.subr.bf16.mxu0 %v12586_v50  ;;  %v13798_v8 = vld [vmem:[#allocation2 + $0x78] ss:$8 sps:$4 sm:$0xff]  }
 0x1c8   :  { %1242 = vst [vmem:[#allocation2 + $0x30] sm:$0xf] %v1241_v18  ;;  %1245 = vst [vmem:[#allocation2 + $0x34] sm:$0x1] %v1244_v53  ;;  %v1247_v42 = vsel %vm13616_vm6, %v1183_v28, %v1246_v52  ;;  %v1250_v14 = vsel %vm13185_vm3, %v1184_v12, %v1249_v13  ;;  %11290 = vmatprep.subr.bf16.mxu1 %v13788_v27  ;;  %v13803_v47 = vld [vmem:[#allocation4 + $0x18] sm:$0xff]   ;;  %v12596_v56 = vld [vmem:[#allocation4 + $0x230] sm:$0xff]  }
 0x1c9   :  { %1248 = vst [vmem:[#allocation2 + $0x38] sm:$0xf] %v1247_v42  ;;  %1251 = vst [vmem:[#allocation2 + $0x3c] sm:$0x1] %v1250_v14  ;;  %v1580_v3 = vld [vmem:[#allocation2] sm:$0xf] }
 0x1ca   :  { %v12577_v20 = vld [vmem:[#allocation2] ss:$8 sps:$4 sm:$0xff]   ;;  %11283 = vmatmul.mubr.bf16.gmra.mxu1 %v13798_v8  ;;  %11419 = vmatpush3.bf16.msra.mxu0 %v12586_v50  ;;  %v13807_v1 = vld [vmem:[#allocation4 + $0x10] sm:$0xff]   ;;  %v2822_v9 = vld [vmem:[#allocation2 + $0xc] sm:$0x1]  ;;  %v1600_v63 = vshrl.u32 %v1580_v3, 16 }
 0x1cb   :  { %v12578_v55 = vld [vmem:[#allocation2 + $0x8] ss:$8 sps:$4 sm:$0xff]   ;;  %11291 = vmatpush3.bf16.msra.mxu1 %v13788_v27  ;;  %11302 = vmatprep.mubr.bf16.mxu1 %v12577_v20  ;;  %v1603_v5 = vshll.u32 %v1580_v3, 16  ;;  %v2824_v26 = vld [vmem:[#allocation2 + $0x14] sm:$0x1]  ;;  %v2847_v36 = vshll.u32 %v2822_v9, 16 }
 0x1cc   :  { %11422 = vmatprep.mubr.bf16.mxu0 %v12578_v55  ;;  %11292 = vmatprep.subr.bf16.mxu1 %v13795_v40  ;;  %v2821_v35 = vld [vmem:[#allocation2 + $0x8] sm:$0xf]  ;;  %v2823_v7 = vld [vmem:[#allocation2 + $0x10] sm:$0xf]  ;;  %v2861_v19 = vshll.u32 %v2824_v26, 16  ;;  %v1602_v58 = vrot.slane %v1600_v63, 4 }
 0x1cd   :  { %11420 = vmatprep.subr.bf16.mxu0 %v12588_v11  ;;  %v12591_v57 = vld [vmem:[#allocation2 + $0x18] ss:$8 sps:$4 sm:$0xff]   ;;  %v2838_v39 = vshrl.u32 %v2821_v35, 16  ;;  %v12600_v30 = vld [vmem:[#allocation4 + $0x228] sm:$0xff]   ;;  %v2841_v24 = vshll.u32 %v2821_v35, 16  ;;  %v2852_v41 = vshrl.u32 %v2823_v7, 16 }
 0x1ce   :  { %11421 = vmatpush3.bf16.msra.mxu0 %v12588_v11  ;;  %v1582_v6 = vld [vmem:[#allocation2 + $0x8] sm:$0xf]  ;;  %v2855_v25 = vshll.u32 %v2823_v7, 16  ;;  %v2835_v17 = vld [vmem:[#allocation2 + $0x40] sm:$0xf]  ;;  %v1605_v60 = vrot.slane %v1603_v5, 5 }
 0x1cf   :  { %11293 = vmatpush3.bf16.msra.mxu1 %v13795_v40  ;;  %11454 = vmatprep.subr.bf16.mxu0 %v12592_v22  ;;  %v12594_v43 = vld [vmem:[#allocation2 + $0x28] ss:$8 sps:$4 sm:$0xff]   ;;  %v2840_v29 = vrot.slane %v2838_v39, 4  ;;  %v2843_v45 = vrot.slane %v2841_v24, 5  ;;  %v2854_v48 = vrot.slane %v2852_v41, 4  ;;  %v1614_v21 = vshrl.u32 %v1582_v6, 16 }
 0x1d0   :  { %11294 = vmatprep.subr.bf16.mxu1 %v13803_v47  ;;  %v13811_v44 = vld [vmem:[#allocation4 + $0x8] sm:$0xff]   ;;  %v2857_v49 = vrot.slane %v2855_v25, 5  ;;  %v1617_v52 = vshll.u32 %v1582_v6, 16  ;;  %v12599_v13 = vld [vmem:[#allocation2 + $0x38] ss:$8 sps:$4 sm:$0xff]   ;;  %v2936_v15 = vshrl.u32 %v2835_v17, 16  ;;  %v1606_v28 = vor.u32 %v1605_v60, %v1602_v58 }
 0x1d1   :  { %11423 = vmatmul.mubr.bf16.vlgmr.msra.gmra.mxu0 %v12591_v57  ;;  %v1581_v54 = vld [vmem:[#allocation2 + $0x4] sm:$0x1]  ;;  %v2844_v31 = vor.u32 %v2843_v45, %v2840_v29  ;;  %v2939_v10 = vshll.u32 %v2835_v17, 16  ;;  %v2849_v34 = vrot.slane %v2847_v36, 5  ;;  %v2863_v33 = vrot.slane %v2861_v19, 5  ;;  %v12604_v55 = vld [vmem:[#allocation4 + $0x218] sm:$0xff]  }
 0x1d2   :  { %11426 = vmatprep.mubr.bf16.mxu0 %v12594_v43  ;;  %11455 = vmatpush3.bf16.msra.mxu0 %v12592_v22  ;;  %v2858_v0 = vor.u32 %v2857_v49, %v2854_v48  ;;  %v12602_v2 = vld [vmem:[#allocation4 + $0x220] sm:$0xff]   ;;  %v2825_v18 = vld [vmem:[#allocation2 + $0x18] sm:$0xf]  ;;  %v16362_v50 = vmov 0  ;;  %v1609_v12 = vshll.u32 %v1581_v54, 16  ;;  %v1616_v53 = vrot.slane %v1614_v21, 4 }
 0x1d3   :  { %11295 = vmatpush3.bf16.msra.mxu1 %v13803_v47  ;;  %11456 = vmatprep.subr.bf16.mxu0 %v12596_v56  ;;  %v13815_v4 = vld [vmem:[#allocation4] sm:$0xff]   ;;  %v2845_v51 = vrot.slane %v2844_v31, 4  ;;  %v16363_v50 = vsel %vm13819_vm9, 4294967295, %v16362_v50  ;;  %v1619_v42 = vrot.slane %v1617_v52, 5  ;;  %v12590_v22 = vld [vmem:[#allocation4 + $0xb8] sm:$0xff]   ;;  %v2866_v3 = vshrl.u32 %v2825_v18, 16 }
 0x1d4   :  { %11296 = vmatprep.subr.bf16.mxu1 %v13807_v1  ;;  %v2859_v37 = vrot.slane %v2858_v0, 4  ;;  %16364 = vst [vmem:[#allocation49_spill] sm:$0xff] %v16363_v50  ;;  %v2827_v14 = vld [vmem:[#allocation2 + $0x20] sm:$0xf]  ;;  %v1583_v57 = vld [vmem:[#allocation2 + $0xc] sm:$0x1] }
 0x1d5   :  { %v2850_v11 = vsel %vm13819_vm9, %v2845_v51, %v2849_v34  ;;  %v2869_v43 = vshll.u32 %v2825_v18, 16  ;;  %v2880_v35 = vshrl.u32 %v2827_v14, 16  ;;  %v2938_v9 = vrot.slane %v2936_v15, 4  ;;  %v12595_v63 = vld [vmem:[#allocation4 + $0xb0] sm:$0xff]   ;;  %v13837_v25 = vld [vmem:[#allocation2 + $0x44] sm:$0x1] }
 0x1d6   :  { %11457 = vmatpush3.bf16.msra.mxu0 %v12596_v56  ;;  %v2864_v20 = vsel %vm13819_vm9, %v2859_v37, %v2863_v33  ;;  %v2941_v7 = vrot.slane %v2939_v10, 5  ;;  %v13831_v5 = vrot.slane %v1606_v28, 4  ;;  %v13833_v26 = vrot.slane %v1609_v12, 5  ;;  %v12589_v6 = vld [vmem:[#allocation2 + $0x10] ss:$8 sps:$4 sm:$0xff]   ;;  %v12598_v60 = vld [vmem:[#allocation4 + $0xa8] sm:$0xff]  }
 0x1d7   :  { %11297 = vmatpush3.bf16.msra.mxu1 %v13807_v1  ;;  %11458 = vmatprep.subr.bf16.mxu0 %v12600_v30  ;;  %v13829_v56 = vcombine.low %v2850_v11, %v2864_v20  ;;  %v1620_v39 = vor.u32 %v1619_v42, %v1616_v53  ;;  %v1623_v24 = vshll.u32 %v1583_v57, 16  ;;  %v12606_v41 = vld [vmem:[#allocation4 + $0x210] sm:$0xff]   ;;  %v2868_v29 = vrot.slane %v2866_v3, 4  ;;  %v2829_v49 = vld [vmem:[#allocation2 + $0x28] sm:$0xf]  ;;  %v12601_v57 = vld [vmem:[#allocation4 + $0xa0] sm:$0xff]  }
 0x1d8   :  { %11298 = vmatprep.subr.bf16.mxu1 %v13811_v44  ;;  %v2871_v36 = vrot.slane %v2869_v43, 5  ;;  %v2882_v45 = vrot.slane %v2880_v35, 4  ;;  %v12593_v19 = vld [vmem:[#allocation2 + $0x20] ss:$8 sps:$4 sm:$0xff]   ;;  %v1584_v17 = vld [vmem:[#allocation2 + $0x10] sm:$0xf]  ;;  %v2942_v58 = vor.u32 %v2941_v7, %v2938_v9  ;;  %v1612_v54 = vsel %vm13819_vm9, %v13831_v5, %v13833_v26 }
 0x1d9   :  { %11427 = vmatmul.mubr.bf16.gmra.mxu0 %v12599_v13  ;;  %v1621_v21 = vrot.slane %v1620_v39, 4  ;;  %v12608_v52 = vld [vmem:[#allocation4 + $0x208] sm:$0xff]   ;;  %v2826_v13 = vld [vmem:[#allocation2 + $0x1c] sm:$0x1]  ;;  %v2828_v31 = vld [vmem:[#allocation2 + $0x24] sm:$0x1] }
 0x1da   :  { %11459 = vmatpush3.bf16.msra.mxu0 %v12600_v30  ;;  %11470 = vmatprep.mubr.bf16.mxu0 %v13829_v56  ;;  %v2883_v30 = vshll.u32 %v2827_v14, 16  ;;  %v2831_v0 = vld [vmem:[#allocation2 + $0x30] sm:$0xf]  ;;  %v2945_v15 = vshll.u32 %v13837_v25, 16  ;;  %v1625_v10 = vrot.slane %v1623_v24, 5  ;;  %v1628_v34 = vshrl.u32 %v1584_v17, 16 }
 0x1db   :  { %11299 = vmatpush3.bf16.msra.mxu1 %v13811_v44  ;;  %11460 = vmatprep.subr.bf16.mxu0 %v12602_v2  ;;  %v13844_v51 = vld [vmem:[#allocation2 + $0x18] sm:$0xf]  ;;  %v2872_v37 = vor.u32 %v2871_v36, %v2868_v29  ;;  %v2830_v18 = vld [vmem:[#allocation2 + $0x2c] sm:$0x1]  ;;  %v1631_v28 = vshll.u32 %v1584_v17, 16  ;;  %v2897_v53 = vshll.u32 %v2829_v49, 16 }
 0x1dc   :  { %11300 = vmatprep.subr.bf16.mxu1 %v13815_v4  ;;  %v2885_v48 = vrot.slane %v2883_v30, 5  ;;  %v13846_v42 = vrot.slane %v2942_v58, 4  ;;  %v1626_v14 = vsel %vm13819_vm9, %v1621_v21, %v1625_v10  ;;  %v2875_v11 = vshll.u32 %v2826_v13, 16  ;;  %v12610_v3 = vld [vmem:[#allocation4 + $0x200] sm:$0xff]   ;;  %v12597_v5 = vld [vmem:[#allocation2 + $0x30] ss:$8 sps:$4 sm:$0xff]  }
 0x1dd   :  { %v2889_v20 = vshll.u32 %v2828_v31, 16  ;;  %v1642_v43 = vshrl.u32 %v13844_v51, 16  ;;  %v2899_v35 = vrot.slane %v2897_v53, 5  ;;  %v2903_v9 = vshll.u32 %v2830_v18, 16  ;;  %v2833_v17 = vld [vmem:[#allocation2 + $0x38] sm:$0xf] }
 0x1de   :  { %11461 = vmatpush3.bf16.msra.mxu0 %v12602_v2  ;;  %v2894_v2 = vshrl.u32 %v2829_v49, 16  ;;  %v2886_v33 = vor.u32 %v2885_v48, %v2882_v45  ;;  %v2911_v7 = vshll.u32 %v2831_v0, 16  ;;  %v13851_v26 = vrot.slane %v1628_v34, 4  ;;  %v1590_v58 = vld [vmem:[#allocation2 + $0x28] sm:$0xf]  ;;  %v12603_v31 = vld [vmem:[#allocation4 + $0x98] sm:$0xff]  }
 0x1df   :  { %11301 = vmatpush3.bf16.msra.mxu1 %v13815_v4  ;;  %11462 = vmatprep.subr.bf16.mxu0 %v12604_v55  ;;  %v2873_v39 = vrot.slane %v2872_v37, 4  ;;  %v13853_v24 = vcombine.low %v1612_v54, %v1626_v14  ;;  %v13855_v45 = vrot.slane %v1631_v28, 5  ;;  %v1645_v48 = vshll.u32 %v13844_v51, 16  ;;  %v2834_v37 = vld [vmem:[#allocation2 + $0x3c] sm:$0x1]  ;;  %v12605_v14 = vld [vmem:[#allocation4 + $0x90] sm:$0xff]  }
 0x1e0   :  { %11310 = vmatprep.subr.bf16.mxu1 %v12590_v22  ;;  %v2896_v12 = vrot.slane %v2894_v2, 4  ;;  %v2887_v30 = vrot.slane %v2886_v33, 4  ;;  %v2877_v49 = vrot.slane %v2875_v11, 5  ;;  %v2905_v13 = vrot.slane %v2903_v9, 5  ;;  %v1592_v9 = vld [vmem:[#allocation2 + $0x30] sm:$0xf] }
 0x1e1   :  { %v2922_v33 = vshrl.u32 %v2833_v17, 16  ;;  %v1670_v28 = vshrl.u32 %v1590_v58, 16  ;;  %v2925_v53 = vshll.u32 %v2833_v17, 16  ;;  %v1647_v11 = vrot.slane %v1645_v48, 5 }
 0x1e2   :  { %11303 = vmatmul.mubr.bf16.vlgmr.msra.gmra.mxu1 %v12589_v6  ;;  %11463 = vmatpush3.bf16.msra.mxu0 %v12604_v55  ;;  %v2832_v55 = vld [vmem:[#allocation2 + $0x34] sm:$0x1]  ;;  %v2900_v29 = vor.u32 %v2899_v35, %v2896_v12  ;;  %v1673_v12 = vshll.u32 %v1590_v58, 16  ;;  %v1634_v25 = vor.u32 %v13855_v45, %v13851_v26 }
 0x1e3   :  { %11306 = vmatprep.mubr.bf16.mxu1 %v12593_v19  ;;  %11311 = vmatpush3.bf16.msra.mxu1 %v12590_v22  ;;  %v2908_v22 = vshrl.u32 %v2831_v0, 16  ;;  %v2917_v36 = vshll.u32 %v2832_v55, 16  ;;  %v2891_v19 = vrot.slane %v2889_v20, 5  ;;  %v13859_v0 = vrot.slane %v1642_v43, 4  ;;  %v12815_v55 = vld [vmem:[#allocation4 + $0x38] sm:$0xff]  }
 0x1e4   :  { %11312 = vmatprep.subr.bf16.mxu1 %v12595_v63  ;;  %11464 = vmatprep.subr.bf16.mxu0 %v12606_v41  ;;  %v2901_v21 = vrot.slane %v2900_v29, 4  ;;  %v2924_v43 = vrot.slane %v2922_v33, 4 }
 0x1e5   :  { %v2910_v6 = vrot.slane %v2908_v22, 4  ;;  %v2892_v2 = vsel %vm13819_vm9, %v2887_v30, %v2891_v19  ;;  %v2919_v34 = vrot.slane %v2917_v36, 5  ;;  %v1585_v36 = vld [vmem:[#allocation2 + $0x14] sm:$0x1]  ;;  %v1589_v19 = vld [vmem:[#allocation2 + $0x24] sm:$0x1] }
 0x1e6   :  { %11465 = vmatpush3.bf16.msra.mxu0 %v12606_v41  ;;  %v1588_v41 = vld [vmem:[#allocation2 + $0x20] sm:$0xf] }
 0x1e7   :  { %11313 = vmatpush3.bf16.msra.mxu1 %v12595_v63  ;;  %11466 = vmatprep.subr.bf16.mxu0 %v12608_v52  ;;  %v2913_v63 = vrot.slane %v2911_v7, 5  ;;  %v1656_v10 = vshrl.u32 %v1588_v41, 16  ;;  %v1659_v18 = vshll.u32 %v1588_v41, 16  ;;  %v2931_v7 = vshll.u32 %v2834_v37, 16 }
 0x1e8   :  { %11314 = vmatprep.subr.bf16.mxu1 %v12598_v60  ;;  %v1675_v41 = vrot.slane %v1673_v12, 5  ;;  %v1665_v37 = vshll.u32 %v1589_v19, 16 }
 0x1e9   :  { %v2914_v54 = vor.u32 %v2913_v63, %v2910_v6  ;;  %v1661_v30 = vrot.slane %v1659_v18, 5  ;;  %v1672_v6 = vrot.slane %v1670_v28, 4  ;;  %v12607_v63 = vld [vmem:[#allocation4 + $0x88] sm:$0xff]   ;;  %v2933_v58 = vrot.slane %v2931_v7, 5  ;;  %v1595_v7 = vld [vmem:[#allocation2 + $0x3c] sm:$0x1] }
 0x1ea   :  { %11307 = vmatmul.mubr.bf16.gmra.mxu1 %v12597_v5  ;;  %11467 = vmatpush3.bf16.msra.mxu0 %v12608_v52  ;;  %v2878_v52 = vsel %vm13819_vm9, %v2873_v39, %v2877_v49  ;;  %v1658_v5 = vrot.slane %v1656_v10, 4  ;;  %v2947_v39 = vrot.slane %v2945_v15, 5  ;;  %v1587_v49 = vld [vmem:[#allocation2 + $0x1c] sm:$0x1]  ;;  %v1648_v15 = vor.u32 %v1647_v11, %v13859_v0  ;;  %v12609_v0 = vld [vmem:[#allocation4 + $0x80] sm:$0xff]  }
 0x1eb   :  { %11315 = vmatpush3.bf16.msra.mxu1 %v12598_v60  ;;  %11326 = vmatprep.mubr.bf16.mxu1 %v13853_v24  ;;  %v2906_v60 = vsel %vm13819_vm9, %v2901_v21, %v2905_v13  ;;  %v2915_v51 = vrot.slane %v2914_v54, 4  ;;  %v13867_v20 = vcombine.low %v2878_v52, %v2892_v2  ;;  %v1591_v21 = vld [vmem:[#allocation2 + $0x2c] sm:$0x1]  ;;  %v1684_v13 = vshrl.u32 %v1592_v9, 16 }
 0x1ec   :  { %11316 = vmatprep.subr.bf16.mxu1 %v12601_v57  ;;  %11468 = vmatprep.subr.bf16.mxu0 %v12610_v3  ;;  %v2948_v48 = vsel %vm13819_vm9, %v13846_v42, %v2947_v39  ;;  %v1687_v54 = vshll.u32 %v1592_v9, 16  ;;  %v1662_v2 = vor.u32 %v1661_v30, %v1658_v5  ;;  %v1676_v10 = vor.u32 %v1675_v41, %v1672_v6 }
 0x1ed   :  { %v2920_v22 = vsel %vm13819_vm9, %v2915_v51, %v2919_v34  ;;  %v1651_v26 = vshll.u32 %v1587_v49, 16  ;;  %v1635_v51 = vrot.slane %v1634_v25, 4  ;;  %v1649_v34 = vrot.slane %v1648_v15, 4  ;;  %v12613_v15 = vld [vmem:[#allocation4 + $0xe8] sm:$0xff]  }
 0x1ee   :  { %11469 = vmatpush3.bf16.msra.mxu0 %v12610_v3  ;;  %v13871_v35 = vcombine.low %v2906_v60, %v2920_v22  ;;  %v2927_v3 = vrot.slane %v2925_v53, 5  ;;  %v1637_v60 = vshll.u32 %v1585_v36, 16  ;;  %v1679_v33 = vshll.u32 %v1591_v21, 16  ;;  %v13891_v53 = vld [vmem:[#allocation4 + $0xf8] sm:$0xff]  }
 0x1ef   :  { %11317 = vmatpush3.bf16.msra.mxu1 %v12601_v57  ;;  %11502 = vmatprep.subr.bf16.mxu0 %v12815_v55  ;;  %v1594_v57 = vld [vmem:[#allocation2 + $0x38] sm:$0xf]  ;;  %v1686_v18 = vrot.slane %v1684_v13, 4  ;;  %v1689_v28 = vrot.slane %v1687_v54, 5  ;;  %v1677_v11 = vrot.slane %v1676_v10, 4  ;;  %v1653_v22 = vrot.slane %v1651_v26, 5 }
 0x1f0   :  { %11318 = vmatprep.subr.bf16.mxu1 %v12603_v31  ;;  %v2928_v29 = vor.u32 %v2927_v3, %v2924_v43  ;;  %v1701_v52 = vshll.u32 %v1594_v57, 16  ;;  %v1593_v43 = vld [vmem:[#allocation2 + $0x34] sm:$0x1]  ;;  %v1667_v9 = vrot.slane %v1665_v37, 5  ;;  %v1681_v3 = vrot.slane %v1679_v33, 5  ;;  %v13929_v13 = vld [vmem:[#allocation4 + $0xd8] sm:$0xff]  }
 0x1f1   :  { %11471 = vmatmul.mubr.bf16.vlgmr.msra.gmra.mxu0 %v13867_v20  ;;  %v1690_v39 = vor.u32 %v1689_v28, %v1686_v18  ;;  %v1693_v6 = vshll.u32 %v1593_v43, 16  ;;  %v1707_v41 = vshll.u32 %v1595_v7, 16  ;;  %v12614_v21 = vld [vmem:[#allocation2 + $0x90] ss:$8 sps:$4 sm:$0xff]   ;;  %v13952_v37 = vld [vmem:[#allocation4 + $0xc0] sm:$0xff]  }
 0x1f2   :  { %11474 = vmatprep.mubr.bf16.mxu0 %v13871_v35  ;;  %11503 = vmatpush3.bf16.msra.mxu0 %v12815_v55  ;;  %v2929_v17 = vrot.slane %v2928_v29, 4  ;;  %v1639_v55 = vrot.slane %v1637_v60, 5  ;;  %v1682_v30 = vsel %vm13819_vm9, %v1677_v11, %v1681_v3  ;;  %v13936_v54 = vld [vmem:[#allocation4 + $0xd0] sm:$0xff]   ;;  %v13960_v11 = vld [vmem:[#allocation2 + $0xd8] ss:$8 sps:$4 sm:$0xff]  }
 0x1f3   :  { %11319 = vmatpush3.bf16.msra.mxu1 %v12603_v31  ;;  %11504 = vmatprep.subr.bf16.mxu0 %v13751_v32  ;;  %v1698_v31 = vshrl.u32 %v1594_v57, 16  ;;  %v1654_v57 = vsel %vm13819_vm9, %v1649_v34, %v1653_v22  ;;  %v1709_v25 = vrot.slane %v1707_v41, 5  ;;  %v145_v34 = vld [vmem:[#allocation2 + $0x6c] sm:$0x1]  ;;  %v148_v18 = vld [vmem:[#allocation2 + $0x74] sm:$0x1] }
 0x1f4   :  { %11320 = vmatprep.subr.bf16.mxu1 %v12605_v14  ;;  %v2934_v42 = vsel %vm13819_vm9, %v2929_v17, %v2933_v58  ;;  %v1640_v5 = vsel %vm13819_vm9, %v1635_v51, %v1639_v55  ;;  %v13924_v58 = vld [vmem:[#allocation4 + $0xe0] sm:$0xff]   ;;  %v2203_v55 = vld [vmem:[#allocation2 + $0x94] sm:$0x1]  ;;  %v2205_v22 = vld [vmem:[#allocation2 + $0x9c] sm:$0x1]  ;;  %v149_v43 = vsel %vm13185_vm3, 0, %v148_v18 }
 0x1f5   :  { %v13887_v45 = vcombine.low %v2934_v42, %v2948_v48  ;;  %v1700_v12 = vrot.slane %v1698_v31, 4  ;;  %v13906_v29 = vcombine.low %v1640_v5, %v1654_v57  ;;  %v1691_v48 = vrot.slane %v1690_v39, 4  ;;  %v2202_v31 = vld [vmem:[#allocation2 + $0x90] sm:$0xf]  ;;  %v142_v42 = vld [vmem:[#allocation2 + $0x64] sm:$0x1] }
 0x1f6   :  { %11505 = vmatpush3.bf16.msra.mxu0 %v13751_v32  ;;  %v1703_v32 = vrot.slane %v1701_v52, 5  ;;  %v2204_v52 = vld [vmem:[#allocation2 + $0x98] sm:$0xf]  ;;  %v2219_v60 = vshrl.u32 %v2202_v31, 16  ;;  %v143_v33 = vsel %vm13185_vm3, 0, %v142_v42  ;;  %v2228_v7 = vshll.u32 %v2203_v55, 16 }
 0x1f7   :  { %11321 = vmatpush3.bf16.msra.mxu1 %v12605_v14  ;;  %11506 = vmatprep.subr.bf16.mxu0 %v13788_v27  ;;  %v1663_v14 = vrot.slane %v1662_v2, 4  ;;  %v139_v2 = vld [vmem:[#allocation2 + $0x5c] sm:$0x1]  ;;  %v2233_v26 = vshrl.u32 %v2204_v52, 16  ;;  %144 = vst [vmem:[#allocation2 + $0x64] sm:$0x1] %v143_v33 }
 0x1f8   :  { %11322 = vmatprep.subr.bf16.mxu1 %v12607_v63  ;;  %v140_v51 = vsel %vm13185_vm3, 0, %v139_v2  ;;  %v2221_v28 = vrot.slane %v2219_v60, 4  ;;  %150 = vst [vmem:[#allocation2 + $0x74] sm:$0x1] %v149_v43  ;;  %v2242_v5 = vshll.u32 %v2205_v22, 16  ;;  %v14002_v22 = vld [vmem:[#allocation4 + $0x158] sm:$0xff]  }
 0x1f9   :  { %11475 = vmatmul.mubr.bf16.gmra.mxu0 %v13887_v45  ;;  %141 = vst [vmem:[#allocation2 + $0x5c] sm:$0x1] %v140_v51  ;;  %v151_v57 = vld [vmem:[#allocation2 + $0x7c] sm:$0x1]  ;;  %v154_v39 = vld [vmem:[#allocation2 + $0x84] sm:$0x1] }
 0x1fa   :  { %11507 = vmatpush3.bf16.msra.mxu0 %v13788_v27  ;;  %11518 = vmatprep.mubr.bf16.mxu0 %v13749_v46  ;;  %v1704_v27 = vor.u32 %v1703_v32, %v1700_v12  ;;  %v1668_v46 = vsel %vm13819_vm9, %v1663_v14, %v1667_v9  ;;  %v2235_v32 = vrot.slane %v2233_v26, 4  ;;  %v146_v14 = vsel %vm13185_vm3, 0, %v145_v34  ;;  %v12622_v41 = vld [vmem:[#allocation2 + $0xb0] ss:$8 sps:$4 sm:$0xff]   ;;  %v3598_v42 = vld [vmem:[#allocation2 + $0xe4] sm:$0x1] }
 0x1fb   :  { %11323 = vmatpush3.bf16.msra.mxu1 %v12607_v63  ;;  %11508 = vmatprep.subr.bf16.mxu0 %v13795_v40  ;;  %v12612_v63 = vld [vmem:[#allocation4 + $0xf0] sm:$0xff]   ;;  %v13909_v36 = vcombine.low %v1668_v46, %v1682_v30  ;;  %147 = vst [vmem:[#allocation2 + $0x6c] sm:$0x1] %v146_v14  ;;  %v12624_v60 = vld [vmem:[#allocation2 + $0xc0] ss:$8 sps:$4 sm:$0xff]  }
 0x1fc   :  { %11324 = vmatprep.subr.bf16.mxu1 %v12609_v0  ;;  %v1705_v49 = vrot.slane %v1704_v27, 4  ;;  %v12620_v27 = vld [vmem:[#allocation2 + $0xa0] ss:$8 sps:$4 sm:$0xff]   ;;  %v13974_v46 = vld [vmem:[#allocation4 + $0x170] sm:$0xff]   ;;  %v2212_v51 = vld [vmem:[#allocation2 + $0xb8] sm:$0xf] }
 0x1fd   :  { %v2208_v26 = vld [vmem:[#allocation2 + $0xa8] sm:$0xf] }
 0x1fe   :  { %11509 = vmatpush3.bf16.msra.mxu0 %v13795_v40  ;;  %v1695_v40 = vrot.slane %v1693_v6, 5  ;;  %v1710_v17 = vsel %vm13819_vm9, %v1705_v49, %v1709_v25  ;;  %v2230_v49 = vrot.slane %v2228_v7, 5  ;;  %v3597_v25 = vld [vmem:[#allocation2 + $0xe0] sm:$0xf]  ;;  %v2261_v14 = vshrl.u32 %v2208_v26, 16 }
 0x1ff   :  { %11325 = vmatpush3.bf16.msra.mxu1 %v12609_v0  ;;  %11510 = vmatprep.subr.bf16.mxu0 %v13803_v47  ;;  %v2236_v0 = vshll.u32 %v2204_v52, 16  ;;  %v3596_v52 = vld [vmem:[#allocation2 + $0xdc] sm:$0x1]  ;;  %v2264_v55 = vshll.u32 %v2208_v26, 16 }
 0x200   :  { %11334 = vmatprep.subr.bf16.mxu1 %v13891_v53  ;;  %v1696_v19 = vsel %vm13819_vm9, %v1691_v48, %v1695_v40  ;;  %v152_v48 = vsel %vm13185_vm3, 0, %v151_v57  ;;  %v2244_v40 = vrot.slane %v2242_v5, 5  ;;  %v14005_v57 = vld [vmem:[#allocation4 + $0x150] sm:$0xff]  }
 0x201   :  { %153 = vst [vmem:[#allocation2 + $0x7c] sm:$0x1] %v152_v48  ;;  %v2214_v48 = vld [vmem:[#allocation2 + $0xc0] sm:$0xf] }
 0x202   :  { %11327 = vmatmul.mubr.bf16.vlgmr.msra.gmra.mxu1 %v13906_v29  ;;  %11511 = vmatpush3.bf16.msra.mxu0 %v13803_v47  ;;  %v13922_v47 = vcombine.low %v1696_v19, %v1710_v17  ;;  %v13983_v19 = vld [vmem:[#allocation4 + $0x168] sm:$0xff]  }
 0x203   :  { %11330 = vmatprep.mubr.bf16.mxu1 %v13909_v36  ;;  %11335 = vmatpush3.bf16.msra.mxu1 %v13891_v53 }
 0x204   :  { %11336 = vmatprep.subr.bf16.mxu1 %v12612_v63  ;;  %11512 = vmatprep.subr.bf16.mxu0 %v13807_v1 }
 0x206   :  { %11513 = vmatpush3.bf16.msra.mxu0 %v13807_v1  ;;  %v133_v1 = vld [vmem:[#allocation2 + $0x4c] sm:$0x1] }
 0x207   :  { %11337 = vmatpush3.bf16.msra.mxu1 %v12612_v63  ;;  %11514 = vmatprep.subr.bf16.mxu0 %v13811_v44 }
 0x208   :  { %11338 = vmatprep.subr.bf16.mxu1 %v12613_v15 }
 0x20a   :  { %11331 = vmatmul.mubr.bf16.gmra.mxu1 %v13922_v47  ;;  %11515 = vmatpush3.bf16.msra.mxu0 %v13811_v44  ;;  %v136_v44 = vld [vmem:[#allocation2 + $0x54] sm:$0x1] }
 0x20b   :  { %11339 = vmatpush3.bf16.msra.mxu1 %v12613_v15  ;;  %11350 = vmatprep.mubr.bf16.mxu1 %v12614_v21  ;;  %v137_v10 = vsel %vm13185_vm3, 0, %v136_v44  ;;  %v2206_v21 = vld [vmem:[#allocation2 + $0xa0] sm:$0xf]  ;;  %v3626_v44 = vshrl.u32 %v3597_v25, 16 }
 0x20c   :  { %11340 = vmatprep.subr.bf16.mxu1 %v13924_v58  ;;  %11516 = vmatprep.subr.bf16.mxu0 %v13815_v4  ;;  %138 = vst [vmem:[#allocation2 + $0x54] sm:$0x1] %v137_v10  ;;  %v2247_v2 = vshrl.u32 %v2206_v21, 16  ;;  %v2250_v10 = vshll.u32 %v2206_v21, 16  ;;  %v2211_v21 = vld [vmem:[#allocation2 + $0xb4] sm:$0x1] }
 0x20d   :  { %v3628_v33 = vrot.slane %v3626_v44, 4  ;;  %v157_v44 = vld [vmem:[#allocation2 + $0x8c] sm:$0x1] }
 0x20e   :  { %11517 = vmatpush3.bf16.msra.mxu0 %v13815_v4  ;;  %v134_v4 = vsel %vm13185_vm3, 0, %v133_v1 }
 0x20f   :  { %11341 = vmatpush3.bf16.msra.mxu1 %v13924_v58  ;;  %11550 = vmatprep.subr.bf16.mxu0 %v13891_v53  ;;  %135 = vst [vmem:[#allocation2 + $0x4c] sm:$0x1] %v134_v4  ;;  %v13992_v4 = vld [vmem:[#allocation4 + $0x160] sm:$0xff]  }
 0x210   :  { %11342 = vmatprep.subr.bf16.mxu1 %v13929_v13 }
 0x211   :  { %11519 = vmatmul.mubr.bf16.vlgmr.msra.gmra.mxu0 %v13764_v62  ;;  %v13947_v62 = vld [vmem:[#allocation4 + $0xc8] sm:$0xff]  }
 0x212   :  { %11522 = vmatprep.mubr.bf16.mxu0 %v13766_v38  ;;  %11551 = vmatpush3.bf16.msra.mxu0 %v13891_v53  ;;  %v2222_v38 = vshll.u32 %v2202_v31, 16  ;;  %v2238_v53 = vrot.slane %v2236_v0, 5  ;;  %v3629_v31 = vshll.u32 %v3597_v25, 16  ;;  %v2210_v0 = vld [vmem:[#allocation2 + $0xb0] sm:$0xf] }
 0x213   :  { %11343 = vmatpush3.bf16.msra.mxu1 %v13929_v13  ;;  %11552 = vmatprep.subr.bf16.mxu0 %v12612_v63  ;;  %v2275_v43 = vshrl.u32 %v2210_v0, 16 }
 0x214   :  { %11344 = vmatprep.subr.bf16.mxu1 %v13936_v54  ;;  %v2224_v12 = vrot.slane %v2222_v38, 5  ;;  %v2239_v3 = vor.u32 %v2238_v53, %v2235_v32  ;;  %v3631_v18 = vrot.slane %v3629_v31, 5  ;;  %v2249_v32 = vrot.slane %v2247_v2, 4  ;;  %v2213_v31 = vld [vmem:[#allocation2 + $0xbc] sm:$0x1] }
 0x215   :  { %v2252_v53 = vrot.slane %v2250_v10, 5  ;;  %v2277_v25 = vrot.slane %v2275_v43, 4  ;;  %v2303_v2 = vshrl.u32 %v2214_v48, 16  ;;  %v2306_v10 = vshll.u32 %v2214_v48, 16 }
 0x216   :  { %11553 = vmatpush3.bf16.msra.mxu0 %v12612_v63  ;;  %v2225_v9 = vor.u32 %v2224_v12, %v2221_v28  ;;  %v2240_v6 = vrot.slane %v2239_v3, 4  ;;  %v3595_v63 = vld [vmem:[#allocation2 + $0xd8] sm:$0xf]  ;;  %v3621_v28 = vshll.u32 %v3596_v52, 16  ;;  %v3635_v12 = vshll.u32 %v3598_v42, 16 }
 0x217   :  { %11345 = vmatpush3.bf16.msra.mxu1 %v13936_v54  ;;  %11554 = vmatprep.subr.bf16.mxu0 %v12613_v15  ;;  %v3615_v1 = vshll.u32 %v3595_v63, 16  ;;  %v2289_v3 = vshrl.u32 %v2212_v51, 16  ;;  %v3632_v5 = vor.u32 %v3631_v18, %v3628_v33  ;;  %v14014_v52 = vld [vmem:[#allocation2 + $0xf8] ss:$8 sps:$4 sm:$0xff]   ;;  %v2284_v18 = vshll.u32 %v2211_v21, 16 }
 0x218   :  { %11346 = vmatprep.subr.bf16.mxu1 %v13947_v62  ;;  %v2226_v30 = vrot.slane %v2225_v9, 4  ;;  %v2278_v9 = vshll.u32 %v2210_v0, 16  ;;  %v2308_v43 = vrot.slane %v2306_v10, 5 }
 0x219   :  { %11523 = vmatmul.mubr.bf16.gmra.mxu0 %v13798_v8  ;;  %v13968_v8 = vld [vmem:[#allocation4 + $0x178] sm:$0xff]  }
 0x21a   :  { %11555 = vmatpush3.bf16.msra.mxu0 %v12613_v15  ;;  %11566 = vmatprep.mubr.bf16.mxu0 %v13960_v11  ;;  %v155_v15 = vsel %vm13185_vm3, 0, %v154_v39  ;;  %v2231_v17 = vsel %vm13819_vm9, %v2226_v30, %v2230_v49  ;;  %v2207_v39 = vld [vmem:[#allocation2 + $0xa4] sm:$0x1]  ;;  %v3637_v30 = vrot.slane %v3635_v12, 5  ;;  %v2216_v49 = vld [vmem:[#allocation2 + $0xc8] sm:$0xf] }
 0x21b   :  { %11347 = vmatpush3.bf16.msra.mxu1 %v13947_v62  ;;  %11556 = vmatprep.subr.bf16.mxu0 %v13924_v58  ;;  %156 = vst [vmem:[#allocation2 + $0x84] sm:$0x1] %v155_v15  ;;  %v2280_v15 = vrot.slane %v2278_v9, 5  ;;  %v2317_v42 = vshrl.u32 %v2216_v49, 16  ;;  %v2256_v0 = vshll.u32 %v2207_v39, 16  ;;  %v14037_v39 = vld [vmem:[#allocation4 + $0x140] sm:$0xff]  }
 0x21c   :  { %11348 = vmatprep.subr.bf16.mxu1 %v13952_v37 }
 0x21d   :  { %v2281_v33 = vor.u32 %v2280_v15, %v2277_v25  ;;  %v2319_v9 = vrot.slane %v2317_v42, 4  ;;  %v14045_v15 = vld [vmem:[#allocation2 + $0x108] ss:$8 sps:$4 sm:$0xff]  }
 0x21e   :  { %11557 = vmatpush3.bf16.msra.mxu0 %v13924_v58  ;;  %v2245_v58 = vsel %vm13819_vm9, %v2240_v6, %v2244_v40  ;;  %v2253_v6 = vor.u32 %v2252_v53, %v2249_v32  ;;  %v2209_v40 = vld [vmem:[#allocation2 + $0xac] sm:$0x1]  ;;  %v158_v53 = vsel %vm13185_vm3, 0, %v157_v44 }
 0x21f   :  { %11349 = vmatpush3.bf16.msra.mxu1 %v13952_v37  ;;  %11558 = vmatprep.subr.bf16.mxu0 %v13929_v13  ;;  %v13996_v38 = vcombine.low %v2231_v17, %v2245_v58  ;;  %v2291_v17 = vrot.slane %v2289_v3, 4  ;;  %159 = vst [vmem:[#allocation2 + $0x8c] sm:$0x1] %v158_v53  ;;  %v3602_v53 = vld [vmem:[#allocation2 + $0xf4] sm:$0x1] }
 0x220   :  { %11382 = vmatprep.subr.bf16.mxu1 %v13968_v8  ;;  %v14019_v26 = vrot.slane %v2253_v6, 4 }
 0x222   :  { %11351 = vmatmul.mubr.bf16.vlgmr.msra.gmra.mxu1 %v12620_v27  ;;  %11559 = vmatpush3.bf16.msra.mxu0 %v13929_v13  ;;  %v3612_v13 = vshrl.u32 %v3595_v63, 16  ;;  %v3623_v27 = vrot.slane %v3621_v28, 5  ;;  %v2266_v63 = vrot.slane %v2264_v55, 5  ;;  %v2298_v28 = vshll.u32 %v2213_v31, 16 }
 0x223   :  { %11354 = vmatprep.mubr.bf16.mxu1 %v12622_v41  ;;  %11383 = vmatpush3.bf16.msra.mxu1 %v13968_v8  ;;  %v2263_v41 = vrot.slane %v2261_v14, 4  ;;  %v14032_v14 = vld [vmem:[#allocation2 + $0xc4] sm:$0x1]  ;;  %v2305_v55 = vrot.slane %v2303_v2, 4 }
 0x224   :  { %11384 = vmatprep.subr.bf16.mxu1 %v13974_v46  ;;  %11560 = vmatprep.subr.bf16.mxu0 %v13936_v54  ;;  %v3614_v34 = vrot.slane %v3612_v13, 4  ;;  %v2312_v25 = vshll.u32 %v14032_v14, 16 }
 0x226   :  { %11561 = vmatpush3.bf16.msra.mxu0 %v13936_v54  ;;  %v3617_v54 = vrot.slane %v3615_v1, 5  ;;  %v3633_v1 = vrot.slane %v3632_v5, 4  ;;  %v130_v5 = vld [vmem:[#allocation2 + $0xd0] sm:$0x1] }
 0x227   :  { %11385 = vmatpush3.bf16.msra.mxu1 %v13974_v46  ;;  %11562 = vmatprep.subr.bf16.mxu0 %v13947_v62  ;;  %v131_v44 = vsel %vm13185_vm3, 0, %v130_v5  ;;  %v14071_v5 = vld [vmem:[#allocation4 + $0x1f0] sm:$0xff]  }
 0x228   :  { %11386 = vmatprep.subr.bf16.mxu1 %v13983_v19  ;;  %v3618_v7 = vor.u32 %v3617_v54, %v3614_v34  ;;  %v14023_v34 = vld [vmem:[#allocation4 + $0x148] sm:$0xff]   ;;  %v2267_v54 = vor.u32 %v2266_v63, %v2263_v41  ;;  %v3638_v32 = vsel %vm13819_vm9, %v3633_v1, %v3637_v30  ;;  %v3601_v41 = vld [vmem:[#allocation2 + $0xf0] sm:$0xf]  ;;  %v3605_v1 = vld [vmem:[#allocation2 + $0x100] sm:$0xf] }
 0x229   :  { %v3654_v10 = vshrl.u32 %v3601_v41, 16  ;;  %v3657_v42 = vshll.u32 %v3601_v41, 16  ;;  %132 = vst [vmem:[#allocation2 + $0xd0] sm:$0x1] %v131_v44 }
 0x22a   :  { %11355 = vmatmul.mubr.bf16.gmra.mxu1 %v12624_v60  ;;  %11563 = vmatpush3.bf16.msra.mxu0 %v13947_v62  ;;  %v2292_v62 = vshll.u32 %v2212_v51, 16  ;;  %v3619_v13 = vrot.slane %v3618_v7, 4  ;;  %v2320_v60 = vshll.u32 %v2216_v49, 16  ;;  %v2270_v51 = vshll.u32 %v2209_v40, 16  ;;  %v3599_v7 = vld [vmem:[#allocation2 + $0xe8] sm:$0xf] }
 0x22b   :  { %11387 = vmatpush3.bf16.msra.mxu1 %v13983_v19  ;;  %11398 = vmatprep.mubr.bf16.mxu1 %v13996_v38  ;;  %v2286_v49 = vrot.slane %v2284_v18, 5  ;;  %v2217_v40 = vld [vmem:[#allocation2 + $0xcc] sm:$0x1]  ;;  %v3640_v31 = vshrl.u32 %v3599_v7, 16  ;;  %v3643_v2 = vshll.u32 %v3599_v7, 16  ;;  %v3682_v18 = vshrl.u32 %v3605_v1, 16 }
 0x22c   :  { %11388 = vmatprep.subr.bf16.mxu1 %v13992_v4  ;;  %11564 = vmatprep.subr.bf16.mxu0 %v13952_v37  ;;  %v2294_v58 = vrot.slane %v2292_v62, 5  ;;  %v3624_v12 = vsel %vm13819_vm9, %v3619_v13, %v3623_v27  ;;  %v2322_v3 = vrot.slane %v2320_v60, 5  ;;  %v2258_v62 = vrot.slane %v2256_v0, 5  ;;  %v3603_v13 = vld [vmem:[#allocation2 + $0xf8] sm:$0xf] }
 0x22d   :  { %v2268_v27 = vrot.slane %v2267_v54, 4  ;;  %v14039_v6 = vcombine.low %v3624_v12, %v3638_v32  ;;  %v2272_v48 = vrot.slane %v2270_v51, 5  ;;  %v14057_v60 = vld [vmem:[#allocation4 + $0x1f8] sm:$0xff]   ;;  %v2326_v51 = vshll.u32 %v2217_v40, 16  ;;  %v3600_v32 = vld [vmem:[#allocation2 + $0xec] sm:$0x1] }
 0x22e   :  { %11565 = vmatpush3.bf16.msra.mxu0 %v13952_v37  ;;  %v14011_v37 = vld [vmem:[#allocation2 + $0xe8] ss:$8 sps:$4 sm:$0xff]   ;;  %v2259_v63 = vsel %vm13819_vm9, %v14019_v26, %v2258_v62  ;;  %v2323_v21 = vor.u32 %v2322_v3, %v2319_v9  ;;  %v3668_v54 = vshrl.u32 %v3603_v13, 16  ;;  %v3642_v14 = vrot.slane %v3640_v31, 4  ;;  %v3604_v3 = vld [vmem:[#allocation2 + $0xfc] sm:$0x1] }
 0x22f   :  { %11389 = vmatpush3.bf16.msra.mxu1 %v13992_v4  ;;  %11598 = vmatprep.subr.bf16.mxu0 %v13968_v8  ;;  %v3659_v9 = vrot.slane %v3657_v42, 5  ;;  %v3609_v40 = vld [vmem:[#allocation2 + $0x110] sm:$0xf]  ;;  %v3677_v44 = vshll.u32 %v3604_v3, 16  ;;  %v14082_v31 = vld [vmem:[#allocation4 + $0x1e8] sm:$0xff]  }
 0x230   :  { %11390 = vmatprep.subr.bf16.mxu1 %v14002_v22  ;;  %v2324_v12 = vrot.slane %v2323_v21, 4  ;;  %v3606_v21 = vld [vmem:[#allocation2 + $0x104] sm:$0x1]  ;;  %v3713_v42 = vshll.u32 %v3609_v40, 16  ;;  %v14091_v3 = vld [vmem:[#allocation2 + $0x50] ss:$8 sps:$4 sm:$0xff]  }
 0x231   :  { %11567 = vmatmul.mubr.bf16.vlgmr.msra.gmra.mxu0 %v14011_v37 }
 0x232   :  { %11570 = vmatprep.mubr.bf16.mxu0 %v14014_v52  ;;  %11599 = vmatpush3.bf16.msra.mxu0 %v13968_v8  ;;  %v2295_v8 = vor.u32 %v2294_v58, %v2291_v17  ;;  %v2300_v17 = vrot.slane %v2298_v28, 5  ;;  %v2309_v58 = vor.u32 %v2308_v43, %v2305_v55  ;;  %v3645_v55 = vrot.slane %v3643_v2, 5 }
 0x233   :  { %11391 = vmatpush3.bf16.msra.mxu1 %v14002_v22  ;;  %11600 = vmatprep.subr.bf16.mxu0 %v13974_v46  ;;  %v3656_v43 = vrot.slane %v3654_v10, 4  ;;  %v3710_v10 = vshrl.u32 %v3609_v40, 16 }
 0x234   :  { %11392 = vmatprep.subr.bf16.mxu1 %v14005_v57  ;;  %v2296_v30 = vrot.slane %v2295_v8, 4  ;;  %v3685_v8 = vshll.u32 %v3605_v1, 16  ;;  %v2310_v28 = vrot.slane %v2309_v58, 4  ;;  %v3663_v58 = vshll.u32 %v3602_v53, 16  ;;  %v3610_v53 = vld [vmem:[#allocation2 + $0x114] sm:$0x1] }
 0x235   :  { %v3660_v1 = vor.u32 %v3659_v9, %v3656_v43  ;;  %v3715_v9 = vrot.slane %v3713_v42, 5 }
 0x236   :  { %11601 = vmatpush3.bf16.msra.mxu0 %v13974_v46  ;;  %v2282_v46 = vrot.slane %v2281_v33, 4  ;;  %v2301_v0 = vsel %vm13819_vm9, %v2296_v30, %v2300_v17  ;;  %v3671_v33 = vshll.u32 %v3603_v13, 16  ;;  %v3670_v30 = vrot.slane %v3668_v54, 4 }
 0x237   :  { %11393 = vmatpush3.bf16.msra.mxu1 %v14005_v57  ;;  %11602 = vmatprep.subr.bf16.mxu0 %v13983_v19  ;;  %v3649_v17 = vshll.u32 %v3600_v32, 16  ;;  %v3646_v13 = vor.u32 %v3645_v55, %v3642_v14  ;;  %v3665_v54 = vrot.slane %v3663_v58, 5  ;;  %v3679_v32 = vrot.slane %v3677_v44, 5  ;;  %v12635_v14 = vld [vmem:[#allocation4 + $0x1e0] sm:$0xff]  }
 0x238   :  { %11394 = vmatprep.subr.bf16.mxu1 %v14023_v34  ;;  %v2287_v26 = vsel %vm13819_vm9, %v2282_v46, %v2286_v49  ;;  %v3607_v46 = vld [vmem:[#allocation2 + $0x108] sm:$0xf]  ;;  %v3673_v41 = vrot.slane %v3671_v33, 5  ;;  %v3687_v49 = vrot.slane %v3685_v8, 5  ;;  %v3608_v33 = vld [vmem:[#allocation2 + $0x10c] sm:$0x1] }
 0x239   :  { %11571 = vmatmul.mubr.bf16.gmra.mxu0 %v14045_v15  ;;  %v14069_v7 = vcombine.low %v2287_v26, %v2301_v0  ;;  %v3699_v2 = vshll.u32 %v3607_v46, 16  ;;  %v3691_v0 = vshll.u32 %v3606_v21, 16  ;;  %v3719_v58 = vshll.u32 %v3610_v53, 16  ;;  %v12823_v53 = vld [vmem:[#allocation4 + $0x60] sm:$0xff]  }
 0x23a   :  { %11603 = vmatpush3.bf16.msra.mxu0 %v13983_v19  ;;  %11614 = vmatprep.mubr.bf16.mxu0 %v14039_v6  ;;  %v2273_v19 = vsel %vm13819_vm9, %v2268_v27, %v2272_v48  ;;  %v2328_v27 = vrot.slane %v2326_v51, 5  ;;  %v3684_v48 = vrot.slane %v3682_v18, 4  ;;  %v3651_v51 = vrot.slane %v3649_v17, 5  ;;  %v70_v18 = vld [vmem:[#allocation2 + $0xd4] sm:$0x1] }
 0x23b   :  { %11395 = vmatpush3.bf16.msra.mxu1 %v14023_v34  ;;  %11604 = vmatprep.subr.bf16.mxu0 %v13992_v4  ;;  %v14066_v62 = vcombine.low %v2259_v63, %v2273_v19  ;;  %v3674_v19 = vor.u32 %v3673_v41, %v3670_v30  ;;  %v3701_v43 = vrot.slane %v3699_v2, 5  ;;  %v71_v30 = vsel %vm13185_vm3, 0, %v70_v18 }
 0x23c   :  { %11396 = vmatprep.subr.bf16.mxu1 %v14037_v39  ;;  %v3688_v26 = vor.u32 %v3687_v49, %v3684_v48  ;;  %72 = vst [vmem:[#allocation2 + $0xd4] sm:$0x1] %v71_v30  ;;  %v3705_v48 = vshll.u32 %v3608_v33, 16  ;;  %v12636_v49 = vld [vmem:[#allocation4 + $0x1d8] sm:$0xff]  }
 0x23d   :  { %v14133_v33 = vld [vmem:[#allocation2 + $0x70] ss:$8 sps:$4 sm:$0xff]  }
 0x23e   :  { %11605 = vmatpush3.bf16.msra.mxu0 %v13992_v4  ;;  %v2314_v4 = vrot.slane %v2312_v25, 5  ;;  %v2329_v25 = vsel %vm13819_vm9, %v2324_v12, %v2328_v27  ;;  %v3661_v12 = vrot.slane %v3660_v1, 4  ;;  %v3689_v27 = vrot.slane %v3688_v26, 4  ;;  %v12637_v1 = vld [vmem:[#allocation4 + $0x1d0] sm:$0xff]  }
 0x23f   :  { %11397 = vmatpush3.bf16.msra.mxu1 %v14037_v39  ;;  %11606 = vmatprep.subr.bf16.mxu0 %v14002_v22 }
 0x240   :  { %11430 = vmatprep.subr.bf16.mxu1 %v14057_v60  ;;  %v2315_v63 = vsel %vm13819_vm9, %v2310_v28, %v2314_v4  ;;  %v3647_v28 = vrot.slane %v3646_v13, 4  ;;  %v3675_v4 = vrot.slane %v3674_v19, 4  ;;  %v3666_v40 = vsel %vm13819_vm9, %v3661_v12, %v3665_v54  ;;  %v12820_v54 = vld [vmem:[#allocation4 + $0x78] sm:$0xff]   ;;  %v14139_v12 = vld [vmem:[#allocation2 + $0x80] ss:$8 sps:$4 sm:$0xff]  }
 0x241   :  { %v14087_v8 = vcombine.low %v2315_v63, %v2329_v25  ;;  %v3707_v13 = vrot.slane %v3705_v48, 5 }
 0x242   :  { %11399 = vmatmul.mubr.bf16.vlgmr.msra.gmra.mxu1 %v14066_v62  ;;  %11607 = vmatpush3.bf16.msra.mxu0 %v14002_v22  ;;  %v3696_v22 = vshrl.u32 %v3607_v46, 16  ;;  %v3693_v46 = vrot.slane %v3691_v0, 5  ;;  %v3652_v41 = vsel %vm13819_vm9, %v3647_v28, %v3651_v51  ;;  %v75_v0 = vld [vmem:[#allocation2 + $0x11c] sm:$0x1]  ;;  %v14131_v51 = vld [vmem:[#allocation2 + $0x60] ss:$8 sps:$4 sm:$0xff]  }
 0x243   :  { %11402 = vmatprep.mubr.bf16.mxu1 %v14069_v7  ;;  %11431 = vmatpush3.bf16.msra.mxu1 %v14057_v60  ;;  %v14109_v25 = vcombine.low %v3652_v41, %v3666_v40  ;;  %v3233_v40 = vld [vmem:[#allocation2 + $0x4c] sm:$0x1] }
 0x244   :  { %11432 = vmatprep.subr.bf16.mxu1 %v14071_v5  ;;  %11608 = vmatprep.subr.bf16.mxu0 %v14005_v57  ;;  %v3698_v55 = vrot.slane %v3696_v22, 4  ;;  %v3694_v21 = vsel %vm13819_vm9, %v3689_v27, %v3693_v46  ;;  %v12826_v46 = vld [vmem:[#allocation4 + $0x48] sm:$0xff]  }
 0x246   :  { %11609 = vmatpush3.bf16.msra.mxu0 %v14005_v57  ;;  %v3712_v57 = vrot.slane %v3710_v10, 4  ;;  %v3702_v63 = vor.u32 %v3701_v43, %v3698_v55  ;;  %v3721_v10 = vrot.slane %v3719_v58, 5  ;;  %v3232_v55 = vld [vmem:[#allocation2 + $0x48] sm:$0xf]  ;;  %v3234_v43 = vld [vmem:[#allocation2 + $0x50] sm:$0xf] }
 0x247   :  { %11433 = vmatpush3.bf16.msra.mxu1 %v14071_v5  ;;  %11610 = vmatprep.subr.bf16.mxu0 %v14023_v34  ;;  %v3266_v27 = vshll.u32 %v3234_v43, 16 }
 0x248   :  { %11434 = vmatprep.subr.bf16.mxu1 %v14082_v31  ;;  %v3716_v17 = vor.u32 %v3715_v9, %v3712_v57  ;;  %v3703_v22 = vrot.slane %v3702_v63, 4  ;;  %v12825_v57 = vld [vmem:[#allocation4 + $0x50] sm:$0xff]   ;;  %v3252_v9 = vshll.u32 %v3232_v55, 16 }
 0x249   :  { %v3235_v63 = vld [vmem:[#allocation2 + $0x54] sm:$0x1] }
 0x24a   :  { %11403 = vmatmul.mubr.bf16.gmra.mxu1 %v14087_v8  ;;  %11611 = vmatpush3.bf16.msra.mxu0 %v14023_v34  ;;  %v3680_v34 = vsel %vm13819_vm9, %v3675_v4, %v3679_v32  ;;  %v3717_v2 = vrot.slane %v3716_v17, 4  ;;  %v3708_v42 = vsel %vm13819_vm9, %v3703_v22, %v3707_v13  ;;  %v12822_v32 = vld [vmem:[#allocation4 + $0x68] sm:$0xff]   ;;  %v3263_v4 = vshrl.u32 %v3234_v43, 16  ;;  %v12827_v17 = vld [vmem:[#allocation4 + $0x40] sm:$0xff]  }
 0x24b   :  { %11435 = vmatpush3.bf16.msra.mxu1 %v14082_v31  ;;  %11446 = vmatprep.mubr.bf16.mxu1 %v14091_v3  ;;  %v14112_v44 = vcombine.low %v3680_v34, %v3694_v21  ;;  %v3254_v41 = vrot.slane %v3252_v9, 5  ;;  %v3258_v34 = vshll.u32 %v3233_v40, 16  ;;  %v3272_v13 = vshll.u32 %v3235_v63, 16  ;;  %v14172_v43 = vld [vmem:[#allocation4 + $0xa0] sm:$0xff]  }
 0x24c   :  { %11436 = vmatprep.subr.bf16.mxu1 %v12635_v14  ;;  %11612 = vmatprep.subr.bf16.mxu0 %v14037_v39  ;;  %v3722_v19 = vsel %vm13819_vm9, %v3717_v2, %v3721_v10  ;;  %v3265_v48 = vrot.slane %v3263_v4, 4  ;;  %v3239_v40 = vld [vmem:[#allocation2 + $0x64] sm:$0x1] }
 0x24d   :  { %v14123_v26 = vcombine.low %v3708_v42, %v3722_v19  ;;  %v3260_v22 = vrot.slane %v3258_v34, 5  ;;  %v3274_v10 = vrot.slane %v3272_v13, 5  ;;  %v14155_v42 = vld [vmem:[#allocation4 + $0xb0] sm:$0xff]   ;;  %v3244_v13 = vld [vmem:[#allocation2 + $0x78] sm:$0xf] }
 0x24e   :  { %11613 = vmatpush3.bf16.msra.mxu0 %v14037_v39  ;;  %v12638_v39 = vld [vmem:[#allocation4 + $0x1c8] sm:$0xff]  }
 0x24f   :  { %11437 = vmatpush3.bf16.msra.mxu1 %v12635_v14  ;;  %11646 = vmatprep.subr.bf16.mxu0 %v14057_v60 }
 0x250   :  { %11438 = vmatprep.subr.bf16.mxu1 %v12636_v49 }
 0x251   :  { %11615 = vmatmul.mubr.bf16.vlgmr.msra.gmra.mxu0 %v14109_v25 }
 0x252   :  { %11618 = vmatprep.mubr.bf16.mxu0 %v14112_v44  ;;  %11647 = vmatpush3.bf16.msra.mxu0 %v14057_v60  ;;  %v12639_v60 = vld [vmem:[#allocation4 + $0x1c0] sm:$0xff]  }
 0x253   :  { %11439 = vmatpush3.bf16.msra.mxu1 %v12636_v49  ;;  %11648 = vmatprep.subr.bf16.mxu0 %v14071_v5 }
 0x254   :  { %11440 = vmatprep.subr.bf16.mxu1 %v12637_v1 }
 0x256   :  { %11649 = vmatpush3.bf16.msra.mxu0 %v14071_v5  ;;  %v76_v5 = vsel %vm13185_vm3, 0, %v75_v0  ;;  %v3236_v0 = vld [vmem:[#allocation2 + $0x58] sm:$0xf] }
 0x257   :  { %11441 = vmatpush3.bf16.msra.mxu1 %v12637_v1  ;;  %11650 = vmatprep.subr.bf16.mxu0 %v14082_v31  ;;  %77 = vst [vmem:[#allocation2 + $0x11c] sm:$0x1] %v76_v5  ;;  %v3238_v5 = vld [vmem:[#allocation2 + $0x60] sm:$0xf] }
 0x258   :  { %11442 = vmatprep.subr.bf16.mxu1 %v12638_v39 }
 0x259   :  { %11619 = vmatmul.mubr.bf16.gmra.mxu0 %v14123_v26 }
 0x25a   :  { %11651 = vmatpush3.bf16.msra.mxu0 %v14082_v31  ;;  %11662 = vmatprep.mubr.bf16.mxu0 %v13829_v56  ;;  %v12821_v31 = vld [vmem:[#allocation4 + $0x70] sm:$0xff]  }
 0x25b   :  { %11443 = vmatpush3.bf16.msra.mxu1 %v12638_v39  ;;  %11652 = vmatprep.subr.bf16.mxu0 %v12635_v14 }
 0x25c   :  { %11444 = vmatprep.subr.bf16.mxu1 %v12639_v60 }
 0x25e   :  { %11653 = vmatpush3.bf16.msra.mxu0 %v12635_v14  ;;  %v185_v18 = vld [vmem:[#allocation2 + $0x11c] sm:$0x1] }
 0x25f   :  { %11445 = vmatpush3.bf16.msra.mxu1 %v12639_v60  ;;  %11654 = vmatprep.subr.bf16.mxu0 %v12636_v49  ;;  %v186_v28 = vsel %vm13185_vm3, 0, %v185_v18  ;;  %v12824_v14 = vld [vmem:[#allocation4 + $0x58] sm:$0xff]   ;;  %v3242_v18 = vld [vmem:[#allocation2 + $0x70] sm:$0xf] }
 0x260   :  { %11478 = vmatprep.subr.bf16.mxu1 %v12820_v54  ;;  %187 = vst [vmem:[#allocation2 + $0x11c] sm:$0x1] %v186_v28  ;;  %v3277_v28 = vshrl.u32 %v3236_v0, 16  ;;  %v3319_v9 = vshrl.u32 %v3242_v18, 16 }
 0x262   :  { %11447 = vmatmul.mubr.bf16.vlgmr.msra.gmra.mxu1 %v14131_v51  ;;  %11655 = vmatpush3.bf16.msra.mxu0 %v12636_v49  ;;  %v3268_v49 = vrot.slane %v3266_v27, 5  ;;  %v3279_v4 = vrot.slane %v3277_v28, 4  ;;  %v3321_v34 = vrot.slane %v3319_v9, 4 }
 0x263   :  { %11450 = vmatprep.mubr.bf16.mxu1 %v14133_v33  ;;  %11479 = vmatpush3.bf16.msra.mxu1 %v12820_v54 }
 0x264   :  { %11480 = vmatprep.subr.bf16.mxu1 %v12821_v31  ;;  %11656 = vmatprep.subr.bf16.mxu0 %v12637_v1  ;;  %v3269_v21 = vor.u32 %v3268_v49, %v3265_v48  ;;  %v14179_v48 = vld [vmem:[#allocation4 + $0x98] sm:$0xff]  }
 0x265   :  { %v3237_v49 = vld [vmem:[#allocation2 + $0x5c] sm:$0x1] }
 0x266   :  { %11657 = vmatpush3.bf16.msra.mxu0 %v12637_v1  ;;  %v14147_v1 = vld [vmem:[#allocation4 + $0xb8] sm:$0xff]   ;;  %v3270_v2 = vrot.slane %v3269_v21, 4 }
 0x267   :  { %11481 = vmatpush3.bf16.msra.mxu1 %v12821_v31  ;;  %11658 = vmatprep.subr.bf16.mxu0 %v12638_v39 }
 0x268   :  { %11482 = vmatprep.subr.bf16.mxu1 %v12822_v32 }
 0x26a   :  { %11451 = vmatmul.mubr.bf16.gmra.mxu1 %v14139_v12  ;;  %11659 = vmatpush3.bf16.msra.mxu0 %v12638_v39 }
 0x26b   :  { %11483 = vmatpush3.bf16.msra.mxu1 %v12822_v32  ;;  %11494 = vmatprep.mubr.bf16.mxu1 %v13853_v24  ;;  %v3249_v24 = vshrl.u32 %v3232_v55, 16 }
 0x26c   :  { %11484 = vmatprep.subr.bf16.mxu1 %v12823_v53  ;;  %11660 = vmatprep.subr.bf16.mxu0 %v12639_v60 }
 0x26d   :  { %v3251_v30 = vrot.slane %v3249_v24, 4 }
 0x26e   :  { %11661 = vmatpush3.bf16.msra.mxu0 %v12639_v60  ;;  %v14165_v60 = vld [vmem:[#allocation4 + $0xa8] sm:$0xff]  }
 0x26f   :  { %11485 = vmatpush3.bf16.msra.mxu1 %v12823_v53  ;;  %11694 = vmatprep.subr.bf16.mxu0 %v12820_v54  ;;  %v3255_v58 = vor.u32 %v3254_v41, %v3251_v30 }
 0x270   :  { %11486 = vmatprep.subr.bf16.mxu1 %v12824_v14 }
 0x271   :  { %11663 = vmatmul.mubr.bf16.vlgmr.msra.gmra.mxu0 %v13867_v20 }
 0x272   :  { %11666 = vmatprep.mubr.bf16.mxu0 %v13871_v35  ;;  %11695 = vmatpush3.bf16.msra.mxu0 %v12820_v54 }
 0x273   :  { %11487 = vmatpush3.bf16.msra.mxu1 %v12824_v14  ;;  %11696 = vmatprep.subr.bf16.mxu0 %v12821_v31 }
 0x274   :  { %11488 = vmatprep.subr.bf16.mxu1 %v12825_v57 }
 0x276   :  { %11697 = vmatpush3.bf16.msra.mxu0 %v12821_v31  ;;  %v3240_v31 = vld [vmem:[#allocation2 + $0x68] sm:$0xf] }
 0x277   :  { %11489 = vmatpush3.bf16.msra.mxu1 %v12825_v57  ;;  %11698 = vmatprep.subr.bf16.mxu0 %v12822_v32  ;;  %v3308_v24 = vshll.u32 %v3240_v31, 16 }
 0x278   :  { %11490 = vmatprep.subr.bf16.mxu1 %v12826_v46 }
 0x279   :  { %11667 = vmatmul.mubr.bf16.gmra.mxu0 %v13887_v45 }
 0x27a   :  { %11699 = vmatpush3.bf16.msra.mxu0 %v12822_v32  ;;  %11710 = vmatprep.mubr.bf16.mxu0 %v13960_v11  ;;  %v3256_v11 = vrot.slane %v3255_v58, 4  ;;  %v3280_v32 = vshll.u32 %v3236_v0, 16  ;;  %v3310_v58 = vrot.slane %v3308_v24, 5 }
 0x27b   :  { %11491 = vmatpush3.bf16.msra.mxu1 %v12826_v46  ;;  %11700 = vmatprep.subr.bf16.mxu0 %v12823_v53 }
 0x27c   :  { %11492 = vmatprep.subr.bf16.mxu1 %v12827_v17  ;;  %v3261_v19 = vsel %vm13819_vm9, %v3256_v11, %v3260_v22  ;;  %v3282_v27 = vrot.slane %v3280_v32, 5  ;;  %v3243_v11 = vld [vmem:[#allocation2 + $0x74] sm:$0x1]  ;;  %v3246_v22 = vld [vmem:[#allocation2 + $0x80] sm:$0xf] }
 0x27d   :  { %v3347_v28 = vshrl.u32 %v3246_v22, 16  ;;  %v3350_v32 = vshll.u32 %v3246_v22, 16 }
 0x27e   :  { %11701 = vmatpush3.bf16.msra.mxu0 %v12823_v53  ;;  %v3291_v53 = vshrl.u32 %v3238_v5, 16 }
 0x27f   :  { %11493 = vmatpush3.bf16.msra.mxu1 %v12827_v17  ;;  %11702 = vmatprep.subr.bf16.mxu0 %v12824_v14 }
 0x280   :  { %11526 = vmatprep.subr.bf16.mxu1 %v14147_v1 }
 0x282   :  { %11495 = vmatmul.mubr.bf16.vlgmr.msra.gmra.mxu1 %v13906_v29  ;;  %11703 = vmatpush3.bf16.msra.mxu0 %v12824_v14  ;;  %v14153_v39 = vpop.f32.mrf.mxu1  ;;  %v3275_v29 = vsel %vm13819_vm9, %v3270_v2, %v3274_v10  ;;  %v3294_v14 = vshll.u32 %v3238_v5, 16  ;;  %v3283_v2 = vor.u32 %v3282_v27, %v3279_v4  ;;  %v3286_v10 = vshll.u32 %v3237_v49, 16 }
 0x283   :  { %11498 = vmatprep.mubr.bf16.mxu1 %v13909_v36  ;;  %11527 = vmatpush3.bf16.msra.mxu1 %v14147_v1  ;;  %v10321_v54 = vcombine.low %v3261_v19, %v3275_v29  ;;  %v3300_v29 = vshll.u32 %v3239_v40, 16  ;;  %v3349_v40 = vrot.slane %v3347_v28, 4 }
 0x284   :  { %11528 = vmatprep.subr.bf16.mxu1 %v14155_v42  ;;  %11704 = vmatprep.subr.bf16.mxu0 %v12825_v57  ;;  %v14163_v36 = vpop.f32.mrf.mxu1  ;;  %v3296_v30 = vrot.slane %v3294_v14, 5  ;;  %v3288_v14 = vrot.slane %v3286_v10, 5 }
 0x285   :  { %v3302_v24 = vrot.slane %v3300_v29, 5 }
 0x286   :  { %11705 = vmatpush3.bf16.msra.mxu0 %v12825_v57  ;;  %v14170_v55 = vpop.f32.mrf.mxu1  ;;  %v3305_v57 = vshrl.u32 %v3240_v31, 16  ;;  %v3336_v31 = vshll.u32 %v3244_v13, 16 }
 0x287   :  { %11529 = vmatpush3.bf16.msra.mxu1 %v14155_v42  ;;  %11706 = vmatprep.subr.bf16.mxu0 %v12826_v46 }
 0x288   :  { %11530 = vmatprep.subr.bf16.mxu1 %v14165_v60  ;;  %v14177_v41 = vpop.f32.mrf.mxu1  ;;  %v3307_v63 = vrot.slane %v3305_v57, 4 }
 0x28a   :  { %11499 = vmatmul.mubr.bf16.gmra.mxu1 %v13922_v47  ;;  %11707 = vmatpush3.bf16.msra.mxu0 %v12826_v46  ;;  %v3322_v47 = vshll.u32 %v3242_v18, 16  ;;  %v3293_v46 = vrot.slane %v3291_v53, 4  ;;  %v14187_v0 = vpop.f32.mrf.mxu1  ;;  %v3311_v5 = vor.u32 %v3310_v58, %v3307_v63  ;;  %v3328_v18 = vshll.u32 %v3243_v11, 16  ;;  %v3245_v58 = vld [vmem:[#allocation2 + $0x7c] sm:$0x1] }
 0x28b   :  { %11531 = vmatpush3.bf16.msra.mxu1 %v14165_v60  ;;  %11542 = vmatprep.mubr.bf16.mxu1 %v10321_v54  ;;  %v3284_v53 = vrot.slane %v3283_v2, 4  ;;  %v3352_v63 = vrot.slane %v3350_v32, 5  ;;  %v3342_v2 = vshll.u32 %v3245_v58, 16  ;;  %v12840_v58 = vld [vmem:[#allocation4 + $0x118] sm:$0xff]  }
 0x28c   :  { %11532 = vmatprep.subr.bf16.mxu1 %v14172_v43  ;;  %11708 = vmatprep.subr.bf16.mxu0 %v12827_v17  ;;  %v3324_v21 = vrot.slane %v3322_v47, 5  ;;  %v3297_v19 = vor.u32 %v3296_v30, %v3293_v46  ;;  %v14195_v9 = vpop.f32.mrf.mxu1  ;;  %v14197_v47 = vld [vmem:[#allocation4 + $0x88] sm:$0xff]   ;;  %v3312_v4 = vrot.slane %v3311_v5, 4  ;;  %v3338_v30 = vrot.slane %v3336_v31, 5 }
 0x28d   :  { %v3353_v10 = vor.u32 %v3352_v63, %v3349_v40 }
 0x28e   :  { %11709 = vmatpush3.bf16.msra.mxu0 %v12827_v17  ;;  %v3241_v17 = vld [vmem:[#allocation2 + $0x6c] sm:$0x1]  ;;  %v3298_v57 = vrot.slane %v3297_v19, 4 }
 0x28f   :  { %11533 = vmatpush3.bf16.msra.mxu1 %v14172_v43  ;;  %11742 = vmatprep.subr.bf16.mxu0 %v14147_v1  ;;  %v3314_v54 = vshll.u32 %v3241_v17, 16  ;;  %v3247_v17 = vld [vmem:[#allocation2 + $0x84] sm:$0x1] }
 0x290   :  { %11534 = vmatprep.subr.bf16.mxu1 %v14179_v48  ;;  %v3303_v11 = vsel %vm13819_vm9, %v3298_v57, %v3302_v24  ;;  %v3356_v19 = vshll.u32 %v3247_v17, 16 }
 0x291   :  { %11711 = vmatmul.mubr.bf16.vlgmr.msra.gmra.mxu0 %v14011_v37  ;;  %v14189_v37 = vld [vmem:[#allocation4 + $0x90] sm:$0xff]   ;;  %v3316_v27 = vrot.slane %v3314_v54, 5  ;;  %v12836_v54 = vld [vmem:[#allocation4 + $0x138] sm:$0xff]  }
 0x292   :  { %11714 = vmatprep.mubr.bf16.mxu0 %v14014_v52  ;;  %11743 = vmatpush3.bf16.msra.mxu0 %v14147_v1  ;;  %v3333_v52 = vshrl.u32 %v3244_v13, 16  ;;  %v3325_v1 = vor.u32 %v3324_v21, %v3321_v34  ;;  %v11285_v34 = vpop.f32.mrf.mxu1  ;;  %v12835_v21 = vld [vmem:[#allocation4 + $0x80] sm:$0xff]   ;;  %v3289_v13 = vsel %vm13819_vm9, %v3284_v53, %v3288_v14  ;;  %v3358_v28 = vrot.slane %v3356_v19, 5  ;;  %v12837_v14 = vld [vmem:[#allocation4 + $0x130] sm:$0xff]   ;;  %v12846_v19 = vld [vmem:[#allocation4 + $0x1a8] sm:$0xff]  }
 0x293   :  { %11535 = vmatpush3.bf16.msra.mxu1 %v14179_v48  ;;  %11744 = vmatprep.subr.bf16.mxu0 %v14155_v42  ;;  %v10322_v5 = vcombine.low %v3289_v13, %v3303_v11 }
 0x294   :  { %11536 = vmatprep.subr.bf16.mxu1 %v14189_v37  ;;  %v3335_v46 = vrot.slane %v3333_v52, 4  ;;  %v3326_v49 = vrot.slane %v3325_v1, 4  ;;  %v14215_v29 = vpop.f32.mrf.mxu1  ;;  %v3344_v1 = vrot.slane %v3342_v2, 5 }
 0x295   :  { %16365 = vst [vmem:[#allocation50_spill] sm:$0xff] %v14215_v29 }
 0x296   :  { %11745 = vmatpush3.bf16.msra.mxu0 %v14155_v42  ;;  %v3330_v42 = vrot.slane %v3328_v18, 5  ;;  %v3339_v22 = vor.u32 %v3338_v30, %v3335_v46  ;;  %v3354_v18 = vrot.slane %v3353_v10, 4 }
 0x297   :  { %11537 = vmatpush3.bf16.msra.mxu1 %v14189_v37  ;;  %11746 = vmatprep.subr.bf16.mxu0 %v14165_v60 }
 0x298   :  { %11538 = vmatprep.subr.bf16.mxu1 %v14197_v47  ;;  %v3340_v31 = vrot.slane %v3339_v22, 4 }
 0x299   :  { %11715 = vmatmul.mubr.bf16.gmra.mxu0 %v14045_v15  ;;  %v3317_v15 = vsel %vm13819_vm9, %v3312_v4, %v3316_v27  ;;  %v3359_v4 = vsel %vm13819_vm9, %v3354_v18, %v3358_v28 }
 0x29a   :  { %11747 = vmatpush3.bf16.msra.mxu0 %v14165_v60  ;;  %11758 = vmatprep.mubr.bf16.mxu0 %v13996_v38  ;;  %v3331_v60 = vsel %vm13819_vm9, %v3326_v49, %v3330_v42  ;;  %v3345_v24 = vsel %vm13819_vm9, %v3340_v31, %v3344_v1  ;;  %v12847_v31 = vld [vmem:[#allocation4 + $0x1a0] sm:$0xff]  }
 0x29b   :  { %11539 = vmatpush3.bf16.msra.mxu1 %v14197_v47  ;;  %11748 = vmatprep.subr.bf16.mxu0 %v14172_v43  ;;  %v10323_v52 = vcombine.low %v3317_v15, %v3331_v60  ;;  %v10324_v46 = vcombine.low %v3345_v24, %v3359_v4  ;;  %v12845_v15 = vld [vmem:[#allocation4 + $0x1b0] sm:$0xff]  }
 0x29c   :  { %11540 = vmatprep.subr.bf16.mxu1 %v12835_v21 }
 0x29e   :  { %11749 = vmatpush3.bf16.msra.mxu0 %v14172_v43 }
 0x29f   :  { %11541 = vmatpush3.bf16.msra.mxu1 %v12835_v21  ;;  %11750 = vmatprep.subr.bf16.mxu0 %v14179_v48 }
 0x2a0   :  { %11574 = vmatprep.subr.bf16.mxu1 %v12836_v54 }
 0x2a2   :  { %v11304_v32 = vpop.f32.mrf.mxu1  ;;  %11543 = vmatmul.mubr.bf16.vlgmr.msra.gmra.mxu1 %v10322_v5  ;;  %11751 = vmatpush3.bf16.msra.mxu0 %v14179_v48 }
 0x2a3   :  { %v14219_v53 = vadd.f32 %v11304_v32, %v14153_v39  ;;  %11546 = vmatprep.mubr.bf16.mxu1 %v10323_v52  ;;  %11575 = vmatpush3.bf16.msra.mxu1 %v12836_v54  ;;  %v12848_v32 = vld [vmem:[#allocation4 + $0x198] sm:$0xff]  }
 0x2a4   :  { %v1549_v43 = vpop.f32.mrf.mxu1  ;;  %11576 = vmatprep.subr.bf16.mxu1 %v12837_v14  ;;  %11752 = vmatprep.subr.bf16.mxu0 %v14189_v37 }
 0x2a5   :  { %v14223_v57 = vadd.f32 %v1549_v43, %v14163_v36  ;;  %v12838_v36 = vld [vmem:[#allocation4 + $0x128] sm:$0xff]   ;;  %v3960_v43 = vld [vmem:[#allocation2 + $0x58] sm:$0xf] }
 0x2a6   :  { %v11305_v48 = vpop.f32.mrf.mxu1  ;;  %11753 = vmatpush3.bf16.msra.mxu0 %v14189_v37  ;;  %v3989_v24 = vshrl.u32 %v3960_v43, 16  ;;  %v3992_v4 = vshll.u32 %v3960_v43, 16 }
 0x2a7   :  { %v14231_v39 = vadd.f32 %v11305_v48, %v14170_v55  ;;  %11577 = vmatpush3.bf16.msra.mxu1 %v12837_v14  ;;  %11754 = vmatprep.subr.bf16.mxu0 %v14197_v47  ;;  %v12839_v55 = vld [vmem:[#allocation4 + $0x120] sm:$0xff]   ;;  %v14269_v48 = vld [vmem:[#allocation4 + $0x188] sm:$0xff]  }
 0x2a8   :  { %v14234_v27 = vpop.f32.mrf.mxu1  ;;  %11578 = vmatprep.subr.bf16.mxu1 %v12838_v36 }
 0x2aa   :  { %v11308_v30 = vpop.f32.mrf.mxu1  ;;  %11547 = vmatmul.mubr.bf16.gmra.mxu1 %v10324_v46  ;;  %11755 = vmatpush3.bf16.msra.mxu0 %v14197_v47  ;;  %v12843_v47 = vld [vmem:[#allocation4 + $0x100] sm:$0xff]  }
 0x2ab   :  { %v1574_v49 = vadd.f32 %v11308_v30, %v14187_v0  ;;  %11579 = vmatpush3.bf16.msra.mxu1 %v12838_v36  ;;  %11590 = vmatprep.mubr.bf16.mxu1 %v13996_v38  ;;  %v12841_v0 = vld [vmem:[#allocation4 + $0x110] sm:$0xff]   ;;  %v3994_v30 = vrot.slane %v3992_v4, 5  ;;  %v3962_v4 = vld [vmem:[#allocation2 + $0x60] sm:$0xf] }
 0x2ac   :  { %v1565_v37 = vpop.f32.mrf.mxu1  ;;  %11580 = vmatprep.subr.bf16.mxu1 %v12839_v55  ;;  %11756 = vmatprep.subr.bf16.mxu0 %v12835_v21 }
 0x2ad   :  { %v1566_v42 = vadd.f32 %v1565_v37, %v14195_v9  ;;  %v12842_v9 = vld [vmem:[#allocation4 + $0x108] sm:$0xff]   ;;  %v3959_v37 = vld [vmem:[#allocation2 + $0x54] sm:$0x1] }
 0x2ae   :  { %v11309_v40 = vpop.f32.mrf.mxu1  ;;  %11757 = vmatpush3.bf16.msra.mxu0 %v12835_v21 }
 0x2af   :  { %v1577_v63 = vadd.f32 %v11309_v40, %v11285_v34  ;;  %11581 = vmatpush3.bf16.msra.mxu1 %v12839_v55  ;;  %11790 = vmatprep.subr.bf16.mxu0 %v12836_v54  ;;  %v12844_v34 = vld [vmem:[#allocation4 + $0x1b8] sm:$0xff]  }
 0x2b0   :  { %11582 = vmatprep.subr.bf16.mxu1 %v12840_v58  ;;  %v14244_v17 = vpop.f32.mrf.mxu1 }
 0x2b1   :  { %11759 = vmatmul.mubr.bf16.vlgmr.msra.gmra.mxu0 %v14066_v62  ;;  %16366 = vst [vmem:[#allocation51_spill] sm:$0xff] %v14244_v17 }
 0x2b2   :  { %11762 = vmatprep.mubr.bf16.mxu0 %v14069_v7  ;;  %11791 = vmatpush3.bf16.msra.mxu0 %v12836_v54 }
 0x2b3   :  { %11583 = vmatpush3.bf16.msra.mxu1 %v12840_v58  ;;  %11792 = vmatprep.subr.bf16.mxu0 %v12837_v14 }
 0x2b4   :  { %11584 = vmatprep.subr.bf16.mxu1 %v12841_v0 }
 0x2b6   :  { %11793 = vmatpush3.bf16.msra.mxu0 %v12837_v14 }
 0x2b7   :  { %11585 = vmatpush3.bf16.msra.mxu1 %v12841_v0  ;;  %11794 = vmatprep.subr.bf16.mxu0 %v12838_v36 }
 0x2b8   :  { %11586 = vmatprep.subr.bf16.mxu1 %v12842_v9 }
 0x2b9   :  { %11763 = vmatmul.mubr.bf16.gmra.mxu0 %v14087_v8 }
 0x2ba   :  { %11795 = vmatpush3.bf16.msra.mxu0 %v12838_v36  ;;  %11806 = vmatprep.mubr.bf16.mxu0 %v14091_v3  ;;  %v3991_v36 = vrot.slane %v3989_v24, 4 }
 0x2bb   :  { %11587 = vmatpush3.bf16.msra.mxu1 %v12842_v9  ;;  %11796 = vmatprep.subr.bf16.mxu0 %v12839_v55 }
 0x2bc   :  { %11588 = vmatprep.subr.bf16.mxu1 %v12843_v47 }
 0x2be   :  { %11797 = vmatpush3.bf16.msra.mxu0 %v12839_v55  ;;  %v3961_v55 = vld [vmem:[#allocation2 + $0x5c] sm:$0x1] }
 0x2bf   :  { %11589 = vmatpush3.bf16.msra.mxu1 %v12843_v47  ;;  %11798 = vmatprep.subr.bf16.mxu0 %v12840_v58 }
 0x2c0   :  { %11622 = vmatprep.subr.bf16.mxu1 %v12844_v34 }
 0x2c2   :  { %v11328_v21 = vpop.f32.mrf.mxu1  ;;  %11591 = vmatmul.mubr.bf16.vlgmr.msra.gmra.mxu1 %v14066_v62  ;;  %11799 = vmatpush3.bf16.msra.mxu0 %v12840_v58  ;;  %v3995_v58 = vor.u32 %v3994_v30, %v3991_v36  ;;  %v14306_v36 = vld [vmem:[#allocation4 + $0x228] sm:$0xff]   ;;  %v3966_v30 = vld [vmem:[#allocation2 + $0x70] sm:$0xf] }
 0x2c3   :  { %v14248_v13 = vadd.f32 %v11328_v21, %v14219_v53  ;;  %11594 = vmatprep.mubr.bf16.mxu1 %v14069_v7  ;;  %11623 = vmatpush3.bf16.msra.mxu1 %v12844_v34  ;;  %v3958_v53 = vld [vmem:[#allocation2 + $0x50] sm:$0xf] }
 0x2c4   :  { %v1825_v11 = vpop.f32.mrf.mxu1  ;;  %11624 = vmatprep.subr.bf16.mxu1 %v12845_v15  ;;  %11800 = vmatprep.subr.bf16.mxu0 %v12841_v0  ;;  %v3975_v14 = vshrl.u32 %v3958_v53, 16 }
 0x2c5   :  { %v14252_v22 = vadd.f32 %v1825_v11, %v14223_v57  ;;  %v3978_v57 = vshll.u32 %v3958_v53, 16  ;;  %v3996_v11 = vrot.slane %v3995_v58, 4  ;;  %v4006_v58 = vshll.u32 %v3962_v4, 16 }
 0x2c6   :  { %v11329_v60 = vpop.f32.mrf.mxu1  ;;  %11801 = vmatpush3.bf16.msra.mxu0 %v12841_v0  ;;  %v3998_v0 = vshll.u32 %v3961_v55, 16 }
 0x2c7   :  { %v14255_v2 = vadd.f32 %v11329_v60, %v14231_v39  ;;  %11625 = vmatpush3.bf16.msra.mxu1 %v12845_v15  ;;  %11802 = vmatprep.subr.bf16.mxu0 %v12842_v9  ;;  %v3977_v39 = vrot.slane %v3975_v14, 4  ;;  %v3980_v46 = vrot.slane %v3978_v57, 5  ;;  %v4809_v60 = vld [vmem:[#allocation2 + $0x98] sm:$0xf] }
 0x2c8   :  { %v14257_v10 = vpop.f32.mrf.mxu1  ;;  %11626 = vmatprep.subr.bf16.mxu1 %v12846_v19  ;;  %v4829_v43 = vshll.u32 %v4809_v60, 16 }
 0x2c9   :  { %v3981_v40 = vor.u32 %v3980_v46, %v3977_v39  ;;  %v3964_v39 = vld [vmem:[#allocation2 + $0x68] sm:$0xf] }
 0x2ca   :  { %v11332_v5 = vpop.f32.mrf.mxu1  ;;  %11595 = vmatmul.mubr.bf16.gmra.mxu1 %v14087_v8  ;;  %11803 = vmatpush3.bf16.msra.mxu0 %v12842_v9 }
 0x2cb   :  { %v14260_v54 = vadd.f32 %v11332_v5, %v1574_v49  ;;  %11627 = vmatpush3.bf16.msra.mxu1 %v12846_v19  ;;  %11638 = vmatprep.mubr.bf16.mxu1 %v14091_v3  ;;  %v12849_v3 = vld [vmem:[#allocation4 + $0x190] sm:$0xff]   ;;  %v12643_v49 = vld [vmem:[#allocation2 + $0x98] ss:$8 sps:$4 sm:$0xff]  }
 0x2cc   :  { %v1841_v52 = vpop.f32.mrf.mxu1  ;;  %11628 = vmatprep.subr.bf16.mxu1 %v12847_v31  ;;  %11804 = vmatprep.subr.bf16.mxu0 %v12843_v47  ;;  %v4811_v5 = vld [vmem:[#allocation2 + $0xa0] sm:$0xf] }
 0x2cd   :  { %v14263_v1 = vadd.f32 %v1841_v52, %v1566_v42  ;;  %v14274_v42 = vld [vmem:[#allocation4 + $0x180] sm:$0xff]   ;;  %v4843_v14 = vshll.u32 %v4811_v5, 16 }
 0x2ce   :  { %v11333_v18 = vpop.f32.mrf.mxu1  ;;  %11805 = vmatpush3.bf16.msra.mxu0 %v12843_v47  ;;  %v14280_v47 = vld [vmem:[#allocation4 + $0x238] sm:$0xff]  }
 0x2cf   :  { %v14265_v28 = vadd.f32 %v11333_v18, %v1577_v63  ;;  %11629 = vmatpush3.bf16.msra.mxu1 %v12847_v31  ;;  %11838 = vmatprep.subr.bf16.mxu0 %v12844_v34  ;;  %v3984_v63 = vshll.u32 %v3959_v37, 16  ;;  %v14289_v18 = vld [vmem:[#allocation4 + $0x230] sm:$0xff]   ;;  %v4831_v37 = vrot.slane %v4829_v43, 5  ;;  %v4845_v55 = vrot.slane %v4843_v14, 5  ;;  %v3970_v43 = vld [vmem:[#allocation2 + $0x80] sm:$0xf] }
 0x2d0   :  { %11630 = vmatprep.subr.bf16.mxu1 %v12848_v32  ;;  %v14278_v9 = vpop.f32.mrf.mxu1 }
 0x2d1   :  { %11807 = vmatmul.mubr.bf16.vlgmr.msra.gmra.mxu0 %v14131_v51  ;;  %16367 = vst [vmem:[#allocation52_spill] sm:$0xff] %v14278_v9  ;;  %v3986_v21 = vrot.slane %v3984_v63, 5  ;;  %v4003_v63 = vshrl.u32 %v3962_v4, 16 }
 0x2d2   :  { %11810 = vmatprep.mubr.bf16.mxu0 %v14133_v33  ;;  %11839 = vmatpush3.bf16.msra.mxu0 %v12844_v34  ;;  %v3982_v34 = vrot.slane %v3981_v40, 4 }
 0x2d3   :  { %11631 = vmatpush3.bf16.msra.mxu1 %v12848_v32  ;;  %11840 = vmatprep.subr.bf16.mxu0 %v12845_v15 }
 0x2d4   :  { %11632 = vmatprep.subr.bf16.mxu1 %v12849_v3  ;;  %v3987_v53 = vsel %vm13819_vm9, %v3982_v34, %v3986_v21  ;;  %v3963_v21 = vld [vmem:[#allocation2 + $0x64] sm:$0x1] }
 0x2d5   :  { %v4012_v23 = vshll.u32 %v3963_v21, 16 }
 0x2d6   :  { %11841 = vmatpush3.bf16.msra.mxu0 %v12845_v15  ;;  %v4000_v15 = vrot.slane %v3998_v0, 5  ;;  %v4017_v0 = vshrl.u32 %v3964_v39, 16 }
 0x2d7   :  { %11633 = vmatpush3.bf16.msra.mxu1 %v12849_v3  ;;  %11842 = vmatprep.subr.bf16.mxu0 %v12846_v19 }
 0x2d8   :  { %11634 = vmatprep.subr.bf16.mxu1 %v14269_v48  ;;  %v4019_v16 = vrot.slane %v4017_v0, 4  ;;  %v4062_v0 = vshll.u32 %v3970_v43, 16 }
 0x2d9   :  { %11811 = vmatmul.mubr.bf16.gmra.mxu0 %v14139_v12 }
 0x2da   :  { %11843 = vmatpush3.bf16.msra.mxu0 %v12846_v19  ;;  %11854 = vmatprep.mubr.bf16.mxu0 %v12643_v49  ;;  %v3968_v49 = vld [vmem:[#allocation2 + $0x78] sm:$0xf] }
 0x2db   :  { %11635 = vmatpush3.bf16.msra.mxu1 %v14269_v48  ;;  %11844 = vmatprep.subr.bf16.mxu0 %v12847_v31 }
 0x2dc   :  { %11636 = vmatprep.subr.bf16.mxu1 %v14274_v42 }
 0x2de   :  { %11845 = vmatpush3.bf16.msra.mxu0 %v12847_v31 }
 0x2df   :  { %11637 = vmatpush3.bf16.msra.mxu1 %v14274_v42  ;;  %11846 = vmatprep.subr.bf16.mxu0 %v12848_v32 }
 0x2e0   :  { %11670 = vmatprep.subr.bf16.mxu1 %v14280_v47 }
 0x2e2   :  { %v11352_v19 = vpop.f32.mrf.mxu1  ;;  %11639 = vmatmul.mubr.bf16.vlgmr.msra.gmra.mxu1 %v14131_v51  ;;  %11847 = vmatpush3.bf16.msra.mxu0 %v12848_v32  ;;  %v4001_v51 = vsel %vm13819_vm9, %v3996_v11, %v4000_v15  ;;  %v4826_v32 = vshrl.u32 %v4809_v60, 16  ;;  %v4020_v11 = vshll.u32 %v3964_v39, 16  ;;  %v4810_v15 = vld [vmem:[#allocation2 + $0x9c] sm:$0x1]  ;;  %v14318_v60 = vpop.f32.mrf.mxu0  ;;  %v4005_v39 = vrot.slane %v4003_v63, 4 }
 0x2e3   :  { %v14285_v52 = vadd.f32 %v11352_v19, %v14248_v13  ;;  %11642 = vmatprep.mubr.bf16.mxu1 %v14133_v33  ;;  %11671 = vmatpush3.bf16.msra.mxu1 %v14280_v47  ;;  %v4840_v33 = vshrl.u32 %v4811_v5, 16  ;;  %16368 = vst [vmem:[#allocation53_spill] sm:$0xff] %v14318_v60  ;;  %v14320_v5 = vld [vmem:[#allocation4 + $0x220] sm:$0xff]   ;;  %v3972_v60 = vld [vmem:[#allocation2 + $0x88] sm:$0xf] }
 0x2e4   :  { %v1994_v31 = vpop.f32.mrf.mxu1  ;;  %11672 = vmatprep.subr.bf16.mxu1 %v14289_v18  ;;  %11848 = vmatprep.subr.bf16.mxu0 %v12849_v3  ;;  %v4076_v17 = vshll.u32 %v3972_v60, 16 }
 0x2e5   :  { %v14297_v13 = vadd.f32 %v1994_v31, %v14252_v22  ;;  %v14309_v22 = vcombine.low %v3987_v53, %v4001_v51  ;;  %v4812_v31 = vld [vmem:[#allocation2 + $0xa4] sm:$0x1]  ;;  %v12644_v51 = vld [vmem:[#allocation2 + $0xa8] ss:$8 sps:$4 sm:$0xff]  }
 0x2e6   :  { %v11353_v57 = vpop.f32.mrf.mxu1  ;;  %11849 = vmatpush3.bf16.msra.mxu0 %v12849_v3  ;;  %v4828_v3 = vrot.slane %v4826_v32, 4  ;;  %v4048_v32 = vshll.u32 %v3968_v49, 16 }
 0x2e7   :  { %v14300_v24 = vadd.f32 %v11353_v57, %v14255_v2  ;;  %11673 = vmatpush3.bf16.msra.mxu1 %v14289_v18  ;;  %11850 = vmatprep.subr.bf16.mxu0 %v14269_v48  ;;  %v4842_v2 = vrot.slane %v4840_v33, 4  ;;  %v14327_v57 = vpop.f32.mrf.mxu0 }
 0x2e8   :  { %v14304_v46 = vpop.f32.mrf.mxu1  ;;  %11674 = vmatprep.subr.bf16.mxu1 %v14306_v36  ;;  %v4832_v33 = vor.u32 %v4831_v37, %v4828_v3  ;;  %v4835_v3 = vshll.u32 %v4810_v15, 16  ;;  %v4849_v37 = vshll.u32 %v4812_v31, 16  ;;  %v4050_v21 = vrot.slane %v4048_v32, 5  ;;  %v3969_v15 = vld [vmem:[#allocation2 + $0x7c] sm:$0x1]  ;;  %v14343_v32 = vld [vmem:[#allocation4 + $0x210] sm:$0xff]  }
 0x2e9   :  { %v4846_v14 = vor.u32 %v4845_v55, %v4842_v2  ;;  %v14335_v2 = vld [vmem:[#allocation4 + $0x218] sm:$0xff]   ;;  %v14338_v59 = vpop.f32.mrf.mxu0  ;;  %v4073_v31 = vshrl.u32 %v3972_v60, 16  ;;  %v3971_v60 = vld [vmem:[#allocation2 + $0x84] sm:$0x1] }
 0x2ea   :  { %v11356_v40 = vpop.f32.mrf.mxu1  ;;  %11643 = vmatmul.mubr.bf16.gmra.mxu1 %v14139_v12  ;;  %11851 = vmatpush3.bf16.msra.mxu0 %v14269_v48  ;;  %v4031_v12 = vshrl.u32 %v3966_v30, 16  ;;  %v4034_v48 = vshll.u32 %v3966_v30, 16  ;;  %v12645_v30 = vld [vmem:[#allocation2 + $0xb8] ss:$8 sps:$4 sm:$0xff]  }
 0x2eb   :  { %v14314_v34 = vadd.f32 %v11356_v40, %v14260_v54  ;;  %11675 = vmatpush3.bf16.msra.mxu1 %v14306_v36  ;;  %11686 = vmatprep.mubr.bf16.mxu1 %v14309_v22  ;;  %v4045_v54 = vshrl.u32 %v3968_v49, 16  ;;  %v4008_v40 = vrot.slane %v4006_v58, 5  ;;  %v4022_v49 = vrot.slane %v4020_v11, 5 }
 0x2ec   :  { %v2010_v19 = vpop.f32.mrf.mxu1  ;;  %11676 = vmatprep.subr.bf16.mxu1 %v14320_v5  ;;  %11852 = vmatprep.subr.bf16.mxu0 %v14274_v42  ;;  %v4033_v55 = vrot.slane %v4031_v12, 4  ;;  %v4036_v63 = vrot.slane %v4034_v48, 5  ;;  %v4059_v58 = vshrl.u32 %v3970_v43, 16  ;;  %v14346_v43 = vrot.slane %v4012_v23, 5 }
 0x2ed   :  { %v14325_v53 = vadd.f32 %v2010_v19, %v14263_v1  ;;  %v3965_v1 = vld [vmem:[#allocation2 + $0x6c] sm:$0x1]  ;;  %v4833_v19 = vrot.slane %v4832_v33, 4  ;;  %v4009_v11 = vor.u32 %v4008_v40, %v4005_v39  ;;  %v4023_v12 = vor.u32 %v4022_v49, %v4019_v16 }
 0x2ee   :  { %v11357_v4 = vpop.f32.mrf.mxu1  ;;  %11853 = vmatpush3.bf16.msra.mxu0 %v14274_v42  ;;  %v3967_v42 = vld [vmem:[#allocation2 + $0x74] sm:$0x1]  ;;  %v4026_v9 = vshll.u32 %v3965_v1, 16  ;;  %v4037_v33 = vor.u32 %v4036_v63, %v4033_v55  ;;  %v4064_v39 = vrot.slane %v4062_v0, 5  ;;  %v4054_v40 = vshll.u32 %v3969_v15, 16  ;;  %v14352_v1 = vpop.f32.mrf.mxu0 }
 0x2ef   :  { %v14331_v61 = vadd.f32 %v11357_v4, %v14265_v28  ;;  %11677 = vmatpush3.bf16.msra.mxu1 %v14320_v5  ;;  %11886 = vmatprep.subr.bf16.mxu0 %v14280_v47  ;;  %v4047_v28 = vrot.slane %v4045_v54, 4  ;;  %v4847_v4 = vrot.slane %v4846_v14, 4  ;;  %v4040_v48 = vshll.u32 %v3967_v42, 16  ;;  %v4813_v42 = vld [vmem:[#allocation2 + $0xa8] sm:$0xf] }
 0x2f0   :  { %11678 = vmatprep.subr.bf16.mxu1 %v14335_v2  ;;  %v4837_v54 = vrot.slane %v4835_v3, 5  ;;  %v4061_v14 = vrot.slane %v4059_v58, 4  ;;  %v4010_v49 = vrot.slane %v4009_v11, 4  ;;  %v4028_v3 = vrot.slane %v4026_v9, 5  ;;  %v3973_v58 = vld [vmem:[#allocation2 + $0x8c] sm:$0x1] }
 0x2f1   :  { %11855 = vmatmul.mubr.bf16.vlgmr.msra.gmra.mxu0 %v12644_v51  ;;  %v4851_v51 = vrot.slane %v4849_v37, 5  ;;  %v4075_v23 = vrot.slane %v4073_v31, 4  ;;  %v4078_v37 = vrot.slane %v4076_v17, 5  ;;  %v4024_v55 = vrot.slane %v4023_v12, 4  ;;  %v12646_v0 = vld [vmem:[#allocation2 + $0xc8] ss:$8 sps:$4 sm:$0xff]   ;;  %v14362_v31 = vpop.f32.mrf.mxu0 }
 0x2f2   :  { %11858 = vmatprep.mubr.bf16.mxu0 %v12645_v30  ;;  %11887 = vmatpush3.bf16.msra.mxu0 %v14280_v47  ;;  %v4051_v47 = vor.u32 %v4050_v21, %v4047_v28  ;;  %v4838_v16 = vsel %vm13819_vm9, %v4833_v19, %v4837_v54  ;;  %v4042_v63 = vrot.slane %v4040_v48, 5  ;;  %v14357_v28 = vld [vmem:[#allocation4 + $0x208] sm:$0xff]   ;;  %v4038_v21 = vrot.slane %v4037_v33, 4  ;;  %v4817_v15 = vld [vmem:[#allocation2 + $0xb8] sm:$0xf]  ;;  %16369 = vst [vmem:[#allocation54_spill] sm:$0xff] %v14362_v31 }
 0x2f3   :  { %11679 = vmatpush3.bf16.msra.mxu1 %v14335_v2  ;;  %11888 = vmatprep.subr.bf16.mxu0 %v14289_v18  ;;  %v4852_v30 = vsel %vm13819_vm9, %v4847_v4, %v4851_v51  ;;  %v4065_v19 = vor.u32 %v4064_v39, %v4061_v14  ;;  %v4068_v9 = vshll.u32 %v3971_v60, 16  ;;  %v4056_v11 = vrot.slane %v4054_v40, 5  ;;  %v4819_v33 = vld [vmem:[#allocation2 + $0xc0] sm:$0xf] }
 0x2f4   :  { %11680 = vmatprep.subr.bf16.mxu1 %v14343_v32  ;;  %v14360_v4 = vcombine.low %v4838_v16, %v4852_v30  ;;  %v4052_v17 = vrot.slane %v4051_v47, 4  ;;  %v4079_v12 = vor.u32 %v4078_v37, %v4075_v23  ;;  %v4082_v48 = vshll.u32 %v3973_v58, 16  ;;  %v14373_v60 = vld [vmem:[#allocation4 + $0x200] sm:$0xff]  }
 0x2f5   :  { %v4854_v54 = vshrl.u32 %v4813_v42, 16  ;;  %v4857_v51 = vshll.u32 %v4813_v42, 16  ;;  %v4015_v14 = vsel %vm13819_vm9, %v4010_v49, %v14346_v43  ;;  %v4029_v39 = vsel %vm13819_vm9, %v4024_v55, %v4028_v3  ;;  %v14380_v42 = vpop.f32.mrf.mxu0 }
 0x2f6   :  { %11889 = vmatpush3.bf16.msra.mxu0 %v14289_v18  ;;  %v4815_v18 = vld [vmem:[#allocation2 + $0xb0] sm:$0xf]  ;;  %v4066_v16 = vrot.slane %v4065_v19, 4  ;;  %v4070_v30 = vrot.slane %v4068_v9, 5  ;;  %v4882_v23 = vshrl.u32 %v4817_v15, 16  ;;  %v4057_v43 = vsel %vm13819_vm9, %v4052_v17, %v4056_v11  ;;  %v14385_v19 = vpop.f32.mrf.mxu1  ;;  %v14389_v17 = vld [vmem:[#allocation4 + $0x38] sm:$0xff]  }
 0x2f7   :  { %11681 = vmatpush3.bf16.msra.mxu1 %v14343_v32  ;;  %11890 = vmatprep.subr.bf16.mxu0 %v14306_v36  ;;  %v4868_v47 = vshrl.u32 %v4815_v18, 16  ;;  %v4871_v40 = vshll.u32 %v4815_v18, 16  ;;  %v4885_v49 = vshll.u32 %v4817_v15, 16  ;;  %v4896_v37 = vshrl.u32 %v4819_v33, 16  ;;  %16370 = vst [vmem:[#allocation55_spill] sm:$0xff] %v14385_v19 }
 0x2f8   :  { %11682 = vmatprep.subr.bf16.mxu1 %v14357_v28  ;;  %v4899_v3 = vshll.u32 %v4819_v33, 16  ;;  %v4080_v55 = vrot.slane %v4079_v12, 4  ;;  %v4084_v58 = vrot.slane %v4082_v48, 5  ;;  %v4859_v18 = vrot.slane %v4857_v51, 5  ;;  %v4814_v15 = vld [vmem:[#allocation2 + $0xac] sm:$0x1] }
 0x2f9   :  { %11859 = vmatmul.mubr.bf16.gmra.mxu0 %v12646_v0  ;;  %v4856_v0 = vrot.slane %v4854_v54, 4  ;;  %v14387_v9 = vcombine.low %v4015_v14, %v4029_v39  ;;  %v4821_v12 = vld [vmem:[#allocation2 + $0xc8] sm:$0xf]  ;;  %v2196_v48 = vadd.f32 %v14327_v57, %v14285_v52  ;;  %v4887_v54 = vrot.slane %v4885_v49, 5  ;;  %v4816_v57 = vld [vmem:[#allocation2 + $0xb4] sm:$0x1] }
 0x2fa   :  { %11891 = vmatpush3.bf16.msra.mxu0 %v14306_v36  ;;  %11902 = vmatprep.mubr.bf16.mxu0 %v14360_v4  ;;  %v4043_v36 = vsel %vm13819_vm9, %v4038_v21, %v4042_v63  ;;  %v4870_v63 = vrot.slane %v4868_v47, 4  ;;  %v4873_v21 = vrot.slane %v4871_v40, 5  ;;  %v4898_v51 = vrot.slane %v4896_v37, 4  ;;  %v4823_v47 = vld [vmem:[#allocation2 + $0xd0] sm:$0xf]  ;;  %v2179_v40 = vpop.f32.mrf.mxu0 }
 0x2fb   :  { %11683 = vmatpush3.bf16.msra.mxu1 %v14357_v28  ;;  %11892 = vmatprep.subr.bf16.mxu0 %v14320_v5  ;;  %v14392_v11 = vcombine.low %v4043_v36, %v4057_v43  ;;  %v4901_v33 = vrot.slane %v4899_v3, 5  ;;  %v4071_v14 = vsel %vm13819_vm9, %v4066_v16, %v4070_v30  ;;  %v4085_v39 = vsel %vm13819_vm9, %v4080_v55, %v4084_v58  ;;  %v4818_v37 = vld [vmem:[#allocation2 + $0xbc] sm:$0x1]  ;;  %v14408_v30 = vld [vmem:[#allocation4 + $0x30] sm:$0xff]  }
 0x2fc   :  { %11684 = vmatprep.subr.bf16.mxu1 %v14373_v60  ;;  %v4860_v36 = vor.u32 %v4859_v18, %v4856_v0  ;;  %v2194_v52 = vadd.f32 %v14338_v59, %v14297_v13  ;;  %v4863_v43 = vshll.u32 %v4814_v15, 16  ;;  %v4874_v49 = vor.u32 %v4873_v21, %v4870_v63  ;;  %v11381_v21 = vpop.f32.mrf.mxu0 }
 0x2fd   :  { %v4910_v3 = vshrl.u32 %v4821_v12, 16  ;;  %v4913_v55 = vshll.u32 %v4821_v12, 16  ;;  %v4924_v58 = vshrl.u32 %v4823_v47, 16  ;;  %v4927_v0 = vshll.u32 %v4823_v47, 16 }
 0x2fe   :  { %11893 = vmatpush3.bf16.msra.mxu0 %v14320_v5  ;;  %v4884_v5 = vrot.slane %v4882_v23, 4  ;;  %v2197_v59 = vadd.f32 %v14352_v1, %v14300_v24  ;;  %v4902_v63 = vor.u32 %v4901_v33, %v4898_v51  ;;  %v14416_v15 = vcombine.low %v4071_v14, %v4085_v39  ;;  %v14425_v1 = vld [vmem:[#allocation4 + $0x28] sm:$0xff]  }
 0x2ff   :  { %11685 = vmatpush3.bf16.msra.mxu1 %v14373_v60  ;;  %11894 = vmatprep.subr.bf16.mxu0 %v14335_v2  ;;  %v4891_v29 = vshll.u32 %v4818_v37, 16  ;;  %v4861_v12 = vrot.slane %v4860_v36, 4  ;;  %v4875_v47 = vrot.slane %v4874_v49, 4  ;;  %v4929_v51 = vrot.slane %v4927_v0, 5  ;;  %v4824_v37 = vld [vmem:[#allocation2 + $0xd4] sm:$0x1]  ;;  %v14430_v36 = vpop.f32.mrf.mxu0 }
 0x300   :  { %11718 = vmatprep.subr.bf16.mxu1 %v14389_v17  ;;  %v4888_v13 = vor.u32 %v4887_v54, %v4884_v5  ;;  %v4912_v5 = vrot.slane %v4910_v3, 4  ;;  %v4915_v54 = vrot.slane %v4913_v55, 5  ;;  %v2200_v33 = vadd.f32 %v14380_v42, %v14314_v34  ;;  %v12863_v55 = vld [vmem:[#allocation2 + $0x90] ss:$8 sps:$4 sm:$0xff]  }
 0x301   :  { %v4865_v14 = vrot.slane %v4863_v43, 5  ;;  %v2198_v34 = vadd.f32 %v2179_v40, %v14325_v53  ;;  %v11424_v0 = vpop.f32.mrf.mxu0  ;;  %v2201_v53 = vadd.f32 %v11381_v21, %v14331_v61 }
 0x302   :  { %v11400_v19 = vpop.f32.mrf.mxu1  ;;  %11687 = vmatmul.mubr.bf16.vlgmr.msra.gmra.mxu1 %v14387_v9  ;;  %11895 = vmatpush3.bf16.msra.mxu0 %v14335_v2  ;;  %v4820_v2 = vld [vmem:[#allocation2 + $0xc4] sm:$0x1]  ;;  %v4889_v39 = vrot.slane %v4888_v13, 4 }
 0x303   :  { %v14402_v23 = vadd.f32 %v11400_v19, %v2196_v48  ;;  %11690 = vmatprep.mubr.bf16.mxu1 %v14392_v11  ;;  %11719 = vmatpush3.bf16.msra.mxu1 %v14389_v17  ;;  %v4877_v48 = vshll.u32 %v4816_v57, 16  ;;  %v4903_v57 = vrot.slane %v4902_v63, 4  ;;  %v4866_v42 = vsel %vm13819_vm9, %v4861_v12, %v4865_v14  ;;  %v12864_v13 = vld [vmem:[#allocation4 + $0x20] sm:$0xff]  }
 0x304   :  { %v2444_v16 = vpop.f32.mrf.mxu1  ;;  %11720 = vmatprep.subr.bf16.mxu1 %v14408_v30  ;;  %11896 = vmatprep.subr.bf16.mxu0 %v14343_v32 }
 0x305   :  { %v14412_v18 = vadd.f32 %v2444_v16, %v2194_v52  ;;  %v4905_v52 = vshll.u32 %v4820_v2, 16  ;;  %v4879_v16 = vrot.slane %v4877_v48, 5  ;;  %v4893_v2 = vrot.slane %v4891_v29, 5 }
 0x306   :  { %v11401_v19 = vpop.f32.mrf.mxu1  ;;  %11897 = vmatpush3.bf16.msra.mxu0 %v14343_v32  ;;  %v4926_v32 = vrot.slane %v4924_v58, 4  ;;  %v4822_v58 = vld [vmem:[#allocation2 + $0xcc] sm:$0x1] }
 0x307   :  { %v14419_v31 = vadd.f32 %v11401_v19, %v2197_v59  ;;  %11721 = vmatpush3.bf16.msra.mxu1 %v14408_v30  ;;  %11898 = vmatprep.subr.bf16.mxu0 %v14357_v28  ;;  %v4907_v43 = vrot.slane %v4905_v52, 5  ;;  %v4880_v29 = vsel %vm13819_vm9, %v4875_v47, %v4879_v16  ;;  %v4933_v19 = vshll.u32 %v4824_v37, 16 }
 0x308   :  { %v14423_v24 = vpop.f32.mrf.mxu1  ;;  %11722 = vmatprep.subr.bf16.mxu1 %v14425_v1  ;;  %v4930_v63 = vor.u32 %v4929_v51, %v4926_v32  ;;  %v4894_v40 = vsel %vm13819_vm9, %v4889_v39, %v4893_v2  ;;  %v14453_v47 = vcombine.low %v4866_v42, %v4880_v29  ;;  %v12867_v2 = vld [vmem:[#allocation4 + $0x8] sm:$0xff]   ;;  %v12869_v42 = vld [vmem:[#allocation4] sm:$0xff]  }
 0x309   :  { %v4908_v12 = vsel %vm13819_vm9, %v4903_v57, %v4907_v43  ;;  %v4935_v51 = vrot.slane %v4933_v19, 5  ;;  %v12866_v57 = vld [vmem:[#allocation4 + $0x10] sm:$0xff]  }
 0x30a   :  { %v11404_v49 = vpop.f32.mrf.mxu1  ;;  %11691 = vmatmul.mubr.bf16.gmra.mxu1 %v14416_v15  ;;  %11899 = vmatpush3.bf16.msra.mxu0 %v14357_v28  ;;  %v4916_v28 = vor.u32 %v4915_v54, %v4912_v5  ;;  %v2613_v5 = vpop.f32.mrf.mxu0  ;;  %v12865_v54 = vld [vmem:[#allocation4 + $0x18] sm:$0xff]   ;;  %v14456_v61 = vcombine.low %v4894_v40, %v4908_v12  ;;  %v4931_v32 = vrot.slane %v4930_v63, 4  ;;  %v12873_v40 = vld [vmem:[#allocation4 + $0xf0] sm:$0xff]  }
 0x30b   :  { %v14434_v3 = vadd.f32 %v11404_v49, %v2200_v33  ;;  %11723 = vmatpush3.bf16.msra.mxu1 %v14425_v1  ;;  %11734 = vmatprep.mubr.bf16.mxu1 %v12863_v55  ;;  %v4919_v33 = vshll.u32 %v4822_v58, 16  ;;  %v12868_v55 = vld [vmem:[#allocation2 + $0xd8] ss:$8 sps:$4 sm:$0xff]  }
 0x30c   :  { %v2460_v59 = vpop.f32.mrf.mxu1  ;;  %11724 = vmatprep.subr.bf16.mxu1 %v12864_v13  ;;  %11900 = vmatprep.subr.bf16.mxu0 %v14373_v60  ;;  %v4917_v21 = vrot.slane %v4916_v28, 4  ;;  %v11425_v39 = vpop.f32.mrf.mxu0  ;;  %v4936_v49 = vsel %vm13819_vm9, %v4931_v32, %v4935_v51  ;;  %v12870_v58 = vld [vmem:[#allocation4 + $0xf8] sm:$0xff]   ;;  %v12871_v28 = vld [vmem:[#allocation2 + $0xa0] ss:$8 sps:$4 sm:$0xff]  }
 0x30d   :  { %v14443_v48 = vadd.f32 %v2460_v59, %v2198_v34  ;;  %v2646_v59 = vadd.f32 %v11424_v0, %v14402_v23  ;;  %v12872_v63 = vld [vmem:[#allocation2 + $0xb0] ss:$8 sps:$4 sm:$0xff]   ;;  %v2647_v23 = vadd.f32 %v11425_v39, %v14419_v31  ;;  %v12875_v51 = vld [vmem:[#allocation2 + $0xc0] ss:$8 sps:$4 sm:$0xff]  }
 0x30e   :  { %v11405_v52 = vpop.f32.mrf.mxu1  ;;  %11901 = vmatpush3.bf16.msra.mxu0 %v14373_v60  ;;  %v4921_v60 = vrot.slane %v4919_v33, 5 }
 0x30f   :  { %v14451_v14 = vadd.f32 %v11405_v52, %v2201_v53  ;;  %11725 = vmatpush3.bf16.msra.mxu1 %v12864_v13  ;;  %11934 = vmatprep.subr.bf16.mxu0 %v14389_v17 }
 0x310   :  { %11726 = vmatprep.subr.bf16.mxu1 %v12865_v54  ;;  %v4922_v37 = vsel %vm13819_vm9, %v4917_v21, %v4921_v60  ;;  %v14474_v43 = vpop.f32.mrf.mxu1  ;;  %v12876_v60 = vld [vmem:[#allocation2 + $0x8] ss:$8 sps:$4 sm:$0xff]  }
 0x311   :  { %11903 = vmatmul.mubr.bf16.vlgmr.msra.gmra.mxu0 %v14453_v47  ;;  %v14467_v16 = vcombine.low %v4922_v37, %v4936_v49  ;;  %v12877_v37 = vld [vmem:[#allocation4 + $0xe0] sm:$0xff]  }
 0x312   :  { %11906 = vmatprep.mubr.bf16.mxu0 %v14456_v61  ;;  %11935 = vmatpush3.bf16.msra.mxu0 %v14389_v17  ;;  %v14470_v17 = vpop.f32.mrf.mxu0 }
 0x313   :  { %11727 = vmatpush3.bf16.msra.mxu1 %v12865_v54  ;;  %11936 = vmatprep.subr.bf16.mxu0 %v14408_v30 }
 0x314   :  { %11728 = vmatprep.subr.bf16.mxu1 %v12866_v57  ;;  %v11428_v34 = vpop.f32.mrf.mxu0 }
 0x316   :  { %11937 = vmatpush3.bf16.msra.mxu0 %v14408_v30  ;;  %v2629_v30 = vpop.f32.mrf.mxu0 }
 0x317   :  { %11729 = vmatpush3.bf16.msra.mxu1 %v12866_v57  ;;  %11938 = vmatprep.subr.bf16.mxu0 %v14425_v1  ;;  %v2648_v39 = vadd.f32 %v2629_v30, %v14443_v48  ;;  %v12880_v30 = vld [vmem:[#allocation2 + $0xf8] ss:$8 sps:$4 sm:$0xff]  }
 0x318   :  { %11730 = vmatprep.subr.bf16.mxu1 %v12867_v2  ;;  %v11429_v19 = vpop.f32.mrf.mxu0 }
 0x319   :  { %11907 = vmatmul.mubr.bf16.gmra.mxu0 %v14467_v16 }
 0x31a   :  { %11939 = vmatpush3.bf16.msra.mxu0 %v14425_v1  ;;  %11950 = vmatprep.mubr.bf16.mxu0 %v12868_v55  ;;  %v14485_v33 = vpop.f32.mrf.mxu0  ;;  %v2651_v55 = vadd.f32 %v11429_v19, %v14451_v14  ;;  %v12884_v19 = vld [vmem:[#allocation2 + $0x50] ss:$8 sps:$4 sm:$0xff]  }
 0x31b   :  { %11731 = vmatpush3.bf16.msra.mxu1 %v12867_v2  ;;  %11940 = vmatprep.subr.bf16.mxu0 %v12864_v13  ;;  %16371 = vst [vmem:[#allocation56_spill] sm:$0xff] %v14485_v33 }
 0x31c   :  { %11732 = vmatprep.subr.bf16.mxu1 %v12869_v42  ;;  %v14490_v21 = vpop.f32.mrf.mxu0 }
 0x31e   :  { %11941 = vmatpush3.bf16.msra.mxu0 %v12864_v13  ;;  %v2644_v13 = vadd.f32 %v2613_v5, %v14412_v18  ;;  %v12874_v18 = vld [vmem:[#allocation4 + $0xe8] sm:$0xff]   ;;  %v2650_v5 = vadd.f32 %v11428_v34, %v14434_v3  ;;  %v14497_v3 = vpop.f32.mrf.mxu0 }
 0x31f   :  { %11733 = vmatpush3.bf16.msra.mxu1 %v12869_v42  ;;  %11942 = vmatprep.subr.bf16.mxu0 %v12865_v54 }
 0x320   :  { %11766 = vmatprep.subr.bf16.mxu1 %v12870_v58  ;;  %v14502_v48 = vpop.f32.mrf.mxu0 }
 0x321   :  { %16375 = vst [vmem:[#allocation60_spill] sm:$0xff] %v14502_v48 }
 0x322   :  { %v11448_v29 = vpop.f32.mrf.mxu1  ;;  %11735 = vmatmul.mubr.bf16.vlgmr.msra.gmra.mxu1 %v12871_v28  ;;  %11943 = vmatpush3.bf16.msra.mxu0 %v12865_v54  ;;  %v12881_v28 = vld [vmem:[#allocation4 + $0xd0] sm:$0xff]   ;;  %v14504_v14 = vpop.f32.mrf.mxu0 }
 0x323   :  { %v14477_v1 = vadd.f32 %v11448_v29, %v2646_v59  ;;  %11738 = vmatprep.mubr.bf16.mxu1 %v12872_v63  ;;  %11767 = vmatpush3.bf16.msra.mxu1 %v12870_v58  ;;  %v12878_v59 = vld [vmem:[#allocation4 + $0xd8] sm:$0xff]   ;;  %v12879_v29 = vld [vmem:[#allocation2 + $0xe8] ss:$8 sps:$4 sm:$0xff]  }
 0x324   :  { %v2782_v53 = vpop.f32.mrf.mxu1  ;;  %11768 = vmatprep.subr.bf16.mxu1 %v12873_v40  ;;  %11944 = vmatprep.subr.bf16.mxu0 %v12866_v57  ;;  %v12883_v63 = vld [vmem:[#allocation2 + $0x108] ss:$8 sps:$4 sm:$0xff]  }
 0x325   :  { %v14480_v12 = vadd.f32 %v2782_v53, %v2644_v13  ;;  %v14506_v13 = vpop.f32.mrf.mxu0 }
 0x326   :  { %v11449_v0 = vpop.f32.mrf.mxu1  ;;  %11945 = vmatpush3.bf16.msra.mxu0 %v12866_v57  ;;  %16376 = vst [vmem:[#allocation61_spill] sm:$0xff] %v14506_v13  ;;  %v12898_v13 = vld [vmem:[#allocation2 + $0x80] ss:$8 sps:$4 sm:$0xff]  }
 0x327   :  { %v14483_v52 = vadd.f32 %v11449_v0, %v2647_v23  ;;  %11769 = vmatpush3.bf16.msra.mxu1 %v12873_v40  ;;  %11946 = vmatprep.subr.bf16.mxu0 %v12867_v2  ;;  %v14508_v53 = vpop.f32.mrf.mxu0 }
 0x328   :  { %v14487_v54 = vpop.f32.mrf.mxu1  ;;  %11770 = vmatprep.subr.bf16.mxu1 %v12874_v18  ;;  %16377 = vst [vmem:[#allocation62_spill] sm:$0xff] %v14508_v53 }
 0x329   :  { %v14510_v23 = vpop.f32.mrf.mxu0 }
 0x32a   :  { %v11452_v32 = vpop.f32.mrf.mxu1  ;;  %11739 = vmatmul.mubr.bf16.gmra.mxu1 %v12875_v51  ;;  %11947 = vmatpush3.bf16.msra.mxu0 %v12867_v2  ;;  %16378 = vst [vmem:[#allocation63_spill] sm:$0xff] %v14510_v23  ;;  %v12889_v51 = vld [vmem:[#allocation4 + $0x170] sm:$0xff]  }
 0x32b   :  { %v14492_v31 = vadd.f32 %v11452_v32, %v2650_v5  ;;  %11771 = vmatpush3.bf16.msra.mxu1 %v12874_v18  ;;  %11782 = vmatprep.mubr.bf16.mxu1 %v12876_v60  ;;  %v12887_v5 = vld [vmem:[#allocation2 + $0x18] ss:$8 sps:$4 sm:$0xff]   ;;  %v14516_v60 = vpop.f32.mrf.mxu0 }
 0x32c   :  { %v2798_v57 = vpop.f32.mrf.mxu1  ;;  %11772 = vmatprep.subr.bf16.mxu1 %v12877_v37  ;;  %11948 = vmatprep.subr.bf16.mxu0 %v12869_v42  ;;  %16380 = vst [vmem:[#allocation65_spill] sm:$0xff] %v14516_v60  ;;  %v12900_v60 = vld [vmem:[#allocation4 + $0x1f8] sm:$0xff]  }
 0x32d   :  { %16372 = vst [vmem:[#allocation57_spill] sm:$0xff] %v14492_v31  ;;  %v14495_v49 = vadd.f32 %v2798_v57, %v2648_v39  ;;  %v11520_v39 = vpop.f32.mrf.mxu0 }
 0x32e   :  { %v11453_v34 = vpop.f32.mrf.mxu1  ;;  %11949 = vmatpush3.bf16.msra.mxu0 %v12869_v42  ;;  %v12882_v42 = vld [vmem:[#allocation4 + $0xc8] sm:$0xff]  }
 0x32f   :  { %16373 = vst [vmem:[#allocation58_spill] sm:$0xff] %v14495_v49  ;;  %11773 = vmatpush3.bf16.msra.mxu1 %v12877_v37  ;;  %v14500_v2 = vadd.f32 %v11453_v34, %v2651_v55  ;;  %11982 = vmatprep.subr.bf16.mxu0 %v12870_v58  ;;  %v12891_v55 = vld [vmem:[#allocation2 + $0x38] ss:$8 sps:$4 sm:$0xff]   ;;  %v3201_v34 = vpop.f32.mrf.mxu0 }
 0x330   :  { %11774 = vmatprep.subr.bf16.mxu1 %v12878_v59  ;;  %v14512_v0 = vpop.f32.mrf.mxu1 }
 0x331   :  { %16374 = vst [vmem:[#allocation59_spill] sm:$0xff] %v14500_v2  ;;  %11951 = vmatmul.mubr.bf16.vlgmr.msra.gmra.mxu0 %v12879_v29  ;;  %16379 = vst [vmem:[#allocation64_spill] sm:$0xff] %v14512_v0  ;;  %v12892_v29 = vld [vmem:[#allocation4 + $0x160] sm:$0xff]   ;;  %v12897_v2 = vld [vmem:[#allocation4 + $0x148] sm:$0xff]  }
 0x332   :  { %11954 = vmatprep.mubr.bf16.mxu0 %v12880_v30  ;;  %11983 = vmatpush3.bf16.msra.mxu0 %v12870_v58  ;;  %v12885_v58 = vld [vmem:[#allocation4 + $0xc0] sm:$0xff]   ;;  %v11521_v30 = vpop.f32.mrf.mxu0  ;;  %v12901_v0 = vld [vmem:[#allocation4 + $0x1f0] sm:$0xff]  }
 0x333   :  { %11775 = vmatpush3.bf16.msra.mxu1 %v12878_v59  ;;  %11984 = vmatprep.subr.bf16.mxu0 %v12873_v40 }
 0x334   :  { %11776 = vmatprep.subr.bf16.mxu1 %v12881_v28 }
 0x336   :  { %11985 = vmatpush3.bf16.msra.mxu0 %v12873_v40  ;;  %v12886_v40 = vld [vmem:[#allocation4 + $0x178] sm:$0xff]  }
 0x337   :  { %11777 = vmatpush3.bf16.msra.mxu1 %v12881_v28  ;;  %11986 = vmatprep.subr.bf16.mxu0 %v12874_v18 }
 0x338   :  { %11778 = vmatprep.subr.bf16.mxu1 %v12882_v42  ;;  %v16423_v50 = vld [vmem:[#allocation64_spill] sm:$0xff] }
 0x339   :  { %11955 = vmatmul.mubr.bf16.gmra.mxu0 %v12883_v63  ;;  %v12893_v63 = vld [vmem:[#allocation4 + $0x158] sm:$0xff]  }
 0x33a   :  { %11987 = vmatpush3.bf16.msra.mxu0 %v12874_v18  ;;  %11998 = vmatprep.mubr.bf16.mxu0 %v12884_v19  ;;  %v12888_v18 = vld [vmem:[#allocation2 + $0x28] ss:$8 sps:$4 sm:$0xff]  }
 0x33b   :  { %11779 = vmatpush3.bf16.msra.mxu1 %v12882_v42  ;;  %11988 = vmatprep.subr.bf16.mxu0 %v12877_v37  ;;  %v12894_v19 = vld [vmem:[#allocation2 + $0x60] ss:$8 sps:$4 sm:$0xff]  }
 0x33c   :  { %11780 = vmatprep.subr.bf16.mxu1 %v12885_v58 }
 0x33e   :  { %11989 = vmatpush3.bf16.msra.mxu0 %v12877_v37  ;;  %v12890_v37 = vld [vmem:[#allocation4 + $0x168] sm:$0xff]  }
 0x33f   :  { %11781 = vmatpush3.bf16.msra.mxu1 %v12885_v58  ;;  %11990 = vmatprep.subr.bf16.mxu0 %v12878_v59 }
 0x340   :  { %11814 = vmatprep.subr.bf16.mxu1 %v12886_v40 }
 0x342   :  { %11783 = vmatmul.mubr.bf16.vlgmr.msra.gmra.mxu1 %v12887_v5  ;;  %11991 = vmatpush3.bf16.msra.mxu0 %v12878_v59  ;;  %v14514_v32 = vpop.f32.mrf.mxu1  ;;  %v12895_v5 = vld [vmem:[#allocation2 + $0x70] ss:$8 sps:$4 sm:$0xff]  }
 0x343   :  { %11786 = vmatprep.mubr.bf16.mxu1 %v12888_v18  ;;  %11815 = vmatpush3.bf16.msra.mxu1 %v12886_v40  ;;  %v3210_v53 = vadd.f32 %v11520_v39, %v14514_v32 }
 0x344   :  { %11816 = vmatprep.subr.bf16.mxu1 %v12889_v51  ;;  %11992 = vmatprep.subr.bf16.mxu0 %v12881_v28  ;;  %v3136_v57 = vpop.f32.mrf.mxu1 }
 0x346   :  { %11993 = vmatpush3.bf16.msra.mxu0 %v12881_v28  ;;  %v11497_v59 = vpop.f32.mrf.mxu1 }
 0x347   :  { %11817 = vmatpush3.bf16.msra.mxu1 %v12889_v51  ;;  %11994 = vmatprep.subr.bf16.mxu0 %v12882_v42 }
 0x348   :  { %11818 = vmatprep.subr.bf16.mxu1 %v12890_v37  ;;  %v14519_v28 = vpop.f32.mrf.mxu1 }
 0x34a   :  { %11787 = vmatmul.mubr.bf16.gmra.mxu1 %v12891_v55  ;;  %11995 = vmatpush3.bf16.msra.mxu0 %v12882_v42  ;;  %v14521_v42 = vpop.f32.mrf.mxu0  ;;  %v11500_v18 = vpop.f32.mrf.mxu1  ;;  %v12896_v55 = vld [vmem:[#allocation4 + $0x150] sm:$0xff]  }
 0x34b   :  { %11819 = vmatpush3.bf16.msra.mxu1 %v12890_v37  ;;  %11830 = vmatprep.mubr.bf16.mxu1 %v13829_v56 }
 0x34c   :  { %11820 = vmatprep.subr.bf16.mxu1 %v12892_v29  ;;  %11996 = vmatprep.subr.bf16.mxu0 %v12885_v58  ;;  %v3152_v23 = vpop.f32.mrf.mxu1 }
 0x34e   :  { %11997 = vmatpush3.bf16.msra.mxu0 %v12885_v58  ;;  %v11524_v58 = vpop.f32.mrf.mxu0 }
 0x34f   :  { %11821 = vmatpush3.bf16.msra.mxu1 %v12892_v29  ;;  %12030 = vmatprep.subr.bf16.mxu0 %v12886_v40 }
 0x350   :  { %11822 = vmatprep.subr.bf16.mxu1 %v12893_v63 }
 0x351   :  { %11999 = vmatmul.mubr.bf16.vlgmr.msra.gmra.mxu0 %v12894_v19  ;;  %v11501_v19 = vpop.f32.mrf.mxu1 }
 0x352   :  { %12002 = vmatprep.mubr.bf16.mxu0 %v12895_v5  ;;  %12031 = vmatpush3.bf16.msra.mxu0 %v12886_v40  ;;  %v3217_v40 = vpop.f32.mrf.mxu0  ;;  %v12899_v5 = vld [vmem:[#allocation4 + $0x140] sm:$0xff]  }
 0x353   :  { %11823 = vmatpush3.bf16.msra.mxu1 %v12893_v63  ;;  %12032 = vmatprep.subr.bf16.mxu0 %v12889_v51  ;;  %v14524_v31 = vpop.f32.mrf.mxu1 }
 0x354   :  { %11824 = vmatprep.subr.bf16.mxu1 %v12896_v55  ;;  %16381 = vst [vmem:[#allocation66_spill] sm:$0xff] %v14524_v31  ;;  %v3213_v31 = vadd.f32 %v11521_v30, %v11497_v59  ;;  %v12903_v30 = vld [vmem:[#allocation4 + $0x1e0] sm:$0xff]  }
 0x356   :  { %12033 = vmatpush3.bf16.msra.mxu0 %v12889_v51  ;;  %v11525_v51 = vpop.f32.mrf.mxu0 }
 0x357   :  { %11825 = vmatpush3.bf16.msra.mxu1 %v12896_v55  ;;  %12034 = vmatprep.subr.bf16.mxu0 %v12890_v37 }
 0x358   :  { %11826 = vmatprep.subr.bf16.mxu1 %v12897_v2 }
 0x359   :  { %12003 = vmatmul.mubr.bf16.gmra.mxu0 %v12898_v13 }
 0x35a   :  { %12035 = vmatpush3.bf16.msra.mxu0 %v12890_v37  ;;  %12046 = vmatprep.mubr.bf16.mxu0 %v14309_v22  ;;  %v3202_v22 = vadd.f32 %v3201_v34, %v3136_v57  ;;  %v12902_v57 = vld [vmem:[#allocation4 + $0x1e8] sm:$0xff]   ;;  %v3226_v34 = vadd.f32 %v11524_v58, %v11500_v18 }
 0x35b   :  { %11827 = vmatpush3.bf16.msra.mxu1 %v12897_v2  ;;  %12036 = vmatprep.subr.bf16.mxu0 %v12892_v29 }
 0x35c   :  { %11828 = vmatprep.subr.bf16.mxu1 %v12899_v5 }
 0x35e   :  { %12037 = vmatpush3.bf16.msra.mxu0 %v12892_v29  ;;  %v14531_v29 = vpop.f32.mrf.mxu0 }
 0x35f   :  { %11829 = vmatpush3.bf16.msra.mxu1 %v12899_v5  ;;  %12038 = vmatprep.subr.bf16.mxu0 %v12893_v63  ;;  %16382 = vst [vmem:[#allocation67_spill] sm:$0xff] %v14531_v29 }
 0x360   :  { %11862 = vmatprep.subr.bf16.mxu1 %v12900_v60  ;;  %v14535_v32 = vpop.f32.mrf.mxu0 }
 0x362   :  { %v11544_v13 = vpop.f32.mrf.mxu1  ;;  %11831 = vmatmul.mubr.bf16.vlgmr.msra.gmra.mxu1 %v13867_v20  ;;  %12039 = vmatpush3.bf16.msra.mxu0 %v12893_v63  ;;  %v3483_v29 = vpop.f32.mrf.mxu0 }
 0x363   :  { %v14528_v37 = vadd.f32 %v11544_v13, %v3210_v53  ;;  %11834 = vmatprep.mubr.bf16.mxu1 %v13871_v35  ;;  %11863 = vmatpush3.bf16.msra.mxu1 %v12900_v60  ;;  %v14541_v13 = vld [vmem:[#allocation2 + $0xe0] ss:$8 sps:$4 sm:$0xff]  }
 0x364   :  { %v3410_v49 = vpop.f32.mrf.mxu1  ;;  %11864 = vmatprep.subr.bf16.mxu1 %v12901_v0  ;;  %12040 = vmatprep.subr.bf16.mxu0 %v12896_v55  ;;  %v11569_v18 = vpop.f32.mrf.mxu0 }
 0x365   :  { %v14533_v33 = vadd.f32 %v3410_v49, %v3202_v22  ;;  %v3218_v49 = vadd.f32 %v3217_v40, %v3152_v23  ;;  %v12905_v23 = vld [vmem:[#allocation4 + $0x1d0] sm:$0xff]  }
 0x366   :  { %v11545_v39 = vpop.f32.mrf.mxu1  ;;  %12041 = vmatpush3.bf16.msra.mxu0 %v12896_v55  ;;  %v3229_v55 = vadd.f32 %v11525_v51, %v11501_v19  ;;  %v12906_v19 = vld [vmem:[#allocation4 + $0x1c8] sm:$0xff]   ;;  %v12908_v51 = vld [vmem:[#allocation4 + $0x78] sm:$0xff]  }
 0x367   :  { %v14537_v63 = vadd.f32 %v11545_v39, %v3213_v31  ;;  %11865 = vmatpush3.bf16.msra.mxu1 %v12901_v0  ;;  %12042 = vmatprep.subr.bf16.mxu0 %v12897_v2 }
 0x368   :  { %v14539_v53 = vpop.f32.mrf.mxu1  ;;  %11866 = vmatprep.subr.bf16.mxu1 %v12902_v57 }
 0x36a   :  { %v11548_v48 = vpop.f32.mrf.mxu1  ;;  %11835 = vmatmul.mubr.bf16.gmra.mxu1 %v13887_v45  ;;  %12043 = vmatpush3.bf16.msra.mxu0 %v12897_v2  ;;  %v12904_v2 = vld [vmem:[#allocation4 + $0x1d8] sm:$0xff]  }
 0x36b   :  { %v14544_v59 = vadd.f32 %v11548_v48, %v3226_v34  ;;  %11867 = vmatpush3.bf16.msra.mxu1 %v12902_v57  ;;  %11878 = vmatprep.mubr.bf16.mxu1 %v14541_v13  ;;  %v14552_v48 = vpop.f32.mrf.mxu0 }
 0x36c   :  { %v3426_v31 = vpop.f32.mrf.mxu1  ;;  %11868 = vmatprep.subr.bf16.mxu1 %v12903_v30  ;;  %12044 = vmatprep.subr.bf16.mxu0 %v12899_v5 }
 0x36d   :  { %v14547_v22 = vadd.f32 %v3426_v31, %v3218_v49  ;;  %v11572_v40 = vpop.f32.mrf.mxu0  ;;  %v3514_v31 = vadd.f32 %v3483_v29, %v14533_v33 }
 0x36e   :  { %v11549_v58 = vpop.f32.mrf.mxu1  ;;  %12045 = vmatpush3.bf16.msra.mxu0 %v12899_v5  ;;  %v3520_v33 = vadd.f32 %v11572_v40, %v14544_v59 }
 0x36f   :  { %v14549_v39 = vadd.f32 %v11549_v58, %v3229_v55  ;;  %11869 = vmatpush3.bf16.msra.mxu1 %v12903_v30  ;;  %12078 = vmatprep.subr.bf16.mxu0 %v12900_v60  ;;  %v3499_v5 = vpop.f32.mrf.mxu0  ;;  %v12909_v58 = vld [vmem:[#allocation4 + $0x70] sm:$0xff]  }
 0x370   :  { %11870 = vmatprep.subr.bf16.mxu1 %v12904_v2 }
 0x371   :  { %12047 = vmatmul.mubr.bf16.vlgmr.msra.gmra.mxu0 %v14387_v9  ;;  %v12907_v9 = vld [vmem:[#allocation4 + $0x1c0] sm:$0xff]  }
 0x372   :  { %12050 = vmatprep.mubr.bf16.mxu0 %v14392_v11  ;;  %12079 = vmatpush3.bf16.msra.mxu0 %v12900_v60  ;;  %v11573_v11 = vpop.f32.mrf.mxu0  ;;  %v14557_v60 = vpop.f32.mrf.mxu1 }
 0x373   :  { %11871 = vmatpush3.bf16.msra.mxu1 %v12904_v2  ;;  %12080 = vmatprep.subr.bf16.mxu0 %v12901_v0  ;;  %16383 = vst [vmem:[#allocation68_spill] sm:$0xff] %v14557_v60 }
 0x374   :  { %11872 = vmatprep.subr.bf16.mxu1 %v12905_v23 }
 0x376   :  { %12081 = vmatpush3.bf16.msra.mxu0 %v12901_v0  ;;  %v14559_v0 = vld [vmem:[#allocation2 + $0xf0] ss:$8 sps:$4 sm:$0xff]  }
 0x377   :  { %11873 = vmatpush3.bf16.msra.mxu1 %v12905_v23  ;;  %12082 = vmatprep.subr.bf16.mxu0 %v12902_v57 }
 0x378   :  { %11874 = vmatprep.subr.bf16.mxu1 %v12906_v19 }
 0x379   :  { %12051 = vmatmul.mubr.bf16.gmra.mxu0 %v14416_v15  ;;  %v3516_v15 = vadd.f32 %v14535_v32, %v14528_v37  ;;  %v3517_v32 = vadd.f32 %v11569_v18, %v14537_v63  ;;  %v3518_v63 = vadd.f32 %v3499_v5, %v14547_v22  ;;  %v12913_v22 = vld [vmem:[#allocation4 + $0x50] sm:$0xff]  }
 0x37a   :  { %12083 = vmatpush3.bf16.msra.mxu0 %v12902_v57  ;;  %12094 = vmatprep.mubr.bf16.mxu0 %v14360_v4  ;;  %v14563_v57 = vld [vmem:[#allocation2 + $0x100] ss:$8 sps:$4 sm:$0xff]   ;;  %v14565_v4 = vpop.f32.mrf.mxu0 }
 0x37b   :  { %11875 = vmatpush3.bf16.msra.mxu1 %v12906_v19  ;;  %12084 = vmatprep.subr.bf16.mxu0 %v12903_v30  ;;  %16384 = vst [vmem:[#allocation69_spill] sm:$0xff] %v14565_v4 }
 0x37c   :  { %11876 = vmatprep.subr.bf16.mxu1 %v12907_v9 }
 0x37e   :  { %12085 = vmatpush3.bf16.msra.mxu0 %v12903_v30  ;;  %v11616_v30 = vpop.f32.mrf.mxu0 }
 0x37f   :  { %11877 = vmatpush3.bf16.msra.mxu1 %v12907_v9  ;;  %12086 = vmatprep.subr.bf16.mxu0 %v12904_v2 }
 0x380   :  { %11910 = vmatprep.subr.bf16.mxu1 %v12908_v51 }
 0x382   :  { %v11592_v34 = vpop.f32.mrf.mxu1  ;;  %11879 = vmatmul.mubr.bf16.vlgmr.msra.gmra.mxu1 %v14559_v0  ;;  %12087 = vmatpush3.bf16.msra.mxu0 %v12904_v2  ;;  %v3773_v2 = vpop.f32.mrf.mxu0 }
 0x383   :  { %v14568_v49 = vadd.f32 %v11592_v34, %v3516_v15  ;;  %11882 = vmatprep.mubr.bf16.mxu1 %v14563_v57  ;;  %11911 = vmatpush3.bf16.msra.mxu1 %v12908_v51  ;;  %v14575_v34 = vld [vmem:[#allocation2 + $0x110] ss:$8 sps:$4 sm:$0xff]   ;;  %v12910_v51 = vld [vmem:[#allocation4 + $0x68] sm:$0xff]  }
 0x384   :  { %v3556_v55 = vpop.f32.mrf.mxu1  ;;  %11912 = vmatprep.subr.bf16.mxu1 %v12909_v58  ;;  %12088 = vmatprep.subr.bf16.mxu0 %v12905_v23  ;;  %v11617_v18 = vpop.f32.mrf.mxu0 }
 0x385   :  { %v3587_v37 = vadd.f32 %v3556_v55, %v3514_v31 }
 0x386   :  { %v11593_v4 = vpop.f32.mrf.mxu1  ;;  %12089 = vmatpush3.bf16.msra.mxu0 %v12905_v23  ;;  %v14582_v40 = vpop.f32.mrf.mxu0 }
 0x387   :  { %v3590_v60 = vadd.f32 %v11593_v4, %v3517_v32  ;;  %11913 = vmatpush3.bf16.msra.mxu1 %v12909_v58  ;;  %12090 = vmatprep.subr.bf16.mxu0 %v12906_v19  ;;  %v12911_v4 = vld [vmem:[#allocation4 + $0x60] sm:$0xff]   ;;  %v3521_v58 = vadd.f32 %v11573_v11, %v14549_v39  ;;  %16385 = vst [vmem:[#allocation70_spill] sm:$0xff] %v14582_v40 }
 0x388   :  { %v14573_v15 = vpop.f32.mrf.mxu1  ;;  %11914 = vmatprep.subr.bf16.mxu1 %v12910_v51 }
 0x38a   :  { %v11596_v29 = vpop.f32.mrf.mxu1  ;;  %11883 = vmatmul.mubr.bf16.gmra.mxu1 %v14575_v34  ;;  %12091 = vmatpush3.bf16.msra.mxu0 %v12906_v19  ;;  %v12912_v19 = vld [vmem:[#allocation4 + $0x58] sm:$0xff]  }
 0x38b   :  { %v3593_v31 = vadd.f32 %v11596_v29, %v3520_v33  ;;  %11915 = vmatpush3.bf16.msra.mxu1 %v12910_v51  ;;  %11926 = vmatprep.mubr.bf16.mxu1 %v13996_v38  ;;  %v11620_v38 = vpop.f32.mrf.mxu0  ;;  %v12914_v51 = vld [vmem:[#allocation4 + $0x48] sm:$0xff]   ;;  %v3806_v33 = vadd.f32 %v11616_v30, %v14568_v49 }
 0x38c   :  { %v3572_v23 = vpop.f32.mrf.mxu1  ;;  %11916 = vmatprep.subr.bf16.mxu1 %v12911_v4  ;;  %12092 = vmatprep.subr.bf16.mxu0 %v12907_v9  ;;  %v12918_v49 = vld [vmem:[#allocation4 + $0xa8] sm:$0xff]  }
 0x38d   :  { %v3591_v55 = vadd.f32 %v3572_v23, %v3518_v63  ;;  %v3789_v5 = vpop.f32.mrf.mxu0  ;;  %v3810_v30 = vadd.f32 %v11620_v38, %v3593_v31  ;;  %v12920_v31 = vld [vmem:[#allocation4 + $0x98] sm:$0xff]  }
 0x38e   :  { %v11597_v32 = vpop.f32.mrf.mxu1  ;;  %12093 = vmatpush3.bf16.msra.mxu0 %v12907_v9  ;;  %v12915_v9 = vld [vmem:[#allocation4 + $0x40] sm:$0xff]  }
 0x38f   :  { %v3594_v59 = vadd.f32 %v11597_v32, %v3521_v58  ;;  %11917 = vmatpush3.bf16.msra.mxu1 %v12911_v4  ;;  %v11621_v39 = vpop.f32.mrf.mxu0  ;;  %v12917_v58 = vld [vmem:[#allocation4 + $0xb0] sm:$0xff]  }
 0x390   :  { %11918 = vmatprep.subr.bf16.mxu1 %v12912_v19 }
 0x391   :  { %12095 = vmatmul.mubr.bf16.vlgmr.msra.gmra.mxu0 %v14453_v47  ;;  %v14587_v11 = vpop.f32.mrf.mxu0  ;;  %v14589_v47 = vpop.f32.mrf.mxu1 }
 0x392   :  { %12098 = vmatprep.mubr.bf16.mxu0 %v14456_v61  ;;  %16386 = vst [vmem:[#allocation71_spill] sm:$0xff] %v14587_v11  ;;  %16387 = vst [vmem:[#allocation72_spill] sm:$0xff] %v14589_v47  ;;  %v12916_v61 = vld [vmem:[#allocation4 + $0xb8] sm:$0xff]   ;;  %v12939_v47 = vld [vmem:[#allocation4 + $0x180] sm:$0xff]  }
 0x393   :  { %11919 = vmatpush3.bf16.msra.mxu1 %v12912_v19  ;;  %v11664_v29 = vpop.f32.mrf.mxu0  ;;  %v3807_v19 = vadd.f32 %v11617_v18, %v3590_v60  ;;  %v12919_v60 = vld [vmem:[#allocation4 + $0xa0] sm:$0xff]  }
 0x394   :  { %11920 = vmatprep.subr.bf16.mxu1 %v12913_v22 }
 0x397   :  { %11921 = vmatpush3.bf16.msra.mxu1 %v12913_v22  ;;  %v3919_v22 = vpop.f32.mrf.mxu0 }
 0x398   :  { %11922 = vmatprep.subr.bf16.mxu1 %v12914_v51 }
 0x399   :  { %12099 = vmatmul.mubr.bf16.gmra.mxu0 %v14467_v16  ;;  %v3804_v16 = vadd.f32 %v3773_v2, %v3587_v37  ;;  %v3808_v37 = vadd.f32 %v3789_v5, %v3591_v55  ;;  %v12923_v5 = vld [vmem:[#allocation4 + $0x80] sm:$0xff]  }
 0x39b   :  { %11923 = vmatpush3.bf16.msra.mxu1 %v12914_v51 }
 0x39c   :  { %11924 = vmatprep.subr.bf16.mxu1 %v12915_v9 }
 0x39f   :  { %11925 = vmatpush3.bf16.msra.mxu1 %v12915_v9 }
 0x3a0   :  { %11958 = vmatprep.subr.bf16.mxu1 %v12916_v61 }
 0x3a2   :  { %v11640_v63 = vpop.f32.mrf.mxu1  ;;  %11927 = vmatmul.mubr.bf16.vlgmr.msra.gmra.mxu1 %v14066_v62  ;;  %v11665_v62 = vpop.f32.mrf.mxu0 }
 0x3a3   :  { %v3879_v23 = vadd.f32 %v11640_v63, %v3806_v33  ;;  %11930 = vmatprep.mubr.bf16.mxu1 %v14069_v7  ;;  %11959 = vmatpush3.bf16.msra.mxu1 %v12916_v61  ;;  %v3811_v61 = vadd.f32 %v11621_v39, %v3594_v59 }
 0x3a4   :  { %v3846_v4 = vpop.f32.mrf.mxu1  ;;  %11960 = vmatprep.subr.bf16.mxu1 %v12917_v58  ;;  %v14598_v63 = vpop.f32.mrf.mxu0 }
 0x3a5   :  { %v3877_v32 = vadd.f32 %v3846_v4, %v3804_v16  ;;  %16389 = vst [vmem:[#allocation74_spill] sm:$0xff] %v14598_v63 }
 0x3a6   :  { %v11641_v51 = vpop.f32.mrf.mxu1  ;;  %v11668_v38 = vpop.f32.mrf.mxu0 }
 0x3a7   :  { %v3880_v9 = vadd.f32 %v11641_v51, %v3807_v19  ;;  %11961 = vmatpush3.bf16.msra.mxu1 %v12917_v58  ;;  %v12924_v51 = vld [vmem:[#allocation4 + $0x138] sm:$0xff]  }
 0x3a8   :  { %v14594_v11 = vpop.f32.mrf.mxu1  ;;  %11962 = vmatprep.subr.bf16.mxu1 %v12918_v49  ;;  %v3935_v58 = vpop.f32.mrf.mxu0 }
 0x3a9   :  { %16388 = vst [vmem:[#allocation73_spill] sm:$0xff] %v14594_v11 }
 0x3aa   :  { %v11644_v33 = vpop.f32.mrf.mxu1  ;;  %11931 = vmatmul.mubr.bf16.gmra.mxu1 %v14087_v8  ;;  %v12921_v8 = vld [vmem:[#allocation4 + $0x90] sm:$0xff]   ;;  %v11669_v55 = vpop.f32.mrf.mxu0 }
 0x3ab   :  { %v3883_v7 = vadd.f32 %v11644_v33, %v3810_v30  ;;  %11963 = vmatpush3.bf16.msra.mxu1 %v12918_v49  ;;  %11974 = vmatprep.mubr.bf16.mxu1 %v14039_v6  ;;  %v12922_v6 = vld [vmem:[#allocation4 + $0x88] sm:$0xff]   ;;  %v3952_v49 = vadd.f32 %v11664_v29, %v3879_v23 }
 0x3ac   :  { %v3862_v2 = vpop.f32.mrf.mxu1  ;;  %11964 = vmatprep.subr.bf16.mxu1 %v12919_v60  ;;  %v14600_v59 = vpop.f32.mrf.mxu0  ;;  %v12926_v23 = vld [vmem:[#allocation4 + $0x128] sm:$0xff]  }
 0x3ad   :  { %v3881_v18 = vadd.f32 %v3862_v2, %v3808_v37  ;;  %16390 = vst [vmem:[#allocation75_spill] sm:$0xff] %v14600_v59  ;;  %v3950_v37 = vadd.f32 %v3919_v22, %v3877_v32 }
 0x3ae   :  { %v11645_v16 = vpop.f32.mrf.mxu1  ;;  %v14602_v39 = vpop.f32.mrf.mxu0 }
 0x3af   :  { %v3884_v4 = vadd.f32 %v11645_v16, %v3811_v61  ;;  %11965 = vmatpush3.bf16.msra.mxu1 %v12919_v60  ;;  %v12925_v61 = vld [vmem:[#allocation4 + $0x130] sm:$0xff]  }
 0x3b0   :  { %11966 = vmatprep.subr.bf16.mxu1 %v12920_v31  ;;  %v14604_v19 = vpop.f32.mrf.mxu1  ;;  %v14610_v2 = vpop.f32.mrf.mxu0 }
 0x3b1   :  { %16391 = vst [vmem:[#allocation76_spill] sm:$0xff] %v14604_v19  ;;  %v5597_v19 = vld [vmem:[#allocation2 + $0xec] sm:$0x1] }
 0x3b2   :  { %v14616_v29 = vpop.f32.mrf.mxu0 }
 0x3b3   :  { %11967 = vmatpush3.bf16.msra.mxu1 %v12920_v31  ;;  %v3953_v31 = vadd.f32 %v11665_v62, %v3880_v9  ;;  %v3954_v9 = vadd.f32 %v3935_v58, %v3881_v18  ;;  %v12930_v58 = vld [vmem:[#allocation4 + $0x108] sm:$0xff]  }
 0x3b4   :  { %11968 = vmatprep.subr.bf16.mxu1 %v12921_v8  ;;  %v14624_v62 = vpop.f32.mrf.mxu0 }
 0x3b5   :  { %16397 = vst [vmem:[#allocation82_spill] sm:$0xff] %v14624_v62 }
 0x3b7   :  { %11969 = vmatpush3.bf16.msra.mxu1 %v12921_v8 }
 0x3b8   :  { %11970 = vmatprep.subr.bf16.mxu1 %v12922_v6 }
 0x3bb   :  { %11971 = vmatpush3.bf16.msra.mxu1 %v12922_v6 }
 0x3bc   :  { %11972 = vmatprep.subr.bf16.mxu1 %v12923_v5 }
 0x3bf   :  { %11973 = vmatpush3.bf16.msra.mxu1 %v12923_v5 }
 0x3c0   :  { %12006 = vmatprep.subr.bf16.mxu1 %v12924_v51 }
 0x3c2   :  { %v11688_v30 = vpop.f32.mrf.mxu1  ;;  %11975 = vmatmul.mubr.bf16.vlgmr.msra.gmra.mxu1 %v14109_v25 }
 0x3c3   :  { %v14607_v33 = vadd.f32 %v11688_v30, %v3952_v49  ;;  %11978 = vmatprep.mubr.bf16.mxu1 %v14112_v44  ;;  %12007 = vmatpush3.bf16.msra.mxu1 %v12924_v51  ;;  %v3956_v44 = vadd.f32 %v11668_v38, %v3883_v7  ;;  %v12927_v51 = vld [vmem:[#allocation4 + $0x120] sm:$0xff]   ;;  %v3957_v30 = vadd.f32 %v11669_v55, %v3884_v4  ;;  %v14630_v7 = vpop.f32.mrf.mxu0 }
 0x3c4   :  { %v4136_v60 = vpop.f32.mrf.mxu1  ;;  %12008 = vmatprep.subr.bf16.mxu1 %v12925_v61  ;;  %v12931_v55 = vld [vmem:[#allocation4 + $0x100] sm:$0xff]  }
 0x3c5   :  { %16392 = vst [vmem:[#allocation77_spill] sm:$0xff] %v14607_v33  ;;  %v14612_v16 = vadd.f32 %v4136_v60, %v3950_v37  ;;  %v14632_v38 = vpop.f32.mrf.mxu0  ;;  %v5595_v33 = vld [vmem:[#allocation2 + $0xe4] sm:$0x1] }
 0x3c6   :  { %v11689_v8 = vpop.f32.mrf.mxu1 }
 0x3c7   :  { %16393 = vst [vmem:[#allocation78_spill] sm:$0xff] %v14612_v16  ;;  %v14614_v6 = vadd.f32 %v11689_v8, %v3953_v31  ;;  %12009 = vmatpush3.bf16.msra.mxu1 %v12925_v61  ;;  %v14634_v18 = vpop.f32.mrf.mxu0  ;;  %v12932_v31 = vld [vmem:[#allocation4 + $0x1b8] sm:$0xff]  }
 0x3c8   :  { %v14618_v25 = vpop.f32.mrf.mxu1  ;;  %12010 = vmatprep.subr.bf16.mxu1 %v12926_v23 }
 0x3c9   :  { %16394 = vst [vmem:[#allocation79_spill] sm:$0xff] %v14614_v6  ;;  %16395 = vst [vmem:[#allocation80_spill] sm:$0xff] %v14618_v25  ;;  %v14636_v4 = vpop.f32.mrf.mxu0  ;;  %v5634_v25 = vshll.u32 %v5597_v19, 16 }
 0x3ca   :  { %v11692_v32 = vpop.f32.mrf.mxu1  ;;  %11979 = vmatmul.mubr.bf16.gmra.mxu1 %v14123_v26  ;;  %v12928_v26 = vld [vmem:[#allocation4 + $0x118] sm:$0xff]   ;;  %16400 = vst [vmem:[#allocation85_spill] sm:$0xff] %v14636_v4 }
 0x3cb   :  { %v14621_v22 = vadd.f32 %v11692_v32, %v3956_v44  ;;  %12011 = vmatpush3.bf16.msra.mxu1 %v12926_v23  ;;  %12022 = vmatprep.mubr.bf16.mxu1 %v13829_v56  ;;  %v12929_v56 = vld [vmem:[#allocation4 + $0x110] sm:$0xff]   ;;  %v14638_v61 = vpop.f32.mrf.mxu0  ;;  %v5636_v19 = vrot.slane %v5634_v25, 5 }
 0x3cc   :  { %v4152_v5 = vpop.f32.mrf.mxu1  ;;  %12012 = vmatprep.subr.bf16.mxu1 %v12927_v51  ;;  %v12933_v32 = vld [vmem:[#allocation4 + $0x1b0] sm:$0xff]  }
 0x3cd   :  { %16396 = vst [vmem:[#allocation81_spill] sm:$0xff] %v14621_v22  ;;  %v14626_v49 = vadd.f32 %v4152_v5, %v3954_v9  ;;  %v14640_v8 = vpop.f32.mrf.mxu0 }
 0x3ce   :  { %v11693_v37 = vpop.f32.mrf.mxu1 }
 0x3cf   :  { %16398 = vst [vmem:[#allocation83_spill] sm:$0xff] %v14626_v49  ;;  %v14628_v60 = vadd.f32 %v11693_v37, %v3957_v30  ;;  %12013 = vmatpush3.bf16.msra.mxu1 %v12927_v51  ;;  %v14646_v9 = vpop.f32.mrf.mxu0  ;;  %v12934_v51 = vld [vmem:[#allocation4 + $0x1a8] sm:$0xff]   ;;  %v12935_v37 = vld [vmem:[#allocation4 + $0x1a0] sm:$0xff]  }
 0x3d0   :  { %12014 = vmatprep.subr.bf16.mxu1 %v12928_v26  ;;  %v14642_v23 = vpop.f32.mrf.mxu1  ;;  %v12938_v49 = vld [vmem:[#allocation4 + $0x188] sm:$0xff]  }
 0x3d1   :  { %16399 = vst [vmem:[#allocation84_spill] sm:$0xff] %v14628_v60  ;;  %16401 = vst [vmem:[#allocation86_spill] sm:$0xff] %v14642_v23  ;;  %v14648_v30 = vpop.f32.mrf.mxu0 }
 0x3d2   :  { %16402 = vst [vmem:[#allocation87_spill] sm:$0xff] %v14648_v30 }
 0x3d3   :  { %12015 = vmatpush3.bf16.msra.mxu1 %v12928_v26 }
 0x3d4   :  { %12016 = vmatprep.subr.bf16.mxu1 %v12929_v56 }
 0x3d7   :  { %12017 = vmatpush3.bf16.msra.mxu1 %v12929_v56  ;;  %v12936_v56 = vld [vmem:[#allocation4 + $0x198] sm:$0xff]  }
 0x3d8   :  { %12018 = vmatprep.subr.bf16.mxu1 %v12930_v58 }
 0x3db   :  { %12019 = vmatpush3.bf16.msra.mxu1 %v12930_v58 }
 0x3dc   :  { %12020 = vmatprep.subr.bf16.mxu1 %v12931_v55 }
 0x3df   :  { %12021 = vmatpush3.bf16.msra.mxu1 %v12931_v55  ;;  %v5594_v55 = vld [vmem:[#allocation2 + $0xe0] sm:$0xf] }
 0x3e0   :  { %12054 = vmatprep.subr.bf16.mxu1 %v12932_v31  ;;  %v5614_v60 = vshll.u32 %v5594_v55, 16 }
 0x3e2   :  { %12023 = vmatmul.mubr.bf16.vlgmr.msra.gmra.mxu1 %v13867_v20  ;;  %v11736_v44 = vpop.f32.mrf.mxu1  ;;  %v5616_v6 = vrot.slane %v5614_v60, 5 }
 0x3e3   :  { %12026 = vmatprep.mubr.bf16.mxu1 %v13871_v35  ;;  %12055 = vmatpush3.bf16.msra.mxu1 %v12932_v31  ;;  %v14652_v35 = vpop.f32.mrf.mxu0  ;;  %v5596_v31 = vld [vmem:[#allocation2 + $0xe8] sm:$0xf] }
 0x3e4   :  { %12056 = vmatprep.subr.bf16.mxu1 %v12933_v32  ;;  %v4274_v5 = vpop.f32.mrf.mxu1  ;;  %v5625_v22 = vshrl.u32 %v5596_v31, 16  ;;  %v5628_v4 = vshll.u32 %v5596_v31, 16 }
 0x3e5   :  { %v14656_v58 = vpop.f32.mrf.mxu0 }
 0x3e6   :  { %v11737_v20 = vpop.f32.mrf.mxu1  ;;  %v5630_v30 = vrot.slane %v5628_v4, 5 }
 0x3e7   :  { %12057 = vmatpush3.bf16.msra.mxu1 %v12933_v32  ;;  %v4286_v4 = vadd.f32 %v11737_v20, %v14616_v29  ;;  %v12941_v29 = vld [vmem:[#allocation4 + $0x230] sm:$0xff]  }
 0x3e8   :  { %12058 = vmatprep.subr.bf16.mxu1 %v12934_v51  ;;  %v14654_v26 = vpop.f32.mrf.mxu1  ;;  %v5598_v20 = vld [vmem:[#allocation2 + $0xf0] sm:$0xf] }
 0x3e9   :  { %16403 = vst [vmem:[#allocation88_spill] sm:$0xff] %v14654_v26 }
 0x3ea   :  { %12027 = vmatmul.mubr.bf16.gmra.mxu1 %v13887_v45  ;;  %v11740_v32 = vpop.f32.mrf.mxu1  ;;  %v12937_v45 = vld [vmem:[#allocation4 + $0x190] sm:$0xff]  }
 0x3eb   :  { %12059 = vmatpush3.bf16.msra.mxu1 %v12934_v51  ;;  %12070 = vmatprep.mubr.bf16.mxu1 %v14541_v13  ;;  %v14658_v51 = vpop.f32.mrf.mxu0  ;;  %v5611_v13 = vshrl.u32 %v5594_v55, 16  ;;  %v4283_v55 = vadd.f32 %v11736_v44, %v14602_v39 }
 0x3ec   :  { %12060 = vmatprep.subr.bf16.mxu1 %v12935_v37 }
 0x3ed   :  { %v14660_v23 = vpop.f32.mrf.mxu0  ;;  %v5613_v59 = vrot.slane %v5611_v13, 4  ;;  %v4372_v13 = vadd.f32 %v14638_v61, %v4283_v55  ;;  %v4299_v61 = vadd.f32 %v11740_v32, %v14630_v7  ;;  %v12942_v7 = vld [vmem:[#allocation4 + $0x228] sm:$0xff]   ;;  %v5600_v55 = vld [vmem:[#allocation2 + $0xf8] sm:$0xf] }
 0x3ee   :  { %16404 = vst [vmem:[#allocation89_spill] sm:$0xff] %v14660_v23  ;;  %v4275_v23 = vadd.f32 %v4274_v5, %v14610_v2 }
 0x3ef   :  { %12061 = vmatpush3.bf16.msra.mxu1 %v12935_v37  ;;  %v4290_v37 = vpop.f32.mrf.mxu1  ;;  %v14662_v26 = vpop.f32.mrf.mxu0  ;;  %v5617_v31 = vor.u32 %v5616_v6, %v5613_v59  ;;  %v4376_v32 = vadd.f32 %v14652_v35, %v4299_v61  ;;  %v5653_v35 = vshrl.u32 %v5600_v55, 16 }
 0x3f0   :  { %12062 = vmatprep.subr.bf16.mxu1 %v12936_v56  ;;  %v4291_v25 = vadd.f32 %v4290_v37, %v14632_v38  ;;  %v5604_v38 = vld [vmem:[#allocation2 + $0x108] sm:$0xf] }
 0x3f1   :  { %v11741_v62 = vpop.f32.mrf.mxu1  ;;  %v14666_v60 = vpop.f32.mrf.mxu0  ;;  %v5618_v59 = vrot.slane %v5617_v31, 4  ;;  %v5602_v31 = vld [vmem:[#allocation2 + $0x100] sm:$0xf] }
 0x3f3   :  { %12063 = vmatpush3.bf16.msra.mxu1 %v12936_v56  ;;  %v5627_v56 = vrot.slane %v5625_v22, 4  ;;  %v14668_v22 = vpop.f32.mrf.mxu1  ;;  %v14677_v2 = vpop.f32.mrf.mxu0 }
 0x3f4   :  { %12064 = vmatprep.subr.bf16.mxu1 %v12937_v45  ;;  %16405 = vst [vmem:[#allocation90_spill] sm:$0xff] %v14668_v22 }
 0x3f5   :  { %v5631_v16 = vor.u32 %v5630_v30, %v5627_v56 }
 0x3f7   :  { %12065 = vmatpush3.bf16.msra.mxu1 %v12937_v45  ;;  %v5620_v45 = vshll.u32 %v5595_v33, 16  ;;  %v5632_v33 = vrot.slane %v5631_v16, 4 }
 0x3f8   :  { %12066 = vmatprep.subr.bf16.mxu1 %v12938_v49 }
 0x3f9   :  { %v5622_v39 = vrot.slane %v5620_v45, 5 }
 0x3fb   :  { %12067 = vmatpush3.bf16.msra.mxu1 %v12938_v49  ;;  %v12940_v49 = vld [vmem:[#allocation4 + $0x238] sm:$0xff]  }
 0x3fc   :  { %12068 = vmatprep.subr.bf16.mxu1 %v12939_v47 }
 0x3ff   :  { %12069 = vmatpush3.bf16.msra.mxu1 %v12939_v47  ;;  %v4370_v47 = vadd.f32 %v14640_v8, %v4275_v23  ;;  %v14690_v23 = vpop.f32.mrf.mxu0 }
 0x400   :  { %12102 = vmatprep.subr.bf16.mxu1 %v12940_v49  ;;  %16406 = vst [vmem:[#allocation91_spill] sm:$0xff] %v14690_v23 }
 0x402   :  { %v11784_v63 = vpop.f32.mrf.mxu1  ;;  %12071 = vmatmul.mubr.bf16.vlgmr.msra.gmra.mxu1 %v14559_v0  ;;  %v4373_v0 = vadd.f32 %v14646_v9, %v4286_v4  ;;  %v4302_v9 = vadd.f32 %v11741_v62, %v14634_v18  ;;  %v5639_v4 = vshrl.u32 %v5598_v20, 16  ;;  %v12943_v18 = vld [vmem:[#allocation4 + $0x220] sm:$0xff]  }
 0x403   :  { %v14673_v6 = vadd.f32 %v11784_v63, %v4372_v13  ;;  %12074 = vmatprep.mubr.bf16.mxu1 %v14563_v57  ;;  %12103 = vmatpush3.bf16.msra.mxu1 %v12940_v49  ;;  %v5623_v63 = vsel %vm13819_vm9, %v5618_v59, %v5622_v39  ;;  %v5637_v57 = vsel %vm13819_vm9, %v5632_v33, %v5636_v19  ;;  %v5642_v13 = vshll.u32 %v5598_v20, 16  ;;  %v14700_v59 = vpop.f32.mrf.mxu0 }
 0x404   :  { %v4412_v44 = vpop.f32.mrf.mxu1  ;;  %12104 = vmatprep.subr.bf16.mxu1 %v12941_v29  ;;  %v10345_v56 = vcombine.low %v5623_v63, %v5637_v57  ;;  %v4374_v49 = vadd.f32 %v14656_v58, %v4291_v25  ;;  %v5656_v39 = vshll.u32 %v5600_v55, 16  ;;  %v5667_v33 = vshrl.u32 %v5602_v31, 16  ;;  %v5599_v58 = vld [vmem:[#allocation2 + $0xf4] sm:$0x1] }
 0x405   :  { %v14680_v5 = vadd.f32 %v4412_v44, %v4370_v47  ;;  %v5670_v19 = vshll.u32 %v5602_v31, 16  ;;  %v5681_v44 = vshrl.u32 %v5604_v38, 16  ;;  %v5641_v63 = vrot.slane %v5639_v4, 4  ;;  %v14707_v25 = vpop.f32.mrf.mxu0 }
 0x406   :  { %v11785_v16 = vpop.f32.mrf.mxu1  ;;  %v5644_v57 = vrot.slane %v5642_v13, 5  ;;  %v5655_v20 = vrot.slane %v5653_v35, 4  ;;  %v5669_v55 = vrot.slane %v5667_v33, 4 }
 0x407   :  { %v14688_v8 = vadd.f32 %v11785_v16, %v4373_v0  ;;  %12105 = vmatpush3.bf16.msra.mxu1 %v12941_v29  ;;  %v5684_v29 = vshll.u32 %v5604_v38, 16  ;;  %v5601_v16 = vld [vmem:[#allocation2 + $0xfc] sm:$0x1]  ;;  %v5672_v31 = vrot.slane %v5670_v19, 5  ;;  %v5606_v38 = vld [vmem:[#allocation2 + $0x110] sm:$0xf]  ;;  %v14709_v13 = vpop.f32.mrf.mxu0 }
 0x408   :  { %v14692_v30 = vpop.f32.mrf.mxu1  ;;  %12106 = vmatprep.subr.bf16.mxu1 %v12942_v7  ;;  %v5695_v23 = vshrl.u32 %v5606_v38, 16  ;;  %v5698_v19 = vshll.u32 %v5606_v38, 16  ;;  %v5609_v38 = vld [vmem:[#allocation2 + $0x11c] sm:$0x1] }
 0x409   :  { %16407 = vst [vmem:[#allocation92_spill] sm:$0xff] %v14692_v30  ;;  %v5673_v35 = vor.u32 %v5672_v31, %v5669_v55  ;;  %v5607_v55 = vld [vmem:[#allocation2 + $0x114] sm:$0x1] }
 0x40a   :  { %v11788_v45 = vpop.f32.mrf.mxu1  ;;  %12075 = vmatmul.mubr.bf16.gmra.mxu1 %v14575_v34  ;;  %v4377_v34 = vadd.f32 %v14658_v51, %v4302_v9  ;;  %v5605_v51 = vld [vmem:[#allocation2 + $0x10c] sm:$0x1]  ;;  %v5683_v9 = vrot.slane %v5681_v44, 4  ;;  %v5700_v31 = vrot.slane %v5698_v19, 5 }
 0x40b   :  { %v14697_v37 = vadd.f32 %v11788_v45, %v4376_v32  ;;  %12107 = vmatpush3.bf16.msra.mxu1 %v12942_v7  ;;  %12118 = vmatprep.mubr.bf16.mxu1 %v10345_v56  ;;  %v12944_v7 = vld [vmem:[#allocation4 + $0x218] sm:$0xff]   ;;  %v5658_v32 = vrot.slane %v5656_v39, 5  ;;  %v5603_v56 = vld [vmem:[#allocation2 + $0x104] sm:$0x1]  ;;  %v5686_v45 = vrot.slane %v5684_v29, 5  ;;  %v5690_v39 = vshll.u32 %v5605_v51, 16 }
 0x40c   :  { %v4428_v62 = vpop.f32.mrf.mxu1  ;;  %12108 = vmatprep.subr.bf16.mxu1 %v12943_v18  ;;  %v5676_v4 = vshll.u32 %v5603_v56, 16  ;;  %v5674_v56 = vrot.slane %v5673_v35, 4 }
 0x40d   :  { %v14702_v47 = vadd.f32 %v4428_v62, %v4374_v49  ;;  %v5608_v49 = vld [vmem:[#allocation2 + $0x118] sm:$0xf]  ;;  %v5645_v62 = vor.u32 %v5644_v57, %v5641_v63  ;;  %v5659_v22 = vor.u32 %v5658_v32, %v5655_v20  ;;  %v5687_v33 = vor.u32 %v5686_v45, %v5683_v9 }
 0x40e   :  { %v11789_v61 = vpop.f32.mrf.mxu1  ;;  %v5709_v30 = vshrl.u32 %v5608_v49, 16  ;;  %v5712_v44 = vshll.u32 %v5608_v49, 16  ;;  %v5678_v63 = vrot.slane %v5676_v4, 5  ;;  %v5692_v40 = vrot.slane %v5690_v39, 5  ;;  %v12947_v49 = vld [vmem:[#allocation4 + $0x200] sm:$0xff]  }
 0x40f   :  { %v14705_v0 = vadd.f32 %v11789_v61, %v4377_v34  ;;  %12109 = vmatpush3.bf16.msra.mxu1 %v12943_v18  ;;  %v5648_v18 = vshll.u32 %v5599_v58, 16  ;;  %v5662_v34 = vshll.u32 %v5601_v16, 16  ;;  %v12945_v61 = vld [vmem:[#allocation4 + $0x210] sm:$0xff]   ;;  %v5646_v29 = vrot.slane %v5645_v62, 4  ;;  %v14711_v58 = vpop.f32.mrf.mxu0  ;;  %v12946_v16 = vld [vmem:[#allocation4 + $0x208] sm:$0xff]  }
 0x410   :  { %12110 = vmatprep.subr.bf16.mxu1 %v12944_v7  ;;  %v5660_v57 = vrot.slane %v5659_v22, 4  ;;  %v5697_v20 = vrot.slane %v5695_v23, 4  ;;  %v5688_v32 = vrot.slane %v5687_v33, 4  ;;  %v5711_v51 = vrot.slane %v5709_v30, 4  ;;  %v14721_v39 = vpop.f32.mrf.mxu1 }
 0x411   :  { %v5650_v11 = vrot.slane %v5648_v18, 5  ;;  %v5714_v9 = vrot.slane %v5712_v44, 5  ;;  %v11856_v45 = vpop.f32.mrf.mxu0  ;;  %v5679_v22 = vsel %vm13819_vm9, %v5674_v56, %v5678_v63  ;;  %v5704_v23 = vshll.u32 %v5607_v55, 16 }
 0x412   :  { %v5701_v30 = vor.u32 %v5700_v31, %v5697_v20  ;;  %v4518_v44 = vadd.f32 %v14662_v26, %v14673_v6  ;;  %v4516_v56 = vadd.f32 %v14666_v60, %v14680_v5  ;;  %v4519_v55 = vadd.f32 %v14677_v2, %v14688_v8 }
 0x413   :  { %12111 = vmatpush3.bf16.msra.mxu1 %v12944_v7  ;;  %v5664_v7 = vrot.slane %v5662_v34, 5  ;;  %v5651_v62 = vsel %vm13819_vm9, %v5646_v29, %v5650_v11  ;;  %v5693_v34 = vsel %vm13819_vm9, %v5688_v32, %v5692_v40  ;;  %v5715_v4 = vor.u32 %v5714_v9, %v5711_v51  ;;  %v4664_v35 = vpop.f32.mrf.mxu0 }
 0x414   :  { %12112 = vmatprep.subr.bf16.mxu1 %v12945_v61  ;;  %v10347_v19 = vcombine.low %v5679_v22, %v5693_v34  ;;  %v5706_v11 = vrot.slane %v5704_v23, 5  ;;  %v5702_v29 = vrot.slane %v5701_v30, 4  ;;  %v4522_v60 = vadd.f32 %v14700_v59, %v14697_v37 }
 0x415   :  { %v5665_v18 = vsel %vm13819_vm9, %v5660_v57, %v5664_v7  ;;  %v5716_v7 = vrot.slane %v5715_v4, 4  ;;  %v4520_v8 = vadd.f32 %v14707_v25, %v14702_v47  ;;  %v4523_v34 = vadd.f32 %v14709_v13, %v14705_v0 }
 0x416   :  { %v10346_v33 = vcombine.low %v5651_v62, %v5665_v18  ;;  %v5707_v31 = vsel %vm13819_vm9, %v5702_v29, %v5706_v11 }
 0x417   :  { %12113 = vmatpush3.bf16.msra.mxu1 %v12945_v61  ;;  %v5718_v61 = vshll.u32 %v5609_v38, 16 }
 0x418   :  { %12114 = vmatprep.subr.bf16.mxu1 %v12946_v16 }
 0x419   :  { %v5720_v63 = vrot.slane %v5718_v61, 5 }
 0x41b   :  { %12115 = vmatpush3.bf16.msra.mxu1 %v12946_v16  ;;  %v11857_v16 = vpop.f32.mrf.mxu0  ;;  %v5721_v26 = vsel %vm13819_vm9, %v5716_v7, %v5720_v63 }
 0x41c   :  { %12116 = vmatprep.subr.bf16.mxu1 %v12947_v49  ;;  %v10348_v62 = vcombine.low %v5707_v31, %v5721_v26 }
 0x41d   :  { %v14733_v6 = vpop.f32.mrf.mxu0 }
 0x41f   :  { %12117 = vmatpush3.bf16.msra.mxu1 %v12947_v49  ;;  %v11860_v5 = vpop.f32.mrf.mxu0 }
 0x421   :  { %v4680_v30 = vpop.f32.mrf.mxu0 }
 0x422   :  { %v11832_v57 = vpop.f32.mrf.mxu1  ;;  %12119 = vmatmul.mubr.bf16.vlgmr.msra.gmra.mxu1 %v10346_v33 }
 0x423   :  { %v4591_v40 = vadd.f32 %v11832_v57, %v4518_v44  ;;  %12122 = vmatprep.mubr.bf16.mxu1 %v10347_v19 }
 0x424   :  { %v4558_v20 = vpop.f32.mrf.mxu1 }
 0x425   :  { %v4589_v32 = vadd.f32 %v4558_v20, %v4516_v56  ;;  %v4697_v19 = vadd.f32 %v11856_v45, %v4591_v40  ;;  %v11861_v56 = vpop.f32.mrf.mxu0 }
 0x426   :  { %v11833_v51 = vpop.f32.mrf.mxu1 }
 0x427   :  { %v4592_v9 = vadd.f32 %v11833_v51, %v4519_v55  ;;  %v4695_v38 = vadd.f32 %v4664_v35, %v4589_v32  ;;  %v14759_v55 = vpop.f32.mrf.mxu0 }
 0x428   :  { %v14735_v49 = vpop.f32.mrf.mxu1 }
 0x429   :  { %v4698_v29 = vadd.f32 %v11857_v16, %v4592_v9  ;;  %v14761_v16 = vpop.f32.mrf.mxu0 }
 0x42a   :  { %v11836_v18 = vpop.f32.mrf.mxu1  ;;  %12123 = vmatmul.mubr.bf16.gmra.mxu1 %v10348_v62 }
 0x42b   :  { %v4595_v2 = vadd.f32 %v11836_v18, %v4522_v60  ;;  %v14763_v31 = vpop.f32.mrf.mxu0 }
 0x42c   :  { %v4574_v22 = vpop.f32.mrf.mxu1 }
 0x42d   :  { %v4593_v23 = vadd.f32 %v4574_v22, %v4520_v8  ;;  %v4701_v0 = vadd.f32 %v11860_v5, %v4595_v2  ;;  %v14765_v26 = vpop.f32.mrf.mxu0  ;;  %v1553_v8 = vadd.f32 %v14234_v27, %v14177_v41 }
 0x42e   :  { %v11837_v4 = vpop.f32.mrf.mxu1 }
 0x42f   :  { %v4596_v61 = vadd.f32 %v11837_v4, %v4523_v34  ;;  %v4699_v35 = vadd.f32 %v4680_v30, %v4593_v23  ;;  %v14767_v51 = vpop.f32.mrf.mxu0  ;;  %v1857_v34 = vadd.f32 %v14257_v10, %v1553_v8 }
 0x430   :  { %v14743_v33 = vpop.f32.mrf.mxu1 }
 0x431   :  { %v4702_v45 = vadd.f32 %v11861_v56, %v4596_v61  ;;  %v2026_v4 = vadd.f32 %v14304_v46, %v1857_v34  ;;  %v16412_v46 = vld [vmem:[#allocation51_spill] sm:$0xff] }
 0x432   :  { %v16415_v34 = vld [vmem:[#allocation55_spill] sm:$0xff] }
 0x442   :  { %v11880_v37 = vpop.f32.mrf.mxu1 }
 0x443   :  { %v14745_v59 = vadd.f32 %v11880_v37, %v4697_v19  ;;  %v16410_v19 = vld [vmem:[#allocation54_spill] sm:$0xff] }
 0x444   :  { %v4770_v11 = vpop.f32.mrf.mxu1  ;;  %v2195_v37 = vadd.f32 %v16410_v19, %v2026_v4 }
 0x445   :  { %v14747_v44 = vadd.f32 %v4770_v11, %v4695_v38  ;;  %v14771_v38 = vpop.f32.mrf.mxu0 }
 0x446   :  { %v11881_v47 = vpop.f32.mrf.mxu1  ;;  %v2476_v41 = vadd.f32 %v14423_v24, %v2195_v37 }
 0x447   :  { %v14749_v25 = vadd.f32 %v11881_v47, %v4698_v29  ;;  %v14775_v60 = vpop.f32.mrf.mxu0 }
 0x448   :  { %v14751_v7 = vpop.f32.mrf.mxu1  ;;  %v2645_v10 = vadd.f32 %v14470_v17, %v2476_v41  ;;  %v14824_v17 = vadd.f32 %v14497_v3, %v14480_v12 }
 0x449   :  { %v14779_v18 = vpop.f32.mrf.mxu0 }
 0x44a   :  { %v11884_v13 = vpop.f32.mrf.mxu1  ;;  %16409 = vst [vmem:[#allocation94_spill] sm:$0xff] %v14779_v18  ;;  %16417 = vst [vmem:[#allocation51_spill] sm:$0xff] %v14824_v17 }
 0x44b   :  { %v14753_v63 = vadd.f32 %v11884_v13, %v4701_v0  ;;  %v14785_v22 = vpop.f32.mrf.mxu0  ;;  %v16411_v0 = vld [vmem:[#allocation50_spill] sm:$0xff] }
 0x44c   :  { %v4786_v57 = vpop.f32.mrf.mxu1  ;;  %v1569_v13 = vadd.f32 %v16412_v46, %v16411_v0  ;;  %v14836_v46 = vadd.f32 %v14490_v21, %v14477_v1  ;;  %v16419_v1 = vld [vmem:[#allocation60_spill] sm:$0xff] }
 0x44d   :  { %v14755_v20 = vadd.f32 %v4786_v57, %v4699_v35  ;;  %v14790_v30 = vpop.f32.mrf.mxu0  ;;  %v2814_v57 = vadd.f32 %v14487_v54, %v2645_v10  ;;  %v14852_v21 = vadd.f32 %v16419_v1, %v14483_v52  ;;  %v16425_v52 = vld [vmem:[#allocation58_spill] sm:$0xff] }
 0x44e   :  { %v11885_v40 = vpop.f32.mrf.mxu1  ;;  %v16426_v1 = vld [vmem:[#allocation62_spill] sm:$0xff] }
 0x44f   :  { %v14757_v32 = vadd.f32 %v11885_v40, %v4702_v45  ;;  %v14795_v35 = vpop.f32.mrf.mxu0  ;;  %v16414_v45 = vld [vmem:[#allocation52_spill] sm:$0xff]  ;;  %v14820_v19 = vadd.f32 %v14504_v14, %v2814_v57  ;;  %v5848_v14 = vmul.f32 %v14824_v17, %v14824_v17  ;;  %v3205_v57 = vadd.f32 %v14521_v42, %v14519_v28  ;;  %16420 = vst [vmem:[#allocation55_spill] sm:$0xff] %v14852_v21 }
 0x450   :  { %v14769_v9 = vpop.f32.mrf.mxu1  ;;  %v1861_v40 = vadd.f32 %v16414_v45, %v1569_v13  ;;  %16418 = vst [vmem:[#allocation52_spill] sm:$0xff] %v14836_v46  ;;  %v16421_v45 = vld [vmem:[#allocation56_spill] sm:$0xff] }
 0x451   :  { %16408 = vst [vmem:[#allocation93_spill] sm:$0xff] %v14757_v32  ;;  %v14801_v27 = vpop.f32.mrf.mxu0  ;;  %16416 = vst [vmem:[#allocation50_spill] sm:$0xff] %v14820_v19  ;;  %v5849_v10 = vmul.f32 %v14820_v19, %v14820_v19  ;;  %v5811_v13 = vadd.f32 %v14820_v19, %v14824_v17  ;;  %v5851_v19 = vmul.f32 %v14852_v21, %v14852_v21 }
 0x452   :  { %v2030_v4 = vadd.f32 %v16415_v34, %v1861_v40  ;;  %v3442_v34 = vadd.f32 %v14539_v53, %v3205_v57  ;;  %v14868_v17 = vadd.f32 %v16426_v1, %v16425_v52  ;;  %v16434_v1 = vld [vmem:[#allocation61_spill] sm:$0xff] }
 0x453   :  { %v14806_v47 = vpop.f32.mrf.mxu0 }
 0x454   :  { %v2199_v41 = vadd.f32 %v14430_v36, %v2030_v4  ;;  %v5880_v36 = vadd.f32 %v5849_v10, %v5848_v14  ;;  %v5812_v10 = vadd.f32 %v5811_v13, %v14836_v46  ;;  %16427 = vst [vmem:[#allocation64_spill] sm:$0xff] %v14868_v17  ;;  %v3515_v53 = vadd.f32 %v14552_v48, %v3442_v34  ;;  %v16429_v13 = vld [vmem:[#allocation65_spill] sm:$0xff] }
 0x455   :  { %v14814_v8 = vpop.f32.mrf.mxu0 }
 0x456   :  { %v2480_v0 = vadd.f32 %v14474_v43, %v2199_v41  ;;  %v5850_v43 = vmul.f32 %v14836_v46, %v14836_v46  ;;  %v5813_v57 = vadd.f32 %v5812_v10, %v14852_v21  ;;  %v16431_v10 = vld [vmem:[#allocation70_spill] sm:$0xff] }
 0x457   :  { %v14826_v37 = vpop.f32.mrf.mxu0 }
 0x458   :  { %v2649_v40 = vadd.f32 %v16421_v45, %v2480_v0  ;;  %v5881_v14 = vadd.f32 %v5880_v36, %v5850_v43  ;;  %v5814_v52 = vadd.f32 %v5813_v57, %v14868_v17  ;;  %v16438_v57 = vld [vmem:[#allocation66_spill] sm:$0xff] }
 0x459   :  { %v14840_v12 = vpop.f32.mrf.mxu0 }
 0x45a   :  { %v2818_v28 = vadd.f32 %v16423_v50, %v2649_v40  ;;  %v5882_v45 = vadd.f32 %v5881_v14, %v5851_v19  ;;  %v3588_v50 = vadd.f32 %v14573_v15, %v3515_v53  ;;  %v5852_v40 = vmul.f32 %v14868_v17, %v14868_v17  ;;  %v16436_v53 = vld [vmem:[#allocation73_spill] sm:$0xff] }
 0x45b   :  { %v14856_v4 = vpop.f32.mrf.mxu0 }
 0x45c   :  { %16422 = vst [vmem:[#allocation60_spill] sm:$0xff] %v14856_v4  ;;  %v14875_v36 = vadd.f32 %v16429_v13, %v2818_v28  ;;  %v5883_v48 = vadd.f32 %v5882_v45, %v5852_v40  ;;  %v3805_v19 = vadd.f32 %v16431_v10, %v3588_v50  ;;  %v16433_v28 = vld [vmem:[#allocation57_spill] sm:$0xff]  ;;  %v16439_v45 = vld [vmem:[#allocation67_spill] sm:$0xff] }
 0x45d   :  { %v14862_v42 = vpop.f32.mrf.mxu0  ;;  %v14892_v15 = vadd.f32 %v16434_v1, %v16433_v28  ;;  %v3221_v40 = vadd.f32 %v16439_v45, %v16438_v57  ;;  %v16441_v10 = vld [vmem:[#allocation59_spill] sm:$0xff]  ;;  %v16444_v28 = vld [vmem:[#allocation68_spill] sm:$0xff] }
 0x45e   :  { %16424 = vst [vmem:[#allocation56_spill] sm:$0xff] %v14862_v42  ;;  %16430 = vst [vmem:[#allocation62_spill] sm:$0xff] %v14875_v36  ;;  %v5853_v34 = vmul.f32 %v14875_v36, %v14875_v36  ;;  %v3878_v13 = vadd.f32 %v16436_v53, %v3805_v19  ;;  %v5815_v18 = vadd.f32 %v5814_v52, %v14875_v36  ;;  %v16445_v19 = vld [vmem:[#allocation74_spill] sm:$0xff]  ;;  %v16461_v42 = vld [vmem:[#allocation87_spill] sm:$0xff] }
 0x45f   :  { %v14878_v43 = vpop.f32.mrf.mxu0  ;;  %16435 = vst [vmem:[#allocation70_spill] sm:$0xff] %v14892_v15  ;;  %v5854_v50 = vmul.f32 %v14892_v15, %v14892_v15  ;;  %v3446_v1 = vadd.f32 %v16444_v28, %v3221_v40  ;;  %v16452_v40 = vld [vmem:[#allocation78_spill] sm:$0xff]  ;;  %v16453_v28 = vld [vmem:[#allocation72_spill] sm:$0xff] }
 0x460   :  { %v5884_v32 = vadd.f32 %v5883_v48, %v5853_v34  ;;  %v3951_v53 = vadd.f32 %v16445_v19, %v3878_v13  ;;  %v5816_v52 = vadd.f32 %v5815_v18, %v14892_v15  ;;  %v16447_v34 = vld [vmem:[#allocation80_spill] sm:$0xff]  ;;  %v5856_v13 = vmul.f32 %v16452_v40, %v16452_v40 }
 0x461   :  { %v14888_v14 = vpop.f32.mrf.mxu0 }
 0x462   :  { %v14773_v62 = vpop.f32.mrf.mxu1  ;;  %16432 = vst [vmem:[#allocation65_spill] sm:$0xff] %v14888_v14  ;;  %v16442_v14 = vld [vmem:[#allocation63_spill] sm:$0xff]  ;;  %v5885_v48 = vadd.f32 %v5884_v32, %v5854_v50  ;;  %v14914_v57 = vadd.f32 %v16447_v34, %v3951_v53 }
 0x463   :  { %v14900_v17 = vpop.f32.mrf.mxu0 }
 0x464   :  { %v14777_v5 = vpop.f32.mrf.mxu1  ;;  %16440 = vst [vmem:[#allocation61_spill] sm:$0xff] %v14900_v17  ;;  %16448 = vst [vmem:[#allocation67_spill] sm:$0xff] %v14914_v57  ;;  %v5857_v50 = vmul.f32 %v14914_v57, %v14914_v57 }
 0x465   :  { %v14916_v45 = vpop.f32.mrf.mxu0 }
 0x466   :  { %v14781_v2 = vpop.f32.mrf.mxu1  ;;  %16449 = vst [vmem:[#allocation59_spill] sm:$0xff] %v14916_v45 }
 0x467   :  { %v14929_v53 = vpop.f32.mrf.mxu0 }
 0x468   :  { %v14787_v23 = vpop.f32.mrf.mxu1  ;;  %16454 = vst [vmem:[#allocation68_spill] sm:$0xff] %v14929_v53  ;;  %v16460_v53 = vld [vmem:[#allocation77_spill] sm:$0xff] }
 0x469   :  { %v5858_v17 = vmul.f32 %v16460_v53, %v16460_v53 }
 0x46a   :  { %v14793_v61 = vpop.f32.mrf.mxu1 }
 0x46c   :  { %v14798_v11 = vpop.f32.mrf.mxu1 }
 0x46e   :  { %v14803_v29 = vpop.f32.mrf.mxu1 }
 0x470   :  { %v14811_v56 = vpop.f32.mrf.mxu1 }
 0x471   :  { %16413 = vst [vmem:[#allocation54_spill] sm:$0xff] %v14811_v56 }
 0x482   :  { %v14816_v24 = vpop.f32.mrf.mxu1 }
 0x484   :  { %v14828_v54 = vpop.f32.mrf.mxu1 }
 0x486   :  { %v14842_v3 = vpop.f32.mrf.mxu1 }
 0x488   :  { %v14858_v41 = vpop.f32.mrf.mxu1 }
 0x48a   :  { %v14871_v0 = vpop.f32.mrf.mxu1 }
 0x48b   :  { %16428 = vst [vmem:[#allocation58_spill] sm:$0xff] %v14871_v0  ;;  %v14906_v0 = vadd.f32 %v16442_v14, %v16441_v10  ;;  %v16451_v10 = vld [vmem:[#allocation69_spill] sm:$0xff] }
 0x48c   :  { %v14882_v46 = vpop.f32.mrf.mxu1  ;;  %v3519_v4 = vadd.f32 %v16451_v10, %v3446_v1  ;;  %v16456_v1 = vld [vmem:[#allocation88_spill] sm:$0xff] }
 0x48d   :  { %16443 = vst [vmem:[#allocation73_spill] sm:$0xff] %v14906_v0  ;;  %v5855_v14 = vmul.f32 %v14906_v0, %v14906_v0  ;;  %v5817_v18 = vadd.f32 %v5816_v52, %v14906_v0  ;;  %v14938_v52 = vpop.f32.mrf.mxu0 }
 0x48e   :  { %v14895_v21 = vpop.f32.mrf.mxu1  ;;  %v3592_v19 = vadd.f32 %v16453_v28, %v3519_v4  ;;  %16458 = vst [vmem:[#allocation74_spill] sm:$0xff] %v14938_v52  ;;  %v14988_v52 = vadd.f32 %v14763_v31, %v14747_v44 }
 0x48f   :  { %16437 = vst [vmem:[#allocation57_spill] sm:$0xff] %v14895_v21  ;;  %v5886_v32 = vadd.f32 %v5885_v48, %v5855_v14  ;;  %v5818_v15 = vadd.f32 %v5817_v18, %v16452_v40  ;;  %v16459_v14 = vld [vmem:[#allocation76_spill] sm:$0xff] }
 0x490   :  { %v14910_v21 = vpop.f32.mrf.mxu1 }
 0x491   :  { %16446 = vst [vmem:[#allocation66_spill] sm:$0xff] %v14910_v21  ;;  %v5887_v45 = vadd.f32 %v5886_v32, %v5856_v13  ;;  %v16455_v21 = vld [vmem:[#allocation82_spill] sm:$0xff]  ;;  %v5819_v4 = vadd.f32 %v5818_v15, %v14914_v57 }
 0x492   :  { %v4278_v10 = vadd.f32 %v16456_v1, %v16455_v21  ;;  %v16462_v21 = vld [vmem:[#allocation92_spill] sm:$0xff] }
 0x493   :  { %v5888_v28 = vadd.f32 %v5887_v45, %v5857_v50  ;;  %v5820_v13 = vadd.f32 %v5819_v4, %v16460_v53  ;;  %v16464_v45 = vld [vmem:[#allocation79_spill] sm:$0xff] }
 0x494   :  { %v4371_v18 = vadd.f32 %v16461_v42, %v4278_v10  ;;  %v16465_v50 = vld [vmem:[#allocation75_spill] sm:$0xff]  ;;  %v16466_v42 = vld [vmem:[#allocation86_spill] sm:$0xff] }
 0x495   :  { %v5889_v32 = vadd.f32 %v5888_v28, %v5858_v17  ;;  %v16467_v17 = vld [vmem:[#allocation91_spill] sm:$0xff] }
 0x496   :  { %v4444_v1 = vadd.f32 %v16462_v21, %v4371_v18  ;;  %v16469_v18 = vld [vmem:[#allocation83_spill] sm:$0xff] }
 0x497   :  { %v5860_v21 = vmul.f32 %v16469_v18, %v16469_v18 }
 0x498   :  { %v4517_v4 = vadd.f32 %v16467_v17, %v4444_v1 }
 0x49a   :  { %v4590_v53 = vadd.f32 %v14735_v49, %v4517_v4 }
 0x49c   :  { %v4696_v17 = vadd.f32 %v14733_v6, %v4590_v53 }
 0x49e   :  { %v4802_v4 = vadd.f32 %v14751_v7, %v4696_v17 }
 0x4a0   :  { %v14995_v7 = vadd.f32 %v14767_v51, %v4802_v4 }
 0x4a2   :  { %v14918_v36 = vpop.f32.mrf.mxu1  ;;  %v5865_v51 = vmul.f32 %v14995_v7, %v14995_v7 }
 0x4a3   :  { %16450 = vst [vmem:[#allocation63_spill] sm:$0xff] %v14918_v36  ;;  %v16457_v36 = vld [vmem:[#allocation71_spill] sm:$0xff] }
 0x4a4   :  { %v14931_v34 = vpop.f32.mrf.mxu1  ;;  %v3809_v56 = vadd.f32 %v16457_v36, %v3592_v19  ;;  %v14948_v36 = vpop.f32.mrf.mxu0  ;;  %v5859_v19 = vmul.f32 %v16464_v45, %v16464_v45 }
 0x4a5   :  { %16463 = vst [vmem:[#allocation80_spill] sm:$0xff] %v14948_v36 }
 0x4a6   :  { %v14940_v48 = vpop.f32.mrf.mxu1  ;;  %v3882_v0 = vadd.f32 %v16459_v14, %v3809_v56  ;;  %v14955_v56 = vpop.f32.mrf.mxu0  ;;  %v5821_v14 = vadd.f32 %v5820_v13, %v16464_v45  ;;  %v5890_v40 = vadd.f32 %v5889_v32, %v5859_v19  ;;  %v16471_v19 = vld [vmem:[#allocation90_spill] sm:$0xff] }
 0x4a8   :  { %v14950_v15 = vpop.f32.mrf.mxu1  ;;  %v3955_v57 = vadd.f32 %v16465_v50, %v3882_v0  ;;  %v14967_v36 = vpop.f32.mrf.mxu0  ;;  %v5822_v0 = vadd.f32 %v5821_v14, %v16469_v18  ;;  %v5891_v50 = vadd.f32 %v5890_v40, %v5860_v21  ;;  %v16472_v40 = vld [vmem:[#allocation81_spill] sm:$0xff] }
 0x4a9   :  { %v5862_v14 = vmul.f32 %v16472_v40, %v16472_v40  ;;  %v16473_v21 = vld [vmem:[#allocation89_spill] sm:$0xff] }
 0x4aa   :  { %v14959_v10 = vadd.f32 %v16466_v42, %v3955_v57  ;;  %v14962_v28 = vpop.f32.mrf.mxu1  ;;  %v16470_v57 = vld [vmem:[#allocation85_spill] sm:$0xff]  ;;  %v14976_v42 = vpop.f32.mrf.mxu0 }
 0x4ab   :  { %16468 = vst [vmem:[#allocation69_spill] sm:$0xff] %v14962_v28  ;;  %v4294_v1 = vadd.f32 %v16471_v19, %v16470_v57 }
 0x4ac   :  { %v5861_v13 = vmul.f32 %v14959_v10, %v14959_v10  ;;  %v14972_v32 = vpop.f32.mrf.mxu1  ;;  %v5823_v45 = vadd.f32 %v5822_v0, %v14959_v10  ;;  %v14990_v57 = vpop.f32.mrf.mxu0 }
 0x4ad   :  { %v4375_v18 = vadd.f32 %v16473_v21, %v4294_v1  ;;  %v5864_v1 = vmul.f32 %v14988_v52, %v14988_v52 }
 0x4ae   :  { %v5892_v49 = vadd.f32 %v5891_v50, %v5861_v13  ;;  %v14981_v28 = vpop.f32.mrf.mxu1  ;;  %v5824_v6 = vadd.f32 %v5823_v45, %v16472_v40  ;;  %v16474_v13 = vld [vmem:[#allocation84_spill] sm:$0xff]  ;;  %v15003_v44 = vpop.f32.mrf.mxu0 }
 0x4af   :  { %v4448_v0 = vadd.f32 %v14721_v39, %v4375_v18  ;;  %v5863_v19 = vmul.f32 %v16474_v13, %v16474_v13 }
 0x4b0   :  { %v5893_v53 = vadd.f32 %v5892_v49, %v5862_v14  ;;  %v14997_v50 = vpop.f32.mrf.mxu1  ;;  %v5825_v17 = vadd.f32 %v5824_v6, %v16474_v13  ;;  %v15014_v49 = vadd.f32 %v14761_v16, %v14745_v59  ;;  %v15017_v21 = vpop.f32.mrf.mxu0 }
 0x4b1   :  { %v4521_v45 = vadd.f32 %v14711_v58, %v4448_v0 }
 0x4b2   :  { %v5894_v39 = vadd.f32 %v5893_v53, %v5863_v19  ;;  %v5826_v4 = vadd.f32 %v5825_v17, %v14988_v52  ;;  %v5866_v53 = vmul.f32 %v15014_v49, %v15014_v49  ;;  %v15028_v0 = vpop.f32.mrf.mxu0 }
 0x4b3   :  { %v4594_v18 = vadd.f32 %v14743_v33, %v4521_v45  ;;  %v15026_v33 = vadd.f32 %v14765_v26, %v14749_v25 }
 0x4b4   :  { %v5895_v14 = vadd.f32 %v5894_v39, %v5864_v1  ;;  %v5827_v58 = vadd.f32 %v5826_v4, %v14995_v7  ;;  %v15039_v39 = vadd.f32 %v14775_v60, %v14755_v20  ;;  %v15041_v25 = vpop.f32.mrf.mxu0 }
 0x4b5   :  { %v4700_v59 = vadd.f32 %v14759_v55, %v4594_v18  ;;  %v5867_v17 = vmul.f32 %v15026_v33, %v15026_v33  ;;  %v5126_v55 = vadd.f32 %v14795_v35, %v14777_v5  ;;  %v5129_v5 = vadd.f32 %v14806_v47, %v14787_v23 }
 0x4b6   :  { %v5896_v6 = vadd.f32 %v5895_v14, %v5865_v51  ;;  %v5828_v19 = vadd.f32 %v5827_v58, %v15014_v49  ;;  %v5868_v20 = vmul.f32 %v15039_v39, %v15039_v39  ;;  %v5134_v58 = vadd.f32 %v14790_v30, %v14773_v62 }
 0x4b7   :  { %v4806_v45 = vadd.f32 %v14769_v9, %v4700_v59  ;;  %v15051_v9 = vpop.f32.mrf.mxu0  ;;  %v5221_v14 = vadd.f32 %v14828_v54, %v5126_v55  ;;  %v5137_v54 = vadd.f32 %v14801_v27, %v14781_v2  ;;  %v5142_v23 = vadd.f32 %v14826_v37, %v14798_v11  ;;  %v12651_v2 = vld [vmem:[#allocation7 + $0x78] sm:$0xff]   ;;  %v12652_v27 = vld [vmem:[#allocation7 + $0x70] sm:$0xff]  }
 0x4b8   :  { %v5897_v1 = vadd.f32 %v5896_v6, %v5866_v53  ;;  %v5829_v51 = vadd.f32 %v5828_v19, %v15026_v33  ;;  %v5223_v59 = vadd.f32 %v14816_v24, %v5134_v58  ;;  %v5222_v19 = vadd.f32 %v14858_v41, %v5129_v5  ;;  %v12653_v24 = vld [vmem:[#allocation7 + $0x38] sm:$0xff]   ;;  %12126 = vmatprep.subr.bf16.mxu0 %v12651_v2  ;;  %v16479_v58 = vld [vmem:[#allocation58_spill] sm:$0xff] }
 0x4b9   :  { %v15049_v4 = vadd.f32 %v14785_v22, %v4806_v45  ;;  %v15065_v53 = vpop.f32.mrf.mxu0  ;;  %v5294_v62 = vadd.f32 %v14878_v43, %v5221_v14  ;;  %v5224_v30 = vadd.f32 %v14842_v3, %v5137_v54  ;;  %v5150_v11 = vadd.f32 %v14814_v8, %v14793_v61  ;;  %v12655_v3 = vld [vmem:[#allocation7 + $0x30] sm:$0xff]   ;;  %12150 = vmatprep.subr.bf16.mxu1 %v12653_v24  ;;  %v16478_v14 = vld [vmem:[#allocation60_spill] sm:$0xff]  ;;  %v16481_v8 = vld [vmem:[#allocation63_spill] sm:$0xff] }
 0x4ba   :  { %v5898_v18 = vadd.f32 %v5897_v1, %v5867_v17  ;;  %v5830_v35 = vadd.f32 %v5829_v51, %v15039_v39  ;;  %v15079_v1 = vadd.f32 %v14771_v38, %v14753_v63  ;;  %v5225_v37 = vadd.f32 %v14882_v46, %v5142_v23  ;;  %v16475_v38 = vld [vmem:[#allocation56_spill] sm:$0xff]  ;;  %12127 = vmatpush3.bf16.msra.mxu0 %v12651_v2  ;;  %v12657_v54 = vld [vmem:[#allocation7 + $0x28] sm:$0xff]   ;;  %v16483_v23 = vld [vmem:[#allocation66_spill] sm:$0xff] }
 0x4bb   :  { %v5869_v22 = vmul.f32 %v15049_v4, %v15049_v4  ;;  %v5367_v45 = vadd.f32 %v14931_v34, %v5294_v62  ;;  %v15083_v43 = vpop.f32.mrf.mxu0  ;;  %v5153_v63 = vadd.f32 %v14840_v12, %v14803_v29  ;;  %v5296_v55 = vadd.f32 %v16475_v38, %v5223_v59  ;;  %v16476_v34 = vld [vmem:[#allocation61_spill] sm:$0xff]  ;;  %12151 = vmatpush3.bf16.msra.mxu1 %v12653_v24  ;;  %v16484_v38 = vld [vmem:[#allocation68_spill] sm:$0xff] }
 0x4bc   :  { %v5899_v6 = vadd.f32 %v5898_v18, %v5868_v20  ;;  %v5831_v41 = vadd.f32 %v5830_v35, %v15049_v4  ;;  %v5295_v51 = vadd.f32 %v16476_v34, %v5222_v19  ;;  %v16477_v18 = vld [vmem:[#allocation54_spill] sm:$0xff]  ;;  %v5227_v5 = vadd.f32 %v16479_v58, %v5150_v11  ;;  %v16480_v35 = vld [vmem:[#allocation65_spill] sm:$0xff]  ;;  %12128 = vmatprep.subr.bf16.mxu0 %v12652_v27 }
 0x4bd   :  { %v5145_v20 = vadd.f32 %v16478_v14, %v16477_v18  ;;  %v5369_v46 = vadd.f32 %v16481_v8, %v5296_v55  ;;  %v5440_v12 = vadd.f32 %v14967_v36, %v5367_v45  ;;  %12152 = vmatprep.subr.bf16.mxu1 %v12655_v3  ;;  %v5558_v59 = vpop.f32.mrf.mxu0  ;;  %v16482_v19 = vld [vmem:[#allocation57_spill] sm:$0xff]  ;;  %v5298_v2 = vadd.f32 %v16484_v38, %v5225_v37  ;;  %v16486_v36 = vld [vmem:[#allocation94_spill] sm:$0xff]  ;;  %v16487_v18 = vld [vmem:[#allocation59_spill] sm:$0xff] }
 0x4be   :  { %v5900_v17 = vadd.f32 %v5899_v6, %v5869_v22  ;;  %v5297_v6 = vadd.f32 %v16480_v35, %v5224_v30  ;;  %v5368_v29 = vadd.f32 %v14950_v15, %v5295_v51  ;;  %v12654_v22 = vld [vmem:[#allocation7 + $0x68] sm:$0xff]   ;;  %v5228_v62 = vadd.f32 %v16482_v19, %v5153_v63  ;;  %12129 = vmatpush3.bf16.msra.mxu0 %v12652_v27  ;;  %v16488_v35 = vld [vmem:[#allocation74_spill] sm:$0xff] }
 0x4bf   :  { %v5226_v11 = vadd.f32 %v16483_v23, %v5145_v20  ;;  %v5870_v24 = vmul.f32 %v15079_v1, %v15079_v1  ;;  %v16485_v55 = vld [vmem:[#allocation93_spill] sm:$0xff]  ;;  %v5371_v34 = vadd.f32 %v14972_v32, %v5298_v2  ;;  %v5832_v63 = vadd.f32 %v5831_v41, %v15079_v1  ;;  %12153 = vmatpush3.bf16.msra.mxu1 %v12655_v3  ;;  %v12656_v20 = vld [vmem:[#allocation7 + $0x60] sm:$0xff]   ;;  %v15117_v58 = vpop.f32.mrf.mxu0 }
 0x4c0   :  { %v5370_v30 = vadd.f32 %v14940_v48, %v5297_v6  ;;  %v15110_v45 = vadd.f32 %v16486_v36, %v16485_v55  ;;  %v5300_v48 = vadd.f32 %v16487_v18, %v5227_v5  ;;  %v5442_v37 = vadd.f32 %v14955_v56, %v5369_v46  ;;  %12130 = vmatprep.subr.bf16.mxu0 %v12654_v22  ;;  %v16489_v32 = vld [vmem:[#allocation80_spill] sm:$0xff]  ;;  %v12663_v18 = vld [vmem:[#allocation7 + $0x10] sm:$0xff]  }
 0x4c1   :  { %v5441_v14 = vadd.f32 %v14990_v57, %v5368_v29  ;;  %12154 = vmatprep.subr.bf16.mxu1 %v12657_v54  ;;  %v5301_v6 = vadd.f32 %v16488_v35, %v5228_v62  ;;  %v5299_v8 = vadd.f32 %v16489_v32, %v5226_v11  ;;  %v5901_v3 = vadd.f32 %v5900_v17, %v5870_v24  ;;  %v5571_v11 = vpop.f32.mrf.mxu0  ;;  %v12662_v32 = vld [vmem:[#allocation7 + $0x48] sm:$0xff]  }
 0x4c2   :  { %v15005_v31 = vpop.f32.mrf.mxu1  ;;  %v5443_v41 = vadd.f32 %v14976_v42, %v5370_v30  ;;  %v5444_v62 = vadd.f32 %v15017_v21, %v5371_v34  ;;  %12131 = vmatpush3.bf16.msra.mxu0 %v12654_v22  ;;  %v5871_v42 = vmul.f32 %v15110_v45, %v15110_v45 }
 0x4c3   :  { %v5515_v56 = vadd.f32 %v15005_v31, %v5442_v37  ;;  %v5372_v29 = vadd.f32 %v14997_v50, %v5299_v8  ;;  %12155 = vmatpush3.bf16.msra.mxu1 %v12657_v54  ;;  %12132 = vmatprep.subr.bf16.mxu0 %v12656_v20  ;;  %v12658_v31 = vld [vmem:[#allocation7 + $0x58] sm:$0xff]   ;;  %v12101_v34 = vpop.f32.mrf.mxu0 }
 0x4c4   :  { %v15019_v40 = vpop.f32.mrf.mxu1  ;;  %v5902_v30 = vadd.f32 %v5901_v3, %v5871_v42  ;;  %v12665_v3 = vld [vmem:[#allocation7 + $0x8] sm:$0xff]   ;;  %v12664_v42 = vld [vmem:[#allocation7 + $0x40] sm:$0xff]  }
 0x4c5   :  { %v5513_v15 = vadd.f32 %v15019_v40, %v5440_v12  ;;  %v12659_v40 = vld [vmem:[#allocation7 + $0x20] sm:$0xff]   ;;  %v16490_v12 = vld [vmem:[#allocation69_spill] sm:$0xff]  ;;  %v5588_v22 = vadd.f32 %v15051_v9, %v5515_v56  ;;  %v5445_v24 = vadd.f32 %v15041_v25, %v5372_v29  ;;  %v12660_v9 = vld [vmem:[#allocation7 + $0x50] sm:$0xff]   ;;  %v5574_v8 = vpop.f32.mrf.mxu0 }
 0x4c6   :  { %v15031_v16 = vpop.f32.mrf.mxu1  ;;  %v5373_v5 = vadd.f32 %v16490_v12, %v5300_v48  ;;  %12156 = vmatprep.subr.bf16.mxu1 %v12659_v40  ;;  %12133 = vmatpush3.bf16.msra.mxu0 %v12656_v20 }
 0x4c7   :  { %v5586_v46 = vadd.f32 %v15065_v53, %v5513_v15  ;;  %v5516_v19 = vadd.f32 %v15031_v16, %v5443_v41  ;;  %v5374_v53 = vadd.f32 %v14981_v28, %v5301_v6  ;;  %v5833_v16 = vadd.f32 %v5832_v63, %v15110_v45  ;;  %12157 = vmatpush3.bf16.msra.mxu1 %v12659_v40 }
 0x4c8   :  { %v15043_v26 = vpop.f32.mrf.mxu1  ;;  %v5446_v2 = vadd.f32 %v15003_v44, %v5373_v5  ;;  %12134 = vmatprep.subr.bf16.mxu0 %v12658_v31 }
 0x4c9   :  { %v5514_v57 = vadd.f32 %v15043_v26, %v5441_v14  ;;  %v12661_v26 = vld [vmem:[#allocation7 + $0x18] sm:$0xff]   ;;  %v5589_v15 = vadd.f32 %v15083_v43, %v5516_v19  ;;  %v5447_v44 = vadd.f32 %v15028_v0, %v5374_v53 }
 0x4ca   :  { %v15056_v60 = vpop.f32.mrf.mxu1  ;;  %12158 = vmatprep.subr.bf16.mxu1 %v12661_v26  ;;  %12135 = vmatpush3.bf16.msra.mxu0 %v12658_v31  ;;  %v12670_v31 = vld [vmem:[#allocation7] sm:$0xff]  }
 0x4cb   :  { %v5587_v38 = vadd.f32 %v5558_v59, %v5514_v57  ;;  %v5519_v59 = vadd.f32 %v15056_v60, %v5446_v2  ;;  %12159 = vmatpush3.bf16.msra.mxu1 %v12661_v26  ;;  %12136 = vmatprep.subr.bf16.mxu0 %v12660_v9 }
 0x4cc   :  { %v15075_v47 = vpop.f32.mrf.mxu1  ;;  %12160 = vmatprep.subr.bf16.mxu1 %v12663_v18 }
 0x4cd   :  { %v5517_v50 = vadd.f32 %v15075_v47, %v5444_v62  ;;  %v5592_v41 = vadd.f32 %v15117_v58, %v5519_v59 }
 0x4ce   :  { %v15096_v61 = vpop.f32.mrf.mxu1  ;;  %12137 = vmatpush3.bf16.msra.mxu0 %v12660_v9 }
 0x4cf   :  { %v5590_v43 = vadd.f32 %v5571_v11, %v5517_v50  ;;  %v5520_v40 = vadd.f32 %v15096_v61, %v5447_v44  ;;  %12161 = vmatpush3.bf16.msra.mxu1 %v12663_v18  ;;  %12138 = vmatprep.subr.bf16.mxu0 %v12662_v32 }
 0x4d0   :  { %v5501_v51 = vpop.f32.mrf.mxu1  ;;  %12162 = vmatprep.subr.bf16.mxu1 %v12665_v3 }
 0x4d1   :  { %v5518_v25 = vadd.f32 %v5501_v51, %v5445_v24 }
 0x4d2   :  { %12139 = vmatpush3.bf16.msra.mxu0 %v12662_v32 }
 0x4d3   :  { %v5591_v56 = vadd.f32 %v5574_v8, %v5518_v25  ;;  %12163 = vmatpush3.bf16.msra.mxu1 %v12665_v3  ;;  %12140 = vmatprep.subr.bf16.mxu0 %v12664_v42  ;;  %v16494_v3 = vld [vmem:[#allocation19_spill] sm:$0xff] }
 0x4d4   :  { %12164 = vmatprep.subr.bf16.mxu1 %v12670_v31 }
 0x4d6   :  { %12141 = vmatpush3.bf16.msra.mxu0 %v12664_v42 }
 0x4d7   :  { %12165 = vmatpush3.bf16.msra.mxu1 %v12670_v31 }
 0x4e2   :  { %v12120_v27 = vpop.f32.mrf.mxu1 }
 0x4e3   :  { %v15142_v28 = vadd.f32 %v12120_v27, %v5588_v22 }
 0x4e4   :  { %v5772_v23 = vpop.f32.mrf.mxu1 }
 0x4e5   :  { %v15131_v17 = vadd.f32 %v5772_v23, %v5586_v46  ;;  %v5874_v0 = vmul.f32 %v15142_v28, %v15142_v28  ;;  %v5593_v46 = vadd.f32 %v12101_v34, %v5520_v40  ;;  %v7102_v40 = vld [vmem:[#allocation2 + $0x48] sm:$0xf] }
 0x4e6   :  { %v12121_v21 = vpop.f32.mrf.mxu1 }
 0x4e7   :  { %v5872_v54 = vmul.f32 %v15131_v17, %v15131_v17  ;;  %v5834_v47 = vadd.f32 %v5833_v16, %v15131_v17  ;;  %v15149_v37 = vadd.f32 %v12121_v21, %v5589_v15 }
 0x4e8   :  { %v5775_v55 = vpop.f32.mrf.mxu1 }
 0x4e9   :  { %v15145_v36 = vadd.f32 %v5775_v55, %v5587_v38  ;;  %v5903_v48 = vadd.f32 %v5902_v30, %v5872_v54  ;;  %v5875_v61 = vmul.f32 %v15149_v37, %v15149_v37  ;;  %v15179_v54 = vld [vmem:[#allocation7 + $0xb8] sm:$0xff]  }
 0x4ea   :  { %v12124_v63 = vpop.f32.mrf.mxu1  ;;  %16491 = vst [vmem:[#allocation72_spill] sm:$0xff] %v15179_v54  ;;  %v12673_v30 = vld [vmem:[#allocation7 + $0xf8] sm:$0xff]   ;;  %12174 = vmatprep.subr.bf16.mxu0 %v15179_v54 }
 0x4eb   :  { %v5835_v14 = vadd.f32 %v5834_v47, %v15145_v36  ;;  %v5873_v20 = vmul.f32 %v15145_v36, %v15145_v36  ;;  %v15164_v57 = vadd.f32 %v12124_v63, %v5592_v41  ;;  %12198 = vmatprep.subr.bf16.mxu1 %v12673_v30  ;;  %v10180_v63 = vld [vmem:[%s16278_s4] ss:$0 sm:$0xff]  ;;  %v16501_v30 = vld [vmem:[#allocation26_spill] sm:$0xff]  ;;  %s13042_s4 = smov [#allocation9]  }
 0x4ec   :  { %v5788_v35 = vpop.f32.mrf.mxu1  ;;  %s10111_s10 = sshll.u32 %s13042_s4, 4  ;;  %s10112_s10 = int_to_ptr.vmem [resolvable:$true] %s10111_s10 }
 0x4ed   :  { %v5836_v60 = vadd.f32 %v5835_v14, %v15142_v28  ;;  %v5904_v51 = vadd.f32 %v5903_v48, %v5873_v20  ;;  %v15158_v6 = vadd.f32 %v5788_v35, %v5590_v43  ;;  %v5878_v16 = vmul.f32 %v15164_v57, %v15164_v57  ;;  %v6821_v48 = vld [vmem:[#allocation2] sm:$0xf]  ;;  %v16492_v35 = vld [vmem:[#allocation17_spill] sm:$0xff]  ;;  %s12989_s11 = scalar_lea.vmem %s10112_s10, 4096  ;;  %p12994_p11 = scmp.lt.s32.totalorder %s10112_s10, %s10112_s10 }
 0x4ee   :  { %v12125_v27 = vpop.f32.mrf.mxu1  ;;  %v6838_v41 = vshrl.u32 %v6821_v48, 16  ;;  %p12990_p10 = scmp.ne.s32.totalorder %s10112_s10, %s12989_s11  ;;  %p12995_p12 = scmp.lt.s32.totalorder %s12989_s11, %s12989_s11 }
 0x4ef   :  { %v5905_v12 = vadd.f32 %v5904_v51, %v5874_v0  ;;  %v5837_v5 = vadd.f32 %v5836_v60, %v15149_v37  ;;  %v5876_v58 = vmul.f32 %v15158_v6, %v15158_v6  ;;  %v15171_v11 = vadd.f32 %v12125_v27, %v5593_v46  ;;  %v16493_v60 = vld [vmem:[#allocation18_spill] sm:$0xff] }
 0x4f0   :  { %v5791_v29 = vpop.f32.mrf.mxu1  ;;  %v15189_v0 = vadd.f32 %v10180_v63, %v16492_v35  ;;  %v15192_v51 = vadd.f32 %v10180_v63, %v16493_v60  ;;  %v6841_v27 = vshll.u32 %v6821_v48, 16  ;;  %v7122_v46 = vshll.u32 %v7102_v40, 16  ;;  %v16505_v48 = vld [vmem:[#allocation30_spill] sm:$0xff]  ;;  %v16507_v35 = vld [vmem:[#allocation32_spill] sm:$0xff]  ;;  %p12996_p13 = por %p12995_p12, %p12994_p11 }
 0x4f1   :  { %v5838_v19 = vadd.f32 %v5837_v5, %v15158_v6  ;;  %v5906_v62 = vadd.f32 %v5905_v12, %v5875_v61  ;;  %v15169_v23 = vadd.f32 %v5791_v29, %v5591_v56  ;;  %v5879_v38 = vmul.f32 %v15171_v11, %v15171_v11  ;;  %v16495_v12 = vld [vmem:[#allocation20_spill] sm:$0xff]  ;;  %v16496_v29 = vld [vmem:[#allocation21_spill] sm:$0xff] }
 0x4f2   :  { %v15197_v61 = vadd.f32 %v10180_v63, %v16494_v3  ;;  %v15200_v5 = vadd.f32 %v10180_v63, %v16495_v12  ;;  %v7119_v56 = vshrl.u32 %v7102_v40, 16  ;;  %v15238_v60 = vadd.f32 %v10180_v63, %v16507_v35  ;;  %v16508_v3 = vld [vmem:[#allocation33_spill] sm:$0xff]  ;;  %p12997_p0 = pnand %p12996_p13, %p12990_p10 }
 0x4f3   :  { %v5907_v26 = vadd.f32 %v5906_v62, %v5876_v58  ;;  %v5839_v53 = vadd.f32 %v5838_v19, %v15169_v23  ;;  %v5877_v50 = vmul.f32 %v15169_v23, %v15169_v23  ;;  %v15203_v19 = vadd.f32 %v10180_v63, %v16496_v29  ;;  %v16497_v58 = vld [vmem:[#allocation22_spill] sm:$0xff] }
 0x4f4   :  { %v15206_v62 = vadd.f32 %v10180_v63, %v16497_v58  ;;  %v15241_v12 = vadd.f32 %v10180_v63, %v16508_v3  ;;  %v16509_v29 = vld [vmem:[#allocation34_spill] sm:$0xff]  ;;  %v16521_v3 = vld [vmem:[#allocation40_spill] sm:$0xff] }
 0x4f5   :  { %v5840_v21 = vadd.f32 %v5839_v53, %v15164_v57  ;;  %v5908_v22 = vadd.f32 %v5907_v26, %v5877_v50  ;;  %v16498_v26 = vld [vmem:[#allocation23_spill] sm:$0xff]  ;;  %v16499_v50 = vld [vmem:[#allocation24_spill] sm:$0xff]  ;;  %v15244_v58 = vadd.f32 %v10180_v63, %v16509_v29  ;;  %v15262_v29 = vadd.f32 %v10180_v63, %v16521_v3 }
 0x4f6   :  { %v15211_v53 = vadd.f32 %v10180_v63, %v16498_v26  ;;  %v16515_v26 = vld [vmem:[#allocation37_spill] sm:$0xff] }
 0x4f7   :  { %v5841_v2 = vadd.f32 %v5840_v21, %v15171_v11  ;;  %v5909_v24 = vadd.f32 %v5908_v22, %v5878_v16  ;;  %v15214_v16 = vadd.f32 %v10180_v63, %v16499_v50  ;;  %v16500_v21 = vld [vmem:[#allocation25_spill] sm:$0xff]  ;;  %16510 = vst [vmem:[#allocation82_spill] sm:$0xff] %v15244_v58  ;;  %v15253_v50 = vadd.f32 %v10180_v63, %v16515_v26  ;;  %v16525_v26 = vld [vmem:[#allocation42_spill] sm:$0xff] }
 0x4f8   :  { %v15217_v22 = vadd.f32 %v10180_v63, %v16500_v21  ;;  %16522 = vst [vmem:[#allocation75_spill] sm:$0xff] %v15262_v29  ;;  %v15268_v54 = vadd.f32 %v10180_v63, %v16525_v26 }
 0x4f9   :  { %v5842_v15 = vrot.slane %v5841_v2, 4  ;;  %v5910_v55 = vadd.f32 %v5909_v24, %v5879_v38  ;;  %v15220_v38 = vadd.f32 %v10180_v63, %v16501_v30  ;;  %16516 = vst [vmem:[#allocation76_spill] sm:$0xff] %v15253_v50 }
 0x4fa   :  { %16526 = vst [vmem:[#allocation91_spill] sm:$0xff] %v15268_v54 }
 0x4fb   :  { %v5843_v47 = vadd.f32 %v5842_v15, %v5841_v2  ;;  %v5911_v9 = vrot.slane %v5910_v55, 4  ;;  %v16502_v2 = vld [vmem:[#allocation27_spill] sm:$0xff] }
 0x4fc   :  { %v15223_v24 = vadd.f32 %v10180_v63, %v16502_v2  ;;  %v16517_v2 = vld [vmem:[#allocation38_spill] sm:$0xff] }
 0x4fd   :  { %v5844_v34 = vrot.slane %v5843_v47, 2  ;;  %v5912_v59 = vadd.f32 %v5911_v9, %v5910_v55  ;;  %v6840_v55 = vrot.slane %v6838_v41, 4  ;;  %v16503_v9 = vld [vmem:[#allocation28_spill] sm:$0xff]  ;;  %v7103_v41 = vld [vmem:[#allocation2 + $0x4c] sm:$0x1] }
 0x4ff   :  { %v5845_v44 = vadd.f32 %v5844_v34, %v5843_v47  ;;  %v5913_v25 = vrot.slane %v5912_v59, 2  ;;  %v6843_v47 = vrot.slane %v6841_v27, 5  ;;  %v15226_v34 = vadd.f32 %v10180_v63, %v16503_v9  ;;  %v7105_v27 = vld [vmem:[#allocation2 + $0x54] sm:$0x1] }
 0x501   :  { %v5846_v43 = vrot.slane %v5845_v44, 1  ;;  %v5914_v18 = vadd.f32 %v5913_v25, %v5912_v59  ;;  %v16504_v59 = vld [vmem:[#allocation29_spill] sm:$0xff]  ;;  %v6822_v25 = vld [vmem:[#allocation2 + $0x4] sm:$0x1]  ;;  %v6844_v21 = vor.u32 %v6843_v47, %v6840_v55  ;;  %v15270_v55 = vld [vmem:[#allocation2 + $0x5c] sm:$0x1] }
 0x502   :  { %v6847_v30 = vshll.u32 %v6822_v25, 16  ;;  %16527 = vst [vmem:[#allocation85_spill] sm:$0xff] %v15270_v55  ;;  %v16528_v47 = vld [vmem:[#allocation43_spill] sm:$0xff] }
 0x503   :  { %v5847_v14 = vadd.f32 %v5846_v43, %v5845_v44  ;;  %v5915_v20 = vrot.slane %v5914_v18, 1  ;;  %v15229_v44 = vadd.f32 %v10180_v63, %v16504_v59  ;;  %v7121_v43 = vrot.slane %v7119_v56, 4  ;;  %v16511_v56 = vld [vmem:[#allocation35_spill] sm:$0xff] }
 0x504   :  { %v7128_v59 = vshll.u32 %v7103_v41, 16  ;;  %v15273_v25 = vadd.f32 %v10180_v63, %v16528_v47  ;;  %v15288_v26 = vrot.slane %v6844_v21, 4  ;;  %v15290_v54 = vrot.slane %v6847_v30, 5  ;;  %v16546_v30 = vld [vmem:[#allocation52_spill] sm:$0xff] }
 0x505   :  { %v5916_v32 = vadd.f32 %v5915_v20, %v5914_v18  ;;  %v15194_v8 = vmul.f32 0.00390625, %v5847_v14  ;;  %v7124_v18 = vrot.slane %v7122_v46, 5  ;;  %v15232_v14 = vadd.f32 %v10180_v63, %v16505_v48  ;;  %v16506_v20 = vld [vmem:[#allocation31_spill] sm:$0xff] }
 0x506   :  { %v15235_v40 = vadd.f32 %v10180_v63, %v16506_v20  ;;  %v15247_v46 = vadd.f32 %v10180_v63, %v16511_v56  ;;  %v7142_v48 = vshll.u32 %v7105_v27, 16  ;;  %v16519_v20 = vld [vmem:[#allocation39_spill] sm:$0xff]  ;;  %v16523_v56 = vld [vmem:[#allocation41_spill] sm:$0xff]  ;;  %16529 = vst [vmem:[#allocation90_spill] sm:$0xff] %v15273_v25  ;;  %v16534_v27 = vld [vmem:[#allocation46_spill] sm:$0xff]  ;;  %v15294_v25 = vrot.slane %v7128_v59, 5 }
 0x507   :  { %v5918_v42 = vmul.f32 0.00390625, %v5916_v32  ;;  %v5919_v31 = vmul.f32 %v15194_v8, %v15194_v8  ;;  %v7125_v9 = vor.u32 %v7124_v18, %v7121_v43  ;;  %v15259_v35 = vadd.f32 %v10180_v63, %v16519_v20  ;;  %v16530_v43 = vld [vmem:[#allocation44_spill] sm:$0xff]  ;;  %v16535_v20 = vld [vmem:[#allocation47_spill] sm:$0xff]  ;;  %16539 = vst [vmem:[#allocation54_spill] sm:$0xff] %v15288_v26  ;;  %16540 = vst [vmem:[#allocation60_spill] sm:$0xff] %v15290_v54 }
 0x508   :  { %16512 = vst [vmem:[#allocation88_spill] sm:$0xff] %v15247_v46  ;;  %v15276_v18 = vadd.f32 %v10180_v63, %v16530_v43  ;;  %v15283_v3 = vadd.f32 %v10180_v63, %v16535_v20  ;;  %16542 = vst [vmem:[#allocation65_spill] sm:$0xff] %v15294_v25  ;;  %v15296_v43 = vrot.slane %v7142_v48, 5  ;;  %v16544_v20 = vld [vmem:[#allocation51_spill] sm:$0xff]  ;;  %v16548_v48 = vld [vmem:[#allocation64_spill] sm:$0xff] }
 0x509   :  { %v5920_v15 = vsub.f32 %v5918_v42, %v5919_v31  ;;  %v16513_v42 = vld [vmem:[#allocation36_spill] sm:$0xff]  ;;  %16520 = vst [vmem:[#allocation92_spill] sm:$0xff] %v15259_v35  ;;  %v15292_v47 = vrot.slane %v7125_v9, 4  ;;  %v16547_v9 = vld [vmem:[#allocation55_spill] sm:$0xff] }
 0x50a   :  { %v15250_v31 = vadd.f32 %v10180_v63, %v16513_v42  ;;  %v15265_v42 = vadd.f32 %v10180_v63, %v16523_v56  ;;  %16531 = vst [vmem:[#allocation89_spill] sm:$0xff] %v15276_v18  ;;  %16536 = vst [vmem:[#allocation56_spill] sm:$0xff] %v15283_v3  ;;  %v16537_v56 = vld [vmem:[#allocation53_spill] sm:$0xff]  ;;  %v5921_v3 = vsub.f32 %v16544_v20, %v15194_v8 }
 0x50b   :  { %v5953_v32 = vadd.f32 1e-05, %v5920_v15  ;;  %v15256_v15 = vadd.f32 %v10180_v63, %v16517_v2  ;;  %v626_v2 = vadd.f32 %v10180_v63, %v16534_v27  ;;  %16541 = vst [vmem:[#allocation58_spill] sm:$0xff] %v15292_v47  ;;  %16543 = vst [vmem:[#allocation63_spill] sm:$0xff] %v15296_v43  ;;  %v5950_v27 = vsub.f32 %v15169_v23, %v15194_v8  ;;  %v16550_v23 = vld [vmem:[#allocation70_spill] sm:$0xff]  ;;  %v16551_v20 = vld [vmem:[#allocation73_spill] sm:$0xff] }
 0x50c   :  { %16514 = vst [vmem:[#allocation71_spill] sm:$0xff] %v15250_v31  ;;  %16524 = vst [vmem:[#allocation86_spill] sm:$0xff] %v15265_v42  ;;  %v15286_v42 = vadd.f32 %v10180_v63, %v16537_v56  ;;  %v5923_v56 = vsub.f32 %v16546_v30, %v15194_v8  ;;  %v5924_v59 = vsub.f32 %v16547_v9, %v15194_v8  ;;  %v16553_v30 = vld [vmem:[#allocation67_spill] sm:$0xff]  ;;  %v16554_v9 = vld [vmem:[#allocation77_spill] sm:$0xff] }
 0x50d   :  { %12813 = vrsqrt.f32 %v5953_v32  ;;  %16518 = vst [vmem:[#allocation87_spill] sm:$0xff] %v15256_v15  ;;  %v16532_v32 = vld [vmem:[#allocation45_spill] sm:$0xff]  ;;  %v5925_v43 = vsub.f32 %v16548_v48, %v15194_v8  ;;  %v5927_v25 = vsub.f32 %v16550_v23, %v15194_v8  ;;  %v5928_v26 = vsub.f32 %v16551_v20, %v15194_v8  ;;  %v16555_v48 = vld [vmem:[#allocation79_spill] sm:$0xff] }
 0x50e   :  { %v15279_v41 = vadd.f32 %v10180_v63, %v16532_v32  ;;  %16538 = vst [vmem:[#allocation61_spill] sm:$0xff] %v15286_v42  ;;  %v16545_v63 = vld [vmem:[#allocation50_spill] sm:$0xff]  ;;  %v5930_v55 = vsub.f32 %v16553_v30, %v15194_v8  ;;  %v5931_v42 = vsub.f32 %v16554_v9, %v15194_v8  ;;  %v5934_v23 = vsub.f32 %v14959_v10, %v15194_v8  ;;  %v16557_v20 = vld [vmem:[#allocation81_spill] sm:$0xff] }
 0x50f   :  { %v5922_v21 = vsub.f32 %v16545_v63, %v15194_v8  ;;  %v16549_v32 = vld [vmem:[#allocation62_spill] sm:$0xff]  ;;  %v5935_v29 = vsub.f32 %v16557_v20, %v15194_v8  ;;  %v5937_v30 = vsub.f32 %v14988_v52, %v15194_v8  ;;  %v5938_v9 = vsub.f32 %v14995_v7, %v15194_v8 }
 0x510   :  { %16533 = vst [vmem:[#allocation84_spill] sm:$0xff] %v15279_v41  ;;  %v5926_v47 = vsub.f32 %v16549_v32, %v15194_v8  ;;  %v16552_v63 = vld [vmem:[#allocation78_spill] sm:$0xff]  ;;  %v5932_v41 = vsub.f32 %v16555_v48, %v15194_v8  ;;  %v16556_v32 = vld [vmem:[#allocation83_spill] sm:$0xff]  ;;  %v5939_v48 = vsub.f32 %v15014_v49, %v15194_v8  ;;  %v5941_v10 = vsub.f32 %v15039_v39, %v15194_v8 }
 0x511   :  { %v5929_v54 = vsub.f32 %v16552_v63, %v15194_v8  ;;  %v5933_v18 = vsub.f32 %v16556_v32, %v15194_v8  ;;  %v5936_v63 = vsub.f32 %v16474_v13, %v15194_v8  ;;  %v5940_v32 = vsub.f32 %v15026_v33, %v15194_v8 }
 0x512   :  { %v5942_v20 = vsub.f32 %v15049_v4, %v15194_v8  ;;  %v5943_v13 = vsub.f32 %v15079_v1, %v15194_v8  ;;  %v5944_v52 = vsub.f32 %v15110_v45, %v15194_v8  ;;  %v5945_v7 = vsub.f32 %v15131_v17, %v15194_v8 }
 0x513   :  { %v5946_v49 = vsub.f32 %v15145_v36, %v15194_v8  ;;  %v5947_v33 = vsub.f32 %v15142_v28, %v15194_v8  ;;  %v5948_v39 = vsub.f32 %v15149_v37, %v15194_v8  ;;  %v5949_v4 = vsub.f32 %v15158_v6, %v15194_v8 }
 0x514   :  { %v5951_v1 = vsub.f32 %v15164_v57, %v15194_v8  ;;  %v5952_v45 = vsub.f32 %v15171_v11, %v15194_v8 }
 0x51a   :  { %v12814_v35 = vpop.eup %12813 }
 0x51b   :  { %v5984_v17 = vmul.f32 %v12814_v35, %v5950_v27  ;;  %v15363_v15 = vmul.f32 %v12814_v35, %v5921_v3  ;;  %v15365_v36 = vmul.f32 %v12814_v35, %v5922_v21  ;;  %v15367_v50 = vmul.f32 %v12814_v35, %v5923_v56 }
 0x51c   :  { %v15369_v28 = vmul.f32 %v12814_v35, %v5924_v59  ;;  %v15371_v31 = vmul.f32 %v12814_v35, %v5925_v43  ;;  %v15373_v37 = vmul.f32 %v12814_v35, %v5926_v47  ;;  %v15375_v6 = vmul.f32 %v12814_v35, %v5927_v25 }
 0x51d   :  { %v6016_v46 = vmax.f32 %v5984_v17, 0.0  ;;  %v15377_v57 = vmul.f32 %v12814_v35, %v5928_v26  ;;  %v15379_v58 = vmul.f32 %v12814_v35, %v5929_v54  ;;  %v15381_v11 = vmul.f32 %v12814_v35, %v5930_v55 }
 0x51e   :  { %v15383_v8 = vmul.f32 %v12814_v35, %v5931_v42  ;;  %v15385_v3 = vmul.f32 %v12814_v35, %v5932_v41  ;;  %v15387_v27 = vmul.f32 %v12814_v35, %v5933_v18  ;;  %v15389_v21 = vmul.f32 %v12814_v35, %v5934_v23 }
 0x51f   :  { %v6080_v43 = vadd.f32 %v6016_v46, %v626_v2  ;;  %v15391_v47 = vmul.f32 %v12814_v35, %v5935_v29  ;;  %v15393_v25 = vmul.f32 %v12814_v35, %v5936_v63  ;;  %v15395_v56 = vmul.f32 %v12814_v35, %v5937_v30 }
 0x520   :  { %v15397_v26 = vmul.f32 %v12814_v35, %v5938_v9  ;;  %v15399_v54 = vmul.f32 %v12814_v35, %v5939_v48  ;;  %v15401_v55 = vmul.f32 %v12814_v35, %v5940_v32  ;;  %v15403_v42 = vmul.f32 %v12814_v35, %v5941_v10 }
 0x521   :  { %6112 = vst [vmem:[#allocation9 + $0xe8] sm:$0xff] %v6080_v43  ;;  %v10635_v18 = vpack.c.bf16 %v6080_v43, %v6080_v43  ;;  %v15405_v41 = vmul.f32 %v12814_v35, %v5942_v20  ;;  %v15407_v59 = vmul.f32 %v12814_v35, %v5943_v13  ;;  %v15409_v46 = vmul.f32 %v12814_v35, %v5944_v52 }
 0x522   :  { %v15411_v29 = vmul.f32 %v12814_v35, %v5945_v7  ;;  %v15413_v2 = vmul.f32 %v12814_v35, %v5946_v49  ;;  %v15415_v23 = vmul.f32 %v12814_v35, %v5947_v33  ;;  %v15417_v63 = vmul.f32 %v12814_v35, %v5948_v39 }
 0x523   :  { %v6412_v30 = vshrl.u32 %v10635_v18, 16  ;;  %v6415_v9 = vshll.u32 %v10635_v18, 16  ;;  %v15419_v48 = vmul.f32 %v12814_v35, %v5949_v4  ;;  %v15421_v32 = vmul.f32 %v12814_v35, %v5951_v1 }
 0x524   :  { %v15423_v10 = vmul.f32 %v12814_v35, %v5952_v45  ;;  %v5987_v20 = vmax.f32 %v15363_v15, 0.0  ;;  %v5988_v13 = vmax.f32 %v15365_v36, 0.0  ;;  %v5989_v52 = vmax.f32 %v15367_v50, 0.0  ;;  %v6481_v36 = vld [vmem:[#allocation2 + $0x30] sm:$0xf] }
 0x525   :  { %v6414_v7 = vrot.slane %v6412_v30, 7  ;;  %v5990_v49 = vmax.f32 %v15369_v28, 0.0  ;;  %v5991_v33 = vmax.f32 %v15371_v31, 0.0  ;;  %v5992_v39 = vmax.f32 %v15373_v37, 0.0  ;;  %v6484_v28 = vld [vmem:[#allocation2 + $0x34] sm:$0x1] }
 0x526   :  { %v5993_v4 = vmax.f32 %v15375_v6, 0.0  ;;  %v5994_v1 = vmax.f32 %v15377_v57, 0.0  ;;  %v5995_v35 = vmax.f32 %v15379_v58, 0.0  ;;  %v5996_v45 = vmax.f32 %v15381_v11, 0.0 }
 0x527   :  { %v6417_v15 = vor.u32 %v6415_v9, %v6414_v7  ;;  %v6418_v17 = vrot.slane %v6414_v7, 4  ;;  %v5997_v50 = vmax.f32 %v15383_v8, 0.0  ;;  %v5998_v43 = vmax.f32 %v15385_v3, 0.0 }
 0x528   :  { %v5999_v31 = vmax.f32 %v15387_v27, 0.0  ;;  %v6000_v37 = vmax.f32 %v15389_v21, 0.0  ;;  %v6001_v6 = vmax.f32 %v15391_v47, 0.0  ;;  %v6002_v57 = vmax.f32 %v15393_v25, 0.0 }
 0x529   :  { %v6482_v58 = vsel %vm13616_vm6, %v6417_v15, %v6481_v36  ;;  %v6485_v30 = vsel %vm13185_vm3, %v6418_v17, %v6484_v28  ;;  %v6003_v9 = vmax.f32 %v15395_v56, 0.0  ;;  %v6004_v8 = vmax.f32 %v15397_v26, 0.0  ;;  %v16570_v36 = vld [vmem:[#allocation89_spill] sm:$0xff] }
 0x52a   :  { %6486 = vst [vmem:[#allocation2 + $0x34] sm:$0x1] %v6485_v30  ;;  %6483 = vst [vmem:[#allocation2 + $0x30] sm:$0xf] %v6482_v58  ;;  %v6005_v3 = vmax.f32 %v15399_v54, 0.0  ;;  %v6006_v27 = vmax.f32 %v15401_v55, 0.0 }
 0x52b   :  { %v6007_v21 = vmax.f32 %v15403_v42, 0.0  ;;  %v6008_v47 = vmax.f32 %v15405_v41, 0.0  ;;  %v6009_v25 = vmax.f32 %v15407_v59, 0.0  ;;  %v6010_v7 = vmax.f32 %v15409_v46, 0.0 }
 0x52c   :  { %v6011_v15 = vmax.f32 %v15411_v29, 0.0  ;;  %v6012_v56 = vmax.f32 %v15413_v2, 0.0  ;;  %v6013_v26 = vmax.f32 %v15415_v23, 0.0  ;;  %v6014_v17 = vmax.f32 %v15417_v63, 0.0 }
 0x52d   :  { %v6015_v54 = vmax.f32 %v15419_v48, 0.0  ;;  %v6017_v55 = vmax.f32 %v15421_v32, 0.0  ;;  %v6018_v42 = vmax.f32 %v15423_v10, 0.0  ;;  %v15461_v41 = vadd.f32 %v5987_v20, %v15189_v0  ;;  %v16564_v32 = vld [vmem:[#allocation87_spill] sm:$0xff]  ;;  %v16565_v20 = vld [vmem:[#allocation92_spill] sm:$0xff] }
 0x52e   :  { %v15464_v59 = vadd.f32 %v5988_v13, %v15192_v51  ;;  %v15467_v46 = vadd.f32 %v5989_v52, %v15197_v61  ;;  %v15470_v29 = vadd.f32 %v5990_v49, %v15200_v5  ;;  %v15473_v2 = vadd.f32 %v5991_v33, %v15203_v19  ;;  %v16566_v52 = vld [vmem:[#allocation75_spill] sm:$0xff]  ;;  %v16567_v33 = vld [vmem:[#allocation86_spill] sm:$0xff] }
 0x52f   :  { %v15476_v23 = vadd.f32 %v5992_v39, %v15206_v62  ;;  %v15479_v63 = vadd.f32 %v5993_v4, %v15211_v53  ;;  %v15482_v0 = vadd.f32 %v5994_v1, %v15214_v16  ;;  %v15485_v51 = vadd.f32 %v5995_v35, %v15217_v22  ;;  %6083 = vst [vmem:[#allocation9] sm:$0xff] %v15461_v41  ;;  %v16568_v4 = vld [vmem:[#allocation91_spill] sm:$0xff]  ;;  %v16569_v35 = vld [vmem:[#allocation90_spill] sm:$0xff] }
 0x530   :  { %v15488_v61 = vadd.f32 %v5996_v45, %v15220_v38  ;;  %v15491_v5 = vadd.f32 %v5997_v50, %v15223_v24  ;;  %6084 = vst [vmem:[#allocation9 + $0x8] sm:$0xff] %v15464_v59  ;;  %6085 = vst [vmem:[#allocation9 + $0x10] sm:$0xff] %v15467_v46  ;;  %v15497_v19 = vadd.f32 %v5998_v43, %v15226_v34  ;;  %v16560_v24 = vld [vmem:[#allocation82_spill] sm:$0xff]  ;;  %v16571_v43 = vld [vmem:[#allocation84_spill] sm:$0xff] }
 0x531   :  { %v15500_v62 = vadd.f32 %v5999_v31, %v15229_v44  ;;  %v15503_v53 = vadd.f32 %v6000_v37, %v15232_v14  ;;  %v15506_v16 = vadd.f32 %v6001_v6, %v15235_v40  ;;  %6086 = vst [vmem:[#allocation9 + $0x18] sm:$0xff] %v15470_v29  ;;  %6087 = vst [vmem:[#allocation9 + $0x20] sm:$0xff] %v15473_v2  ;;  %v16561_v44 = vld [vmem:[#allocation88_spill] sm:$0xff]  ;;  %v16562_v40 = vld [vmem:[#allocation71_spill] sm:$0xff] }
 0x532   :  { %6088 = vst [vmem:[#allocation9 + $0x28] sm:$0xff] %v15476_v23  ;;  %6089 = vst [vmem:[#allocation9 + $0x30] sm:$0xff] %v15479_v63  ;;  %v6066_v22 = vadd.f32 %v6002_v57, %v15238_v60  ;;  %v15514_v38 = vadd.f32 %v6003_v9, %v15241_v12  ;;  %v15517_v34 = vadd.f32 %v6004_v8, %v16560_v24  ;;  %v16563_v60 = vld [vmem:[#allocation76_spill] sm:$0xff]  ;;  %v16573_v6 = vld [vmem:[#allocation61_spill] sm:$0xff] }
 0x533   :  { %v15520_v14 = vadd.f32 %v6005_v3, %v16561_v44  ;;  %6090 = vst [vmem:[#allocation9 + $0x38] sm:$0xff] %v15482_v0  ;;  %6091 = vst [vmem:[#allocation9 + $0x40] sm:$0xff] %v15485_v51  ;;  %v15527_v48 = vadd.f32 %v6006_v27, %v16562_v40  ;;  %v15530_v12 = vadd.f32 %v6007_v21, %v16563_v60  ;;  %v16572_v31 = vld [vmem:[#allocation56_spill] sm:$0xff]  ;;  %v6267_v24 = vld [vmem:[#allocation2 + $0x90] sm:$0xf] }
 0x534   :  { %6092 = vst [vmem:[#allocation9 + $0x48] sm:$0xff] %v15488_v61  ;;  %6093 = vst [vmem:[#allocation9 + $0x50] sm:$0xff] %v15491_v5  ;;  %v15533_v10 = vadd.f32 %v6008_v47, %v16564_v32  ;;  %v15536_v13 = vadd.f32 %v6009_v25, %v16565_v20  ;;  %v15543_v49 = vadd.f32 %v6010_v7, %v16566_v52  ;;  %v15731_v18 = vld [vmem:[#allocation2 + $0x30] sm:$0xf] }
 0x535   :  { %6094 = vst [vmem:[#allocation9 + $0x58] sm:$0xff] %v15497_v19  ;;  %6095 = vst [vmem:[#allocation9 + $0x60] sm:$0xff] %v15500_v62  ;;  %v15546_v39 = vadd.f32 %v6011_v15, %v16567_v33  ;;  %v15549_v1 = vadd.f32 %v6012_v56, %v16568_v4  ;;  %v15552_v45 = vadd.f32 %v6013_v26, %v16569_v35  ;;  %v6273_v35 = vld [vmem:[#allocation2 + $0x98] sm:$0xf] }
 0x536   :  { %6096 = vst [vmem:[#allocation9 + $0x68] sm:$0xff] %v15503_v53  ;;  %6097 = vst [vmem:[#allocation9 + $0x70] sm:$0xff] %v15506_v16  ;;  %v15558_v50 = vadd.f32 %v6014_v17, %v16570_v36  ;;  %v15561_v28 = vadd.f32 %v6015_v54, %v16571_v43  ;;  %v15564_v37 = vadd.f32 %v6017_v55, %v16572_v31 }
 0x537   :  { %6098 = vst [vmem:[#allocation9 + $0x78] sm:$0xff] %v6066_v22  ;;  %6099 = vst [vmem:[#allocation9 + $0x80] sm:$0xff] %v15514_v38  ;;  %v15567_v57 = vadd.f32 %v6018_v42, %v16573_v6  ;;  %v10606_v58 = vpack.c.bf16 %v15461_v41, %v15461_v41  ;;  %v10607_v30 = vpack.c.bf16 %v15464_v59, %v15464_v59 }
 0x538   :  { %6100 = vst [vmem:[#allocation9 + $0x88] sm:$0xff] %v15517_v34  ;;  %6101 = vst [vmem:[#allocation9 + $0x90] sm:$0xff] %v15520_v14  ;;  %v10608_v9 = vpack.c.bf16 %v15467_v46, %v15467_v46  ;;  %v10609_v8 = vpack.c.bf16 %v15470_v29, %v15470_v29  ;;  %v10610_v3 = vpack.c.bf16 %v15473_v2, %v15473_v2 }
 0x539   :  { %6102 = vst [vmem:[#allocation9 + $0x98] sm:$0xff] %v15527_v48  ;;  %6103 = vst [vmem:[#allocation9 + $0xa0] sm:$0xff] %v15530_v12  ;;  %v10611_v27 = vpack.c.bf16 %v15476_v23, %v15476_v23  ;;  %v10612_v21 = vpack.c.bf16 %v15479_v63, %v15479_v63  ;;  %v10613_v47 = vpack.c.bf16 %v15482_v0, %v15482_v0 }
 0x53a   :  { %6104 = vst [vmem:[#allocation9 + $0xa8] sm:$0xff] %v15533_v10  ;;  %6105 = vst [vmem:[#allocation9 + $0xb0] sm:$0xff] %v15536_v13  ;;  %v10614_v25 = vpack.c.bf16 %v15485_v51, %v15485_v51  ;;  %v10615_v7 = vpack.c.bf16 %v15488_v61, %v15488_v61  ;;  %v10616_v15 = vpack.c.bf16 %v15491_v5, %v15491_v5 }
 0x53b   :  { %6106 = vst [vmem:[#allocation9 + $0xb8] sm:$0xff] %v15543_v49  ;;  %6107 = vst [vmem:[#allocation9 + $0xc0] sm:$0xff] %v15546_v39  ;;  %v10617_v56 = vpack.c.bf16 %v15497_v19, %v15497_v19  ;;  %v10618_v26 = vpack.c.bf16 %v15500_v62, %v15500_v62  ;;  %v10619_v17 = vpack.c.bf16 %v15503_v53, %v15503_v53 }
 0x53c   :  { %6108 = vst [vmem:[#allocation9 + $0xc8] sm:$0xff] %v15549_v1  ;;  %6109 = vst [vmem:[#allocation9 + $0xd0] sm:$0xff] %v15552_v45  ;;  %v15611_v54 = vpack.c.bf16 %v15506_v16, %v15506_v16  ;;  %v15613_v55 = vpack.c.bf16 %v6066_v22, %v6066_v22  ;;  %v6188_v42 = vshrl.u32 %v10614_v25, 16  ;;  %v6191_v41 = vshll.u32 %v10614_v25, 16  ;;  %v6270_v22 = vld [vmem:[#allocation2 + $0x94] sm:$0x1] }
 0x53d   :  { %6110 = vst [vmem:[#allocation9 + $0xd8] sm:$0xff] %v15558_v50  ;;  %6111 = vst [vmem:[#allocation9 + $0xe0] sm:$0xff] %v15561_v28  ;;  %v6196_v59 = vshrl.u32 %v10615_v7, 16  ;;  %v6199_v46 = vshll.u32 %v10615_v7, 16  ;;  %v6204_v29 = vshrl.u32 %v10616_v15, 16  ;;  %v6207_v2 = vshll.u32 %v10616_v15, 16 }
 0x53e   :  { %6113 = vst [vmem:[#allocation9 + $0xf0] sm:$0xff] %v15564_v37  ;;  %6114 = vst [vmem:[#allocation9 + $0xf8] sm:$0xff] %v15567_v57  ;;  %v6212_v23 = vshrl.u32 %v10617_v56, 16  ;;  %v6215_v63 = vshll.u32 %v10617_v56, 16  ;;  %v6190_v0 = vrot.slane %v6188_v42, 7  ;;  %v6220_v61 = vshrl.u32 %v10618_v26, 16 }
 0x53f   :  { %6159 = vst [vmem:[#allocation2 + $0xd8] sm:$0xf] %v10606_v58  ;;  %6160 = vst [vmem:[#allocation2 + $0xe0] sm:$0xf] %v10607_v30  ;;  %v6198_v51 = vrot.slane %v6196_v59, 7  ;;  %v6223_v5 = vshll.u32 %v10618_v26, 16 }
 0x540   :  { %6161 = vst [vmem:[#allocation2 + $0xe8] sm:$0xf] %v10608_v9  ;;  %6162 = vst [vmem:[#allocation2 + $0xf0] sm:$0xf] %v10609_v8  ;;  %v6206_v19 = vrot.slane %v6204_v29, 7  ;;  %v6214_v62 = vrot.slane %v6212_v23, 7  ;;  %v6193_v44 = vor.u32 %v6191_v41, %v6190_v0 }
 0x541   :  { %6164 = vst [vmem:[#allocation2 + $0x100] sm:$0xf] %v10611_v27  ;;  %6165 = vst [vmem:[#allocation2 + $0x108] sm:$0xf] %v10612_v21  ;;  %v6228_v53 = vshrl.u32 %v10619_v17, 16  ;;  %v6231_v16 = vshll.u32 %v10619_v17, 16  ;;  %v6201_v60 = vor.u32 %v6199_v46, %v6198_v51 }
 0x542   :  { %6166 = vst [vmem:[#allocation2 + $0x110] sm:$0xf] %v10613_v47  ;;  %6163 = vst [vmem:[#allocation2 + $0xf8] sm:$0xf] %v10610_v3  ;;  %v6194_v40 = vrot.slane %v6190_v0, 4  ;;  %v6202_v32 = vrot.slane %v6198_v51, 4  ;;  %v6209_v20 = vor.u32 %v6207_v2, %v6206_v19  ;;  %v6217_v33 = vor.u32 %v6215_v63, %v6214_v62 }
 0x543   :  { %v6210_v52 = vrot.slane %v6206_v19, 4  ;;  %v6218_v4 = vrot.slane %v6214_v62, 4  ;;  %v6222_v36 = vrot.slane %v6220_v61, 7  ;;  %v6230_v43 = vrot.slane %v6228_v53, 7  ;;  %v6279_v58 = vld [vmem:[#allocation2 + $0xa0] sm:$0xf] }
 0x544   :  { %v6236_v31 = vshrl.u32 %v15611_v54, 16  ;;  %v6239_v6 = vshll.u32 %v15611_v54, 16  ;;  %v6282_v30 = vld [vmem:[#allocation2 + $0xa4] sm:$0x1]  ;;  %v6285_v9 = vld [vmem:[#allocation2 + $0xa8] sm:$0xf]  ;;  %v6268_v21 = vsel %vm13616_vm6, %v6193_v44, %v6267_v24  ;;  %v6271_v47 = vsel %vm13185_vm3, %v6194_v40, %v6270_v22 }
 0x545   :  { %v6288_v8 = vld [vmem:[#allocation2 + $0xac] sm:$0x1]  ;;  %v6244_v3 = vshrl.u32 %v15613_v55, 16  ;;  %v6247_v27 = vshll.u32 %v15613_v55, 16  ;;  %v6276_v25 = vld [vmem:[#allocation2 + $0x9c] sm:$0x1]  ;;  %v6225_v7 = vor.u32 %v6223_v5, %v6222_v36  ;;  %v6233_v56 = vor.u32 %v6231_v16, %v6230_v43 }
 0x546   :  { %v6226_v15 = vrot.slane %v6222_v36, 4  ;;  %v6234_v26 = vrot.slane %v6230_v43, 4  ;;  %6269 = vst [vmem:[#allocation2 + $0x90] sm:$0xf] %v6268_v21  ;;  %6272 = vst [vmem:[#allocation2 + $0x94] sm:$0x1] %v6271_v47  ;;  %v6274_v41 = vsel %vm13616_vm6, %v6201_v60, %v6273_v35  ;;  %v6277_v55 = vsel %vm13185_vm3, %v6202_v32, %v6276_v25 }
 0x547   :  { %v6291_v17 = vld [vmem:[#allocation2 + $0xb0] sm:$0xf]  ;;  %v6238_v54 = vrot.slane %v6236_v31, 7  ;;  %v6246_v42 = vrot.slane %v6244_v3, 7  ;;  %v6303_v59 = vld [vmem:[#allocation2 + $0xc0] sm:$0xf]  ;;  %v6280_v29 = vsel %vm13616_vm6, %v6209_v20, %v6279_v58  ;;  %v6283_v2 = vsel %vm13185_vm3, %v6210_v52, %v6282_v30 }
 0x548   :  { %v6294_v46 = vld [vmem:[#allocation2 + $0xb4] sm:$0x1]  ;;  %6278 = vst [vmem:[#allocation2 + $0x9c] sm:$0x1] %v6277_v55  ;;  %v6286_v23 = vsel %vm13616_vm6, %v6217_v33, %v6285_v9  ;;  %v6289_v63 = vsel %vm13185_vm3, %v6218_v4, %v6288_v8  ;;  %6275 = vst [vmem:[#allocation2 + $0x98] sm:$0xf] %v6274_v41  ;;  %v6292_v22 = vsel %vm13616_vm6, %v6225_v7, %v6291_v17 }
 0x549   :  { %v6297_v0 = vld [vmem:[#allocation2 + $0xb8] sm:$0xf]  ;;  %v6300_v51 = vld [vmem:[#allocation2 + $0xbc] sm:$0x1]  ;;  %v6241_v61 = vor.u32 %v6239_v6, %v6238_v54  ;;  %v6242_v5 = vrot.slane %v6238_v54, 4  ;;  %v6249_v19 = vor.u32 %v6247_v27, %v6246_v42  ;;  %v6250_v62 = vrot.slane %v6246_v42, 4 }
 0x54a   :  { %6281 = vst [vmem:[#allocation2 + $0xa0] sm:$0xf] %v6280_v29  ;;  %6284 = vst [vmem:[#allocation2 + $0xa4] sm:$0x1] %v6283_v2  ;;  %v6306_v53 = vld [vmem:[#allocation2 + $0xc4] sm:$0x1]  ;;  %v6295_v44 = vsel %vm13185_vm3, %v6226_v15, %v6294_v46  ;;  %v6298_v40 = vsel %vm13616_vm6, %v6233_v56, %v6297_v0  ;;  %v6301_v60 = vsel %vm13185_vm3, %v6234_v26, %v6300_v51 }
 0x54b   :  { %6287 = vst [vmem:[#allocation2 + $0xa8] sm:$0xf] %v6286_v23  ;;  %6290 = vst [vmem:[#allocation2 + $0xac] sm:$0x1] %v6289_v63  ;;  %v6309_v16 = vld [vmem:[#allocation2 + $0xc8] sm:$0xf]  ;;  %v6304_v32 = vsel %vm13616_vm6, %v6241_v61, %v6303_v59  ;;  %v6307_v20 = vsel %vm13185_vm3, %v6242_v5, %v6306_v53  ;;  %v10622_v4 = vpack.c.bf16 %v15514_v38, %v15514_v38 }
 0x54c   :  { %v6312_v24 = vld [vmem:[#allocation2 + $0xcc] sm:$0x1]  ;;  %6296 = vst [vmem:[#allocation2 + $0xb4] sm:$0x1] %v6295_v44  ;;  %6302 = vst [vmem:[#allocation2 + $0xbc] sm:$0x1] %v6301_v60  ;;  %v6310_v52 = vsel %vm13616_vm6, %v6249_v19, %v6309_v16  ;;  %v10623_v35 = vpack.c.bf16 %v15517_v34, %v15517_v34  ;;  %v10624_v36 = vpack.c.bf16 %v15520_v14, %v15520_v14 }
 0x54d   :  { %v6313_v33 = vsel %vm13185_vm3, %v6250_v62, %v6312_v24  ;;  %6293 = vst [vmem:[#allocation2 + $0xb0] sm:$0xf] %v6292_v22  ;;  %6299 = vst [vmem:[#allocation2 + $0xb8] sm:$0xf] %v6298_v40  ;;  %v10625_v43 = vpack.c.bf16 %v15527_v48, %v15527_v48  ;;  %v15659_v31 = vld [vmem:[#allocation2 + $0x64] sm:$0x1]  ;;  %v10626_v6 = vpack.c.bf16 %v15530_v12, %v15530_v12 }
 0x54e   :  { %6308 = vst [vmem:[#allocation2 + $0xc4] sm:$0x1] %v6307_v20  ;;  %6314 = vst [vmem:[#allocation2 + $0xcc] sm:$0x1] %v6313_v33  ;;  %v10627_v58 = vpack.c.bf16 %v15533_v10, %v15533_v10  ;;  %v10628_v38 = vpack.c.bf16 %v15536_v13, %v15536_v13  ;;  %v10629_v34 = vpack.c.bf16 %v15543_v49, %v15543_v49  ;;  %v6451_v26 = vld [vmem:[#allocation2 + $0x8] sm:$0xf] }
 0x54f   :  { %6305 = vst [vmem:[#allocation2 + $0xc0] sm:$0xf] %v6304_v32  ;;  %6311 = vst [vmem:[#allocation2 + $0xc8] sm:$0xf] %v6310_v52  ;;  %v10630_v14 = vpack.c.bf16 %v15546_v39, %v15546_v39  ;;  %v10631_v48 = vpack.c.bf16 %v15549_v1, %v15549_v1  ;;  %v10632_v12 = vpack.c.bf16 %v15552_v45, %v15552_v45  ;;  %v7170_v1 = vshll.u32 %v15659_v31, 16  ;;  %v15686_v51 = vld [vmem:[#allocation7 + $0xb0] sm:$0xff]  }
 0x550   :  { %6344 = vst [vmem:[#allocation2 + $0x58] sm:$0xf] %v10623_v35  ;;  %6345 = vst [vmem:[#allocation2 + $0x60] sm:$0xf] %v10624_v36  ;;  %v10633_v10 = vpack.c.bf16 %v15558_v50, %v15558_v50  ;;  %v10634_v13 = vpack.c.bf16 %v15561_v28, %v15561_v28  ;;  %v10636_v49 = vpack.c.bf16 %v15564_v37, %v15564_v37  ;;  %v6454_v17 = vld [vmem:[#allocation2 + $0xc] sm:$0x1] }
 0x551   :  { %6343 = vst [vmem:[#allocation2 + $0x50] sm:$0xf] %v10622_v4  ;;  %6346 = vst [vmem:[#allocation2 + $0x68] sm:$0xf] %v10625_v43  ;;  %v15683_v39 = vpack.c.bf16 %v15567_v57, %v15567_v57  ;;  %v6372_v45 = vshrl.u32 %v10630_v14, 16  ;;  %v6375_v50 = vshll.u32 %v10630_v14, 16 }
 0x552   :  { %6348 = vst [vmem:[#allocation2 + $0x78] sm:$0xf] %v10627_v58  ;;  %6349 = vst [vmem:[#allocation2 + $0x80] sm:$0xf] %v10628_v38  ;;  %v6380_v30 = vshrl.u32 %v10631_v48, 16  ;;  %v6383_v9 = vshll.u32 %v10631_v48, 16 }
 0x553   :  { %6350 = vst [vmem:[#allocation2 + $0x88] sm:$0xf] %v10629_v34  ;;  %6347 = vst [vmem:[#allocation2 + $0x70] sm:$0xf] %v10626_v6  ;;  %v6388_v8 = vshrl.u32 %v10632_v12, 16  ;;  %v6391_v3 = vshll.u32 %v10632_v12, 16 }
 0x554   :  { %v6396_v27 = vshrl.u32 %v10633_v10, 16  ;;  %v6399_v21 = vshll.u32 %v10633_v10, 16  ;;  %v6374_v47 = vrot.slane %v6372_v45, 7  ;;  %v6382_v28 = vrot.slane %v6380_v30, 7  ;;  %v6457_v54 = vld [vmem:[#allocation2 + $0x10] sm:$0xf] }
 0x555   :  { %v6404_v25 = vshrl.u32 %v10634_v13, 16  ;;  %v6407_v7 = vshll.u32 %v10634_v13, 16  ;;  %v6390_v37 = vrot.slane %v6388_v8, 7  ;;  %v6420_v56 = vshrl.u32 %v10636_v49, 16  ;;  %v6460_v42 = vld [vmem:[#allocation2 + $0x14] sm:$0x1] }
 0x556   :  { %v6398_v15 = vrot.slane %v6396_v27, 7  ;;  %v6423_v57 = vshll.u32 %v10636_v49, 16  ;;  %v6377_v41 = vor.u32 %v6375_v50, %v6374_v47  ;;  %v6378_v55 = vrot.slane %v6374_v47, 4  ;;  %v6463_v61 = vld [vmem:[#allocation2 + $0x18] sm:$0xf]  ;;  %v16574_v50 = vld [vmem:[#allocation72_spill] sm:$0xff] }
 0x557   :  { %v6385_v59 = vor.u32 %v6383_v9, %v6382_v28  ;;  %v6386_v46 = vrot.slane %v6382_v28, 4  ;;  %v6393_v29 = vor.u32 %v6391_v3, %v6390_v37  ;;  %v6394_v2 = vrot.slane %v6390_v37, 4  ;;  %v6466_v5 = vld [vmem:[#allocation2 + $0x1c] sm:$0x1]  ;;  %v6469_v19 = vld [vmem:[#allocation2 + $0x20] sm:$0xf] }
 0x558   :  { %v6401_v23 = vor.u32 %v6399_v21, %v6398_v15  ;;  %v6402_v63 = vrot.slane %v6398_v15, 4  ;;  %v12666_v0 = vld [vmem:[#allocation2 + $0x48] ss:$8 sps:$4 sm:$0xff]   ;;  %v6406_v62 = vrot.slane %v6404_v25, 7  ;;  %v6422_v53 = vrot.slane %v6420_v56, 7 }
 0x559   :  { %v6428_v16 = vshrl.u32 %v15683_v39, 16  ;;  %v6431_v24 = vshll.u32 %v15683_v39, 16  ;;  %v6472_v22 = vld [vmem:[#allocation2 + $0x24] sm:$0x1]  ;;  %v6487_v44 = vld [vmem:[#allocation2 + $0x38] sm:$0xf]  ;;  %v6452_v32 = vsel %vm13616_vm6, %v6377_v41, %v6451_v26  ;;  %v6455_v20 = vsel %vm13185_vm3, %v6378_v55, %v6454_v17  ;;  %12142 = vmatprep.mubr.bf16.mxu0 %v12666_v0 }
 0x55a   :  { %v6475_v40 = vld [vmem:[#allocation2 + $0x28] sm:$0xf]  ;;  %v6478_v60 = vld [vmem:[#allocation2 + $0x2c] sm:$0x1]  ;;  %v6458_v52 = vsel %vm13616_vm6, %v6385_v59, %v6457_v54  ;;  %v6461_v33 = vsel %vm13185_vm3, %v6386_v46, %v6460_v42  ;;  %v12668_v4 = vld [vmem:[#allocation2 + $0x58] ss:$8 sps:$4 sm:$0xff]   ;;  %v6409_v36 = vor.u32 %v6407_v7, %v6406_v62  ;;  %v6425_v6 = vor.u32 %v6423_v57, %v6422_v53 }
 0x55b   :  { %v6490_v35 = vld [vmem:[#allocation2 + $0x3c] sm:$0x1]  ;;  %v6410_v43 = vrot.slane %v6406_v62, 4  ;;  %v6426_v58 = vrot.slane %v6422_v53, 4  ;;  %6456 = vst [vmem:[#allocation2 + $0xc] sm:$0x1] %v6455_v20  ;;  %v6464_v14 = vsel %vm13616_vm6, %v6393_v29, %v6463_v61  ;;  %v6467_v48 = vsel %vm13185_vm3, %v6394_v2, %v6466_v5  ;;  %12143 = vmatmul.mubr.bf16.vlgmr.msra.gmra.mxu0 %v12668_v4 }
 0x55c   :  { %6459 = vst [vmem:[#allocation2 + $0x10] sm:$0xf] %v6458_v52  ;;  %6462 = vst [vmem:[#allocation2 + $0x14] sm:$0x1] %v6461_v33  ;;  %v12669_v38 = vld [vmem:[#allocation2 + $0x68] ss:$8 sps:$4 sm:$0xff]   ;;  %v6470_v12 = vsel %vm13616_vm6, %v6401_v23, %v6469_v19  ;;  %v6473_v13 = vsel %vm13185_vm3, %v6402_v63, %v6472_v22  ;;  %v6476_v49 = vsel %vm13616_vm6, %v6409_v36, %v6475_v40  ;;  %12175 = vmatpush3.bf16.msra.mxu0 %v16574_v50 }
 0x55d   :  { %6453 = vst [vmem:[#allocation2 + $0x8] sm:$0xf] %v6452_v32  ;;  %v6430_v34 = vrot.slane %v6428_v16, 7  ;;  %v6493_v10 = vld [vmem:[#allocation2 + $0x40] sm:$0xf]  ;;  %v6479_v39 = vsel %vm13185_vm3, %v6410_v43, %v6478_v60  ;;  %v6488_v45 = vsel %vm13616_vm6, %v6425_v6, %v6487_v44  ;;  %v6491_v21 = vsel %vm13185_vm3, %v6426_v58, %v6490_v35  ;;  %12146 = vmatprep.mubr.bf16.mxu0 %v12669_v38  ;;  %v12675_v47 = vld [vmem:[#allocation7 + $0xa8] sm:$0xff]  }
 0x55e   :  { %6465 = vst [vmem:[#allocation2 + $0x18] sm:$0xf] %v6464_v14  ;;  %6468 = vst [vmem:[#allocation2 + $0x1c] sm:$0x1] %v6467_v48  ;;  %v7104_v30 = vld [vmem:[#allocation2 + $0x50] sm:$0xf]  ;;  %12176 = vmatprep.subr.bf16.mxu0 %v15686_v51 }
 0x55f   :  { %6471 = vst [vmem:[#allocation2 + $0x20] sm:$0xf] %v6470_v12  ;;  %v7106_v9 = vld [vmem:[#allocation2 + $0x58] sm:$0xf]  ;;  %v15713_v8 = vld [vmem:[#allocation2 + $0x6c] sm:$0x1]  ;;  %v6433_v3 = vor.u32 %v6431_v24, %v6430_v34 }
 0x560   :  { %v6434_v27 = vrot.slane %v6430_v34, 4  ;;  %6474 = vst [vmem:[#allocation2 + $0x24] sm:$0x1] %v6473_v13  ;;  %6480 = vst [vmem:[#allocation2 + $0x2c] sm:$0x1] %v6479_v39  ;;  %v7133_v28 = vshrl.u32 %v7104_v30, 16  ;;  %12177 = vmatpush3.bf16.msra.mxu0 %v15686_v51 }
 0x561   :  { %6477 = vst [vmem:[#allocation2 + $0x28] sm:$0xf] %v6476_v49  ;;  %6489 = vst [vmem:[#allocation2 + $0x38] sm:$0xf] %v6488_v45  ;;  %v15718_v25 = vld [vmem:[#allocation2 + $0x60] sm:$0xf]  ;;  %v6494_v54 = vsel %vm13616_vm6, %v6433_v3, %v6493_v10  ;;  %12178 = vmatprep.subr.bf16.mxu0 %v12675_v47 }
 0x562   :  { %v6496_v7 = vld [vmem:[#allocation2 + $0x44] sm:$0x1]  ;;  %6492 = vst [vmem:[#allocation2 + $0x3c] sm:$0x1] %v6491_v21  ;;  %v7136_v37 = vshll.u32 %v7104_v30, 16  ;;  %v7147_v15 = vshrl.u32 %v7106_v9, 16 }
 0x563   :  { %v7150_v56 = vshll.u32 %v7106_v9, 16  ;;  %v16575_v57 = vld [vmem:[#allocation85_spill] sm:$0xff]  ;;  %v6497_v42 = vsel %vm13185_vm3, %v6434_v27, %v6496_v7  ;;  %v12679_v41 = vld [vmem:[#allocation7 + $0xa0] sm:$0xff]   ;;  %v7135_v55 = vrot.slane %v7133_v28, 4  ;;  %v7184_v59 = vshll.u32 %v15713_v8, 16  ;;  %v12678_v63 = vld [vmem:[#allocation7 + $0xf0] sm:$0xff]  }
 0x564   :  { %v16576_v26 = vshll.u32 %v16575_v57, 16  ;;  %6495 = vst [vmem:[#allocation2 + $0x40] sm:$0xf] %v6494_v54  ;;  %6498 = vst [vmem:[#allocation2 + $0x44] sm:$0x1] %v6497_v42  ;;  %v7138_v29 = vrot.slane %v7136_v37, 5  ;;  %12179 = vmatpush3.bf16.msra.mxu0 %v12675_v47 }
 0x565   :  { %v12676_v46 = vld [vmem:[#allocation2 + $0x78] ss:$8 sps:$4 sm:$0xff]   ;;  %v7161_v2 = vshrl.u32 %v15718_v25, 16  ;;  %v15733_v0 = vld [vmem:[#allocation2 + $0x74] sm:$0x1]  ;;  %v15735_v19 = vrot.slane %v7147_v15, 4  ;;  %12180 = vmatprep.subr.bf16.mxu0 %v12679_v41 }
 0x566   :  { %v15722_v17 = vrot.slane %v16576_v26, 5  ;;  %v12672_v23 = vld [vmem:[#allocation2] ss:$8 sps:$4 sm:$0xff]   ;;  %v6824_v61 = vld [vmem:[#allocation2 + $0xc] sm:$0x1]  ;;  %v7139_v5 = vor.u32 %v7138_v29, %v7135_v55  ;;  %v15737_v62 = vrot.slane %v7150_v56, 5  ;;  %12147 = vmatmul.mubr.bf16.gmra.mxu0 %v12676_v46 }
 0x567   :  { %v6823_v11 = vld [vmem:[#allocation2 + $0x8] sm:$0xf]  ;;  %12166 = vmatprep.mubr.bf16.mxu1 %v12672_v23  ;;  %v12674_v51 = vld [vmem:[#allocation2 + $0x10] ss:$8 sps:$4 sm:$0xff]   ;;  %v6861_v40 = vshll.u32 %v6824_v61, 16  ;;  %v15739_v33 = vrot.slane %v7161_v2, 4 }
 0x568   :  { %v12682_v53 = vld [vmem:[#allocation7 + $0x98] sm:$0xff]   ;;  %v12677_v16 = vld [vmem:[#allocation2 + $0x20] ss:$8 sps:$4 sm:$0xff]   ;;  %12167 = vmatmul.mubr.bf16.vlgmr.msra.gmra.mxu1 %v12674_v51  ;;  %v6852_v22 = vshrl.u32 %v6823_v11, 16  ;;  %v6855_v44 = vshll.u32 %v6823_v11, 16  ;;  %v7140_v60 = vrot.slane %v7139_v5, 4  ;;  %12181 = vmatpush3.bf16.msra.mxu0 %v12679_v41  ;;  %v7153_v9 = vor.u32 %v15737_v62, %v15735_v19 }
 0x569   :  { %v12680_v24 = vld [vmem:[#allocation7 + $0xe8] sm:$0xff]   ;;  %v6825_v32 = vld [vmem:[#allocation2 + $0x10] sm:$0xf]  ;;  %v12948_v20 = vld [vmem:[#allocation7 + $0xf8] sm:$0xff]   ;;  %12170 = vmatprep.mubr.bf16.mxu1 %v12677_v16  ;;  %v7164_v4 = vshll.u32 %v15718_v25, 16  ;;  %v6922_v35 = vshrl.u32 %v15731_v18, 16  ;;  %12182 = vmatprep.subr.bf16.mxu0 %v12682_v53 }
 0x56a   :  { %12199 = vmatpush3.bf16.msra.mxu1 %v12948_v20  ;;  %v6827_v52 = vld [vmem:[#allocation2 + $0x18] sm:$0xf]  ;;  %v7198_v36 = vshll.u32 %v15733_v0, 16  ;;  %v16577_v43 = vld [vmem:[#allocation60_spill] sm:$0xff]  ;;  %v16578_v6 = vld [vmem:[#allocation54_spill] sm:$0xff]  ;;  %v6854_v34 = vrot.slane %v6852_v22, 4 }
 0x56b   :  { %12200 = vmatprep.subr.bf16.mxu1 %v12678_v63  ;;  %v6850_v38 = vsel %vm13819_vm9, %v16578_v6, %v16577_v43  ;;  %v6857_v14 = vrot.slane %v6855_v44, 5  ;;  %v16580_v48 = vld [vmem:[#allocation65_spill] sm:$0xff]  ;;  %v16581_v12 = vld [vmem:[#allocation58_spill] sm:$0xff]  ;;  %v6829_v49 = vld [vmem:[#allocation2 + $0x20] sm:$0xf]  ;;  %v6863_v39 = vrot.slane %v6861_v40, 5 }
 0x56c   :  { %v7131_v10 = vsel %vm13819_vm9, %v16581_v12, %v16580_v48  ;;  %v6826_v13 = vld [vmem:[#allocation2 + $0x14] sm:$0x1]  ;;  %v6828_v45 = vld [vmem:[#allocation2 + $0x1c] sm:$0x1]  ;;  %v6866_v50 = vshrl.u32 %v6825_v32, 16  ;;  %v6869_v30 = vshll.u32 %v6825_v32, 16  ;;  %12183 = vmatpush3.bf16.msra.mxu0 %v12682_v53 }
 0x56d   :  { %v6858_v3 = vor.u32 %v6857_v14, %v6854_v34  ;;  %v16582_v27 = vld [vmem:[#allocation63_spill] sm:$0xff]  ;;  %v12683_v47 = vld [vmem:[#allocation7 + $0xe0] sm:$0xff]   ;;  %v12684_v28 = vld [vmem:[#allocation7 + $0x90] sm:$0xff]   ;;  %v6880_v7 = vshrl.u32 %v6827_v52, 16  ;;  %v6883_v37 = vshll.u32 %v6827_v52, 16  ;;  %v6875_v57 = vshll.u32 %v6826_v13, 16 }
 0x56e   :  { %v7145_v21 = vsel %vm13819_vm9, %v7140_v60, %v16582_v27  ;;  %12201 = vmatpush3.bf16.msra.mxu1 %v12678_v63  ;;  %v6868_v15 = vrot.slane %v6866_v50, 4  ;;  %v6871_v56 = vrot.slane %v6869_v30, 5  ;;  %v6831_v26 = vld [vmem:[#allocation2 + $0x28] sm:$0xf]  ;;  %v6894_v54 = vshrl.u32 %v6829_v49, 16  ;;  %12184 = vmatprep.subr.bf16.mxu0 %v12684_v28  ;;  %v12685_v52 = vld [vmem:[#allocation7 + $0xd8] sm:$0xff]  }
 0x56f   :  { %12202 = vmatprep.subr.bf16.mxu1 %v12680_v24  ;;  %v12681_v42 = vld [vmem:[#allocation2 + $0x30] ss:$8 sps:$4 sm:$0xff]   ;;  %v6859_v41 = vrot.slane %v6858_v3, 4  ;;  %v6882_v55 = vrot.slane %v6880_v7, 4  ;;  %v6885_v46 = vrot.slane %v6883_v37, 5  ;;  %v6889_v29 = vshll.u32 %v6828_v45, 16 }
 0x570   :  { %v10417_v2 = vcombine.low %v7131_v10, %v7145_v21  ;;  %v12686_v23 = vld [vmem:[#allocation7 + $0x88] sm:$0xff]   ;;  %v6872_v11 = vor.u32 %v6871_v56, %v6868_v15  ;;  %v6830_v61 = vld [vmem:[#allocation2 + $0x24] sm:$0x1]  ;;  %v6896_v5 = vrot.slane %v6894_v54, 4  ;;  %v6897_v51 = vshll.u32 %v6829_v49, 16  ;;  %12171 = vmatmul.mubr.bf16.gmra.mxu1 %v12681_v42  ;;  %12185 = vmatpush3.bf16.msra.mxu0 %v12684_v28  ;;  %v12687_v30 = vld [vmem:[#allocation7 + $0xd0] sm:$0xff]  }
 0x571   :  { %v6864_v63 = vsel %vm13819_vm9, %v6859_v41, %v6863_v39  ;;  %v6886_v16 = vor.u32 %v6885_v46, %v6882_v55  ;;  %v6832_v22 = vld [vmem:[#allocation2 + $0x2c] sm:$0x1]  ;;  %v6908_v44 = vshrl.u32 %v6831_v26, 16  ;;  %v6911_v40 = vshll.u32 %v6831_v26, 16  ;;  %12186 = vmatprep.subr.bf16.mxu0 %v12686_v23  ;;  %v7110_v27 = vld [vmem:[#allocation2 + $0x68] sm:$0xf] }
 0x572   :  { %v10405_v60 = vcombine.low %v6850_v38, %v6864_v63  ;;  %12203 = vmatpush3.bf16.msra.mxu1 %v12680_v24  ;;  %12214 = vmatprep.mubr.bf16.mxu1 %v10417_v2  ;;  %v6873_v32 = vrot.slane %v6872_v11, 4  ;;  %v6877_v53 = vrot.slane %v6875_v57, 5  ;;  %v6899_v20 = vrot.slane %v6897_v51, 5  ;;  %v6835_v38 = vld [vmem:[#allocation2 + $0x38] sm:$0xf]  ;;  %v12688_v24 = vld [vmem:[#allocation7 + $0x80] sm:$0xff]  }
 0x573   :  { %12204 = vmatprep.subr.bf16.mxu1 %v12683_v47  ;;  %v6887_v43 = vrot.slane %v6886_v16, 4  ;;  %v6891_v6 = vrot.slane %v6889_v29, 5  ;;  %v6910_v34 = vrot.slane %v6908_v44, 4  ;;  %v6913_v14 = vrot.slane %v6911_v40, 5  ;;  %v7112_v21 = vld [vmem:[#allocation2 + $0x70] sm:$0xf] }
 0x574   :  { %12190 = vmatprep.mubr.bf16.mxu0 %v10405_v60  ;;  %v6900_v48 = vor.u32 %v6899_v20, %v6896_v5  ;;  %v6903_v12 = vshll.u32 %v6830_v61, 16  ;;  %v6917_v10 = vshll.u32 %v6832_v22, 16  ;;  %v7166_v13 = vrot.slane %v7164_v4, 5  ;;  %12187 = vmatpush3.bf16.msra.mxu0 %v12686_v23  ;;  %v12690_v56 = vld [vmem:[#allocation7 + $0x138] sm:$0xff]   ;;  %v7116_v62 = vld [vmem:[#allocation2 + $0x80] sm:$0xf] }
 0x575   :  { %v6914_v49 = vor.u32 %v6913_v14, %v6910_v34  ;;  %v15763_v39 = vrot.slane %v7170_v1, 5  ;;  %v15767_v45 = vrot.slane %v7184_v59, 5  ;;  %v15771_v50 = vrot.slane %v7198_v36, 5  ;;  %v6834_v1 = vld [vmem:[#allocation2 + $0x34] sm:$0x1]  ;;  %12188 = vmatprep.subr.bf16.mxu0 %v12688_v24 }
 0x576   :  { %12205 = vmatpush3.bf16.msra.mxu1 %v12683_v47  ;;  %v6878_v25 = vsel %vm13819_vm9, %v6873_v32, %v6877_v53  ;;  %v6892_v4 = vsel %vm13819_vm9, %v6887_v43, %v6891_v6  ;;  %v6901_v3 = vrot.slane %v6900_v48, 4  ;;  %v7167_v31 = vor.u32 %v7166_v13, %v15739_v33  ;;  %v6836_v33 = vld [vmem:[#allocation2 + $0x3c] sm:$0x1]  ;;  %v7114_v54 = vld [vmem:[#allocation2 + $0x78] sm:$0xf]  ;;  %v12692_v63 = vld [vmem:[#allocation7 + $0x130] sm:$0xff]  }
 0x577   :  { %12206 = vmatprep.subr.bf16.mxu1 %v12685_v52  ;;  %v6915_v8 = vrot.slane %v6914_v49, 4  ;;  %v6924_v59 = vrot.slane %v6922_v35, 4  ;;  %v6925_v0 = vshll.u32 %v15731_v18, 16  ;;  %v6936_v36 = vshrl.u32 %v6835_v38, 16  ;;  %v7115_v20 = vld [vmem:[#allocation2 + $0x7c] sm:$0x1] }
 0x578   :  { %v6905_v47 = vrot.slane %v6903_v12, 5  ;;  %v6919_v28 = vrot.slane %v6917_v10, 5  ;;  %v15784_v7 = vrot.slane %v7153_v9, 4  ;;  %v6939_v37 = vshll.u32 %v6835_v38, 16  ;;  %v12689_v9 = vld [vmem:[#allocation7 + $0xc8] sm:$0xff]   ;;  %12189 = vmatpush3.bf16.msra.mxu0 %v12688_v24  ;;  %v12691_v43 = vld [vmem:[#allocation7 + $0xc0] sm:$0xff]  }
 0x579   :  { %v10406_v15 = vcombine.low %v6878_v25, %v6892_v4  ;;  %v6927_v57 = vrot.slane %v6925_v0, 5  ;;  %v6931_v26 = vshll.u32 %v6834_v1, 16  ;;  %v6938_v35 = vrot.slane %v6936_v36, 4  ;;  %12222 = vmatprep.subr.bf16.mxu0 %v12690_v56  ;;  %v12694_v10 = vld [vmem:[#allocation7 + $0x128] sm:$0xff]   ;;  %v12693_v1 = vld [vmem:[#allocation7 + $0x178] sm:$0xff]  }
 0x57a   :  { %12207 = vmatpush3.bf16.msra.mxu1 %v12685_v52  ;;  %v6906_v18 = vsel %vm13819_vm9, %v6901_v3, %v6905_v47  ;;  %v6920_v42 = vsel %vm13819_vm9, %v6915_v8, %v6919_v28  ;;  %v15790_v41 = vrot.slane %v7167_v31, 4  ;;  %v6941_v19 = vrot.slane %v6939_v37, 5  ;;  %v7117_v52 = vld [vmem:[#allocation2 + $0x84] sm:$0x1] }
 0x57b   :  { %12208 = vmatprep.subr.bf16.mxu1 %v12687_v30  ;;  %v6928_v55 = vor.u32 %v6927_v57, %v6924_v59  ;;  %v6945_v46 = vshll.u32 %v6836_v33, 16  ;;  %v7175_v29 = vshrl.u32 %v7110_v27, 16  ;;  %v7178_v2 = vshll.u32 %v7110_v27, 16  ;;  %12191 = vmatmul.mubr.bf16.vlgmr.msra.gmra.mxu0 %v10406_v15  ;;  %v12697_v37 = vld [vmem:[#allocation7 + $0x120] sm:$0xff]   ;;  %v12696_v15 = vld [vmem:[#allocation7 + $0x170] sm:$0xff]  }
 0x57c   :  { %v6942_v23 = vor.u32 %v6941_v19, %v6938_v35  ;;  %v7189_v11 = vshrl.u32 %v7112_v21, 16  ;;  %v7192_v61 = vshll.u32 %v7112_v21, 16  ;;  %v7203_v5 = vshrl.u32 %v7114_v54, 16  ;;  %12223 = vmatpush3.bf16.msra.mxu0 %v12690_v56  ;;  %v12700_v19 = vld [vmem:[#allocation2 + $0xd8] ss:$8 sps:$4 sm:$0xff]  }
 0x57d   :  { %v10407_v51 = vcombine.low %v6906_v18, %v6920_v42  ;;  %v7177_v16 = vrot.slane %v7175_v29, 4  ;;  %v7180_v22 = vrot.slane %v7178_v2, 5  ;;  %v7206_v44 = vshll.u32 %v7114_v54, 16  ;;  %12224 = vmatprep.subr.bf16.mxu0 %v12692_v63  ;;  %v12702_v42 = vld [vmem:[#allocation7 + $0x110] sm:$0xff]   ;;  %v12703_v29 = vld [vmem:[#allocation7 + $0x158] sm:$0xff]  }
 0x57e   :  { %12209 = vmatpush3.bf16.msra.mxu1 %v12687_v30  ;;  %v6929_v40 = vrot.slane %v6928_v55, 4  ;;  %v6943_v60 = vrot.slane %v6942_v23, 4  ;;  %v7191_v32 = vrot.slane %v7189_v11, 4  ;;  %v7194_v53 = vrot.slane %v7192_v61, 5  ;;  %v7723_v55 = vld [vmem:[#allocation2 + $0x98] sm:$0xf] }
 0x57f   :  { %12210 = vmatprep.subr.bf16.mxu1 %v12689_v9  ;;  %v6933_v6 = vrot.slane %v6931_v26, 5  ;;  %v6947_v34 = vrot.slane %v6945_v46, 5  ;;  %v7181_v14 = vor.u32 %v7180_v22, %v7177_v16  ;;  %v7217_v48 = vshrl.u32 %v7116_v62, 16  ;;  %12194 = vmatprep.mubr.bf16.mxu0 %v10407_v51  ;;  %v12704_v46 = vld [vmem:[#allocation7 + $0x108] sm:$0xff]   ;;  %v12705_v51 = vld [vmem:[#allocation7 + $0x150] sm:$0xff]  }
 0x580   :  { %v7195_v12 = vor.u32 %v7194_v53, %v7191_v32  ;;  %v7205_v13 = vrot.slane %v7203_v5, 4  ;;  %v7208_v38 = vrot.slane %v7206_v44, 5  ;;  %v7220_v24 = vshll.u32 %v7116_v62, 16  ;;  %12225 = vmatpush3.bf16.msra.mxu0 %v12692_v63  ;;  %v12701_v62 = vld [vmem:[#allocation7 + $0x160] sm:$0xff]   ;;  %v7724_v32 = vld [vmem:[#allocation2 + $0x9c] sm:$0x1] }
 0x581   :  { %v7182_v49 = vrot.slane %v7181_v14, 4  ;;  %v7219_v30 = vrot.slane %v7217_v48, 4  ;;  %v6934_v25 = vsel %vm13819_vm9, %v6929_v40, %v6933_v6  ;;  %v6948_v4 = vsel %vm13819_vm9, %v6943_v60, %v6947_v34  ;;  %12226 = vmatprep.subr.bf16.mxu0 %v12694_v10  ;;  %v12706_v5 = vld [vmem:[#allocation7 + $0x100] sm:$0xff]   ;;  %v12709_v40 = vld [vmem:[#allocation7 + $0x1b8] sm:$0xff]   ;;  %v7722_v60 = vld [vmem:[#allocation2 + $0x94] sm:$0x1] }
 0x582   :  { %12211 = vmatpush3.bf16.msra.mxu1 %v12689_v9  ;;  %v7196_v3 = vrot.slane %v7195_v12, 4  ;;  %v7222_v31 = vrot.slane %v7220_v24, 5  ;;  %v7212_v27 = vshll.u32 %v7115_v20, 16  ;;  %v7226_v8 = vshll.u32 %v7117_v52, 16  ;;  %v7721_v9 = vld [vmem:[#allocation2 + $0x90] sm:$0xf] }
 0x583   :  { %12212 = vmatprep.subr.bf16.mxu1 %v12691_v43  ;;  %v7159_v59 = vsel %vm13819_vm9, %v15784_v7, %v15722_v17  ;;  %v7173_v0 = vsel %vm13819_vm9, %v15790_v41, %v15763_v39  ;;  %v7209_v36 = vor.u32 %v7208_v38, %v7205_v13  ;;  %v10408_v47 = vcombine.low %v6934_v25, %v6948_v4  ;;  %v12695_v17 = vld [vmem:[#allocation2 + $0x90] ss:$8 sps:$4 sm:$0xff]   ;;  %v8004_v20 = vld [vmem:[#allocation2 + $0xe0] sm:$0xf]  ;;  %v12707_v52 = vld [vmem:[#allocation7 + $0x148] sm:$0xff]  }
 0x584   :  { %v7223_v21 = vor.u32 %v7222_v31, %v7219_v30  ;;  %v7187_v28 = vsel %vm13819_vm9, %v7182_v49, %v15767_v45  ;;  %v7201_v33 = vsel %vm13819_vm9, %v7196_v3, %v15771_v50  ;;  %v10418_v7 = vcombine.low %v7159_v59, %v7173_v0  ;;  %12227 = vmatpush3.bf16.msra.mxu0 %v12694_v10  ;;  %v12699_v45 = vld [vmem:[#allocation7 + $0x118] sm:$0xff]   ;;  %v12698_v50 = vld [vmem:[#allocation7 + $0x168] sm:$0xff]   ;;  %v12712_v34 = vld [vmem:[#allocation7 + $0x1b0] sm:$0xff]  }
 0x585   :  { %12195 = vmatmul.mubr.bf16.gmra.mxu0 %v10408_v47  ;;  %v7214_v39 = vrot.slane %v7212_v27, 5  ;;  %v10419_v56 = vcombine.low %v7187_v28, %v7201_v33  ;;  %v7210_v57 = vrot.slane %v7209_v36, 4  ;;  %v7228_v35 = vrot.slane %v7226_v8, 5  ;;  %12228 = vmatprep.subr.bf16.mxu0 %v12697_v37  ;;  %v8002_v53 = vld [vmem:[#allocation2 + $0xd8] sm:$0xf]  ;;  %v12711_v30 = vld [vmem:[#allocation7 + $0x140] sm:$0xff]  }
 0x586   :  { %12213 = vmatpush3.bf16.msra.mxu1 %v12691_v43  ;;  %12238 = vmatprep.mubr.bf16.mxu0 %v12695_v17  ;;  %v7224_v26 = vrot.slane %v7223_v21, 4  ;;  %v7738_v2 = vshrl.u32 %v7721_v9, 16  ;;  %v7741_v23 = vshll.u32 %v7721_v9, 16  ;;  %v7752_v11 = vshrl.u32 %v7723_v55, 16  ;;  %v12708_v12 = vld [vmem:[#allocation2 + $0xa0] ss:$8 sps:$4 sm:$0xff]  }
 0x587   :  { %12246 = vmatprep.subr.bf16.mxu1 %v12693_v1  ;;  %v7215_v54 = vsel %vm13819_vm9, %v7210_v57, %v7214_v39  ;;  %v7755_v61 = vshll.u32 %v7723_v55, 16  ;;  %v7747_v14 = vshll.u32 %v7722_v60, 16  ;;  %v7761_v48 = vshll.u32 %v7724_v32, 16  ;;  %v12710_v49 = vld [vmem:[#allocation2 + $0xb0] ss:$8 sps:$4 sm:$0xff]   ;;  %v12717_v31 = vld [vmem:[#allocation7 + $0x1a8] sm:$0xff]  }
 0x588   :  { %12229 = vmatpush3.bf16.msra.mxu0 %v12697_v37  ;;  %v7229_v18 = vsel %vm13819_vm9, %v7224_v26, %v7228_v35  ;;  %v7740_v63 = vrot.slane %v7738_v2, 4  ;;  %v7743_v16 = vrot.slane %v7741_v23, 5  ;;  %v7754_v22 = vrot.slane %v7752_v11, 4  ;;  %v7725_v3 = vld [vmem:[#allocation2 + $0xa0] sm:$0xf]  ;;  %v12714_v17 = vld [vmem:[#allocation7 + $0x1f8] sm:$0xff]  }
 0x589   :  { %12215 = vmatmul.mubr.bf16.vlgmr.msra.gmra.mxu1 %v10418_v7  ;;  %12230 = vmatprep.subr.bf16.mxu0 %v12699_v45  ;;  %v10420_v41 = vcombine.low %v7215_v54, %v7229_v18  ;;  %v7757_v44 = vrot.slane %v7755_v61, 5  ;;  %v8019_v10 = vshrl.u32 %v8002_v53, 16  ;;  %v8022_v13 = vshll.u32 %v8002_v53, 16  ;;  %v7727_v21 = vld [vmem:[#allocation2 + $0xa8] sm:$0xf]  ;;  %v12718_v55 = vld [vmem:[#allocation7 + $0x1f0] sm:$0xff]  }
 0x58a   :  { %12218 = vmatprep.mubr.bf16.mxu1 %v10419_v56  ;;  %12247 = vmatpush3.bf16.msra.mxu1 %v12693_v1  ;;  %v7744_v43 = vor.u32 %v7743_v16, %v7740_v63  ;;  %v8033_v38 = vshrl.u32 %v8004_v20, 16  ;;  %v8036_v24 = vshll.u32 %v8004_v20, 16  ;;  %v7749_v1 = vrot.slane %v7747_v14, 5  ;;  %v8003_v47 = vld [vmem:[#allocation2 + $0xdc] sm:$0x1]  ;;  %v12719_v56 = vld [vmem:[#allocation7 + $0x1a0] sm:$0xff]  }
 0x58b   :  { %12248 = vmatprep.subr.bf16.mxu1 %v12696_v15  ;;  %v7758_v6 = vor.u32 %v7757_v44, %v7754_v22  ;;  %v7763_v27 = vrot.slane %v7761_v48, 5  ;;  %v8021_v8 = vrot.slane %v8019_v10, 4  ;;  %v8024_v59 = vrot.slane %v8022_v13, 5  ;;  %v8005_v28 = vld [vmem:[#allocation2 + $0xe4] sm:$0x1]  ;;  %v12722_v11 = vld [vmem:[#allocation7 + $0x198] sm:$0xff]  }
 0x58c   :  { %12231 = vmatpush3.bf16.msra.mxu0 %v12699_v45  ;;  %v7745_v25 = vrot.slane %v7744_v43, 4  ;;  %v8035_v0 = vrot.slane %v8033_v38, 4  ;;  %v8038_v36 = vrot.slane %v8036_v24, 5  ;;  %v7766_v33 = vshrl.u32 %v7725_v3, 16  ;;  %v7729_v39 = vld [vmem:[#allocation2 + $0xb0] sm:$0xf] }
 0x58d   :  { %12232 = vmatprep.subr.bf16.mxu0 %v12702_v42  ;;  %v7759_v4 = vrot.slane %v7758_v6, 4  ;;  %v7769_v37 = vshll.u32 %v7725_v3, 16  ;;  %v7780_v57 = vshrl.u32 %v7727_v21, 16  ;;  %v7783_v26 = vshll.u32 %v7727_v21, 16  ;;  %v12713_v35 = vld [vmem:[#allocation2 + $0xe8] ss:$8 sps:$4 sm:$0xff]  }
 0x58e   :  { %12249 = vmatpush3.bf16.msra.mxu1 %v12696_v15  ;;  %v7750_v7 = vsel %vm13819_vm9, %v7745_v25, %v7749_v1  ;;  %v12715_v45 = vld [vmem:[#allocation2 + $0xc0] ss:$8 sps:$4 sm:$0xff]   ;;  %v8028_v54 = vshll.u32 %v8003_v47, 16  ;;  %v8039_v18 = vor.u32 %v8038_v36, %v8035_v0  ;;  %v7794_v9 = vshrl.u32 %v7729_v39, 16  ;;  %v7728_v44 = vld [vmem:[#allocation2 + $0xac] sm:$0x1] }
 0x58f   :  { %12250 = vmatprep.subr.bf16.mxu1 %v12698_v50  ;;  %v7764_v15 = vsel %vm13819_vm9, %v7759_v4, %v7763_v27  ;;  %v7797_v2 = vshll.u32 %v7729_v39, 16  ;;  %v12716_v23 = vld [vmem:[#allocation2 + $0xf8] ss:$8 sps:$4 sm:$0xff]   ;;  %v7782_v61 = vrot.slane %v7780_v57, 4  ;;  %v7730_v53 = vld [vmem:[#allocation2 + $0xb4] sm:$0x1] }
 0x590   :  { %12233 = vmatpush3.bf16.msra.mxu0 %v12702_v42  ;;  %v8042_v42 = vshll.u32 %v8005_v28, 16  ;;  %v8030_v63 = vrot.slane %v8028_v54, 5  ;;  %v8040_v16 = vrot.slane %v8039_v18, 4  ;;  %v7796_v20 = vrot.slane %v7794_v9, 4  ;;  %v15818_v48 = vld [vmem:[#allocation2 + $0xec] sm:$0x1] }
 0x591   :  { %12219 = vmatmul.mubr.bf16.gmra.mxu1 %v10420_v41  ;;  %12234 = vmatprep.subr.bf16.mxu0 %v12704_v46  ;;  %v10453_v41 = vcombine.low %v7750_v7, %v7764_v15  ;;  %v7799_v43 = vrot.slane %v7797_v2, 5  ;;  %v12723_v38 = vld [vmem:[#allocation7 + $0x1e0] sm:$0xff]   ;;  %v7789_v24 = vshll.u32 %v7728_v44, 16  ;;  %v8006_v25 = vld [vmem:[#allocation2 + $0xe8] sm:$0xf]  ;;  %v8056_v39 = vshll.u32 %v15818_v48, 16 }
 0x592   :  { %12251 = vmatpush3.bf16.msra.mxu1 %v12698_v50  ;;  %12262 = vmatprep.mubr.bf16.mxu1 %v12700_v19  ;;  %v8025_v50 = vor.u32 %v8024_v59, %v8021_v8  ;;  %v7768_v19 = vrot.slane %v7766_v33, 4  ;;  %v8044_v22 = vrot.slane %v8042_v42, 5  ;;  %v7733_v1 = vld [vmem:[#allocation2 + $0xc0] sm:$0xf]  ;;  %v7735_v27 = vld [vmem:[#allocation2 + $0xc8] sm:$0xf] }
 0x593   :  { %12252 = vmatprep.subr.bf16.mxu1 %v12701_v62  ;;  %v7800_v8 = vor.u32 %v7799_v43, %v7796_v20  ;;  %v12726_v21 = vld [vmem:[#allocation7 + $0x188] sm:$0xff]   ;;  %v8047_v28 = vshrl.u32 %v8006_v25, 16  ;;  %v8050_v33 = vshll.u32 %v8006_v25, 16  ;;  %v7825_v57 = vshll.u32 %v7733_v1, 16  ;;  %v12728_v54 = vld [vmem:[#allocation7 + $0x180] sm:$0xff]  }
 0x594   :  { %12235 = vmatpush3.bf16.msra.mxu0 %v12704_v46  ;;  %v7726_v46 = vld [vmem:[#allocation2 + $0xa4] sm:$0x1]  ;;  %v8045_v13 = vsel %vm13819_vm9, %v8040_v16, %v8044_v22  ;;  %v8009_v2 = vld [vmem:[#allocation2 + $0xf4] sm:$0x1]  ;;  %v7736_v20 = vld [vmem:[#allocation2 + $0xcc] sm:$0x1] }
 0x595   :  { %12236 = vmatprep.subr.bf16.mxu0 %v12706_v5  ;;  %v7775_v32 = vshll.u32 %v7726_v46, 16  ;;  %v15832_v18 = vrot.slane %v7800_v8, 4  ;;  %v8052_v46 = vrot.slane %v8050_v33, 5  ;;  %v7827_v16 = vrot.slane %v7825_v57, 5  ;;  %v8016_v48 = vld [vmem:[#allocation2 + $0x110] sm:$0xf] }
 0x596   :  { %12253 = vmatpush3.bf16.msra.mxu1 %v12701_v62  ;;  %v7771_v62 = vrot.slane %v7769_v37, 5  ;;  %v8010_v37 = vld [vmem:[#allocation2 + $0xf8] sm:$0xf] }
 0x597   :  { %12254 = vmatprep.subr.bf16.mxu1 %v12703_v29  ;;  %v7777_v3 = vrot.slane %v7775_v32, 5 }
 0x598   :  { %12237 = vmatpush3.bf16.msra.mxu0 %v12706_v5  ;;  %v7785_v5 = vrot.slane %v7783_v26, 5  ;;  %v7772_v60 = vor.u32 %v7771_v62, %v7768_v19  ;;  %v7836_v26 = vshrl.u32 %v7735_v27, 16 }
 0x599   :  { %12270 = vmatprep.subr.bf16.mxu0 %v12709_v40 }
 0x59a   :  { %12255 = vmatpush3.bf16.msra.mxu1 %v12703_v29  ;;  %v7731_v29 = vld [vmem:[#allocation2 + $0xb8] sm:$0xf]  ;;  %v7786_v14 = vor.u32 %v7785_v5, %v7782_v61  ;;  %v15826_v4 = vrot.slane %v7772_v60, 4  ;;  %v7838_v22 = vrot.slane %v7836_v26, 4  ;;  %v12731_v26 = vld [vmem:[#allocation7 + $0x1c0] sm:$0xff]  }
 0x59b   :  { %12256 = vmatprep.subr.bf16.mxu1 %v12705_v51  ;;  %12239 = vmatmul.mubr.bf16.vlgmr.msra.gmra.mxu0 %v12708_v12  ;;  %v7811_v6 = vshll.u32 %v7731_v29, 16  ;;  %v12720_v12 = vld [vmem:[#allocation2 + $0x108] ss:$8 sps:$4 sm:$0xff]  }
 0x59c   :  { %12242 = vmatprep.mubr.bf16.mxu0 %v12710_v49  ;;  %12271 = vmatpush3.bf16.msra.mxu0 %v12709_v40  ;;  %v12721_v40 = vld [vmem:[#allocation7 + $0x1e8] sm:$0xff]   ;;  %v15824_v49 = vld [vmem:[#allocation2 + $0xbc] sm:$0x1]  ;;  %v7787_v47 = vrot.slane %v7786_v14, 4  ;;  %v7778_v62 = vsel %vm13819_vm9, %v15826_v4, %v7777_v3  ;;  %v15843_v14 = vrot.slane %v8056_v39, 5 }
 0x59d   :  { %12272 = vmatprep.subr.bf16.mxu0 %v12712_v34  ;;  %v7813_v0 = vrot.slane %v7811_v6, 5  ;;  %v7817_v15 = vshll.u32 %v15824_v49, 16  ;;  %v8070_v49 = vshll.u32 %v8009_v2, 16  ;;  %v8011_v4 = vld [vmem:[#allocation2 + $0xfc] sm:$0x1] }
 0x59e   :  { %12257 = vmatpush3.bf16.msra.mxu1 %v12705_v51  ;;  %v8026_v51 = vrot.slane %v8025_v50, 4  ;;  %v12725_v50 = vld [vmem:[#allocation7 + $0x1d8] sm:$0xff]   ;;  %v8013_v3 = vld [vmem:[#allocation2 + $0x104] sm:$0x1] }
 0x59f   :  { %12258 = vmatprep.subr.bf16.mxu1 %v12707_v52 }
 0x5a0   :  { %12273 = vmatpush3.bf16.msra.mxu0 %v12712_v34  ;;  %v12724_v34 = vld [vmem:[#allocation7 + $0x190] sm:$0xff]   ;;  %v8031_v10 = vsel %vm13819_vm9, %v8026_v51, %v8030_v63  ;;  %v7734_v51 = vld [vmem:[#allocation2 + $0xc4] sm:$0x1] }
 0x5a1   :  { %12274 = vmatprep.subr.bf16.mxu0 %v12717_v31  ;;  %v10465_v36 = vcombine.low %v8031_v10, %v8045_v13  ;;  %v7831_v8 = vshll.u32 %v7734_v51, 16  ;;  %v12733_v51 = vld [vmem:[#allocation7 + $0x278] sm:$0xff]  }
 0x5a2   :  { %12259 = vmatpush3.bf16.msra.mxu1 %v12707_v52  ;;  %v7808_v52 = vshrl.u32 %v7731_v29, 16  ;;  %v12727_v29 = vld [vmem:[#allocation7 + $0x1d0] sm:$0xff]  }
 0x5a3   :  { %12260 = vmatprep.subr.bf16.mxu1 %v12711_v30  ;;  %12243 = vmatmul.mubr.bf16.gmra.mxu0 %v12715_v45  ;;  %v8012_v45 = vld [vmem:[#allocation2 + $0x100] sm:$0xf] }
 0x5a4   :  { %12275 = vmatpush3.bf16.msra.mxu0 %v12717_v31  ;;  %12286 = vmatprep.mubr.bf16.mxu0 %v10453_v41  ;;  %v8008_v31 = vld [vmem:[#allocation2 + $0xf0] sm:$0xf]  ;;  %v7810_v59 = vrot.slane %v7808_v52, 4  ;;  %v8089_v61 = vshrl.u32 %v8012_v45, 16  ;;  %v8092_v5 = vshll.u32 %v8012_v45, 16  ;;  %v8072_v45 = vrot.slane %v8070_v49, 5 }
 0x5a5   :  { %12276 = vmatprep.subr.bf16.mxu0 %v12719_v56  ;;  %v8061_v41 = vshrl.u32 %v8008_v31, 16  ;;  %v8064_v19 = vshll.u32 %v8008_v31, 16  ;;  %v8014_v52 = vld [vmem:[#allocation2 + $0x108] sm:$0xf] }
 0x5a6   :  { %12261 = vmatpush3.bf16.msra.mxu1 %v12711_v30  ;;  %v7803_v30 = vshll.u32 %v7730_v53, 16  ;;  %v7814_v42 = vor.u32 %v7813_v0, %v7810_v59  ;;  %v8091_v13 = vrot.slane %v8089_v61, 4  ;;  %v12729_v31 = vld [vmem:[#allocation7 + $0x1c8] sm:$0xff]   ;;  %v7845_v59 = vshll.u32 %v7736_v20, 16  ;;  %v12737_v20 = vld [vmem:[#allocation7 + $0x220] sm:$0xff]  }
 0x5a7   :  { %12294 = vmatprep.subr.bf16.mxu1 %v12714_v17  ;;  %v8063_v32 = vrot.slane %v8061_v41, 4  ;;  %v8066_v53 = vrot.slane %v8064_v19, 5  ;;  %v8103_v0 = vshrl.u32 %v8014_v52, 16 }
 0x5a8   :  { %12277 = vmatpush3.bf16.msra.mxu0 %v12719_v56  ;;  %v15828_v7 = vrot.slane %v7803_v30, 5  ;;  %v7822_v56 = vshrl.u32 %v7733_v1, 16  ;;  %v7815_v60 = vrot.slane %v7814_v42, 4  ;;  %v8015_v42 = vld [vmem:[#allocation2 + $0x10c] sm:$0x1] }
 0x5a9   :  { %12263 = vmatmul.mubr.bf16.vlgmr.msra.gmra.mxu1 %v12713_v35  ;;  %12278 = vmatprep.subr.bf16.mxu0 %v12722_v11  ;;  %v7839_v35 = vshll.u32 %v7735_v27, 16  ;;  %v8067_v27 = vor.u32 %v8066_v53, %v8063_v32  ;;  %v8105_v41 = vrot.slane %v8103_v0, 4  ;;  %v12743_v0 = vld [vmem:[#allocation7 + $0x258] sm:$0xff]  }
 0x5aa   :  { %12266 = vmatprep.mubr.bf16.mxu1 %v12716_v23  ;;  %12295 = vmatpush3.bf16.msra.mxu1 %v12714_v17  ;;  %v7791_v17 = vrot.slane %v7789_v24, 5  ;;  %v8075_v23 = vshrl.u32 %v8010_v37, 16  ;;  %v7824_v63 = vrot.slane %v7822_v56, 4  ;;  %v7806_v6 = vsel %vm13819_vm9, %v15832_v18, %v15828_v7  ;;  %v12734_v18 = vld [vmem:[#allocation7 + $0x228] sm:$0xff]  }
 0x5ab   :  { %12296 = vmatprep.subr.bf16.mxu1 %v12718_v55  ;;  %v7841_v44 = vrot.slane %v7839_v35, 5  ;;  %v8098_v7 = vshll.u32 %v8013_v3, 16  ;;  %v8068_v35 = vrot.slane %v8067_v27, 4  ;;  %v8621_v3 = vld [vmem:[#allocation2 + $0x8] sm:$0xf] }
 0x5ac   :  { %12279 = vmatpush3.bf16.msra.mxu0 %v12722_v11  ;;  %v7792_v9 = vsel %vm13819_vm9, %v7787_v47, %v7791_v17  ;;  %v8078_v11 = vshll.u32 %v8010_v37, 16  ;;  %v7828_v30 = vor.u32 %v7827_v16, %v7824_v63  ;;  %v8120_v47 = vshll.u32 %v8016_v48, 16  ;;  %v12744_v27 = vld [vmem:[#allocation7 + $0x208] sm:$0xff]  }
 0x5ad   :  { %12280 = vmatprep.subr.bf16.mxu0 %v12724_v34  ;;  %v10454_v43 = vcombine.low %v7778_v62, %v7792_v9  ;;  %v7842_v25 = vor.u32 %v7841_v44, %v7838_v22  ;;  %v8084_v37 = vshll.u32 %v8011_v4, 16  ;;  %v8100_v2 = vrot.slane %v8098_v7, 5  ;;  %v12741_v4 = vld [vmem:[#allocation7 + $0x260] sm:$0xff]  }
 0x5ae   :  { %12297 = vmatpush3.bf16.msra.mxu1 %v12718_v55  ;;  %v8049_v55 = vrot.slane %v8047_v28, 4  ;;  %v8080_v10 = vrot.slane %v8078_v11, 5  ;;  %v12732_v28 = vld [vmem:[#allocation7 + $0x230] sm:$0xff]   ;;  %v7829_v56 = vrot.slane %v7828_v30, 4  ;;  %v8122_v9 = vrot.slane %v8120_v47, 5  ;;  %v12746_v47 = vld [vmem:[#allocation7 + $0x200] sm:$0xff]  }
 0x5af   :  { %12298 = vmatprep.subr.bf16.mxu1 %v12721_v40  ;;  %v7843_v57 = vrot.slane %v7842_v25, 4  ;;  %v8112_v63 = vshll.u32 %v8015_v42, 16  ;;  %v8073_v16 = vsel %vm13819_vm9, %v8068_v35, %v8072_v45  ;;  %v12742_v30 = vld [vmem:[#allocation7 + $0x210] sm:$0xff]   ;;  %v12747_v45 = vld [vmem:[#allocation7 + $0x248] sm:$0xff]  }
 0x5b0   :  { %12281 = vmatpush3.bf16.msra.mxu0 %v12724_v34  ;;  %v7819_v34 = vrot.slane %v7817_v15, 5  ;;  %v8053_v24 = vor.u32 %v8052_v46, %v8049_v55  ;;  %v8086_v46 = vrot.slane %v8084_v37, 5  ;;  %v12745_v37 = vld [vmem:[#allocation7 + $0x250] sm:$0xff]  }
 0x5b1   :  { %12267 = vmatmul.mubr.bf16.gmra.mxu1 %v12720_v12  ;;  %12282 = vmatprep.subr.bf16.mxu0 %v12726_v21  ;;  %v8077_v12 = vrot.slane %v8075_v23, 4  ;;  %v8017_v23 = vld [vmem:[#allocation2 + $0x114] sm:$0x1] }
 0x5b2   :  { %12299 = vmatpush3.bf16.msra.mxu1 %v12721_v40  ;;  %12310 = vmatprep.mubr.bf16.mxu1 %v10465_v36  ;;  %v12730_v40 = vld [vmem:[#allocation7 + $0x238] sm:$0xff]   ;;  %v7820_v1 = vsel %vm13819_vm9, %v7815_v60, %v7819_v34  ;;  %v8106_v36 = vshll.u32 %v8014_v52, 16  ;;  %v8054_v39 = vrot.slane %v8053_v24, 4  ;;  %v12735_v52 = vld [vmem:[#allocation2 + $0x8] ss:$8 sps:$4 sm:$0xff]   ;;  %v8114_v34 = vrot.slane %v8112_v63, 5 }
 0x5b3   :  { %12300 = vmatprep.subr.bf16.mxu1 %v12723_v38  ;;  %v8081_v33 = vor.u32 %v8080_v10, %v8077_v12  ;;  %v10455_v15 = vcombine.low %v7806_v6, %v7820_v1  ;;  %v12736_v6 = vld [vmem:[#allocation7 + $0x270] sm:$0xff]  }
 0x5b4   :  { %12283 = vmatpush3.bf16.msra.mxu0 %v12726_v21  ;;  %v8117_v21 = vshrl.u32 %v8016_v48, 16  ;;  %v8108_v19 = vrot.slane %v8106_v36, 5  ;;  %v8623_v1 = vld [vmem:[#allocation2 + $0x10] sm:$0xf] }
 0x5b5   :  { %12284 = vmatprep.subr.bf16.mxu0 %v12728_v54  ;;  %v8082_v55 = vrot.slane %v8081_v33, 4  ;;  %v8652_v36 = vshrl.u32 %v8623_v1, 16 }
 0x5b6   :  { %12301 = vmatpush3.bf16.msra.mxu1 %v12723_v38  ;;  %v8094_v38 = vrot.slane %v8092_v5, 5  ;;  %v8119_v62 = vrot.slane %v8117_v21, 4  ;;  %v8059_v5 = vsel %vm13819_vm9, %v8054_v39, %v15843_v14  ;;  %v8109_v22 = vor.u32 %v8108_v19, %v8105_v41  ;;  %v12749_v39 = vld [vmem:[#allocation7 + $0x2b8] sm:$0xff]  }
 0x5b7   :  { %12302 = vmatprep.subr.bf16.mxu1 %v12725_v50  ;;  %v8087_v32 = vsel %vm13819_vm9, %v8082_v55, %v8086_v46  ;;  %v8655_v21 = vshll.u32 %v8623_v1, 16  ;;  %v12752_v55 = vld [vmem:[#allocation7 + $0x2b0] sm:$0xff]  }
 0x5b8   :  { %12285 = vmatpush3.bf16.msra.mxu0 %v12728_v54  ;;  %v8095_v17 = vor.u32 %v8094_v38, %v8091_v13  ;;  %v7847_v54 = vrot.slane %v7845_v59, 5  ;;  %v8123_v44 = vor.u32 %v8122_v9, %v8119_v62  ;;  %v8110_v48 = vrot.slane %v8109_v22, 4  ;;  %v12739_v13 = vld [vmem:[#allocation7 + $0x218] sm:$0xff]   ;;  %v12738_v38 = vld [vmem:[#allocation7 + $0x268] sm:$0xff]   ;;  %v12758_v1 = vld [vmem:[#allocation7 + $0x2f0] sm:$0xff]  }
 0x5b9   :  { %12318 = vmatprep.subr.bf16.mxu0 %v12730_v40  ;;  %v8641_v59 = vshll.u32 %v8621_v3, 16  ;;  %v8657_v7 = vrot.slane %v8655_v21, 5  ;;  %v12748_v62 = vld [vmem:[#allocation2 + $0x18] ss:$8 sps:$4 sm:$0xff]   ;;  %v12750_v9 = vld [vmem:[#allocation2 + $0x28] ss:$8 sps:$4 sm:$0xff]  }
 0x5ba   :  { %12303 = vmatpush3.bf16.msra.mxu1 %v12725_v50  ;;  %v7833_v50 = vrot.slane %v7831_v8, 5  ;;  %v7848_v61 = vsel %vm13819_vm9, %v7843_v57, %v7847_v54  ;;  %v8124_v12 = vrot.slane %v8123_v44, 4  ;;  %v8115_v24 = vsel %vm13819_vm9, %v8110_v48, %v8114_v34  ;;  %v8904_v57 = vld [vmem:[#allocation2 + $0x58] sm:$0xf] }
 0x5bb   :  { %12304 = vmatprep.subr.bf16.mxu1 %v12727_v29  ;;  %12287 = vmatmul.mubr.bf16.vlgmr.msra.gmra.mxu0 %v10454_v43  ;;  %v10466_v43 = vcombine.low %v8059_v5, %v8073_v16  ;;  %v8638_v8 = vshrl.u32 %v8621_v3, 16  ;;  %v8643_v33 = vrot.slane %v8641_v59, 5  ;;  %v8933_v41 = vshrl.u32 %v8904_v57, 16  ;;  %v8905_v5 = vld [vmem:[#allocation2 + $0x5c] sm:$0x1] }
 0x5bc   :  { %12290 = vmatprep.mubr.bf16.mxu0 %v10455_v15  ;;  %12319 = vmatpush3.bf16.msra.mxu0 %v12730_v40  ;;  %v7834_v11 = vsel %vm13819_vm9, %v7829_v56, %v7833_v50  ;;  %v8126_v40 = vshll.u32 %v8017_v23, 16  ;;  %v8902_v15 = vld [vmem:[#allocation2 + $0x50] sm:$0xf]  ;;  %v8622_v56 = vld [vmem:[#allocation2 + $0xc] sm:$0x1]  ;;  %v8936_v19 = vshll.u32 %v8904_v57, 16 }
 0x5bd   :  { %12320 = vmatprep.subr.bf16.mxu0 %v12732_v28  ;;  %v10456_v60 = vcombine.low %v7834_v11, %v7848_v61  ;;  %v8919_v54 = vshrl.u32 %v8902_v15, 16  ;;  %v8647_v42 = vshll.u32 %v8622_v56, 16  ;;  %v8625_v23 = vld [vmem:[#allocation2 + $0x18] sm:$0xf]  ;;  %v12751_v11 = vld [vmem:[#allocation7 + $0x240] sm:$0xff]   ;;  %v8935_v22 = vrot.slane %v8933_v41, 4 }
 0x5be   :  { %12305 = vmatpush3.bf16.msra.mxu1 %v12727_v29  ;;  %v8096_v29 = vrot.slane %v8095_v17, 4  ;;  %v8128_v10 = vrot.slane %v8126_v40, 5  ;;  %v8654_v17 = vrot.slane %v8652_v36, 4  ;;  %v8938_v44 = vrot.slane %v8936_v19, 5  ;;  %v8627_v40 = vld [vmem:[#allocation2 + $0x20] sm:$0xf] }
 0x5bf   :  { %12306 = vmatprep.subr.bf16.mxu1 %v12729_v31  ;;  %v8649_v16 = vrot.slane %v8647_v42, 5  ;;  %v8942_v48 = vshll.u32 %v8905_v5, 16  ;;  %v12756_v3 = vld [vmem:[#allocation2 + $0x70] ss:$8 sps:$4 sm:$0xff]   ;;  %v12761_v56 = vld [vmem:[#allocation7 + $0x2e8] sm:$0xff]  }
 0x5c0   :  { %12321 = vmatpush3.bf16.msra.mxu0 %v12732_v28  ;;  %v8101_v53 = vsel %vm13819_vm9, %v8096_v29, %v8100_v2  ;;  %v8129_v49 = vsel %vm13819_vm9, %v8124_v12, %v8128_v10  ;;  %v8640_v28 = vrot.slane %v8638_v8, 4  ;;  %v8658_v50 = vor.u32 %v8657_v7, %v8654_v17  ;;  %v8903_v2 = vld [vmem:[#allocation2 + $0x54] sm:$0x1]  ;;  %v12755_v10 = vld [vmem:[#allocation2 + $0x38] ss:$8 sps:$4 sm:$0xff]  }
 0x5c1   :  { %12322 = vmatprep.subr.bf16.mxu0 %v12734_v18  ;;  %v10467_v14 = vcombine.low %v8087_v32, %v8101_v53  ;;  %v10468_v25 = vcombine.low %v8115_v24, %v8129_v49  ;;  %v8666_v53 = vshrl.u32 %v8625_v23, 16  ;;  %v8680_v12 = vshrl.u32 %v8627_v40, 16  ;;  %v12759_v24 = vld [vmem:[#allocation7 + $0x2a0] sm:$0xff]   ;;  %v12762_v17 = vld [vmem:[#allocation7 + $0x298] sm:$0xff]   ;;  %v12764_v19 = vld [vmem:[#allocation7 + $0x290] sm:$0xff]  }
 0x5c2   :  { %12307 = vmatpush3.bf16.msra.mxu1 %v12729_v31  ;;  %v12740_v31 = vld [vmem:[#allocation2 + $0x50] ss:$8 sps:$4 sm:$0xff]   ;;  %v8644_v35 = vor.u32 %v8643_v33, %v8640_v28  ;;  %v8659_v61 = vrot.slane %v8658_v50, 4  ;;  %v8944_v59 = vrot.slane %v8942_v48, 5  ;;  %v12760_v41 = vld [vmem:[#allocation2 + $0x80] ss:$8 sps:$4 sm:$0xff]  }
 0x5c3   :  { %12308 = vmatprep.subr.bf16.mxu1 %v12731_v26  ;;  %12291 = vmatmul.mubr.bf16.gmra.mxu0 %v10456_v60  ;;  %v12757_v60 = vld [vmem:[#allocation7 + $0x2a8] sm:$0xff]   ;;  %v8668_v49 = vrot.slane %v8666_v53, 4  ;;  %v8682_v36 = vrot.slane %v8680_v12, 4  ;;  %v8631_v28 = vld [vmem:[#allocation2 + $0x30] sm:$0xf] }
 0x5c4   :  { %12323 = vmatpush3.bf16.msra.mxu0 %v12734_v18  ;;  %12334 = vmatprep.mubr.bf16.mxu0 %v12735_v52  ;;  %v8922_v18 = vshll.u32 %v8902_v15, 16  ;;  %v8645_v29 = vrot.slane %v8644_v35, 4  ;;  %v8628_v15 = vld [vmem:[#allocation2 + $0x24] sm:$0x1]  ;;  %v8708_v35 = vshrl.u32 %v8631_v28, 16  ;;  %v12766_v53 = vld [vmem:[#allocation7 + $0x288] sm:$0xff]  }
 0x5c5   :  { %12324 = vmatprep.subr.bf16.mxu0 %v12737_v20 }
 0x5c6   :  { %12309 = vmatpush3.bf16.msra.mxu1 %v12731_v26  ;;  %v8624_v26 = vld [vmem:[#allocation2 + $0x14] sm:$0x1]  ;;  %v8924_v63 = vrot.slane %v8922_v18, 5  ;;  %v8650_v52 = vsel %vm13819_vm9, %v8645_v29, %v8649_v16  ;;  %v8635_v16 = vld [vmem:[#allocation2 + $0x40] sm:$0xf] }
 0x5c7   :  { %12342 = vmatprep.subr.bf16.mxu1 %v12733_v51  ;;  %v8661_v46 = vshll.u32 %v8624_v26, 16  ;;  %v15874_v29 = vld [vmem:[#allocation2 + $0x34] sm:$0x1]  ;;  %v8736_v12 = vshrl.u32 %v8635_v16, 16 }
 0x5c8   :  { %12325 = vmatpush3.bf16.msra.mxu0 %v12737_v20  ;;  %v8669_v20 = vshll.u32 %v8625_v23, 16  ;;  %v8633_v23 = vld [vmem:[#allocation2 + $0x38] sm:$0xf] }
 0x5c9   :  { %12311 = vmatmul.mubr.bf16.vlgmr.msra.gmra.mxu1 %v10466_v43  ;;  %12326 = vmatprep.subr.bf16.mxu0 %v12739_v13  ;;  %v8663_v32 = vrot.slane %v8661_v46, 5  ;;  %v8928_v43 = vshll.u32 %v8903_v2, 16  ;;  %v8906_v46 = vld [vmem:[#allocation2 + $0x60] sm:$0xf]  ;;  %v15876_v2 = vld [vmem:[#allocation2 + $0x64] sm:$0x1] }
 0x5ca   :  { %12314 = vmatprep.mubr.bf16.mxu1 %v10467_v14  ;;  %12343 = vmatpush3.bf16.msra.mxu1 %v12733_v51  ;;  %v8921_v51 = vrot.slane %v8919_v54, 4  ;;  %v8725_v48 = vshll.u32 %v8633_v23, 16 }
 0x5cb   :  { %12344 = vmatprep.subr.bf16.mxu1 %v12736_v6  ;;  %v8664_v34 = vsel %vm13819_vm9, %v8659_v61, %v8663_v32  ;;  %v8930_v8 = vrot.slane %v8928_v43, 5  ;;  %v12763_v61 = vld [vmem:[#allocation7 + $0x2e0] sm:$0xff]   ;;  %v8950_v32 = vshll.u32 %v8906_v46, 16 }
 0x5cc   :  { %12327 = vmatpush3.bf16.msra.mxu0 %v12739_v13  ;;  %v8925_v14 = vor.u32 %v8924_v63, %v8921_v51  ;;  %v8939_v13 = vor.u32 %v8938_v44, %v8935_v22  ;;  %v8710_v51 = vrot.slane %v8708_v35, 4 }
 0x5cd   :  { %12328 = vmatprep.subr.bf16.mxu0 %v12742_v30 }
 0x5ce   :  { %12345 = vmatpush3.bf16.msra.mxu1 %v12736_v6  ;;  %v12754_v6 = vld [vmem:[#allocation7 + $0x2f8] sm:$0xff]   ;;  %v8940_v21 = vrot.slane %v8939_v13, 4 }
 0x5cf   :  { %12346 = vmatprep.subr.bf16.mxu1 %v12738_v38  ;;  %v8912_v13 = vld [vmem:[#allocation2 + $0x78] sm:$0xf] }
 0x5d0   :  { %12329 = vmatpush3.bf16.msra.mxu0 %v12742_v30  ;;  %v8671_v30 = vrot.slane %v8669_v20, 5  ;;  %v8945_v50 = vsel %vm13819_vm9, %v8940_v21, %v8944_v59  ;;  %v8992_v21 = vshll.u32 %v8912_v13, 16 }
 0x5d1   :  { %12315 = vmatmul.mubr.bf16.gmra.mxu1 %v10468_v25  ;;  %12330 = vmatprep.subr.bf16.mxu0 %v12744_v27  ;;  %v8629_v25 = vld [vmem:[#allocation2 + $0x28] sm:$0xf] }
 0x5d2   :  { %12347 = vmatpush3.bf16.msra.mxu1 %v12738_v38  ;;  %12358 = vmatprep.mubr.bf16.mxu1 %v12740_v31  ;;  %v8683_v38 = vshll.u32 %v8627_v40, 16  ;;  %v10501_v31 = vcombine.low %v8650_v52, %v8664_v34  ;;  %v8694_v33 = vshrl.u32 %v8629_v25, 16  ;;  %v8672_v7 = vor.u32 %v8671_v30, %v8668_v49  ;;  %v8908_v40 = vld [vmem:[#allocation2 + $0x68] sm:$0xf]  ;;  %v8910_v34 = vld [vmem:[#allocation2 + $0x70] sm:$0xf] }
 0x5d3   :  { %12348 = vmatprep.subr.bf16.mxu1 %v12741_v4  ;;  %v8956_v49 = vshll.u32 %v15876_v2, 16  ;;  %v8961_v30 = vshrl.u32 %v8908_v40, 16  ;;  %v8975_v59 = vshrl.u32 %v8910_v34, 16 }
 0x5d4   :  { %12331 = vmatpush3.bf16.msra.mxu0 %v12744_v27  ;;  %v8926_v27 = vrot.slane %v8925_v14, 4  ;;  %v8696_v18 = vrot.slane %v8694_v33, 4  ;;  %v8722_v14 = vshrl.u32 %v8633_v23, 16  ;;  %v8727_v33 = vrot.slane %v8725_v48, 5  ;;  %v8911_v23 = vld [vmem:[#allocation2 + $0x74] sm:$0x1] }
 0x5d5   :  { %12332 = vmatprep.subr.bf16.mxu0 %v12746_v47 }
 0x5d6   :  { %12349 = vmatpush3.bf16.msra.mxu1 %v12741_v4  ;;  %v12753_v4 = vld [vmem:[#allocation2 + $0x60] ss:$8 sps:$4 sm:$0xff]   ;;  %v8931_v57 = vsel %vm13819_vm9, %v8926_v27, %v8930_v8  ;;  %v12767_v27 = vld [vmem:[#allocation7 + $0x2d0] sm:$0xff]  }
 0x5d7   :  { %12350 = vmatprep.subr.bf16.mxu1 %v12743_v0  ;;  %v12768_v8 = vld [vmem:[#allocation7 + $0x280] sm:$0xff]  }
 0x5d8   :  { %12333 = vmatpush3.bf16.msra.mxu0 %v12746_v47  ;;  %v8685_v47 = vrot.slane %v8683_v38, 5  ;;  %v12765_v38 = vld [vmem:[#allocation7 + $0x2d8] sm:$0xff]  }
 0x5d9   :  { %12366 = vmatprep.subr.bf16.mxu0 %v12749_v39 }
 0x5da   :  { %12351 = vmatpush3.bf16.msra.mxu1 %v12743_v0  ;;  %v8626_v0 = vld [vmem:[#allocation2 + $0x1c] sm:$0x1]  ;;  %v8686_v54 = vor.u32 %v8685_v47, %v8682_v36  ;;  %v8989_v36 = vshrl.u32 %v8912_v13, 16  ;;  %v8909_v47 = vld [vmem:[#allocation2 + $0x6c] sm:$0x1] }
 0x5db   :  { %12352 = vmatprep.subr.bf16.mxu1 %v12745_v37  ;;  %12335 = vmatmul.mubr.bf16.vlgmr.msra.gmra.mxu0 %v12748_v62  ;;  %v8675_v26 = vshll.u32 %v8626_v0, 16  ;;  %v15872_v62 = vrot.slane %v8672_v7, 4  ;;  %v8978_v0 = vshll.u32 %v8910_v34, 16  ;;  %v12770_v7 = vld [vmem:[#allocation7 + $0x338] sm:$0xff]  }
 0x5dc   :  { %12338 = vmatprep.mubr.bf16.mxu0 %v12750_v9  ;;  %12367 = vmatpush3.bf16.msra.mxu0 %v12749_v39  ;;  %v8630_v39 = vld [vmem:[#allocation2 + $0x2c] sm:$0x1]  ;;  %v8689_v9 = vshll.u32 %v8628_v15, 16  ;;  %v8687_v22 = vrot.slane %v8686_v54, 4  ;;  %v8636_v54 = vld [vmem:[#allocation2 + $0x44] sm:$0x1] }
 0x5dd   :  { %12368 = vmatprep.subr.bf16.mxu0 %v12752_v55  ;;  %v8677_v5 = vrot.slane %v8675_v26, 5 }
 0x5de   :  { %12353 = vmatpush3.bf16.msra.mxu1 %v12745_v37  ;;  %v8697_v37 = vshll.u32 %v8629_v25, 16  ;;  %v8691_v52 = vrot.slane %v8689_v9, 5  ;;  %v8964_v25 = vshll.u32 %v8908_v40, 16  ;;  %v8916_v9 = vld [vmem:[#allocation2 + $0x88] sm:$0xf] }
 0x5df   :  { %12354 = vmatprep.subr.bf16.mxu1 %v12747_v45  ;;  %v8678_v20 = vsel %vm13819_vm9, %v15872_v62, %v8677_v5  ;;  %v8994_v62 = vrot.slane %v8992_v21, 5  ;;  %v9017_v40 = vshrl.u32 %v8916_v9, 16 }
 0x5e0   :  { %12369 = vmatpush3.bf16.msra.mxu0 %v12752_v55  ;;  %v8699_v42 = vrot.slane %v8697_v37, 5  ;;  %v8703_v55 = vshll.u32 %v8630_v39, 16  ;;  %v8738_v37 = vrot.slane %v8736_v12, 4  ;;  %v8963_v39 = vrot.slane %v8961_v30, 4  ;;  %v12771_v12 = vld [vmem:[#allocation7 + $0x2c0] sm:$0xff]  }
 0x5e1   :  { %12370 = vmatprep.subr.bf16.mxu0 %v12757_v60  ;;  %v8915_v30 = vld [vmem:[#allocation2 + $0x84] sm:$0x1] }
 0x5e2   :  { %12355 = vmatpush3.bf16.msra.mxu1 %v12747_v45  ;;  %v8711_v45 = vshll.u32 %v8631_v28, 16  ;;  %v8700_v44 = vor.u32 %v8699_v42, %v8696_v18  ;;  %v15881_v43 = vrot.slane %v8703_v55, 5  ;;  %v8724_v28 = vrot.slane %v8722_v14, 4  ;;  %v8914_v18 = vld [vmem:[#allocation2 + $0x80] sm:$0xf] }
 0x5e3   :  { %12356 = vmatprep.subr.bf16.mxu1 %v12751_v11  ;;  %12339 = vmatmul.mubr.bf16.gmra.mxu0 %v12755_v10  ;;  %v8739_v10 = vshll.u32 %v8635_v16, 16  ;;  %v8977_v42 = vrot.slane %v8975_v59, 4  ;;  %v8745_v16 = vshll.u32 %v8636_v54, 16 }
 0x5e4   :  { %12371 = vmatpush3.bf16.msra.mxu0 %v12757_v60  ;;  %12382 = vmatprep.mubr.bf16.mxu0 %v10501_v31  ;;  %v8713_v63 = vrot.slane %v8711_v45, 5  ;;  %v8947_v60 = vshrl.u32 %v8906_v46, 16  ;;  %v8970_v46 = vshll.u32 %v8909_v47, 16 }
 0x5e5   :  { %12372 = vmatprep.subr.bf16.mxu0 %v12759_v24 }
 0x5e6   :  { %12357 = vmatpush3.bf16.msra.mxu1 %v12751_v11  ;;  %v10513_v11 = vcombine.low %v8931_v57, %v8945_v50  ;;  %v8949_v31 = vrot.slane %v8947_v60, 4  ;;  %v8634_v57 = vld [vmem:[#allocation2 + $0x3c] sm:$0x1]  ;;  %v15890_v50 = vrot.slane %v8956_v49, 5  ;;  %v9020_v60 = vshll.u32 %v8916_v9, 16  ;;  %v12774_v49 = vld [vmem:[#allocation7 + $0x328] sm:$0xff]  }
 0x5e7   :  { %12390 = vmatprep.subr.bf16.mxu1 %v12754_v6  ;;  %v8972_v13 = vrot.slane %v8970_v46, 5  ;;  %v12778_v9 = vld [vmem:[#allocation7 + $0x368] sm:$0xff]  }
 0x5e8   :  { %12373 = vmatpush3.bf16.msra.mxu0 %v12759_v24  ;;  %v8714_v24 = vor.u32 %v8713_v63, %v8710_v51  ;;  %v8731_v63 = vshll.u32 %v8634_v57, 16 }
 0x5e9   :  { %12359 = vmatmul.mubr.bf16.vlgmr.msra.gmra.mxu1 %v12753_v4  ;;  %12374 = vmatprep.subr.bf16.mxu0 %v12762_v17  ;;  %v8692_v4 = vsel %vm13819_vm9, %v8687_v22, %v8691_v52  ;;  %v9003_v22 = vshrl.u32 %v8914_v18, 16 }
 0x5ea   :  { %12362 = vmatprep.mubr.bf16.mxu1 %v12756_v3  ;;  %12391 = vmatpush3.bf16.msra.mxu1 %v12754_v6  ;;  %v8717_v6 = vshll.u32 %v15874_v29, 16  ;;  %v8701_v3 = vrot.slane %v8700_v44, 4  ;;  %v8715_v15 = vrot.slane %v8714_v24, 4  ;;  %v10502_v26 = vcombine.low %v8678_v20, %v8692_v4 }
 0x5eb   :  { %12392 = vmatprep.subr.bf16.mxu1 %v12758_v1  ;;  %v8728_v29 = vor.u32 %v8727_v33, %v8724_v28  ;;  %v9006_v44 = vshll.u32 %v8914_v18, 16  ;;  %v8984_v20 = vshll.u32 %v8911_v23, 16  ;;  %v8747_v24 = vrot.slane %v8745_v16, 5  ;;  %v12773_v28 = vld [vmem:[#allocation7 + $0x378] sm:$0xff]   ;;  %v12781_v23 = vld [vmem:[#allocation7 + $0x360] sm:$0xff]  }
 0x5ec   :  { %12375 = vmatpush3.bf16.msra.mxu0 %v12762_v17  ;;  %v8741_v17 = vrot.slane %v8739_v10, 5  ;;  %v8706_v35 = vsel %vm13819_vm9, %v8701_v3, %v15881_v43  ;;  %v8719_v45 = vrot.slane %v8717_v6, 5  ;;  %v9019_v3 = vrot.slane %v9017_v40, 4 }
 0x5ed   :  { %12376 = vmatprep.subr.bf16.mxu0 %v12764_v19  ;;  %v8729_v14 = vrot.slane %v8728_v29, 4  ;;  %v9008_v4 = vrot.slane %v9006_v44, 5  ;;  %v9012_v33 = vshll.u32 %v8915_v30, 16  ;;  %v12782_v29 = vld [vmem:[#allocation7 + $0x310] sm:$0xff]  }
 0x5ee   :  { %12393 = vmatpush3.bf16.msra.mxu1 %v12758_v1  ;;  %v8952_v1 = vrot.slane %v8950_v32, 5  ;;  %v8742_v2 = vor.u32 %v8741_v17, %v8738_v37  ;;  %v8720_v5 = vsel %vm13819_vm9, %v8715_v15, %v8719_v45  ;;  %v12772_v32 = vld [vmem:[#allocation7 + $0x330] sm:$0xff]  }
 0x5ef   :  { %12394 = vmatprep.subr.bf16.mxu1 %v12761_v56  ;;  %v10503_v6 = vcombine.low %v8706_v35, %v8720_v5  ;;  %v12775_v35 = vld [vmem:[#allocation2 + $0x98] ss:$8 sps:$4 sm:$0xff]   ;;  %v9014_v54 = vrot.slane %v9012_v33, 5 }
 0x5f0   :  { %12377 = vmatpush3.bf16.msra.mxu0 %v12764_v19  ;;  %v8991_v19 = vrot.slane %v8989_v36, 4  ;;  %v8953_v55 = vor.u32 %v8952_v1, %v8949_v31  ;;  %v8743_v48 = vrot.slane %v8742_v2, 4  ;;  %v9022_v31 = vrot.slane %v9020_v60, 5  ;;  %v9523_v5 = vld [vmem:[#allocation2 + $0xa0] sm:$0xf] }
 0x5f1   :  { %12363 = vmatmul.mubr.bf16.gmra.mxu1 %v12760_v41  ;;  %12378 = vmatprep.subr.bf16.mxu0 %v12766_v53  ;;  %v8980_v41 = vrot.slane %v8978_v0, 5  ;;  %v8917_v0 = vld [vmem:[#allocation2 + $0x8c] sm:$0x1]  ;;  %v9552_v44 = vshrl.u32 %v9523_v5, 16  ;;  %v9555_v40 = vshll.u32 %v9523_v5, 16  ;;  %v12786_v60 = vld [vmem:[#allocation7 + $0x300] sm:$0xff]  }
 0x5f2   :  { %12395 = vmatpush3.bf16.msra.mxu1 %v12761_v56  ;;  %12406 = vmatprep.mubr.bf16.mxu1 %v10513_v11  ;;  %v8966_v56 = vrot.slane %v8964_v25, 5  ;;  %v8913_v11 = vld [vmem:[#allocation2 + $0x7c] sm:$0x1]  ;;  %v8995_v52 = vor.u32 %v8994_v62, %v8991_v19  ;;  %v8954_v34 = vrot.slane %v8953_v55, 4  ;;  %v9005_v25 = vrot.slane %v9003_v22, 4 }
 0x5f3   :  { %12396 = vmatprep.subr.bf16.mxu1 %v12763_v61  ;;  %v8998_v43 = vshll.u32 %v8913_v11, 16  ;;  %v8748_v21 = vsel %vm13819_vm9, %v8743_v48, %v8747_v24  ;;  %v9026_v15 = vshll.u32 %v8917_v0, 16  ;;  %v12779_v62 = vld [vmem:[#allocation7 + $0x318] sm:$0xff]   ;;  %v12780_v11 = vld [vmem:[#allocation2 + $0xe0] ss:$8 sps:$4 sm:$0xff]  }
 0x5f4   :  { %12379 = vmatpush3.bf16.msra.mxu0 %v12766_v53  ;;  %v8967_v51 = vor.u32 %v8966_v56, %v8963_v39  ;;  %v8981_v53 = vor.u32 %v8980_v41, %v8977_v42  ;;  %v8959_v47 = vsel %vm13819_vm9, %v8954_v34, %v15890_v50  ;;  %v9009_v17 = vor.u32 %v9008_v4, %v9005_v25  ;;  %v12776_v50 = vld [vmem:[#allocation7 + $0x370] sm:$0xff]   ;;  %v9522_v34 = vld [vmem:[#allocation2 + $0x9c] sm:$0x1]  ;;  %v9524_v48 = vld [vmem:[#allocation2 + $0xa4] sm:$0x1] }
 0x5f5   :  { %12380 = vmatprep.subr.bf16.mxu0 %v12768_v8  ;;  %v9000_v59 = vrot.slane %v8998_v43, 5  ;;  %v9028_v19 = vrot.slane %v9026_v15, 5  ;;  %v9557_v43 = vrot.slane %v9555_v40, 5  ;;  %v12788_v24 = vld [vmem:[#allocation2 + $0xa8] ss:$8 sps:$4 sm:$0xff]   ;;  %v12791_v0 = vld [vmem:[#allocation7 + $0x340] sm:$0xff]  }
 0x5f6   :  { %12397 = vmatpush3.bf16.msra.mxu1 %v12763_v61  ;;  %v12769_v61 = vld [vmem:[#allocation7 + $0x2c8] sm:$0xff]   ;;  %v8968_v10 = vrot.slane %v8967_v51, 4  ;;  %v8982_v1 = vrot.slane %v8981_v53, 4  ;;  %v9010_v42 = vrot.slane %v9009_v17, 4  ;;  %v12792_v4 = vld [vmem:[#allocation7 + $0x3b0] sm:$0xff]  }
 0x5f7   :  { %12398 = vmatprep.subr.bf16.mxu1 %v12765_v38  ;;  %v12784_v51 = vld [vmem:[#allocation7 + $0x308] sm:$0xff]   ;;  %v9528_v40 = vld [vmem:[#allocation2 + $0xb4] sm:$0x1] }
 0x5f8   :  { %12381 = vmatpush3.bf16.msra.mxu0 %v12768_v8  ;;  %v8996_v8 = vrot.slane %v8995_v52, 4  ;;  %v8973_v37 = vsel %vm13819_vm9, %v8968_v10, %v8972_v13  ;;  %v9015_v55 = vsel %vm13819_vm9, %v9010_v42, %v9014_v54  ;;  %v9554_v52 = vrot.slane %v9552_v44, 4  ;;  %v12787_v10 = vld [vmem:[#allocation7 + $0x348] sm:$0xff]   ;;  %v12798_v44 = vld [vmem:[#allocation7 + $0x3f0] sm:$0xff]  }
 0x5f9   :  { %12414 = vmatprep.subr.bf16.mxu0 %v12770_v7  ;;  %v10514_v45 = vcombine.low %v8959_v47, %v8973_v37 }
 0x5fa   :  { %12399 = vmatpush3.bf16.msra.mxu1 %v12765_v38  ;;  %v8733_v38 = vrot.slane %v8731_v63, 5  ;;  %v9001_v57 = vsel %vm13819_vm9, %v8996_v8, %v9000_v59  ;;  %v12783_v63 = vld [vmem:[#allocation7 + $0x358] sm:$0xff]  }
 0x5fb   :  { %12400 = vmatprep.subr.bf16.mxu1 %v12767_v27  ;;  %12383 = vmatmul.mubr.bf16.vlgmr.msra.gmra.mxu0 %v10502_v26  ;;  %v12777_v26 = vld [vmem:[#allocation7 + $0x320] sm:$0xff]  }
 0x5fc   :  { %12386 = vmatprep.mubr.bf16.mxu0 %v10503_v6  ;;  %12415 = vmatpush3.bf16.msra.mxu0 %v12770_v7  ;;  %v8734_v36 = vsel %vm13819_vm9, %v8729_v14, %v8733_v38  ;;  %v9023_v7 = vor.u32 %v9022_v31, %v9019_v3  ;;  %v12789_v6 = vld [vmem:[#allocation7 + $0x3b8] sm:$0xff]   ;;  %v9802_v14 = vld [vmem:[#allocation2 + $0xe0] sm:$0xf]  ;;  %v9558_v38 = vor.u32 %v9557_v43, %v9554_v52  ;;  %v9561_v3 = vshll.u32 %v9524_v48, 16 }
 0x5fd   :  { %12416 = vmatprep.subr.bf16.mxu0 %v12772_v32  ;;  %v10504_v39 = vcombine.low %v8734_v36, %v8748_v21  ;;  %v9819_v30 = vshrl.u32 %v9802_v14, 16  ;;  %v9822_v25 = vshll.u32 %v9802_v14, 16  ;;  %v12790_v8 = vld [vmem:[#allocation2 + $0xb8] ss:$8 sps:$4 sm:$0xff]   ;;  %v12797_v36 = vld [vmem:[#allocation7 + $0x3a8] sm:$0xff]  }
 0x5fe   :  { %12401 = vmatpush3.bf16.msra.mxu1 %v12767_v27  ;;  %v8986_v27 = vrot.slane %v8984_v20, 5  ;;  %v9024_v41 = vrot.slane %v9023_v7, 4  ;;  %v9559_v47 = vrot.slane %v9558_v38, 4  ;;  %v9527_v7 = vld [vmem:[#allocation2 + $0xb0] sm:$0xf] }
 0x5ff   :  { %12402 = vmatprep.subr.bf16.mxu1 %v12769_v61  ;;  %v9821_v37 = vrot.slane %v9819_v30, 4  ;;  %v9824_v17 = vrot.slane %v9822_v25, 5  ;;  %v9531_v52 = vld [vmem:[#allocation2 + $0xc0] sm:$0xf]  ;;  %v9589_v25 = vshll.u32 %v9528_v40, 16 }
 0x600   :  { %12417 = vmatpush3.bf16.msra.mxu0 %v12772_v32  ;;  %v8987_v56 = vsel %vm13819_vm9, %v8982_v1, %v8986_v27  ;;  %v9029_v46 = vsel %vm13819_vm9, %v9024_v41, %v9028_v19  ;;  %v12785_v32 = vld [vmem:[#allocation7 + $0x350] sm:$0xff]   ;;  %v9525_v27 = vld [vmem:[#allocation2 + $0xa8] sm:$0xf]  ;;  %v9580_v19 = vshrl.u32 %v9527_v7, 16 }
 0x601   :  { %12418 = vmatprep.subr.bf16.mxu0 %v12774_v49  ;;  %v10515_v18 = vcombine.low %v8987_v56, %v9001_v57  ;;  %v10516_v2 = vcombine.low %v9015_v55, %v9029_v46  ;;  %v9566_v15 = vshrl.u32 %v9525_v27, 16  ;;  %v9563_v56 = vrot.slane %v9561_v3, 5  ;;  %v9805_v57 = vld [vmem:[#allocation2 + $0xec] sm:$0x1]  ;;  %v12796_v43 = vld [vmem:[#allocation2 + $0x100] ss:$8 sps:$4 sm:$0xff]  }
 0x602   :  { %12403 = vmatpush3.bf16.msra.mxu1 %v12769_v61  ;;  %v9521_v61 = vld [vmem:[#allocation2 + $0x98] sm:$0xf]  ;;  %v9825_v55 = vor.u32 %v9824_v17, %v9821_v37  ;;  %v9608_v3 = vshrl.u32 %v9531_v52, 16 }
 0x603   :  { %12404 = vmatprep.subr.bf16.mxu1 %v12771_v12  ;;  %12387 = vmatmul.mubr.bf16.gmra.mxu0 %v10504_v39  ;;  %v9538_v16 = vshrl.u32 %v9521_v61, 16  ;;  %v9541_v22 = vshll.u32 %v9521_v61, 16  ;;  %v9564_v41 = vsel %vm13819_vm9, %v9559_v47, %v9563_v56  ;;  %v9526_v61 = vld [vmem:[#allocation2 + $0xac] sm:$0x1]  ;;  %v9532_v47 = vld [vmem:[#allocation2 + $0xc4] sm:$0x1] }
 0x604   :  { %12419 = vmatpush3.bf16.msra.mxu0 %v12774_v49  ;;  %12430 = vmatprep.mubr.bf16.mxu0 %v12775_v35  ;;  %v9547_v49 = vshll.u32 %v9522_v34, 16  ;;  %v9575_v48 = vshll.u32 %v9526_v61, 16  ;;  %v12800_v37 = vld [vmem:[#allocation2 + $0x110] ss:$8 sps:$4 sm:$0xff]  }
 0x605   :  { %12420 = vmatprep.subr.bf16.mxu0 %v12777_v26  ;;  %v9540_v53 = vrot.slane %v9538_v16, 4  ;;  %v9543_v20 = vrot.slane %v9541_v22, 5  ;;  %v12793_v16 = vld [vmem:[#allocation2 + $0xf0] ss:$8 sps:$4 sm:$0xff]  }
 0x606   :  { %12405 = vmatpush3.bf16.msra.mxu1 %v12771_v12  ;;  %v9804_v12 = vld [vmem:[#allocation2 + $0xe8] sm:$0xf]  ;;  %v9549_v33 = vrot.slane %v9547_v49, 5 }
 0x607   :  { %12438 = vmatprep.subr.bf16.mxu1 %v12773_v28  ;;  %v9544_v13 = vor.u32 %v9543_v20, %v9540_v53  ;;  %v9833_v31 = vshrl.u32 %v9804_v12, 16  ;;  %v9836_v1 = vshll.u32 %v9804_v12, 16  ;;  %v9530_v20 = vld [vmem:[#allocation2 + $0xbc] sm:$0x1] }
 0x608   :  { %12421 = vmatpush3.bf16.msra.mxu0 %v12777_v26 }
 0x609   :  { %12407 = vmatmul.mubr.bf16.vlgmr.msra.gmra.mxu1 %v10514_v45  ;;  %12422 = vmatprep.subr.bf16.mxu0 %v12779_v62  ;;  %v9545_v21 = vrot.slane %v9544_v13, 4  ;;  %v9835_v26 = vrot.slane %v9833_v31, 4  ;;  %v9838_v35 = vrot.slane %v9836_v1, 5  ;;  %v9569_v45 = vshll.u32 %v9525_v27, 16  ;;  %v12801_v27 = vld [vmem:[#allocation7 + $0x3e8] sm:$0xff]  }
 0x60a   :  { %12410 = vmatprep.mubr.bf16.mxu1 %v10515_v18  ;;  %12439 = vmatpush3.bf16.msra.mxu1 %v12773_v28  ;;  %v9803_v28 = vld [vmem:[#allocation2 + $0xe4] sm:$0x1]  ;;  %v12794_v18 = vld [vmem:[#allocation7 + $0x3f8] sm:$0xff]  }
 0x60b   :  { %12440 = vmatprep.subr.bf16.mxu1 %v12776_v50  ;;  %v9550_v42 = vsel %vm13819_vm9, %v9545_v21, %v9549_v33  ;;  %v9828_v46 = vshll.u32 %v9803_v28, 16  ;;  %v9571_v5 = vrot.slane %v9569_v45, 5  ;;  %v9806_v28 = vld [vmem:[#allocation2 + $0xf0] sm:$0xf]  ;;  %v15942_v45 = vrot.slane %v9589_v25, 5  ;;  %v12808_v25 = vld [vmem:[#allocation7 + $0x380] sm:$0xff]  }
 0x60c   :  { %12423 = vmatpush3.bf16.msra.mxu0 %v12779_v62  ;;  %v9583_v62 = vshll.u32 %v9527_v7, 16  ;;  %v10549_v22 = vcombine.low %v9550_v42, %v9564_v41  ;;  %v15946_v42 = vld [vmem:[#allocation2 + $0xf8] sm:$0xf] }
 0x60d   :  { %12424 = vmatprep.subr.bf16.mxu0 %v12782_v29  ;;  %v9830_v34 = vrot.slane %v9828_v46, 5  ;;  %v9847_v46 = vshrl.u32 %v9806_v28, 16 }
 0x60e   :  { %12441 = vmatpush3.bf16.msra.mxu1 %v12776_v50  ;;  %v9529_v50 = vld [vmem:[#allocation2 + $0xb8] sm:$0xf]  ;;  %v9585_v53 = vrot.slane %v9583_v62, 5 }
 0x60f   :  { %12442 = vmatprep.subr.bf16.mxu1 %v12778_v9 }
 0x610   :  { %12425 = vmatpush3.bf16.msra.mxu0 %v12782_v29  ;;  %v9842_v29 = vshll.u32 %v9805_v57, 16  ;;  %v9533_v57 = vld [vmem:[#allocation2 + $0xc8] sm:$0xf] }
 0x611   :  { %12411 = vmatmul.mubr.bf16.gmra.mxu1 %v10516_v2  ;;  %12426 = vmatprep.subr.bf16.mxu0 %v12784_v51  ;;  %v9568_v2 = vrot.slane %v9566_v15, 4  ;;  %v15935_v15 = vrot.slane %v9575_v48, 5 }
 0x612   :  { %12443 = vmatpush3.bf16.msra.mxu1 %v12778_v9  ;;  %12454 = vmatprep.mubr.bf16.mxu1 %v12780_v11  ;;  %v12795_v9 = vld [vmem:[#allocation2 + $0xc8] ss:$8 sps:$4 sm:$0xff]   ;;  %v9839_v11 = vor.u32 %v9838_v35, %v9835_v26  ;;  %v9844_v14 = vrot.slane %v9842_v29, 5  ;;  %v12803_v35 = vld [vmem:[#allocation7 + $0x3e0] sm:$0xff]  }
 0x613   :  { %12444 = vmatprep.subr.bf16.mxu1 %v12781_v23  ;;  %v9572_v38 = vor.u32 %v9571_v5, %v9568_v2  ;;  %v9535_v29 = vld [vmem:[#allocation2 + $0xd0] sm:$0xf]  ;;  %v12806_v5 = vld [vmem:[#allocation7 + $0x388] sm:$0xff]  }
 0x614   :  { %12427 = vmatpush3.bf16.msra.mxu0 %v12784_v51  ;;  %v9594_v51 = vshrl.u32 %v9529_v50, 16  ;;  %v9840_v13 = vrot.slane %v9839_v11, 4  ;;  %v9622_v11 = vshrl.u32 %v9533_v57, 16 }
 0x615   :  { %12428 = vmatprep.subr.bf16.mxu0 %v12786_v60  ;;  %v15933_v7 = vrot.slane %v9572_v38, 4  ;;  %v9864_v38 = vshll.u32 %v15946_v42, 16 }
 0x616   :  { %12445 = vmatpush3.bf16.msra.mxu1 %v12781_v23  ;;  %v12799_v23 = vld [vmem:[#allocation7 + $0x3a0] sm:$0xff]   ;;  %v9845_v17 = vsel %vm13819_vm9, %v9840_v13, %v9844_v14 }
 0x617   :  { %12446 = vmatprep.subr.bf16.mxu1 %v12783_v63 }
 0x618   :  { %12429 = vmatpush3.bf16.msra.mxu0 %v12786_v60 }
 0x619   :  { %12462 = vmatprep.subr.bf16.mxu0 %v12789_v6 }
 0x61a   :  { %12447 = vmatpush3.bf16.msra.mxu1 %v12783_v63  ;;  %v9597_v63 = vshll.u32 %v9529_v50, 16 }
 0x61b   :  { %12448 = vmatprep.subr.bf16.mxu1 %v12785_v32  ;;  %12431 = vmatmul.mubr.bf16.vlgmr.msra.gmra.mxu0 %v12788_v24  ;;  %v15911_v59 = vpop.f32.mrf.mxu0  ;;  %v9596_v24 = vrot.slane %v9594_v51, 4  ;;  %v9578_v51 = vsel %vm13819_vm9, %v15933_v7, %v15935_v15 }
 0x61c   :  { %12434 = vmatprep.mubr.bf16.mxu0 %v12790_v8  ;;  %12463 = vmatpush3.bf16.msra.mxu0 %v12789_v6  ;;  %v9826_v6 = vrot.slane %v9825_v55, 4  ;;  %v9599_v49 = vrot.slane %v9597_v63, 5  ;;  %v9617_v55 = vshll.u32 %v9532_v47, 16 }
 0x61d   :  { %v15913_v39 = vpop.f32.mrf.mxu0  ;;  %12464 = vmatprep.subr.bf16.mxu0 %v12792_v4 }
 0x61e   :  { %12449 = vmatpush3.bf16.msra.mxu1 %v12785_v32  ;;  %v9582_v32 = vrot.slane %v9580_v19, 4  ;;  %v9831_v21 = vsel %vm13819_vm9, %v9826_v6, %v9830_v34  ;;  %v9600_v56 = vor.u32 %v9599_v49, %v9596_v24  ;;  %v12805_v6 = vld [vmem:[#allocation7 + $0x3d8] sm:$0xff]   ;;  %v15964_v48 = vrot.slane %v9617_v55, 5 }
 0x61f   :  { %12450 = vmatprep.subr.bf16.mxu1 %v12787_v10  ;;  %v15915_v54 = vpop.f32.mrf.mxu0  ;;  %v10561_v2 = vcombine.low %v9831_v21, %v9845_v17  ;;  %v9624_v24 = vrot.slane %v9622_v11, 4  ;;  %v9816_v55 = vld [vmem:[#allocation2 + $0x118] sm:$0xf]  ;;  %v9811_v11 = vld [vmem:[#allocation2 + $0x104] sm:$0x1] }
 0x620   :  { %12465 = vmatpush3.bf16.msra.mxu0 %v12792_v4  ;;  %v9603_v4 = vshll.u32 %v9530_v20, 16  ;;  %v9586_v8 = vor.u32 %v9585_v53, %v9582_v32  ;;  %v15955_v63 = vrot.slane %v9600_v56, 4  ;;  %v9636_v32 = vshrl.u32 %v9535_v29, 16  ;;  %v9812_v20 = vld [vmem:[#allocation2 + $0x108] sm:$0xf] }
 0x621   :  { %12466 = vmatprep.subr.bf16.mxu0 %v12797_v36  ;;  %v15921_v60 = vpop.f32.mrf.mxu0  ;;  %v9639_v53 = vshll.u32 %v9535_v29, 16  ;;  %v9536_v56 = vld [vmem:[#allocation2 + $0xd4] sm:$0x1] }
 0x622   :  { %12451 = vmatpush3.bf16.msra.mxu1 %v12787_v10  ;;  %v12802_v10 = vld [vmem:[#allocation7 + $0x398] sm:$0xff]   ;;  %v15944_v50 = vrot.slane %v9603_v4, 5  ;;  %v9587_v62 = vrot.slane %v9586_v8, 4  ;;  %v9638_v21 = vrot.slane %v9636_v32, 4  ;;  %v9920_v32 = vshll.u32 %v9816_v55, 16 }
 0x623   :  { %12452 = vmatprep.subr.bf16.mxu1 %v12791_v0  ;;  %12435 = vmatmul.mubr.bf16.gmra.mxu0 %v12795_v9  ;;  %v9809_v8 = vld [vmem:[#allocation2 + $0xfc] sm:$0x1]  ;;  %v9641_v47 = vrot.slane %v9639_v53, 5 }
 0x624   :  { %12467 = vmatpush3.bf16.msra.mxu0 %v12797_v36  ;;  %12478 = vmatprep.mubr.bf16.mxu0 %v10549_v22  ;;  %v9861_v22 = vshrl.u32 %v15946_v42, 16  ;;  %v9592_v34 = vsel %vm13819_vm9, %v9587_v62, %v15942_v45  ;;  %v9866_v45 = vrot.slane %v9864_v38, 5  ;;  %v9814_v42 = vld [vmem:[#allocation2 + $0x110] sm:$0xf] }
 0x625   :  { %12468 = vmatprep.subr.bf16.mxu0 %v12799_v23 }
 0x626   :  { %12453 = vmatpush3.bf16.msra.mxu1 %v12791_v0  ;;  %v12148_v31 = vpop.f32.mrf.mxu0  ;;  %v9611_v0 = vshll.u32 %v9531_v52, 16  ;;  %v9863_v15 = vrot.slane %v9861_v22, 4 }
 0x627   :  { %12486 = vmatprep.subr.bf16.mxu1 %v12794_v18 }
 0x628   :  { %v12168_v12 = vpop.f32.mrf.mxu1  ;;  %12469 = vmatpush3.bf16.msra.mxu0 %v12799_v23  ;;  %v6669_v41 = vpop.f32.mrf.mxu0  ;;  %v9613_v9 = vrot.slane %v9611_v0, 5  ;;  %v9850_v23 = vshll.u32 %v9806_v28, 16 }
 0x629   :  { %12455 = vmatmul.mubr.bf16.vlgmr.msra.gmra.mxu1 %v12793_v16  ;;  %v15924_v30 = vadd.f32 %v12168_v12, %v15911_v59  ;;  %v12804_v59 = vld [vmem:[#allocation7 + $0x390] sm:$0xff]   ;;  %12470 = vmatprep.subr.bf16.mxu0 %v12802_v10  ;;  %v9849_v12 = vrot.slane %v9847_v46, 4  ;;  %v9870_v46 = vshll.u32 %v9809_v8, 16  ;;  %v9922_v8 = vrot.slane %v9920_v32, 5 }
 0x62a   :  { %12458 = vmatprep.mubr.bf16.mxu1 %v12796_v43  ;;  %12487 = vmatpush3.bf16.msra.mxu1 %v12794_v18  ;;  %v6790_v1 = vpop.f32.mrf.mxu1  ;;  %v9610_v18 = vrot.slane %v9608_v3, 4  ;;  %v12149_v52 = vpop.f32.mrf.mxu0  ;;  %v9852_v13 = vrot.slane %v9850_v23, 5  ;;  %v9645_v23 = vshll.u32 %v9536_v56, 16 }
 0x62b   :  { %12488 = vmatprep.subr.bf16.mxu1 %v12798_v44  ;;  %v15927_v36 = vadd.f32 %v6790_v1, %v15913_v39  ;;  %v15937_v39 = vld [vmem:[#allocation2 + $0xf4] sm:$0x1]  ;;  %v9892_v1 = vshll.u32 %v9812_v20, 16  ;;  %v9872_v38 = vrot.slane %v9870_v46, 5 }
 0x62c   :  { %v12169_v33 = vpop.f32.mrf.mxu1  ;;  %12471 = vmatpush3.bf16.msra.mxu0 %v12802_v10  ;;  %v9856_v16 = vshll.u32 %v15937_v39, 16  ;;  %v9614_v14 = vor.u32 %v9613_v9, %v9610_v18  ;;  %v6672_v28 = vpop.f32.mrf.mxu0  ;;  %v9534_v18 = vld [vmem:[#allocation2 + $0xcc] sm:$0x1] }
 0x62d   :  { %v15940_v26 = vadd.f32 %v12169_v33, %v15915_v54  ;;  %12472 = vmatprep.subr.bf16.mxu0 %v12804_v59  ;;  %v12807_v33 = vld [vmem:[#allocation7 + $0x3d0] sm:$0xff]   ;;  %v9894_v9 = vrot.slane %v9892_v1, 5 }
 0x62e   :  { %12489 = vmatpush3.bf16.msra.mxu1 %v12798_v44  ;;  %v6793_v19 = vpop.f32.mrf.mxu1  ;;  %v9810_v44 = vld [vmem:[#allocation2 + $0x100] sm:$0xf]  ;;  %v9615_v17 = vrot.slane %v9614_v14, 4  ;;  %v15971_v7 = vrot.slane %v9856_v16, 5  ;;  %v9906_v16 = vshll.u32 %v9814_v42, 16 }
 0x62f   :  { %12490 = vmatprep.subr.bf16.mxu1 %v12801_v27  ;;  %v15949_v54 = vadd.f32 %v6793_v19, %v15921_v60  ;;  %v9625_v60 = vshll.u32 %v9533_v57, 16  ;;  %v9875_v4 = vshrl.u32 %v9810_v44, 16  ;;  %v9878_v3 = vshll.u32 %v9810_v44, 16 }
 0x630   :  { %v12172_v61 = vpop.f32.mrf.mxu1  ;;  %12473 = vmatpush3.bf16.msra.mxu0 %v12804_v59  ;;  %v9606_v57 = vsel %vm13819_vm9, %v15955_v63, %v15944_v50  ;;  %v9620_v50 = vsel %vm13819_vm9, %v9615_v17, %v15964_v48  ;;  %v9903_v63 = vshrl.u32 %v9814_v42, 16  ;;  %v9867_v44 = vor.u32 %v9866_v45, %v9863_v15  ;;  %v12810_v48 = vld [vmem:[#allocation7 + $0x3c0] sm:$0xff]  }
 0x631   :  { %12459 = vmatmul.mubr.bf16.gmra.mxu1 %v12800_v37  ;;  %v15959_v40 = vadd.f32 %v12172_v61, %v12148_v31  ;;  %12474 = vmatprep.subr.bf16.mxu0 %v12806_v5  ;;  %v9889_v31 = vshrl.u32 %v9812_v20, 16  ;;  %v9627_v0 = vrot.slane %v9625_v60, 5  ;;  %v10550_v37 = vcombine.low %v9578_v51, %v9592_v34  ;;  %v9813_v61 = vld [vmem:[#allocation2 + $0x10c] sm:$0x1] }
 0x632   :  { %12491 = vmatpush3.bf16.msra.mxu1 %v12801_v27  ;;  %12502 = vmatprep.mubr.bf16.mxu1 %v10561_v2  ;;  %v6806_v43 = vpop.f32.mrf.mxu1  ;;  %v9880_v19 = vrot.slane %v9878_v3, 5  ;;  %v9642_v2 = vor.u32 %v9641_v47, %v9638_v21  ;;  %v9631_v51 = vshll.u32 %v9534_v18, 16  ;;  %v9917_v60 = vshrl.u32 %v9816_v55, 16 }
 0x633   :  { %12492 = vmatprep.subr.bf16.mxu1 %v12803_v35  ;;  %v15966_v10 = vadd.f32 %v6806_v43, %v6669_v41  ;;  %v9877_v41 = vrot.slane %v9875_v4, 4  ;;  %v9891_v62 = vrot.slane %v9889_v31, 4  ;;  %v9628_v29 = vor.u32 %v9627_v0, %v9624_v24  ;;  %v9815_v31 = vld [vmem:[#allocation2 + $0x114] sm:$0x1] }
 0x634   :  { %v12173_v49 = vpop.f32.mrf.mxu1  ;;  %12475 = vmatpush3.bf16.msra.mxu0 %v12806_v5  ;;  %v12809_v5 = vld [vmem:[#allocation7 + $0x3c8] sm:$0xff]   ;;  %v9884_v20 = vshll.u32 %v9811_v11, 16  ;;  %v9898_v43 = vshll.u32 %v9813_v61, 16  ;;  %v9643_v14 = vrot.slane %v9642_v2, 4  ;;  %v9633_v24 = vrot.slane %v9631_v51, 5 }
 0x635   :  { %v15969_v27 = vadd.f32 %v12173_v49, %v12149_v52  ;;  %12476 = vmatprep.subr.bf16.mxu0 %v12808_v25  ;;  %v9881_v53 = vor.u32 %v9880_v19, %v9877_v41  ;;  %v9895_v52 = vor.u32 %v9894_v9, %v9891_v62  ;;  %v9629_v34 = vrot.slane %v9628_v29, 4 }
 0x636   :  { %12493 = vmatpush3.bf16.msra.mxu1 %v12803_v35  ;;  %v6809_v59 = vpop.f32.mrf.mxu1  ;;  %v9853_v35 = vor.u32 %v9852_v13, %v9849_v12  ;;  %v9647_v12 = vrot.slane %v9645_v23, 5  ;;  %v9905_v49 = vrot.slane %v9903_v63, 4  ;;  %v9868_v3 = vrot.slane %v9867_v44, 4 }
 0x637   :  { %12494 = vmatprep.subr.bf16.mxu1 %v12805_v6  ;;  %v15973_v39 = vadd.f32 %v6809_v59, %v6672_v28  ;;  %v9919_v1 = vrot.slane %v9917_v60, 4  ;;  %v9882_v21 = vrot.slane %v9881_v53, 4  ;;  %v9886_v47 = vrot.slane %v9884_v20, 5 }
 0x638   :  { %12477 = vmatpush3.bf16.msra.mxu0 %v12808_v25  ;;  %v9854_v22 = vrot.slane %v9853_v35, 4  ;;  %v9908_v25 = vrot.slane %v9906_v16, 5  ;;  %v9896_v28 = vrot.slane %v9895_v52, 4  ;;  %v9900_v59 = vrot.slane %v9898_v43, 5 }
 0x639   :  { %v9634_v17 = vsel %vm13819_vm9, %v9629_v34, %v9633_v24  ;;  %v9912_v35 = vshll.u32 %v9815_v31, 16  ;;  %v9873_v18 = vsel %vm13819_vm9, %v9868_v3, %v9872_v38  ;;  %v9887_v62 = vsel %vm13819_vm9, %v9882_v21, %v9886_v47 }
 0x63a   :  { %12495 = vmatpush3.bf16.msra.mxu1 %v12805_v6  ;;  %v10551_v6 = vcombine.low %v9606_v57, %v9620_v50  ;;  %v9859_v56 = vsel %vm13819_vm9, %v9854_v22, %v15971_v7  ;;  %v9909_v57 = vor.u32 %v9908_v25, %v9905_v49  ;;  %v9901_v9 = vsel %vm13819_vm9, %v9896_v28, %v9900_v59 }
 0x63b   :  { %12496 = vmatprep.subr.bf16.mxu1 %v12807_v33  ;;  %v12192_v13 = vpop.f32.mrf.mxu0  ;;  %12479 = vmatmul.mubr.bf16.vlgmr.msra.gmra.mxu0 %v10550_v37  ;;  %v10562_v55 = vcombine.low %v9859_v56, %v9873_v18  ;;  %v9914_v29 = vrot.slane %v9912_v35, 5  ;;  %v10563_v23 = vcombine.low %v9887_v62, %v9901_v9 }
 0x63c   :  { %v7096_v4 = vadd.f32 %v12192_v13, %v15924_v30  ;;  %12482 = vmatprep.mubr.bf16.mxu0 %v10551_v6  ;;  %v9648_v30 = vsel %vm13819_vm9, %v9643_v14, %v9647_v12 }
 0x63d   :  { %v7063_v0 = vpop.f32.mrf.mxu0  ;;  %v10552_v19 = vcombine.low %v9634_v17, %v9648_v30 }
 0x63e   :  { %12497 = vmatpush3.bf16.msra.mxu1 %v12807_v33  ;;  %v9817_v33 = vld [vmem:[#allocation2 + $0x11c] sm:$0x1]  ;;  %v7094_v37 = vadd.f32 %v7063_v0, %v15927_v36  ;;  %v9923_v36 = vor.u32 %v9922_v8, %v9919_v1 }
 0x63f   :  { %12498 = vmatprep.subr.bf16.mxu1 %v12809_v5  ;;  %v12193_v15 = vpop.f32.mrf.mxu0  ;;  %v9926_v42 = vshll.u32 %v9817_v33, 16 }
 0x640   :  { %v7097_v45 = vadd.f32 %v12193_v15, %v15940_v26  ;;  %v9910_v26 = vrot.slane %v9909_v57, 4  ;;  %v9924_v11 = vrot.slane %v9923_v36, 4 }
 0x641   :  { %v7066_v41 = vpop.f32.mrf.mxu0  ;;  %v9928_v61 = vrot.slane %v9926_v42, 5 }
 0x642   :  { %12499 = vmatpush3.bf16.msra.mxu1 %v12809_v5  ;;  %v7095_v7 = vadd.f32 %v7066_v41, %v15949_v54 }
 0x643   :  { %12500 = vmatprep.subr.bf16.mxu1 %v12810_v48  ;;  %12483 = vmatmul.mubr.bf16.gmra.mxu0 %v10552_v19  ;;  %v9929_v60 = vsel %vm13819_vm9, %v9924_v11, %v9928_v61 }
 0x645   :  { %v12196_v46 = vpop.f32.mrf.mxu0 }
 0x646   :  { %12501 = vmatpush3.bf16.msra.mxu1 %v12810_v48  ;;  %v7100_v2 = vadd.f32 %v12196_v46, %v15959_v40  ;;  %v9915_v40 = vsel %vm13819_vm9, %v9910_v26, %v9914_v29 }
 0x647   :  { %v7079_v50 = vpop.f32.mrf.mxu0 }
 0x648   :  { %v7098_v63 = vadd.f32 %v7079_v50, %v15966_v10  ;;  %v10564_v10 = vcombine.low %v9915_v40, %v9929_v60 }
 0x649   :  { %v12216_v5 = vpop.f32.mrf.mxu1  ;;  %12503 = vmatmul.mubr.bf16.vlgmr.msra.gmra.mxu1 %v10562_v55  ;;  %v12197_v54 = vpop.f32.mrf.mxu0 }
 0x64a   :  { %v16000_v51 = vadd.f32 %v12216_v5, %v7096_v4  ;;  %12506 = vmatprep.mubr.bf16.mxu1 %v10563_v23  ;;  %v7101_v44 = vadd.f32 %v12197_v54, %v15969_v27 }
 0x64b   :  { %v7344_v16 = vpop.f32.mrf.mxu1  ;;  %v7082_v53 = vpop.f32.mrf.mxu0 }
 0x64c   :  { %v16003_v22 = vadd.f32 %v7344_v16, %v7094_v37  ;;  %v7099_v52 = vadd.f32 %v7082_v53, %v15973_v39 }
 0x64d   :  { %v12217_v32 = vpop.f32.mrf.mxu1 }
 0x64e   :  { %v16010_v20 = vadd.f32 %v12217_v32, %v7097_v45 }
 0x64f   :  { %v7347_v43 = vpop.f32.mrf.mxu1 }
 0x650   :  { %v16013_v6 = vadd.f32 %v7347_v43, %v7095_v7 }
 0x651   :  { %v12220_v34 = vpop.f32.mrf.mxu1  ;;  %12507 = vmatmul.mubr.bf16.gmra.mxu1 %v10564_v10 }
 0x652   :  { %v16015_v14 = vadd.f32 %v12220_v34, %v7100_v2 }
 0x653   :  { %v7360_v27 = vpop.f32.mrf.mxu1 }
 0x654   :  { %v16017_v12 = vadd.f32 %v7360_v27, %v7098_v63 }
 0x655   :  { %v12221_v13 = vpop.f32.mrf.mxu1 }
 0x656   :  { %v16019_v58 = vadd.f32 %v12221_v13, %v7101_v44 }
 0x657   :  { %v7363_v48 = vpop.f32.mrf.mxu1 }
 0x658   :  { %v16021_v38 = vadd.f32 %v7363_v48, %v7099_v52 }
 0x65b   :  { %v16023_v24 = vpop.f32.mrf.mxu0 }
 0x65d   :  { %v16025_v39 = vpop.f32.mrf.mxu0 }
 0x65f   :  { %v16027_v49 = vpop.f32.mrf.mxu0 }
 0x661   :  { %v16031_v4 = vpop.f32.mrf.mxu0 }
 0x663   :  { %v16035_v31 = vpop.f32.mrf.mxu0 }
 0x665   :  { %v16039_v8 = vpop.f32.mrf.mxu0 }
 0x667   :  { %v16043_v21 = vpop.f32.mrf.mxu0 }
 0x669   :  { %v16029_v25 = vpop.f32.mrf.mxu1  ;;  %v16047_v28 = vpop.f32.mrf.mxu0 }
 0x66b   :  { %v16033_v3 = vpop.f32.mrf.mxu1 }
 0x66d   :  { %v16037_v1 = vpop.f32.mrf.mxu1 }
 0x66f   :  { %v16041_v0 = vpop.f32.mrf.mxu1 }
 0x671   :  { %v16045_v47 = vpop.f32.mrf.mxu1 }
 0x673   :  { %v16049_v59 = vpop.f32.mrf.mxu1 }
 0x675   :  { %v16053_v37 = vpop.f32.mrf.mxu1 }
 0x677   :  { %v16057_v30 = vpop.f32.mrf.mxu1 }
 0x67b   :  { %v16051_v33 = vpop.f32.mrf.mxu0 }
 0x67d   :  { %v16055_v17 = vpop.f32.mrf.mxu0 }
 0x67f   :  { %v16059_v15 = vpop.f32.mrf.mxu0 }
 0x681   :  { %v16063_v57 = vpop.f32.mrf.mxu0 }
 0x683   :  { %v16067_v45 = vpop.f32.mrf.mxu0 }
 0x685   :  { %v16071_v36 = vpop.f32.mrf.mxu0 }
 0x687   :  { %v16075_v41 = vpop.f32.mrf.mxu0 }
 0x689   :  { %v16061_v56 = vpop.f32.mrf.mxu1 }
 0x68b   :  { %v16065_v35 = vpop.f32.mrf.mxu1 }
 0x68d   :  { %v16069_v18 = vpop.f32.mrf.mxu1 }
 0x68f   :  { %v16073_v42 = vpop.f32.mrf.mxu1 }
 0x690   :  { %13000 = shalt.err (!%p12997_p0)
}
 0x691   :  { %s13043_s12 = smov 128   ;;  %s13044_s2 = smov 8   ;;  %v16083_v19 = vpop.f32.mrf.mxu1  ;;  %v16085_v62 = vpop.f32.mrf.mxu0 }
 0x692   :  { %10117 = dma.vmem_to_hbm [thread:$0]  %s10112_s10, 4096, %s16280_s6, [#allocation6], %s13043_s12, %s13043_s12, %s13044_s2  }
 0x693   :  { %v16087_v9 = vpop.f32.mrf.mxu1 }
 0x695   :  { %v16089_v55 = vpop.f32.mrf.mxu1 }
 0x697   :  { %v16093_v26 = vpop.f32.mrf.mxu1 }
 0x698   :  { %16583 = vst [vmem:[#allocation57_spill] sm:$0xff] %v16093_v26 }
 0x69b   :  { %v12336_v7 = vpop.f32.mrf.mxu0 }
 0x69d   :  { %v16091_v46 = vpop.f32.mrf.mxu0 }
 0x69f   :  { %v16095_v29 = vpop.f32.mrf.mxu0 }
 0x6a1   :  { %v16097_v23 = vpop.f32.mrf.mxu0 }
 0x6a3   :  { %v16101_v61 = vpop.f32.mrf.mxu0 }
 0x6a5   :  { %v16105_v50 = vpop.f32.mrf.mxu0 }
 0x6a6   :  { %16584 = vst [vmem:[#allocation66_spill] sm:$0xff] %v16105_v50 }
 0x6a7   :  { %v16109_v16 = vpop.f32.mrf.mxu0 }
 0x6a8   :  { %16585 = vst [vmem:[#allocation68_spill] sm:$0xff] %v16109_v16 }
 0x6a9   :  { %v12360_v2 = vpop.f32.mrf.mxu1  ;;  %v16113_v44 = vpop.f32.mrf.mxu0 }
 0x6aa   :  { %16587 = vst [vmem:[#allocation94_spill] sm:$0xff] %v16113_v44 }
 0x6ab   :  { %v16099_v11 = vpop.f32.mrf.mxu1 }
 0x6ad   :  { %v16103_v5 = vpop.f32.mrf.mxu1 }
 0x6af   :  { %v16107_v63 = vpop.f32.mrf.mxu1 }
 0x6b1   :  { %v16111_v54 = vpop.f32.mrf.mxu1 }
 0x6b2   :  { %16586 = vst [vmem:[#allocation93_spill] sm:$0xff] %v16111_v54 }
 0x6b3   :  { %v16115_v40 = vpop.f32.mrf.mxu1 }
 0x6b4   :  { %16588 = vst [vmem:[#allocation59_spill] sm:$0xff] %v16115_v40 }
 0x6b5   :  { %v16117_v32 = vpop.f32.mrf.mxu1 }
 0x6b6   :  { %16589 = vst [vmem:[#allocation74_spill] sm:$0xff] %v16117_v32 }
 0x6b7   :  { %v16121_v52 = vpop.f32.mrf.mxu1 }
 0x6b8   :  { %16590 = vst [vmem:[#allocation80_spill] sm:$0xff] %v16121_v52 }
 0x6bb   :  { %v12384_v60 = vpop.f32.mrf.mxu0 }
 0x6bd   :  { %v16119_v53 = vpop.f32.mrf.mxu0 }
 0x6bf   :  { %v16123_v43 = vpop.f32.mrf.mxu0 }
 0x6c1   :  { %v16127_v34 = vpop.f32.mrf.mxu0 }
 0x6c2   :  { %16591 = vst [vmem:[#allocation69_spill] sm:$0xff] %v16127_v34 }
 0x6c3   :  { %v16131_v13 = vpop.f32.mrf.mxu0 }
 0x6c4   :  { %16592 = vst [vmem:[#allocation17_spill] sm:$0xff] %v16131_v13 }
 0x6c5   :  { %v16135_v44 = vpop.f32.mrf.mxu0 }
 0x6c6   :  { %16594 = vst [vmem:[#allocation19_spill] sm:$0xff] %v16135_v44 }
 0x6c7   :  { %v16139_v32 = vpop.f32.mrf.mxu0 }
 0x6c8   :  { %16596 = vst [vmem:[#allocation21_spill] sm:$0xff] %v16139_v32 }
 0x6c9   :  { %v16125_v10 = vpop.f32.mrf.mxu1  ;;  %v16143_v52 = vpop.f32.mrf.mxu0 }
 0x6ca   :  { %16598 = vst [vmem:[#allocation23_spill] sm:$0xff] %v16143_v52 }
 0x6cb   :  { %v16129_v27 = vpop.f32.mrf.mxu1 }
 0x6cd   :  { %v16133_v48 = vpop.f32.mrf.mxu1 }
 0x6ce   :  { %16593 = vst [vmem:[#allocation18_spill] sm:$0xff] %v16133_v48 }
 0x6cf   :  { %v16137_v40 = vpop.f32.mrf.mxu1 }
 0x6d0   :  { %16595 = vst [vmem:[#allocation20_spill] sm:$0xff] %v16137_v40 }
 0x6d1   :  { %v16141_v16 = vpop.f32.mrf.mxu1 }
 0x6d2   :  { %16597 = vst [vmem:[#allocation22_spill] sm:$0xff] %v16141_v16 }
 0x6d3   :  { %v16145_v26 = vpop.f32.mrf.mxu1 }
 0x6d4   :  { %16599 = vst [vmem:[#allocation24_spill] sm:$0xff] %v16145_v26  ;;  %v7546_v26 = vadd.f32 %v16023_v24, %v16000_v51  ;;  %v7545_v51 = vadd.f32 %v16031_v4, %v16013_v6  ;;  %v7548_v6 = vadd.f32 %v16039_v8, %v16017_v12 }
 0x6d5   :  { %v16149_v34 = vpop.f32.mrf.mxu1 }
 0x6d6   :  { %16600 = vst [vmem:[#allocation25_spill] sm:$0xff] %v16149_v34 }
 0x6d7   :  { %v16153_v13 = vpop.f32.mrf.mxu1 }
 0x6d8   :  { %16602 = vst [vmem:[#allocation27_spill] sm:$0xff] %v16153_v13  ;;  %v7544_v13 = vadd.f32 %v16025_v39, %v16003_v22 }
 0x6db   :  { %v16147_v54 = vpop.f32.mrf.mxu0 }
 0x6dd   :  { %v16151_v50 = vpop.f32.mrf.mxu0 }
 0x6de   :  { %16601 = vst [vmem:[#allocation26_spill] sm:$0xff] %v16151_v50 }
 0x6df   :  { %v16155_v48 = vpop.f32.mrf.mxu0 }
 0x6e0   :  { %16603 = vst [vmem:[#allocation28_spill] sm:$0xff] %v16155_v48  ;;  %v7715_v48 = vadd.f32 %v16029_v25, %v7546_v26  ;;  %v7550_v25 = vadd.f32 %v16035_v31, %v16015_v14 }
 0x6e1   :  { %v16159_v40 = vpop.f32.mrf.mxu0 }
 0x6e2   :  { %16604 = vst [vmem:[#allocation29_spill] sm:$0xff] %v16159_v40  ;;  %v7547_v40 = vadd.f32 %v16027_v49, %v16010_v20  ;;  %v7714_v20 = vadd.f32 %v16041_v0, %v7545_v51  ;;  %v7719_v4 = vadd.f32 %v16045_v47, %v7550_v25  ;;  %v7551_v0 = vadd.f32 %v16043_v21, %v16019_v58  ;;  %v16611_v51 = vld [vmem:[#allocation18_spill] sm:$0xff] }
 0x6e3   :  { %v16163_v16 = vpop.f32.mrf.mxu0 }
 0x6e4   :  { %16606 = vst [vmem:[#allocation31_spill] sm:$0xff] %v16163_v16  ;;  %v7996_v16 = vadd.f32 %v16051_v33, %v7715_v48  ;;  %v7716_v24 = vadd.f32 %v16037_v1, %v7547_v40 }
 0x6e5   :  { %v16169_v34 = vpop.f32.mrf.mxu0 }
 0x6e6   :  { %v8277_v39 = vadd.f32 %v16061_v56, %v7996_v16  ;;  %v7997_v49 = vadd.f32 %v16059_v15, %v7716_v24  ;;  %v7717_v15 = vadd.f32 %v16049_v59, %v7548_v6  ;;  %v16617_v6 = vld [vmem:[#allocation20_spill] sm:$0xff] }
 0x6e8   :  { %v8446_v33 = vadd.f32 %v12336_v7, %v8277_v39  ;;  %v8278_v14 = vadd.f32 %v16069_v18, %v7997_v49  ;;  %v7998_v58 = vadd.f32 %v16071_v36, %v7717_v15  ;;  %v16620_v15 = vld [vmem:[#allocation94_spill] sm:$0xff] }
 0x6e9   :  { %v16157_v44 = vpop.f32.mrf.mxu1 }
 0x6ea   :  { %v8615_v56 = vadd.f32 %v12360_v2, %v8446_v33  ;;  %v8447_v47 = vadd.f32 %v16095_v29, %v8278_v14  ;;  %v7720_v2 = vadd.f32 %v16053_v37, %v7551_v0 }
 0x6eb   :  { %v16161_v32 = vpop.f32.mrf.mxu1 }
 0x6ec   :  { %16605 = vst [vmem:[#allocation30_spill] sm:$0xff] %v16161_v32  ;;  %v7713_v32 = vadd.f32 %v16033_v3, %v7544_v13  ;;  %v8896_v18 = vadd.f32 %v12384_v60, %v8615_v56  ;;  %v8616_v16 = vadd.f32 %v16103_v5, %v8447_v47  ;;  %v8001_v40 = vadd.f32 %v16075_v41, %v7720_v2  ;;  %v16608_v41 = vld [vmem:[#allocation66_spill] sm:$0xff]  ;;  %v16610_v13 = vld [vmem:[#allocation69_spill] sm:$0xff]  ;;  %v16622_v47 = vld [vmem:[#allocation19_spill] sm:$0xff] }
 0x6ed   :  { %v16165_v52 = vpop.f32.mrf.mxu1 }
 0x6ee   :  { %16607 = vst [vmem:[#allocation32_spill] sm:$0xff] %v16165_v52  ;;  %v16180_v52 = vpop.f32.mrf.mxu0  ;;  %v7994_v22 = vadd.f32 %v16055_v17, %v7713_v32  ;;  %v7995_v17 = vadd.f32 %v16063_v57, %v7714_v20  ;;  %v9177_v29 = vadd.f32 %v16125_v10, %v8896_v18  ;;  %v16623_v18 = vld [vmem:[#allocation22_spill] sm:$0xff] }
 0x6ef   :  { %v16174_v50 = vpop.f32.mrf.mxu1 }
 0x6f0   :  { %v8275_v3 = vadd.f32 %v16065_v35, %v7994_v22  ;;  %v16197_v1 = vpop.f32.mrf.mxu0  ;;  %v8000_v35 = vadd.f32 %v16067_v45, %v7719_v4  ;;  %v8276_v8 = vadd.f32 %v16073_v42, %v7995_v17  ;;  %v9346_v60 = vadd.f32 %v16147_v54, %v9177_v29  ;;  %v16614_v54 = vld [vmem:[#allocation68_spill] sm:$0xff] }
 0x6f1   :  { %v16189_v26 = vpop.f32.mrf.mxu1  ;;  %v16618_v17 = vld [vmem:[#allocation28_spill] sm:$0xff] }
 0x6f2   :  { %v8444_v31 = vadd.f32 %v16091_v46, %v8275_v3  ;;  %v7549_v46 = vadd.f32 %v16047_v28, %v16021_v38  ;;  %v8281_v21 = vadd.f32 %v16083_v19, %v8000_v35  ;;  %v8445_v45 = vadd.f32 %v16097_v23, %v8276_v8 }
 0x6f3   :  { %v16206_v7 = vpop.f32.mrf.mxu1  ;;  %v8279_v38 = vadd.f32 %v16087_v9, %v7998_v58  ;;  %v8897_v23 = vadd.f32 %v16123_v43, %v8616_v16  ;;  %v16609_v9 = vld [vmem:[#allocation93_spill] sm:$0xff]  ;;  %v9515_v43 = vadd.f32 %v16157_v44, %v9346_v60  ;;  %v16621_v44 = vld [vmem:[#allocation74_spill] sm:$0xff]  ;;  %v10573_v58 = vld [vmem:[%s16279_s5] ss:$0 sm:$0xff]  ;;  %s13045_s5 = smov [#allocation10]  }
 0x6f4   :  { %v8613_v57 = vadd.f32 %v16099_v11, %v8444_v31  ;;  %v7718_v11 = vadd.f32 %v16057_v30, %v7549_v46  ;;  %v8450_v28 = vadd.f32 %v16101_v61, %v8281_v21  ;;  %v8614_v19 = vadd.f32 %v16107_v63, %v8445_v45  ;;  %v16612_v63 = vld [vmem:[#allocation26_spill] sm:$0xff]  ;;  %v16624_v21 = vld [vmem:[#allocation29_spill] sm:$0xff]  ;;  %s10123_s15 = sshll.u32 %s13045_s5, 4  ;;  %s10124_s15 = int_to_ptr.vmem [resolvable:$true] %s10123_s15 }
 0x6f5   :  { %v16224_v37 = vpop.f32.mrf.mxu1  ;;  %v8282_v30 = vadd.f32 %v16089_v55, %v8001_v40  ;;  %v9178_v24 = vadd.f32 %v16611_v51, %v8897_v23  ;;  %v16616_v55 = vld [vmem:[#allocation17_spill] sm:$0xff]  ;;  %v16619_v31 = vld [vmem:[#allocation30_spill] sm:$0xff]  ;;  %v16625_v16 = vld [vmem:[#allocation32_spill] sm:$0xff]  ;;  %s13009_s16 = scalar_lea.vmem %s10124_s15, 1024  ;;  %p13014_p2 = scmp.lt.s32.totalorder %s10124_s15, %s10124_s15 }
 0x6f6   :  { %v8894_v42 = vadd.f32 %v16119_v53, %v8613_v57  ;;  %v7999_v32 = vadd.f32 %v16085_v62, %v7718_v11  ;;  %v8448_v53 = vadd.f32 %v16608_v41, %v8279_v38  ;;  %v8619_v10 = vadd.f32 %v16609_v9, %v8450_v28  ;;  %v16615_v62 = vld [vmem:[#allocation59_spill] sm:$0xff]  ;;  %v16627_v38 = vld [vmem:[#allocation21_spill] sm:$0xff]  ;;  %p13010_p1 = scmp.ne.s32.totalorder %s10124_s15, %s13009_s16  ;;  %p13015_p3 = scmp.lt.s32.totalorder %s13009_s16, %s13009_s16 }
 0x6f7   :  { %v8895_v48 = vadd.f32 %v16610_v13, %v8614_v19  ;;  %v8451_v25 = vadd.f32 %v16614_v54, %v8282_v30  ;;  %v9501_v3 = vpop.f32.mrf.mxu1  ;;  %v9347_v14 = vadd.f32 %v16618_v17, %v9178_v24  ;;  %v16628_v19 = vld [vmem:[#allocation24_spill] sm:$0xff]  ;;  %v16630_v13 = vld [vmem:[#allocation23_spill] sm:$0xff]  ;;  %v16631_v51 = vld [vmem:[#allocation25_spill] sm:$0xff] }
 0x6f8   :  { %v9175_v5 = vadd.f32 %v16129_v27, %v8894_v42  ;;  %v16613_v27 = vld [vmem:[#allocation57_spill] sm:$0xff]  ;;  %v8617_v20 = vadd.f32 %v16615_v62, %v8448_v53  ;;  %v8900_v49 = vadd.f32 %v16616_v55, %v8619_v10  ;;  %v16632_v54 = vld [vmem:[#allocation27_spill] sm:$0xff]  ;;  %p13016_p4 = por %p13015_p3, %p13014_p2 }
 0x6f9   :  { %v8280_v39 = vadd.f32 %v16613_v27, %v7999_v32  ;;  %v9176_v4 = vadd.f32 %v16617_v6, %v8895_v48  ;;  %v8620_v8 = vadd.f32 %v16621_v44, %v8451_v25  ;;  %v9516_v42 = vadd.f32 %v16625_v16, %v9347_v14 }
 0x6fa   :  { %v9344_v22 = vadd.f32 %v16612_v63, %v9175_v5  ;;  %v8898_v57 = vadd.f32 %v16622_v47, %v8617_v20  ;;  %v9181_v46 = vadd.f32 %v16623_v18, %v8900_v49  ;;  %v16629_v5 = vld [vmem:[#allocation31_spill] sm:$0xff]  ;;  %p13017_p5 = pnand %p13016_p4, %p13010_p1 }
 0x6fb   :  { %v12480_v12 = vpop.f32.mrf.mxu0  ;;  %v8449_v35 = vadd.f32 %v16620_v15, %v8280_v39  ;;  %v9345_v45 = vadd.f32 %v16624_v21, %v9176_v4  ;;  %v8901_v28 = vadd.f32 %v16627_v38, %v8620_v8 }
 0x6fc   :  { %v9513_v56 = vadd.f32 %v16619_v31, %v9344_v22  ;;  %v9796_v0 = vadd.f32 %v12480_v12, %v9515_v43  ;;  %v16626_v12 = vld [vmem:[#allocation80_spill] sm:$0xff]  ;;  %v9179_v23 = vadd.f32 %v16628_v19, %v8898_v57  ;;  %v9350_v60 = vadd.f32 %v16629_v5, %v9181_v46 }
 0x6fd   :  { %v9763_v59 = vpop.f32.mrf.mxu0  ;;  %v8618_v40 = vadd.f32 %v16626_v12, %v8449_v35  ;;  %v9514_v41 = vadd.f32 %v16174_v50, %v9345_v45 }
 0x6fe   :  { %v9794_v29 = vadd.f32 %v9763_v59, %v9513_v56  ;;  %v9182_v59 = vadd.f32 %v16631_v51, %v8901_v28  ;;  %v9348_v24 = vadd.f32 %v16169_v34, %v9179_v23  ;;  %v9519_v22 = vadd.f32 %v16189_v26, %v9350_v60 }
 0x6ff   :  { %v12481_v36 = vpop.f32.mrf.mxu0  ;;  %v8899_v48 = vadd.f32 %v16630_v13, %v8618_v40 }
 0x700   :  { %v9797_v53 = vadd.f32 %v12481_v36, %v9516_v42  ;;  %v9351_v50 = vadd.f32 %v16180_v52, %v9182_v59  ;;  %v9517_v20 = vadd.f32 %v16206_v7, %v9348_v24 }
 0x701   :  { %v9766_v61 = vpop.f32.mrf.mxu0  ;;  %v9180_v25 = vadd.f32 %v16632_v54, %v8899_v48 }
 0x702   :  { %v9795_v43 = vadd.f32 %v9766_v61, %v9514_v41  ;;  %v9520_v26 = vadd.f32 %v16224_v37, %v9351_v50 }
 0x703   :  { %v12484_v33 = vpop.f32.mrf.mxu0  ;;  %v9349_v34 = vadd.f32 %v16197_v1, %v9180_v25 }
 0x704   :  { %v9800_v55 = vadd.f32 %v12484_v33, %v9519_v22 }
 0x705   :  { %v9779_v30 = vpop.f32.mrf.mxu0  ;;  %v9518_v52 = vadd.f32 %v9501_v3, %v9349_v34 }
 0x706   :  { %v9798_v61 = vadd.f32 %v9779_v30, %v9517_v20 }
 0x707   :  { %v12485_v36 = vpop.f32.mrf.mxu0 }
 0x709   :  { %v12504_v2 = vpop.f32.mrf.mxu1  ;;  %v9782_v31 = vpop.f32.mrf.mxu0 }
 0x70a   :  { %v10077_v11 = vadd.f32 %v12504_v2, %v9796_v0  ;;  %v9801_v0 = vadd.f32 %v12485_v36, %v9520_v26  ;;  %v9799_v35 = vadd.f32 %v9782_v31, %v9518_v52 }
 0x70b   :  { %v10044_v32 = vpop.f32.mrf.mxu1 }
 0x70c   :  { %v10092_v9 = vadd.f32 %v10573_v58, %v10077_v11  ;;  %v10075_v10 = vadd.f32 %v10044_v32, %v9794_v29 }
 0x70d   :  { %v12505_v63 = vpop.f32.mrf.mxu1 }
 0x70e   :  { %10100 = vst [vmem:[#allocation10 + $0x10] sm:$0xff] %v10092_v9  ;;  %v10090_v27 = vadd.f32 %v10573_v58, %v10075_v10  ;;  %v10078_v39 = vadd.f32 %v12505_v63, %v9797_v53 }
 0x70f   :  { %v10047_v62 = vpop.f32.mrf.mxu1 }
 0x710   :  { %10098 = vst [vmem:[#allocation10] sm:$0xff] %v10090_v27  ;;  %v10093_v49 = vadd.f32 %v10573_v58, %v10078_v39  ;;  %v10076_v6 = vadd.f32 %v10047_v62, %v9795_v43 }
 0x711   :  { %v12508_v4 = vpop.f32.mrf.mxu1 }
 0x712   :  { %10101 = vst [vmem:[#allocation10 + $0x18] sm:$0xff] %v10093_v49  ;;  %v10091_v17 = vadd.f32 %v10573_v58, %v10076_v6  ;;  %v10081_v14 = vadd.f32 %v12508_v4, %v9800_v55 }
 0x713   :  { %v10060_v56 = vpop.f32.mrf.mxu1 }
 0x714   :  { %10099 = vst [vmem:[#allocation10 + $0x8] sm:$0xff] %v10091_v17  ;;  %v10096_v15 = vadd.f32 %v10573_v58, %v10081_v14  ;;  %v10079_v7 = vadd.f32 %v10060_v56, %v9798_v61 }
 0x715   :  { %v12509_v33 = vpop.f32.mrf.mxu1 }
 0x716   :  { %10104 = vst [vmem:[#allocation10 + $0x30] sm:$0xff] %v10096_v15  ;;  %v10094_v44 = vadd.f32 %v10573_v58, %v10079_v7  ;;  %v10082_v8 = vadd.f32 %v12509_v33, %v9801_v0 }
 0x717   :  { %v10063_v1 = vpop.f32.mrf.mxu1 }
 0x718   :  { %10102 = vst [vmem:[#allocation10 + $0x20] sm:$0xff] %v10094_v44  ;;  %v10097_v37 = vadd.f32 %v10573_v58, %v10082_v8  ;;  %v10080_v47 = vadd.f32 %v10063_v1, %v9799_v35 }
 0x71a   :  { %10105 = vst [vmem:[#allocation10 + $0x38] sm:$0xff] %v10097_v37  ;;  %v10095_v57 = vadd.f32 %v10573_v58, %v10080_v47 }
 0x71c   :  { %10103 = vst [vmem:[#allocation10 + $0x28] sm:$0xff] %v10095_v57 }
 0x71d   :  { %13020 = shalt.err (!%p13017_p5)
}
 0x71e   :  { %10129 = dma.vmem_to_hbm [thread:$0]  %s10124_s15, 1024, %s16281_s7, [#allocation11], %s13043_s12, %s13043_s12, %s13044_s2  }
 0x71f   :  { %13033 = dma.done.wait [#allocation6], 4096  }
 0x720   :  { %13034 = vsyncadd [#allocation6], 4294963200 }
 0x721   :  { %13035 = dma.done.wait [#allocation11], 1024  }
 0x722   :  { %13036 = vsyncadd [#allocation11], 4294966272 }
 0x723   :  { %10136 = vsyncpa [#allocation5], 1 }
 0x724   :  { %10137 = vsyncpa [#allocation8], 1 }
 0x725   :  { %10138 = vsyncpa [#allocation6], 1 }
 0x726   :  { %10139 = vsyncpa [#allocation11], 1 }

</bundles_post_ra>
